<compile_context>
chip_gen: v5e
topology: v5e:2x2
jax: 0.10.0
libtpu: 0.0.40
codegen_flags: <defaults>
</compile_context>

<pallas_src>
import jax
import jax.numpy as jnp
from jax import lax
from jax.experimental import pallas as pl
from jax.experimental.pallas import tpu as pltpu

_EPS = 2.220446049250313e-16   # sys.float_info.epsilon, as in the reference
_PV_BF16 = True                # bf16 operands for P @ V (flip to False for exact f32)


def _pick_tile_q(hw):
    """Largest query tile keeping the (tile_q, HW) logits/probs temporaries ~< 24 MiB."""
    cap = max(8, (24 * 1024 * 1024) // (12 * hw))
    for t in (512, 256, 128, 64, 32, 16, 8):
        if t <= cap and hw % t == 0:
            return t
    return hw


def _make_fused_kernel(inv_temp):
    def kernel(x_ref, yq_ref, yf_ref, mux_ref, muy_ref, coords_ref, o_ref, ex_ref):
        mu_x = mux_ref[0]                                      # (1, C)
        mu_y = muy_ref[0]                                      # (1, C)

        # theta (query tile): spatial mean-center + per-position channel L2 norm.
        xm = x_ref[0] - mu_x                                   # (tq, C)
        qn = xm / (jnp.sqrt(jnp.sum(xm * xm, axis=-1, keepdims=True)) + _EPS)

        # phi at the same positions -- only needed for F.l1_loss(theta, phi).
        ym = yq_ref[0] - mu_y
        yn = ym / (jnp.sqrt(jnp.sum(ym * ym, axis=-1, keepdims=True)) + _EPS)
        ex_ref[0, :, 2:3] = jnp.sum(jnp.abs(qn - yn), axis=-1, keepdims=True)

        # phi for all positions (keys), derived from the VMEM-resident y block.
        v_raw = yf_ref[0]                                      # (HW, C) raw y_feats = values
        km = v_raw - mu_y
        kn = km / (jnp.sqrt(jnp.sum(km * km, axis=-1, keepdims=True)) + _EPS)

        # Logits: temperature folded into q; f32 MXU dot at HIGHEST precision
        # (sharp softmax -> logit fidelity matters).
        s = lax.dot_general(qn * inv_temp, kn,
                            (((1,), (1,)), ((), ())),
                            preferred_element_type=jnp.float32,
                            precision=lax.Precision.HIGHEST)   # (tq, HW)

        # Single-pass softmax: keys fully resident -> no online rescale needed.
        m = jnp.max(s, axis=-1, keepdims=True)
        p = jnp.exp(s - m)                                     # (tq, HW) f32
        r = pl.reciprocal(jnp.sum(p, axis=-1, keepdims=True), approx=True)

        # Warped features: P @ V on the MXU (bf16 operands, f32 accumulation).
        if _PV_BF16:
            pv = jnp.dot(p.astype(jnp.bfloat16), v_raw.astype(jnp.bfloat16),
                         preferred_element_type=jnp.float32)
        else:
            pv = jnp.dot(p, v_raw, preferred_element_type=jnp.float32)
        o_ref[0] = pv * r

        # Coordinate expectations: exact f32 VPU reductions against the resident table.
        xc = coords_ref[0:1, :]                                # (1, HW)
        yc = coords_ref[1:2, :]
        ex_ref[0, :, 0:1] = jnp.sum(p * xc, axis=-1, keepdims=True) * r
        ex_ref[0, :, 1:2] = jnp.sum(p * yc, axis=-1, keepdims=True) * r

    return kernel


def _fused_warp_attention(x, y, mu_x, mu_y, coords, inv_temp, tile_q):
    B, HW, C = x.shape
    nq = HW // tile_q
    return pl.pallas_call(
        _make_fused_kernel(inv_temp),
        out_shape=(jax.ShapeDtypeStruct((B, HW, C), jnp.float32),
                   jax.ShapeDtypeStruct((B, HW, 3), jnp.float32)),
        grid=(B, nq),
        in_specs=[
            pl.BlockSpec((1, tile_q, C), lambda b, q: (b, q, 0)),  # x (theta source), q tile
            pl.BlockSpec((1, tile_q, C), lambda b, q: (b, q, 0)),  # y at q positions (loss)
            pl.BlockSpec((1, HW, C),     lambda b, q: (b, 0, 0)),  # y full: K/V, resident per batch
            pl.BlockSpec((1, 1, C),      lambda b, q: (b, 0, 0)),  # spatial mean of x
            pl.BlockSpec((1, 1, C),      lambda b, q: (b, 0, 0)),  # spatial mean of y
            pl.BlockSpec((2, HW),        lambda b, q: (0, 0)),     # (x, y) coordinate table
        ],
        out_specs=(
            pl.BlockSpec((1, tile_q, C), lambda b, q: (b, q, 0)),  # warped features
            pl.BlockSpec((1, tile_q, 3), lambda b, q: (b, q, 0)),  # [E[x], E[y], L1 partial]
        ),
        compiler_params=pltpu.CompilerParams(
            dimension_semantics=("parallel", "parallel"),
            vmem_limit_bytes=48 * 1024 * 1024),
    )(x, y, y, mu_x, mu_y, coords)


def ncn_warpnet_forward(x_feats, y_feats, temperature=0.0001 * 5):
    """Default path of NCNWarpNet.forward (detach_flag=False, WTA_scale_weight=1, y_img=None)."""
    B, C, H, W = x_feats.shape
    HW = H * W

    # NCHW -> (B, HW, C): positions on sublanes, channels on lanes.
    # TODO(synk): this transpose is one extra HBM round trip; a (B, C, HW)-native kernel
    #             would need sublane-contraction matmuls, so it stays XLA glue.
    x = jnp.transpose(x_feats.astype(jnp.float32).reshape(B, C, HW), (0, 2, 1))
    y = jnp.transpose(y_feats.astype(jnp.float32).reshape(B, C, HW), (0, 2, 1))

    mu_x = jnp.mean(x, axis=1, keepdims=True)       # per-channel spatial means (B, 1, C)
    mu_y = jnp.mean(y, axis=1, keepdims=True)

    # (2, HW) coordinate table: row 0 = x (column) index, row 1 = y (row) index.
    yy, xx = jnp.meshgrid(jnp.arange(H, dtype=jnp.float32),
                          jnp.arange(W, dtype=jnp.float32), indexing="ij")
    coords = jnp.stack([xx.reshape(HW), yy.reshape(HW)], axis=0)

    tile_q = _pick_tile_q(HW)
    # TODO(synk): for very large HW the resident-K/V single-pass kernel should fall back
    #             to an online-softmax (flash) variant; not needed at these sizes.
    y_warp_flat, extras = _fused_warp_attention(
        x, y, mu_x, mu_y, coords, inv_temp=1.0 / temperature, tile_q=tile_q)

    # y = f_div_C @ y_feats_spatial  -> (B, C, H, W)
    y_warp = jnp.transpose(y_warp_flat, (0, 2, 1)).reshape(B, C, H, W)

    # loss_feat_pair = F.l1_loss(theta, phi): mean of the per-row partial sums.
    loss_feat_pair = jnp.sum(extras[..., 2]) / (B * HW * C)

    # flow = E[(x, y)] under f_div_C minus the base grid, then nearest x4 upsample.
    coords1 = jnp.stack([extras[..., 0].reshape(B, H, W),
                         extras[..., 1].reshape(B, H, W)], axis=1)
    grid_x = jnp.broadcast_to(
        jnp.arange(W, dtype=jnp.float32)[None, None, None, :], (B, 1, H, W))
    grid_y = jnp.broadcast_to(
        jnp.arange(H, dtype=jnp.float32)[None, None, :, None], (B, 1, H, W))
    coords0 = jnp.concatenate([grid_x, grid_y], axis=1)
    flow = coords1 - coords0
    flow = jnp.repeat(jnp.repeat(flow, 4, axis=2), 4, axis=3)   # nn.Upsample(4, nearest)

    # TODO(synk): y_img branch (double 2x2 AvgPool + cyclic warp via softmax(f^T)) is not
    #             implemented; the module default uses y_img=None.  similarity_map is
    #             computed but never returned by the reference forward, so it is skipped.
    return y_warp, flow, None, None, loss_feat_pair


# --------------------------- pure-JAX reference (for sanity check) ---------------------------

def _reference_forward(x_feats, y_feats, temperature=0.0001 * 5):
    B, C, H, W = x_feats.shape
    HW = H * W
    theta = x_feats.reshape(B, C, HW).astype(jnp.float32)
    theta = theta - jnp.mean(theta, axis=-1, keepdims=True)
    theta = theta / (jnp.sqrt(jnp.sum(theta * theta, axis=1, keepdims=True)) + _EPS)
    phi = y_feats.reshape(B, C, HW).astype(jnp.float32)
    phi = phi - jnp.mean(phi, axis=-1, keepdims=True)
    phi = phi / (jnp.sqrt(jnp.sum(phi * phi, axis=1, keepdims=True)) + _EPS)
    loss = jnp.mean(jnp.abs(theta - phi))
    f = jnp.einsum("bci,bcj->bij", theta, phi, precision=lax.Precision.HIGHEST)
    p = jax.nn.softmax(f / temperature, axis=-1)
    yv = y_feats.reshape(B, C, HW).astype(jnp.float32)
    y_warp = jnp.einsum("bij,bcj->bci", p, yv).reshape(B, C, H, W)
    idx = jnp.arange(HW)
    xs = (idx % W).astype(jnp.float32)
    ys = (idx // W).astype(jnp.float32)
    cx = jnp.einsum("bij,j->bi", p, xs).reshape(B, H, W)
    cy = jnp.einsum("bij,j->bi", p, ys).reshape(B, H, W)
    coords1 = jnp.stack([cx, cy], axis=1)
    gx = jnp.broadcast_to(jnp.arange(W, dtype=jnp.float32)[None, None, None, :], (B, 1, H, W))
    gy = jnp.broadcast_to(jnp.arange(H, dtype=jnp.float32)[None, None, :, None], (B, 1, H, W))
    flow = coords1 - jnp.concatenate([gx, gy], axis=1)
    flow = jnp.repeat(jnp.repeat(flow, 4, axis=2), 4, axis=3)
    return y_warp, flow, loss


# ----------------------------------------------------------------------------------------------

if __name__ == "__main__":
    B, C, H, W = 2, 32, 16, 16
    key = jax.random.PRNGKey(0)
    kx, ky = jax.random.split(key)
    x_feats = jax.random.normal(kx, (B, C, H, W), jnp.float32)
    y_feats = jax.random.normal(ky, (B, C, H, W), jnp.float32)

    fwd = jax.jit(ncn_warpnet_forward)
    y_warp, flow, y_img, y_img_cyc, loss = fwd(x_feats, y_feats)
    jax.block_until_ready((y_warp, flow, loss))

    assert y_warp.shape == (B, C, H, W)
    assert flow.shape == (B, 2, 4 * H, 4 * W)
    assert y_img is None and y_img_cyc is None
    assert bool(jnp.all(jnp.isfinite(y_warp)))
    assert bool(jnp.all(jnp.isfinite(flow)))
    assert bool(jnp.isfinite(loss))

    # Loose-tolerance check vs. pure JAX (bf16 P@V + approx reciprocal => ~1e-3 rel. error).
    y_ref, flow_ref, loss_ref = jax.jit(_reference_forward)(x_feats, y_feats)
    jax.block_until_ready((y_ref, flow_ref, loss_ref))
    assert bool(jnp.allclose(y_warp, y_ref, rtol=5e-2, atol=5e-2))
    assert bool(jnp.allclose(flow, flow_ref, rtol=0.0, atol=1e-1))
    assert abs(float(loss) - float(loss_ref)) <= 1e-3 * max(1.0, abs(float(loss_ref)))

    print("KERNEL_OK")
</pallas_src>

<mosaic_0001>
module attributes {stable_mosaic.version = 11 : i64} {
  func.func @kernel(%arg0: i32, %arg1: i32, %arg2: memref<1x256x32xf32, #tpu.memory_space<vmem>>, %arg3: memref<1x256x32xf32, #tpu.memory_space<vmem>>, %arg4: memref<1x256x32xf32, #tpu.memory_space<vmem>>, %arg5: memref<1x1x32xf32, #tpu.memory_space<vmem>>, %arg6: memref<1x1x32xf32, #tpu.memory_space<vmem>>, %arg7: memref<2x256xf32, #tpu.memory_space<vmem>>, %arg8: memref<1x256x32xf32, #tpu.memory_space<vmem>>, %arg9: memref<1x256x3xf32, #tpu.memory_space<vmem>>) attributes {dimension_semantics = [#tpu.dimension_semantics<parallel>, #tpu.dimension_semantics<parallel>], iteration_bounds = array<i64: 2, 1>, scalar_prefetch = 0 : i64, scratch_operands = 0 : i64, tpu.core_type = #tpu.core_type<tc>, window_params = [{transform_indices = @transform_0, window_bounds = array<i64: 1, 256, 32>}, {transform_indices = @transform_1, window_bounds = array<i64: 1, 256, 32>}, {transform_indices = @transform_2, window_bounds = array<i64: 1, 256, 32>}, {transform_indices = @transform_3, window_bounds = array<i64: 1, 1, 32>}, {transform_indices = @transform_4, window_bounds = array<i64: 1, 1, 32>}, {pipeline_mode = #tpu.pipeline_mode<synchronous>, transform_indices = @transform_5, window_bounds = array<i64: 2, 256>}, {transform_indices = @transform_6, window_bounds = array<i64: 1, 256, 32>}, {transform_indices = @transform_7, window_bounds = array<i64: 1, 256, 3>}]} {
    %c0 = arith.constant 0 : index
    %c0_0 = arith.constant 0 : index
    %c0_1 = arith.constant 0 : index
    %0 = vector.load %arg5[%c0, %c0_0, %c0_1] : memref<1x1x32xf32, #tpu.memory_space<vmem>>, vector<1x1x32xf32>
    %1 = vector.shape_cast %0 : vector<1x1x32xf32> to vector<1x32xf32>
    %c0_2 = arith.constant 0 : index
    %c0_3 = arith.constant 0 : index
    %c0_4 = arith.constant 0 : index
    %2 = vector.load %arg6[%c0_2, %c0_3, %c0_4] : memref<1x1x32xf32, #tpu.memory_space<vmem>>, vector<1x1x32xf32>
    %3 = vector.shape_cast %2 : vector<1x1x32xf32> to vector<1x32xf32>
    %c0_5 = arith.constant 0 : index
    %c0_6 = arith.constant 0 : index
    %c0_7 = arith.constant 0 : index
    %4 = vector.load %arg2[%c0_5, %c0_6, %c0_7] : memref<1x256x32xf32, #tpu.memory_space<vmem>>, vector<1x256x32xf32>
    %5 = vector.shape_cast %4 : vector<1x256x32xf32> to vector<256x32xf32>
    %6 = vector.broadcast %1 : vector<1x32xf32> to vector<256x32xf32>
    %7 = arith.subf %5, %6 : vector<256x32xf32>
    %8 = arith.mulf %7, %7 : vector<256x32xf32>
    %cst = arith.constant dense<0.000000e+00> : vector<256xf32>
    %9 = vector.multi_reduction <add>, %8, %cst [1] : vector<256x32xf32> to vector<256xf32>
    %10 = vector.shape_cast %9 : vector<256xf32> to vector<256x1xf32>
    %11 = math.sqrt %10 : vector<256x1xf32>
    %cst_8 = arith.constant 2.22044605E-16 : f32
    %12 = vector.broadcast %cst_8 : f32 to vector<256x1xf32>
    %13 = arith.addf %11, %12 : vector<256x1xf32>
    %14 = vector.broadcast %13 : vector<256x1xf32> to vector<256x32xf32>
    %15 = arith.divf %7, %14 : vector<256x32xf32>
    %c0_9 = arith.constant 0 : index
    %c0_10 = arith.constant 0 : index
    %c0_11 = arith.constant 0 : index
    %16 = vector.load %arg3[%c0_9, %c0_10, %c0_11] : memref<1x256x32xf32, #tpu.memory_space<vmem>>, vector<1x256x32xf32>
    %17 = vector.shape_cast %16 : vector<1x256x32xf32> to vector<256x32xf32>
    %18 = vector.broadcast %3 : vector<1x32xf32> to vector<256x32xf32>
    %19 = arith.subf %17, %18 : vector<256x32xf32>
    %20 = arith.mulf %19, %19 : vector<256x32xf32>
    %cst_12 = arith.constant dense<0.000000e+00> : vector<256xf32>
    %21 = vector.multi_reduction <add>, %20, %cst_12 [1] : vector<256x32xf32> to vector<256xf32>
    %22 = vector.shape_cast %21 : vector<256xf32> to vector<256x1xf32>
    %23 = math.sqrt %22 : vector<256x1xf32>
    %cst_13 = arith.constant 2.22044605E-16 : f32
    %24 = vector.broadcast %cst_13 : f32 to vector<256x1xf32>
    %25 = arith.addf %23, %24 : vector<256x1xf32>
    %26 = vector.broadcast %25 : vector<256x1xf32> to vector<256x32xf32>
    %27 = arith.divf %19, %26 : vector<256x32xf32>
    %28 = arith.subf %15, %27 : vector<256x32xf32>
    %29 = math.absf %28 : vector<256x32xf32>
    %cst_14 = arith.constant dense<0.000000e+00> : vector<256xf32>
    %30 = vector.multi_reduction <add>, %29, %cst_14 [1] : vector<256x32xf32> to vector<256xf32>
    %31 = vector.shape_cast %30 : vector<256xf32> to vector<256x1xf32>
    %c0_15 = arith.constant 0 : index
    %c0_16 = arith.constant 0 : index
    %c2 = arith.constant 2 : index
    %32 = vector.load %arg9[%c0_15, %c0_16, %c2] : memref<1x256x3xf32, #tpu.memory_space<vmem>>, vector<1x256x1xf32>
    %33 = vector.shape_cast %32 : vector<1x256x1xf32> to vector<256x1xf32>
    %34 = vector.shape_cast %31 : vector<256x1xf32> to vector<1x256x1xf32>
    tpu.vector_store %arg9[%c0_15, %c0_16, %c2], %34 {strides = array<i32>} : memref<1x256x3xf32, #tpu.memory_space<vmem>>, vector<1x256x1xf32>,
    %c0_17 = arith.constant 0 : index
    %c0_18 = arith.constant 0 : index
    %c0_19 = arith.constant 0 : index
    %35 = vector.load %arg4[%c0_17, %c0_18, %c0_19] : memref<1x256x32xf32, #tpu.memory_space<vmem>>, vector<1x256x32xf32>
    %36 = vector.shape_cast %35 : vector<1x256x32xf32> to vector<256x32xf32>
    %37 = vector.broadcast %3 : vector<1x32xf32> to vector<256x32xf32>
    %38 = arith.subf %36, %37 : vector<256x32xf32>
    %39 = arith.mulf %38, %38 : vector<256x32xf32>
    %cst_20 = arith.constant dense<0.000000e+00> : vector<256xf32>
    %40 = vector.multi_reduction <add>, %39, %cst_20 [1] : vector<256x32xf32> to vector<256xf32>
    %41 = vector.shape_cast %40 : vector<256xf32> to vector<256x1xf32>
    %42 = math.sqrt %41 : vector<256x1xf32>
    %cst_21 = arith.constant 2.22044605E-16 : f32
    %43 = vector.broadcast %cst_21 : f32 to vector<256x1xf32>
    %44 = arith.addf %42, %43 : vector<256x1xf32>
    %45 = vector.broadcast %44 : vector<256x1xf32> to vector<256x32xf32>
    %46 = arith.divf %38, %45 : vector<256x32xf32>
    %cst_22 = arith.constant 2.000000e+03 : f32
    %47 = vector.broadcast %cst_22 : f32 to vector<256x32xf32>
    %48 = arith.mulf %15, %47 : vector<256x32xf32>
    %cst_23 = arith.constant dense<0.000000e+00> : vector<256x256xf32>
    %49 = tpu.matmul %48, %46, %cst_23 {dimension_numbers = #tpu.dot_dimension_numbers<[1], [1], [0], [0], [0, 0, 1, 0], [], []>, precision = #tpu.contract_precision<fp32>} : vector<256x32xf32>, vector<256x32xf32>, vector<256x256xf32> -> vector<256x256xf32>
    %cst_24 = arith.constant dense<0xFF800000> : vector<256xf32>
    %50 = vector.multi_reduction <maximumf>, %49, %cst_24 [1] : vector<256x256xf32> to vector<256xf32>
    %51 = vector.shape_cast %50 : vector<256xf32> to vector<256x1xf32>
    %52 = vector.broadcast %51 : vector<256x1xf32> to vector<256x256xf32>
    %53 = arith.subf %49, %52 : vector<256x256xf32>
    %54 = math.exp %53 : vector<256x256xf32>
    %cst_25 = arith.constant dense<0.000000e+00> : vector<256xf32>
    %55 = vector.multi_reduction <add>, %54, %cst_25 [1] : vector<256x256xf32> to vector<256xf32>
    %56 = vector.shape_cast %55 : vector<256xf32> to vector<256x1xf32>
    %57 = tpu.reciprocal %56 {approx = true} : vector<256x1xf32> -> vector<256x1xf32>
    %58 = arith.truncf %54 : vector<256x256xf32> to vector<256x256xbf16>
    %59 = arith.truncf %36 : vector<256x32xf32> to vector<256x32xbf16>
    %cst_26 = arith.constant dense<0.000000e+00> : vector<256x32xf32>
    %60 = tpu.matmul %58, %59, %cst_26 {dimension_numbers = #tpu.dot_dimension_numbers<[1], [0], [0], [1], [0, 0, 1, 1], [], []>} : vector<256x256xbf16>, vector<256x32xbf16>, vector<256x32xf32> -> vector<256x32xf32>
    %61 = vector.broadcast %57 : vector<256x1xf32> to vector<256x32xf32>
    %62 = arith.mulf %60, %61 : vector<256x32xf32>
    %c0_27 = arith.constant 0 : index
    %c0_28 = arith.constant 0 : index
    %c0_29 = arith.constant 0 : index
    %63 = vector.load %arg8[%c0_27, %c0_28, %c0_29] : memref<1x256x32xf32, #tpu.memory_space<vmem>>, vector<1x256x32xf32>
    %64 = vector.shape_cast %63 : vector<1x256x32xf32> to vector<256x32xf32>
    %65 = vector.shape_cast %62 : vector<256x32xf32> to vector<1x256x32xf32>
    tpu.vector_store %arg8[%c0_27, %c0_28, %c0_29], %65 {strides = array<i32>} : memref<1x256x32xf32, #tpu.memory_space<vmem>>, vector<1x256x32xf32>,
    %c0_30 = arith.constant 0 : index
    %c0_31 = arith.constant 0 : index
    %66 = vector.load %arg7[%c0_30, %c0_31] : memref<2x256xf32, #tpu.memory_space<vmem>>, vector<1x256xf32>
    %c1 = arith.constant 1 : index
    %c0_32 = arith.constant 0 : index
    %67 = vector.load %arg7[%c1, %c0_32] : memref<2x256xf32, #tpu.memory_space<vmem>>, vector<1x256xf32>
    %68 = vector.broadcast %66 : vector<1x256xf32> to vector<256x256xf32>
    %69 = arith.mulf %54, %68 : vector<256x256xf32>
    %cst_33 = arith.constant dense<0.000000e+00> : vector<256xf32>
    %70 = vector.multi_reduction <add>, %69, %cst_33 [1] : vector<256x256xf32> to vector<256xf32>
    %71 = vector.shape_cast %70 : vector<256xf32> to vector<256x1xf32>
    %72 = arith.mulf %71, %57 : vector<256x1xf32>
    %c0_34 = arith.constant 0 : index
    %c0_35 = arith.constant 0 : index
    %c0_36 = arith.constant 0 : index
    %73 = vector.load %arg9[%c0_34, %c0_35, %c0_36] : memref<1x256x3xf32, #tpu.memory_space<vmem>>, vector<1x256x1xf32>
    %74 = vector.shape_cast %73 : vector<1x256x1xf32> to vector<256x1xf32>
    %75 = vector.shape_cast %72 : vector<256x1xf32> to vector<1x256x1xf32>
    tpu.vector_store %arg9[%c0_34, %c0_35, %c0_36], %75 {strides = array<i32>} : memref<1x256x3xf32, #tpu.memory_space<vmem>>, vector<1x256x1xf32>,
    %76 = vector.broadcast %67 : vector<1x256xf32> to vector<256x256xf32>
    %77 = arith.mulf %54, %76 : vector<256x256xf32>
    %cst_37 = arith.constant dense<0.000000e+00> : vector<256xf32>
    %78 = vector.multi_reduction <add>, %77, %cst_37 [1] : vector<256x256xf32> to vector<256xf32>
    %79 = vector.shape_cast %78 : vector<256xf32> to vector<256x1xf32>
    %80 = arith.mulf %79, %57 : vector<256x1xf32>
    %c0_38 = arith.constant 0 : index
    %c0_39 = arith.constant 0 : index
    %c1_40 = arith.constant 1 : index
    %81 = vector.load %arg9[%c0_38, %c0_39, %c1_40] : memref<1x256x3xf32, #tpu.memory_space<vmem>>, vector<1x256x1xf32>
    %82 = vector.shape_cast %81 : vector<1x256x1xf32> to vector<256x1xf32>
    %83 = vector.shape_cast %80 : vector<256x1xf32> to vector<1x256x1xf32>
    tpu.vector_store %arg9[%c0_38, %c0_39, %c1_40], %83 {strides = array<i32>} : memref<1x256x3xf32, #tpu.memory_space<vmem>>, vector<1x256x1xf32>,
    return
  }
  func.func @transform_0(%arg0: i32, %arg1: i32) -> (i32, i32, i32) {
    %c0_i32 = arith.constant 0 : i32
    %c0_i32_0 = arith.constant 0 : i32
    return %arg0, %arg1, %c0_i32 : i32, i32, i32
  }
  func.func @transform_1(%arg0: i32, %arg1: i32) -> (i32, i32, i32) {
    %c0_i32 = arith.constant 0 : i32
    %c0_i32_0 = arith.constant 0 : i32
    return %arg0, %arg1, %c0_i32 : i32, i32, i32
  }
  func.func @transform_2(%arg0: i32, %arg1: i32) -> (i32, i32, i32) {
    %c0_i32 = arith.constant 0 : i32
    %c0_i32_0 = arith.constant 0 : i32
    %c0_i32_1 = arith.constant 0 : i32
    return %arg0, %c0_i32, %c0_i32_0 : i32, i32, i32
  }
  func.func @transform_3(%arg0: i32, %arg1: i32) -> (i32, i32, i32) {
    %c0_i32 = arith.constant 0 : i32
    %c0_i32_0 = arith.constant 0 : i32
    %c0_i32_1 = arith.constant 0 : i32
    return %arg0, %c0_i32, %c0_i32_0 : i32, i32, i32
  }
  func.func @transform_4(%arg0: i32, %arg1: i32) -> (i32, i32, i32) {
    %c0_i32 = arith.constant 0 : i32
    %c0_i32_0 = arith.constant 0 : i32
    %c0_i32_1 = arith.constant 0 : i32
    return %arg0, %c0_i32, %c0_i32_0 : i32, i32, i32
  }
  func.func @transform_5(%arg0: i32, %arg1: i32) -> (i32, i32) {
    %c0_i32 = arith.constant 0 : i32
    %c0_i32_0 = arith.constant 0 : i32
    %c0_i32_1 = arith.constant 0 : i32
    return %c0_i32, %c0_i32_0 : i32, i32
  }
  func.func @transform_6(%arg0: i32, %arg1: i32) -> (i32, i32, i32) {
    %c0_i32 = arith.constant 0 : i32
    %c0_i32_0 = arith.constant 0 : i32
    return %arg0, %arg1, %c0_i32 : i32, i32, i32
  }
  func.func @transform_7(%arg0: i32, %arg1: i32) -> (i32, i32, i32) {
    %c0_i32 = arith.constant 0 : i32
    %c0_i32_0 = arith.constant 0 : i32
    return %arg0, %arg1, %c0_i32 : i32, i32, i32
  }
}

</mosaic_0001>

<bundles_post_ra>
// kernel: squeeze.5
= control target key start
LH: loop header
LB: loop body
LE: loop exit
PB: predicated region body
PF: predicated region fallthrough
CT: control target
= control target key end

     0   :  { %vm11_vm0 = vcmask 130048   ;;  %s77_s10 = smov 80   ;;  %s78_s13 = smov 48   ;;  %s135_s0 = inlined_call_operand.vmem [shape: f32[2,256], index: 0, kind: input, shape index: {}]   ;;  %s136_s1 = inlined_call_operand.vmem [shape: f32[2,1,16,16], index: 1, kind: output, shape index: {}]  }
   0x1   :  { %v60_v0 = vld [vmem:[%s135_s0 + $0x2] sm:$0x3]  ;;  %v8_v1 = vld [vmem:[%s135_s0] sm:$0x3]  ;;  %s76_s0 = smov 112   ;;  %s79_s14 = smov 96  }
   0x2   :  { %7 = vst [vmem:[#allocation0 + $0x8] sm:$0x3] %v60_v0  ;;  %s80_s15 = smov 64   ;;  %s81_s16 = smov 32  }
   0x3   :  { %9 = vst [vmem:[#allocation0] sm:$0x3] %v8_v1  ;;  %s82_s17 = smov 16  }
   0x9   :  { %v14_v4 = vld [vmem:[#allocation0 + $0x8] sm:$0x3]  }
   0xa   :  { %v18_v2 = vld.sshfl [vmem:[#allocation0] sm:$0xff pattern:$0x99999180]   ;;  %61 = vst.msk [vmem:[%s136_s1 + $0x8] ss:$16 sm:$0x3] %vm11_vm0, %v14_v4  }
   0xb   :  { %v10_v3 = vld [vmem:[#allocation0] sm:$0x3]   ;;  %19 = vrot.lane.b32.xlu0 %v18_v2, %s76_s0  ;;  %31 = vrot.lane.b32.xlu1 %v18_v2, %s77_s10 }
   0xc   :  { %12 = vst.msk [vmem:[%s136_s1] ss:$16 sm:$0x3] %vm11_vm0, %v10_v3   ;;  %43 = vrot.lane.b32.xlu2 %v18_v2, %s78_s13 }
  0x13   :  { %25 = vrot.lane.b32.xlu0 %v18_v2, %s79_s14  ;;  %37 = vrot.lane.b32.xlu1 %v18_v2, %s80_s15 }
  0x14   :  { %49 = vrot.lane.b32.xlu2 %v18_v2, %s81_s16 }
  0x1b   :  { %55 = vrot.lane.b32.xlu0 %v18_v2, %s82_s17 }
  0x66   :  { %v44_v5 = vpop.permute.xlu2 %43  }
  0x67   :  { %66 = vst.msk [vmem:[%s136_s1 + $0x5] ss:$8 sm:$0xf] %vm11_vm0, %v44_v5  }
  0x6e   :  { %v50_v6 = vpop.permute.xlu2 %49  }
  0x6f   :  { %67 = vst.msk [vmem:[%s136_s1 + $0x6] ss:$8 sm:$0xf] %vm11_vm0, %v50_v6  }
  0x7d   :  { %v20_v7 = vpop.permute.xlu0 %19   ;;  %v32_v8 = vpop.permute.xlu1 %31  }
  0x7e   :  { %62 = vst.msk [vmem:[%s136_s1 + $0x1] ss:$8 sm:$0xf] %vm11_vm0, %v20_v7  }
  0x7f   :  { %64 = vst.msk [vmem:[%s136_s1 + $0x3] ss:$8 sm:$0xf] %vm11_vm0, %v32_v8  }
  0x85   :  { %v26_v9 = vpop.permute.xlu0 %25   ;;  %v38_v10 = vpop.permute.xlu1 %37  }
  0x86   :  { %63 = vst.msk [vmem:[%s136_s1 + $0x2] ss:$8 sm:$0xf] %vm11_vm0, %v26_v9  }
  0x87   :  { %65 = vst.msk [vmem:[%s136_s1 + $0x4] ss:$8 sm:$0xf] %vm11_vm0, %v38_v10  }
  0x8d   :  { %v56_v11 = vpop.permute.xlu0 %55  }
  0x8e   :  { %68 = vst.msk [vmem:[%s136_s1 + $0x7] ss:$8 sm:$0xf] %vm11_vm0, %v56_v11  }

// kernel: ncn_warpnet_forward.1
= control target key start
LH: loop header
LB: loop body
LE: loop exit
PB: predicated region body
PF: predicated region fallthrough
CT: control target
= control target key end

     0   :  { %13 = vsyncpa [#allocation3], 0  ;;  %s16880_s0 = inlined_call_operand.vmem [shape: f32[2,256,32], index: 0, kind: input, shape index: {}]   ;;  %s16881_s1 = inlined_call_operand.vmem [shape: f32[2,256,32], index: 1, kind: input, shape index: {}, may-alias: {1,2}]   ;;  %s16882_s2 = inlined_call_operand.vmem [shape: f32[2,256,32], index: 2, kind: input, shape index: {}, may-alias: {1,2}]   ;;  %s16883_s3 = inlined_call_operand.vmem [shape: f32[2,1,32], index: 3, kind: input, shape index: {}]   ;;  %s16884_s4 = inlined_call_operand.vmem [shape: f32[2,1,32], index: 4, kind: input, shape index: {}]   ;;  %s16885_s5 = inlined_call_operand.vmem [shape: f32[2,256], index: 5, kind: input, shape index: {}]   ;;  %s16886_s6 = inlined_call_operand.hbm [shape: f32[2,256,32], index: 6, kind: output, shape index: {0}]   ;;  %s16887_s7 = inlined_call_operand.vmem [shape: f32[2,256,3], index: 7, kind: output, shape index: {1}]  }
   0x1   :  { %15 = vsyncpa [#allocation3 + $0x1], 0  ;;  %s8919_s24 = smov 0   ;;  %s8921_s25 = smov 0  }
   0x2   :  { %s8923_s26 = smov 0   ;;  %s8925_s27 = smov 0  }
   0x3   :  { %s8927_s28 = smov 0   ;;  %s8929_s29 = smov 0  }
   0x4 LB: > { %s8074_s30 = sadd.s32 4294967295, %s8875_s29   ;;  %s8075_s8 = sadd.s32 4294967294, %s8875_s29   ;;  %s8875_s29 = sphi %s8929_s29, %s21_s29   ;;  %s8871_s28 = sphi %s8927_s28, %s18489_s28   ;;  %s8867_s27 = sphi %s8925_s27, %s18488_s27   ;;  %s8863_s26 = sphi %s8923_s26, %s18487_s26   ;;  %s8859_s25 = sphi %s8921_s25, %s18486_s25   ;;  %s8855_s24 = sphi %s8919_s24, %s18485_s24  }
   0x5   : > { %s33_s9 = sadd.s32 1, %s8871_s28  ;;  %s197_s10 = sadd.s32 1, %s8863_s26 }
   0x6   : > { %p35_p0 = scmp.ge.s32.totalorder %s33_s9, 2  ;;  %p207_p1 = scmp.ne.s32.totalorder %s8863_s26, %s8859_s25 }
   0x7   : > { %p208_p2 = scmp.eq.s32.totalorder %s8074_s30, 1  ;;  %p213_p3 = scmp.ne.s32.totalorder %s8859_s25, %s8855_s24 }
   0x8   : > { %s18491_s9 = smov (%p35_p0, %s33_s9), 0  ;;  %p214_p5 = scmp.eq.s32.totalorder %s8075_s8, 1 }
   0x9   : > { %p8959_p4 = por %p208_p2, %p207_p1  ;;  %s192_s12 = ssub.s32 %s8871_s28, %s18491_s9 }
   0xa   : > { %p8078_p6 = scmp.ge.s32.totalorder %s8875_s29, 1  ;;  %p195_p7 = scmp.eq.s32.totalorder %s192_s12, 0 }
   0xb   : > { %p8966_p8 = por %p214_p5, %p213_p3  ;;  %p309_p9 = scmp.lt.s32.totalorder %s8875_s29, 3 }
   0xc   : > { %s8972_s14 = scalar_select %p195_p7, %s8863_s26, %s197_s10  }
   0xd   : > { %p310_p10 = pnand %p8078_p6, %p309_p9 }
   0xf   : > { %313 = sbr.rel (%p310_p10) target bundleno = 2038 (0x7f6), region = 44 }
  0x14   : > { %p375_p11 = scmp.lt.s32.totalorder %s8867_s27, 1  ;;  %vm517_vm0 = vcmask 261120  }
  0x16   : > { %s8976_s15 = scalar_select %p375_p11, %s8867_s27, 1 }
  0x18   : > { %s8979_s16 = sshll.u32 %s8976_s15, 8  ;;  %s401_s19 = scalar_lea.vmem %s16883_s3, %s8976_s15 }
  0x19   : > { %s8989_s22 = scalar_lea.vmem %s16882_s2, %s8979_s16  ;;  %s8995_s8 = scalar_lea.vmem %s16884_s4, %s8976_s15  ;;  %v9115_v56 = vld [vmem:[%s401_s19] ss:$0 sm:$0xff] }
  0x1a   : > { %v8998_v0 = vld [vmem:[%s8995_s8] ss:$0 sm:$0xff]  ;;  %v9001_v1 = vld [vmem:[%s8989_s22 + $0x78] sm:$0xff]  ;;  %v2807_v2 = vld [vmem:[%s8989_s22 + $0x68] sm:$0xff]  ;;  %s9108_s17 = scalar_lea.vmem %s16880_s0, %s8979_s16  ;;  %s9504_s21 = scalar_lea.vmem %s16881_s1, %s8979_s16 }
  0x1b   : > { %17382 = vst [vmem:[#allocation5_spill] sm:$0xff] %v9001_v1  ;;  %v2805_v3 = vld [vmem:[%s8989_s22 + $0x58] sm:$0xff]  ;;  %v9006_v4 = vld [vmem:[%s8989_s22 + $0x70] sm:$0xff]  ;;  %v9010_v5 = vsub.f32 %v9001_v1, %v8998_v0  ;;  %v9013_v6 = vsub.f32 %v2807_v2, %v8998_v0  ;;  %v2806_v8 = vld [vmem:[%s8989_s22 + $0x60] sm:$0xff]  ;;  %s8098_s15 = sshll.u32 %s8867_s27, 8 }
  0x1c   : > { %17383 = vst [vmem:[#allocation6_spill] sm:$0xff] %v9006_v4  ;;  %v9016_v7 = vsub.f32 %v2805_v3, %v8998_v0  ;;  %v2804_v9 = vld [vmem:[%s8989_s22 + $0x50] sm:$0xff]  ;;  %v9022_v10 = vsub.f32 %v9006_v4, %v8998_v0  ;;  %v9033_v15 = vsub.f32 %v2806_v8, %v8998_v0  ;;  %v2803_v23 = vld [vmem:[%s8989_s22 + $0x48] sm:$0xff]  ;;  %v2802_v24 = vld [vmem:[%s8989_s22 + $0x40] sm:$0xff]  ;;  %s7902_s23 = scalar_lea.hbm %s16886_s6, %s8098_s15  ;;  %s8817_s15 = scalar_lea.hbm %s16886_s6, 512 }
  0x1d   : > { %v2873_v12 = vmul.f32 %v9010_v5, %v9010_v5  ;;  %v2871_v13 = vmul.f32 %v9013_v6, %v9013_v6  ;;  %v9036_v16 = vsub.f32 %v2804_v9, %v8998_v0  ;;  %v2801_v25 = vld [vmem:[%s8989_s22 + $0x38] sm:$0xff]  ;;  %v9053_v28 = vsub.f32 %v2803_v23, %v8998_v0  ;;  %v2800_v35 = vld [vmem:[%s8989_s22 + $0x30] sm:$0xff]  ;;  %v2799_v36 = vld [vmem:[%s8989_s22 + $0x28] sm:$0xff]  ;;  %s7905_s30 = sshll.u32 %s7902_s23, 4  ;;  %s7906_s30 = int_to_ptr.hbm [resolvable:$true] %s7905_s30 }
  0x1e   : > { %v2869_v14 = vmul.f32 %v9016_v7, %v9016_v7  ;;  %v2872_v20 = vmul.f32 %v9022_v10, %v9022_v10  ;;  %v2870_v21 = vmul.f32 %v9033_v15, %v9033_v15  ;;  %v9056_v29 = vsub.f32 %v2802_v24, %v8998_v0  ;;  %v2798_v37 = vld [vmem:[%s8989_s22 + $0x20] sm:$0xff]  ;;  %v2797_v47 = vld [vmem:[%s8989_s22 + $0x18] sm:$0xff]  ;;  %v2796_v48 = vld [vmem:[%s8989_s22 + $0x10] sm:$0xff] }
  0x1f   : > { %v2935_v17 = vsel %vm517_vm0, %v2873_v12, 0.0  ;;  %v2929_v18 = vsel %vm517_vm0, %v2871_v13, 0.0  ;;  %v2868_v22 = vmul.f32 %v9036_v16, %v9036_v16  ;;  %v9060_v31 = vsub.f32 %v2801_v25, %v8998_v0  ;;  %v2795_v49 = vld [vmem:[%s8989_s22 + $0x8] sm:$0xff]  ;;  %v2794_v60 = vld [vmem:[%s8989_s22] sm:$0xff]  ;;  %v2821_v1 = vld [vmem:[%s8989_s22 + $0xd8] sm:$0xff] }
  0x20   : > { %v2923_v19 = vsel %vm517_vm0, %v2869_v14, 0.0  ;;  %2936 = vadd.xlane.f32.xlu0 %v2935_v17  ;;  %2930 = vadd.xlane.f32.xlu1 %v2929_v18  ;;  %v2932_v26 = vsel %vm517_vm0, %v2872_v20, 0.0  ;;  %v2926_v27 = vsel %vm517_vm0, %v2870_v21, 0.0  ;;  %v2867_v32 = vmul.f32 %v9053_v28, %v9053_v28  ;;  %v434_v61 = vld [vmem:[%s9108_s17 + $0x80] sm:$0xff]  ;;  %v435_v62 = vld [vmem:[%s9108_s17 + $0x88] sm:$0xff]  ;;  %v437_v18 = vld [vmem:[%s9108_s17 + $0x98] sm:$0xff] }
  0x21   : > { %2924 = vadd.xlane.f32.xlu2 %v2923_v19  ;;  %v2920_v30 = vsel %vm517_vm0, %v2868_v22, 0.0  ;;  %v2866_v33 = vmul.f32 %v9056_v29, %v9056_v29  ;;  %v2865_v34 = vmul.f32 %v9060_v31, %v9060_v31  ;;  %v9074_v40 = vsub.f32 %v2800_v35, %v8998_v0  ;;  %v436_v19 = vld [vmem:[%s9108_s17 + $0x90] sm:$0xff]  ;;  %v438_v20 = vld [vmem:[%s9108_s17 + $0xa0] sm:$0xff]  ;;  %v441_v35 = vld [vmem:[%s9108_s17 + $0xb8] sm:$0xff] }
  0x22   : > { %v2917_v38 = vsel %vm517_vm0, %v2867_v32, 0.0  ;;  %v9077_v41 = vsub.f32 %v2799_v36, %v8998_v0  ;;  %v9081_v43 = vsub.f32 %v2798_v37, %v8998_v0  ;;  %v9095_v52 = vsub.f32 %v2797_v47, %v8998_v0 }
  0x23   : > { %v2914_v39 = vsel %vm517_vm0, %v2866_v33, 0.0  ;;  %v2911_v42 = vsel %vm517_vm0, %v2865_v34, 0.0  ;;  %v2864_v44 = vmul.f32 %v9074_v40, %v9074_v40  ;;  %v9098_v53 = vsub.f32 %v2796_v48, %v8998_v0  ;;  %v440_v33 = vld [vmem:[%s9108_s17 + $0xb0] sm:$0xff]  ;;  %v439_v34 = vld [vmem:[%s9108_s17 + $0xa8] sm:$0xff] }
  0x24   : > { %v2863_v45 = vmul.f32 %v9077_v41, %v9077_v41  ;;  %v2862_v46 = vmul.f32 %v9081_v43, %v9081_v43  ;;  %v9102_v55 = vsub.f32 %v2795_v49, %v8998_v0  ;;  %v2861_v57 = vmul.f32 %v9095_v52, %v9095_v52  ;;  %v443_v48 = vld [vmem:[%s9108_s17 + $0xc8] sm:$0xff]  ;;  %v442_v49 = vld [vmem:[%s9108_s17 + $0xc0] sm:$0xff] }
  0x25   : > { %v2908_v50 = vsel %vm517_vm0, %v2864_v44, 0.0  ;;  %v2860_v58 = vmul.f32 %v9098_v53, %v9098_v53  ;;  %v9129_v3 = vsub.f32 %v2794_v60, %v8998_v0  ;;  %v9132_v8 = vsub.f32 %v434_v61, %v9115_v56 }
  0x26   : > { %v2905_v51 = vsel %vm517_vm0, %v2863_v45, 0.0  ;;  %v2902_v54 = vsel %vm517_vm0, %v2862_v46, 0.0  ;;  %v2859_v59 = vmul.f32 %v9102_v55, %v9102_v55  ;;  %v2899_v63 = vsel %vm517_vm0, %v2861_v57, 0.0 }
  0x27   : > { %v2896_v2 = vsel %vm517_vm0, %v2860_v58, 0.0  ;;  %v9136_v12 = vsub.f32 %v435_v62, %v9115_v56  ;;  %v2858_v13 = vmul.f32 %v9129_v3, %v9129_v3  ;;  %v501_v14 = vmul.f32 %v9132_v8, %v9132_v8 }
  0x28   : > { %2933 = vadd.xlane.f32.xlu0 %v2932_v26  ;;  %2927 = vadd.xlane.f32.xlu1 %v2926_v27  ;;  %v2893_v9 = vsel %vm517_vm0, %v2859_v59, 0.0  ;;  %v9150_v23 = vsub.f32 %v437_v18, %v9115_v56  ;;  %v9153_v24 = vsub.f32 %v436_v19, %v9115_v56  ;;  %v9157_v26 = vsub.f32 %v438_v20, %v9115_v56 }
  0x29   : > { %2921 = vadd.xlane.f32.xlu2 %v2920_v30  ;;  %17384 = vst [vmem:[#allocation7_spill] sm:$0xff] %v9136_v12  ;;  %v502_v17 = vmul.f32 %v9136_v12, %v9136_v12  ;;  %v2890_v21 = vsel %vm517_vm0, %v2858_v13, 0.0  ;;  %v566_v22 = vsel %vm517_vm0, %v501_v14, 0.0  ;;  %v9178_v44 = vsub.f32 %v441_v35, %v9115_v56  ;;  %v447_v13 = vld [vmem:[%s9108_s17 + $0xe8] sm:$0xff] }
  0x2a   : > { %17385 = vst [vmem:[#allocation8_spill] sm:$0xff] %v9150_v23  ;;  %v504_v27 = vmul.f32 %v9150_v23, %v9150_v23  ;;  %v503_v30 = vmul.f32 %v9153_v24, %v9153_v24  ;;  %v505_v32 = vmul.f32 %v9157_v26, %v9157_v26  ;;  %v9192_v57 = vsub.f32 %v443_v48, %v9115_v56 }
  0x2b   : > { %17386 = vst [vmem:[#allocation9_spill] sm:$0xff] %v9153_v24  ;;  %v569_v25 = vsel %vm517_vm0, %v502_v17, 0.0  ;;  %v508_v47 = vmul.f32 %v9178_v44, %v9178_v44  ;;  %v9195_v58 = vsub.f32 %v442_v49, %v9115_v56  ;;  %v420_v49 = vld [vmem:[%s9108_s17 + $0x10] sm:$0xff] }
  0x2c   : > { %17387 = vst [vmem:[#allocation10_spill] sm:$0xff] %v9157_v26  ;;  %v575_v36 = vsel %vm517_vm0, %v504_v27, 0.0  ;;  %v572_v37 = vsel %vm517_vm0, %v503_v30, 0.0  ;;  %v510_v61 = vmul.f32 %v9192_v57, %v9192_v57  ;;  %v449_v30 = vld [vmem:[%s9108_s17 + $0xf8] sm:$0xff] }
  0x2d   : > { %17390 = vst [vmem:[#allocation13_spill] sm:$0xff] %v9178_v44  ;;  %v587_v59 = vsel %vm517_vm0, %v508_v47, 0.0  ;;  %v509_v62 = vmul.f32 %v9195_v58, %v9195_v58 }
  0x2e   : > { %17391 = vst [vmem:[#allocation14_spill] sm:$0xff] %v9192_v57  ;;  %v593_v14 = vsel %vm517_vm0, %v510_v61, 0.0  ;;  %v9255_v61 = vsub.f32 %v420_v49, %v9115_v56  ;;  %v427_v49 = vld [vmem:[%s9108_s17 + $0x48] sm:$0xff] }
  0x2f   : > { %17392 = vst [vmem:[#allocation15_spill] sm:$0xff] %v9195_v58  ;;  %v590_v17 = vsel %vm517_vm0, %v509_v62, 0.0 }
  0x30   : > { %2918 = vadd.xlane.f32.xlu0 %v2917_v38  ;;  %2915 = vadd.xlane.f32.xlu1 %v2914_v39  ;;  %v9171_v38 = vsub.f32 %v440_v33, %v9115_v56  ;;  %v9174_v39 = vsub.f32 %v439_v34, %v9115_v56  ;;  %v418_v33 = vld [vmem:[%s9108_s17] sm:$0xff]  ;;  %17400 = vst [vmem:[#allocation23_spill] sm:$0xff] %v9255_v61 }
  0x31   : > { %2912 = vadd.xlane.f32.xlu2 %v2911_v42  ;;  %v578_v42 = vsel %vm517_vm0, %v505_v32, 0.0  ;;  %v448_v32 = vld [vmem:[%s9108_s17 + $0xf0] sm:$0xff] }
  0x32   : > { %17388 = vst [vmem:[#allocation11_spill] sm:$0xff] %v9171_v38  ;;  %v507_v45 = vmul.f32 %v9171_v38, %v9171_v38  ;;  %v506_v46 = vmul.f32 %v9174_v39, %v9174_v39 }
  0x33   : > { %17389 = vst [vmem:[#allocation12_spill] sm:$0xff] %v9174_v39 }
  0x38   : > { %2909 = vadd.xlane.f32.xlu0 %v2908_v50  ;;  %2906 = vadd.xlane.f32.xlu1 %v2905_v51  ;;  %v444_v50 = vld [vmem:[%s9108_s17 + $0xd0] sm:$0xff]  ;;  %v584_v51 = vsel %vm517_vm0, %v507_v45, 0.0  ;;  %v9241_v45 = vsub.f32 %v418_v33, %v9115_v56 }
  0x39   : > { %2903 = vadd.xlane.f32.xlu2 %v2902_v54  ;;  %v581_v54 = vsel %vm517_vm0, %v506_v46, 0.0  ;;  %v9199_v60 = vsub.f32 %v444_v50, %v9115_v56  ;;  %v419_v50 = vld [vmem:[%s9108_s17 + $0x8] sm:$0xff] }
  0x3a   : > { %17399 = vst [vmem:[#allocation22_spill] sm:$0xff] %v9241_v45  ;;  %v485_v48 = vmul.f32 %v9241_v45, %v9241_v45  ;;  %v9258_v62 = vsub.f32 %v419_v50, %v9115_v56 }
  0x3b   : > { %17393 = vst [vmem:[#allocation16_spill] sm:$0xff] %v9199_v60 }
  0x3c   : > { %17401 = vst [vmem:[#allocation24_spill] sm:$0xff] %v9258_v62 }
  0x40   : > { %2900 = vadd.xlane.f32.xlu0 %v2899_v63  ;;  %2897 = vadd.xlane.f32.xlu1 %v2896_v2  ;;  %v511_v63 = vmul.f32 %v9199_v60, %v9199_v60  ;;  %v446_v2 = vld [vmem:[%s9108_s17 + $0xe0] sm:$0xff] }
  0x41   : > { %2894 = vadd.xlane.f32.xlu2 %v2893_v9  ;;  %v445_v9 = vld [vmem:[%s9108_s17 + $0xd8] sm:$0xff]  ;;  %v9213_v18 = vsub.f32 %v446_v2, %v9115_v56 }
  0x42   : > { %v9216_v19 = vsub.f32 %v445_v9, %v9115_v56  ;;  %v596_v20 = vsel %vm517_vm0, %v511_v63, 0.0  ;;  %v518_v63 = vsel %vm517_vm0, %v485_v48, 0.0  ;;  %v487_v9 = vmul.f32 %v9255_v61, %v9255_v61  ;;  %v425_v48 = vld [vmem:[%s9108_s17 + $0x38] sm:$0xff] }
  0x43   : > { %17394 = vst [vmem:[#allocation17_spill] sm:$0xff] %v9213_v18 }
  0x44   : > { %17395 = vst [vmem:[#allocation18_spill] sm:$0xff] %v9216_v19 }
  0x48   : > { %2891 = vadd.xlane.f32.xlu1 %v2890_v21  ;;  %567 = vadd.xlane.f32.xlu0 %v566_v22  ;;  %v9220_v21 = vsub.f32 %v447_v13, %v9115_v56  ;;  %v513_v22 = vmul.f32 %v9213_v18, %v9213_v18  ;;  %v486_v13 = vmul.f32 %v9258_v62, %v9258_v62 }
  0x49   : > { %570 = vadd.xlane.f32.xlu2 %v569_v25  ;;  %v512_v25 = vmul.f32 %v9216_v19, %v9216_v19 }
  0x4a   : > { %17396 = vst [vmem:[#allocation19_spill] sm:$0xff] %v9220_v21  ;;  %v514_v27 = vmul.f32 %v9220_v21, %v9220_v21  ;;  %v602_v34 = vsel %vm517_vm0, %v513_v22, 0.0  ;;  %v424_v22 = vld [vmem:[%s9108_s17 + $0x30] sm:$0xff] }
  0x4b   : > { %v599_v35 = vsel %vm517_vm0, %v512_v25, 0.0  ;;  %v524_v25 = vsel %vm517_vm0, %v487_v9, 0.0  ;;  %v9304_v9 = vsub.f32 %v427_v49, %v9115_v56 }
  0x4d   : > { %17408 = vst [vmem:[#allocation31_spill] sm:$0xff] %v9304_v9 }
  0x50   : > { %576 = vadd.xlane.f32.xlu1 %v575_v36  ;;  %573 = vadd.xlane.f32.xlu0 %v572_v37  ;;  %v9234_v36 = vsub.f32 %v449_v30, %v9115_v56  ;;  %v9237_v37 = vsub.f32 %v448_v32, %v9115_v56 }
  0x51   : > { %579 = vadd.xlane.f32.xlu2 %v578_v42  ;;  %v605_v42 = vsel %vm517_vm0, %v514_v27, 0.0  ;;  %v521_v27 = vsel %vm517_vm0, %v486_v13, 0.0 }
  0x52   : > { %17397 = vst [vmem:[#allocation20_spill] sm:$0xff] %v9234_v36  ;;  %v516_v46 = vmul.f32 %v9234_v36, %v9234_v36  ;;  %v515_v47 = vmul.f32 %v9237_v37, %v9237_v37 }
  0x53   : > { %17398 = vst [vmem:[#allocation21_spill] sm:$0xff] %v9237_v37 }
  0x58   : > { %585 = vadd.xlane.f32.xlu1 %v584_v51  ;;  %582 = vadd.xlane.f32.xlu0 %v581_v54  ;;  %v421_v51 = vld [vmem:[%s9108_s17 + $0x18] sm:$0xff]  ;;  %v611_v54 = vsel %vm517_vm0, %v516_v46, 0.0 }
  0x59   : > { %588 = vadd.xlane.f32.xlu2 %v587_v59  ;;  %v608_v59 = vsel %vm517_vm0, %v515_v47, 0.0  ;;  %v9262_v2 = vsub.f32 %v421_v51, %v9115_v56  ;;  %v426_v47 = vld [vmem:[%s9108_s17 + $0x40] sm:$0xff] }
  0x5b   : > { %17402 = vst [vmem:[#allocation25_spill] sm:$0xff] %v9262_v2 }
  0x60   : > { %594 = vadd.xlane.f32.xlu1 %v593_v14  ;;  %591 = vadd.xlane.f32.xlu0 %v590_v17  ;;  %v488_v14 = vmul.f32 %v9262_v2, %v9262_v2  ;;  %v423_v17 = vld [vmem:[%s9108_s17 + $0x28] sm:$0xff] }
  0x61   : > { %597 = vadd.xlane.f32.xlu2 %v596_v20  ;;  %v422_v20 = vld [vmem:[%s9108_s17 + $0x20] sm:$0xff]  ;;  %v9276_v30 = vsub.f32 %v423_v17, %v9115_v56  ;;  %v494_v17 = vmul.f32 %v9304_v9, %v9304_v9 }
  0x62   : > { %v9279_v32 = vsub.f32 %v422_v20, %v9115_v56  ;;  %v527_v33 = vsel %vm517_vm0, %v488_v14, 0.0  ;;  %v429_v20 = vld [vmem:[%s9108_s17 + $0x58] sm:$0xff] }
  0x63   : > { %17403 = vst [vmem:[#allocation26_spill] sm:$0xff] %v9276_v30 }
  0x64   : > { %17404 = vst [vmem:[#allocation27_spill] sm:$0xff] %v9279_v32 }
  0x68   : > { %603 = vadd.xlane.f32.xlu1 %v602_v34  ;;  %600 = vadd.xlane.f32.xlu0 %v599_v35  ;;  %v9283_v34 = vsub.f32 %v424_v22, %v9115_v56  ;;  %v490_v35 = vmul.f32 %v9276_v30, %v9276_v30  ;;  %v428_v22 = vld [vmem:[%s9108_s17 + $0x50] sm:$0xff] }
  0x69   : > { %606 = vadd.xlane.f32.xlu2 %v605_v42  ;;  %v489_v42 = vmul.f32 %v9279_v32, %v9279_v32 }
  0x6a   : > { %17405 = vst [vmem:[#allocation28_spill] sm:$0xff] %v9283_v34  ;;  %v491_v46 = vmul.f32 %v9283_v34, %v9283_v34  ;;  %v533_v50 = vsel %vm517_vm0, %v490_v35, 0.0  ;;  %v9318_v35 = vsub.f32 %v429_v20, %v9115_v56 }
  0x6b   : > { %v530_v51 = vsel %vm517_vm0, %v489_v42, 0.0  ;;  %v9321_v42 = vsub.f32 %v428_v22, %v9115_v56 }
  0x6c   : > { %17409 = vst [vmem:[#allocation32_spill] sm:$0xff] %v9318_v35 }
  0x6d   : > { %17410 = vst [vmem:[#allocation33_spill] sm:$0xff] %v9321_v42  ;;  %v495_v49 = vmul.f32 %v9321_v42, %v9321_v42  ;;  %v2816_v42 = vld [vmem:[%s8989_s22 + $0xb0] sm:$0xff] }
  0x70   : > { %612 = vadd.xlane.f32.xlu1 %v611_v54  ;;  %609 = vadd.xlane.f32.xlu0 %v608_v59  ;;  %v9297_v54 = vsub.f32 %v426_v47, %v9115_v56  ;;  %v9300_v59 = vsub.f32 %v425_v48, %v9115_v56  ;;  %v496_v48 = vmul.f32 %v9318_v35, %v9318_v35  ;;  %v2815_v35 = vld [vmem:[%s8989_s22 + $0xa8] sm:$0xff] }
  0x71   : > { %519 = vadd.xlane.f32.xlu2 %v518_v63  ;;  %v536_v63 = vsel %vm517_vm0, %v491_v46, 0.0  ;;  %v545_v46 = vsel %vm517_vm0, %v494_v17, 0.0  ;;  %v548_v17 = vsel %vm517_vm0, %v495_v49, 0.0  ;;  %v9355_v49 = vld [vmem:[%s8989_s22 + $0xf0] sm:$0xff] }
  0x72   : > { %17406 = vst [vmem:[#allocation29_spill] sm:$0xff] %v9297_v54  ;;  %v493_v13 = vmul.f32 %v9297_v54, %v9297_v54  ;;  %v492_v14 = vmul.f32 %v9300_v59, %v9300_v59 }
  0x73   : > { %17407 = vst [vmem:[#allocation30_spill] sm:$0xff] %v9300_v59 }
  0x74   : > { %17415 = vst [vmem:[#allocation38_spill] sm:$0xff] %v9355_v49 }
  0x78   : > { %525 = vadd.xlane.f32.xlu1 %v524_v25  ;;  %522 = vadd.xlane.f32.xlu0 %v521_v27  ;;  %v430_v25 = vld [vmem:[%s9108_s17 + $0x60] sm:$0xff]  ;;  %v542_v27 = vsel %vm517_vm0, %v493_v13, 0.0  ;;  %v433_v13 = vld [vmem:[%s9108_s17 + $0x78] sm:$0xff] }
  0x79   : > { %528 = vadd.xlane.f32.xlu2 %v527_v33  ;;  %v539_v33 = vsel %vm517_vm0, %v492_v14, 0.0  ;;  %v9325_v47 = vsub.f32 %v430_v25, %v9115_v56  ;;  %v551_v14 = vsel %vm517_vm0, %v496_v48, 0.0 }
  0x7b   : > { %17411 = vst [vmem:[#allocation34_spill] sm:$0xff] %v9325_v47 }
  0x80   : > { %534 = vadd.xlane.f32.xlu1 %v533_v50  ;;  %531 = vadd.xlane.f32.xlu0 %v530_v51  ;;  %v497_v50 = vmul.f32 %v9325_v47, %v9325_v47  ;;  %v432_v51 = vld [vmem:[%s9108_s17 + $0x70] sm:$0xff] }
  0x81   : > { %537 = vadd.xlane.f32.xlu2 %v536_v63  ;;  %v431_v63 = vld [vmem:[%s9108_s17 + $0x68] sm:$0xff]  ;;  %v9339_v20 = vsub.f32 %v432_v51, %v9115_v56  ;;  %v9358_v51 = vld [vmem:[%s8989_s22 + $0xf8] sm:$0xff]  ;;  %s360_s17 = sand.u32 1, %s8859_s25  }
  0x82   : > { %v9342_v22 = vsub.f32 %v431_v63, %v9115_v56  ;;  %v554_v25 = vsel %vm517_vm0, %v497_v50, 0.0  ;;  %17416 = vst [vmem:[#allocation39_spill] sm:$0xff] %v9358_v51  ;;  %s8079_s18 = sshll.u32 %s360_s17, 8 }
  0x83   : > { %17412 = vst [vmem:[#allocation35_spill] sm:$0xff] %v9339_v20  ;;  %s16368_s20 = scalar_lea.vmem [#allocation2], %s8079_s18 }
  0x84   : > { %17413 = vst [vmem:[#allocation36_spill] sm:$0xff] %v9342_v22  ;;  %s7903_s27 = sshll.u32 %s16368_s20, 4  ;;  %s7904_s27 = int_to_ptr.vmem [resolvable:$true] %s7903_s27 }
  0x88   : > { %543 = vadd.xlane.f32.xlu1 %v542_v27  ;;  %540 = vadd.xlane.f32.xlu0 %v539_v33  ;;  %v9346_v27 = vsub.f32 %v433_v13, %v9115_v56  ;;  %v499_v33 = vmul.f32 %v9339_v20, %v9339_v20  ;;  %v2823_v56 = vld [vmem:[%s8989_s22 + $0xe8] sm:$0xff]  ;;  %v9365_v13 = vsub.f32 %v9355_v49, %v8998_v0 }
  0x89   : > { %546 = vadd.xlane.f32.xlu2 %v545_v46  ;;  %v498_v46 = vmul.f32 %v9342_v22, %v9342_v22  ;;  %v2819_v20 = vld [vmem:[%s8989_s22 + $0xc8] sm:$0xff] }
  0x8a   : > { %17414 = vst [vmem:[#allocation37_spill] sm:$0xff] %v9346_v27  ;;  %v500_v48 = vmul.f32 %v9346_v27, %v9346_v27  ;;  %v560_v50 = vsel %vm517_vm0, %v499_v33, 0.0  ;;  %v2888_v33 = vmul.f32 %v9365_v13, %v9365_v13  ;;  %v9417_v36 = vsub.f32 %v2819_v20, %v8998_v0 }
  0x8b   : > { %v557_v63 = vsel %vm517_vm0, %v498_v46, 0.0  ;;  %17417 = vst [vmem:[#allocation40_spill] sm:$0xff] %v9365_v13 }
  0x8c   : > { %v2980_v27 = vsel %vm517_vm0, %v2888_v33, 0.0  ;;  %17424 = vst [vmem:[#allocation47_spill] sm:$0xff] %v9417_v36 }
  0x90   : > { %552 = vadd.xlane.f32.xlu1 %v551_v14  ;;  %549 = vadd.xlane.f32.xlu0 %v548_v17  ;;  %v9369_v14 = vsub.f32 %v9358_v51, %v8998_v0  ;;  %v563_v17 = vsel %vm517_vm0, %v500_v48, 0.0  ;;  %v2822_v48 = vld [vmem:[%s8989_s22 + $0xe0] sm:$0xff] }
  0x91   : > { %555 = vadd.xlane.f32.xlu2 %v554_v25  ;;  %v9373_v25 = vsub.f32 %v2823_v56, %v8998_v0  ;;  %v2820_v56 = vld [vmem:[%s8989_s22 + $0xd0] sm:$0xff] }
  0x92   : > { %17418 = vst [vmem:[#allocation41_spill] sm:$0xff] %v9369_v14  ;;  %v2889_v46 = vmul.f32 %v9369_v14, %v9369_v14  ;;  %v9398_v51 = vsub.f32 %v2820_v56, %v8998_v0 }
  0x93   : > { %17419 = vst [vmem:[#allocation42_spill] sm:$0xff] %v9373_v25  ;;  %v2887_v4 = vmul.f32 %v9373_v25, %v9373_v25  ;;  %v9394_v11 = vpop.xlane.xlu0 %2936 }
  0x94   : > { %17422 = vst [vmem:[#allocation45_spill] sm:$0xff] %v9398_v51  ;;  %8190 = vrsqrt.f32 %v9394_v11  ;;  %vm3173_vm1 = vcmp.eq.f32.partialorder %v9394_v11, inf  ;;  %vm3175_vm2 = vcmp.eq.f32.partialorder %v9394_v11, 0.0 }
  0x95   : > { %v2977_v49 = vsel %vm517_vm0, %v2887_v4, 0.0  ;;  %v2817_v4 = vld [vmem:[%s8989_s22 + $0xb8] sm:$0xff] }
  0x96   : > { %v9420_v22 = vsub.f32 %v2817_v4, %v8998_v0 }
  0x98   : > { %561 = vadd.xlane.f32.xlu1 %v560_v50  ;;  %558 = vadd.xlane.f32.xlu0 %v557_v63  ;;  %v2983_v50 = vsel %vm517_vm0, %v2889_v46, 0.0  ;;  %v9389_v63 = vsub.f32 %v2821_v1, %v8998_v0  ;;  %v2884_v46 = vmul.f32 %v9398_v51, %v9398_v51  ;;  %17425 = vst [vmem:[#allocation48_spill] sm:$0xff] %v9420_v22 }
  0x99   : > { %564 = vadd.xlane.f32.xlu2 %v563_v17  ;;  %v9392_v17 = vsub.f32 %v2822_v48, %v8998_v0  ;;  %v2818_v48 = vld [vmem:[%s8989_s22 + $0xc0] sm:$0xff]  ;;  %v2881_v20 = vmul.f32 %v9420_v22, %v9420_v22  ;;  %v9435_v22 = vsub.f32 %v2815_v35, %v8998_v0 }
  0x9a   : > { %17420 = vst [vmem:[#allocation43_spill] sm:$0xff] %v9389_v63  ;;  %v2885_v33 = vmul.f32 %v9389_v63, %v9389_v63  ;;  %v8191_v37 = vpop.eup %8190 }
  0x9b   : > { %17421 = vst [vmem:[#allocation44_spill] sm:$0xff] %v9392_v17  ;;  %v2886_v1 = vmul.f32 %v9392_v17, %v9392_v17  ;;  %v1511_v17 = vld [vmem:[%s9504_s21 + $0x8] sm:$0xff] }
  0x9c   : > { %v2971_v56 = vsel %vm517_vm0, %v2885_v33, 0.0  ;;  %17426 = vst [vmem:[#allocation49_spill] sm:$0xff] %v9435_v22 }
  0xa0   : > { %2981 = vadd.xlane.f32.xlu1 %v2980_v27  ;;  %2984 = vadd.xlane.f32.xlu0 %v2983_v50  ;;  %v2974_v27 = vsel %vm517_vm0, %v2886_v1, 0.0  ;;  %v9413_v50 = vsub.f32 %v2818_v48, %v8998_v0  ;;  %v3167_v1 = vmul.f32 %v8191_v37, %v9394_v11  ;;  %v2934_v48 = vpop.xlane.xlu0 %2933 }
  0xa1   : > { %2978 = vadd.xlane.f32.xlu2 %v2977_v49  ;;  %v2968_v49 = vsel %vm517_vm0, %v2884_v46, 0.0  ;;  %v2883_v46 = vmul.f32 %v9417_v36, %v9417_v36  ;;  %8192 = vrsqrt.f32 %v2934_v48  ;;  %v9437_v36 = vpop.xlane.xlu1 %2930  ;;  %vm3161_vm3 = vcmp.eq.f32.partialorder %v2934_v48, inf }
  0xa2   : > { %17423 = vst [vmem:[#allocation46_spill] sm:$0xff] %v9413_v50  ;;  %v2882_v33 = vmul.f32 %v9413_v50, %v9413_v50  ;;  %8194 = vrsqrt.f32 %v9437_v36  ;;  %vm3163_vm4 = vcmp.eq.f32.partialorder %v2934_v48, 0.0  ;;  %vm3149_vm9 = vcmp.eq.f32.partialorder %v9437_v36, inf }
  0xa3   : > { %vm3151_vm10 = vcmp.eq.f32.partialorder %v9437_v36, 0.0 }
  0xa4   : > { %v2962_v4 = vsel %vm517_vm0, %v2882_v33, 0.0  ;;  %v9440_v33 = vsub.f32 %v2816_v42, %v8998_v0 }
  0xa6   : > { %17427 = vst [vmem:[#allocation50_spill] sm:$0xff] %v9440_v33 }
  0xa7   : > { %v8193_v21 = vpop.eup %8192 }
  0xa8   : > { %2972 = vadd.xlane.f32.xlu1 %v2971_v56  ;;  %2975 = vadd.xlane.f32.xlu0 %v2974_v27  ;;  %v3168_v56 = vmul.f32 %v8191_v37, %v3167_v1  ;;  %v2965_v27 = vsel %vm517_vm0, %v2883_v46, 0.0  ;;  %v3155_v50 = vmul.f32 %v8193_v21, %v2934_v48 }
  0xa9   : > { %2969 = vadd.xlane.f32.xlu2 %v2968_v49  ;;  %v2959_v49 = vsel %vm517_vm0, %v2881_v20, 0.0  ;;  %v2814_v20 = vld [vmem:[%s8989_s22 + $0xa0] sm:$0xff] }
  0xaa   : > { %v3169_v47 = vmul.f32 0.5, %v3168_v56  ;;  %v3156_v46 = vmul.f32 %v8193_v21, %v3155_v50  ;;  %v2880_v56 = vmul.f32 %v9440_v33, %v9440_v33 }
  0xac   : > { %v3170_v18 = vsub.f32 1.5, %v3169_v47  ;;  %v9448_v47 = vsub.f32 %v2814_v20, %v8998_v0  ;;  %v9458_v20 = vpop.xlane.xlu1 %2927 }
  0xad   : > { %8196 = vrsqrt.f32 %v9458_v20  ;;  %vm3137_vm11 = vcmp.eq.f32.partialorder %v9458_v20, inf  ;;  %vm3139_vm12 = vcmp.eq.f32.partialorder %v9458_v20, 0.0 }
  0xae   : > { %v3171_v1 = vmul.f32 %v8191_v37, %v3170_v18  ;;  %17428 = vst [vmem:[#allocation51_spill] sm:$0xff] %v9448_v47  ;;  %v2956_v18 = vsel %vm517_vm0, %v2880_v56, 0.0  ;;  %v2878_v37 = vmul.f32 %v9448_v47, %v9448_v47 }
  0xb0   : > { %2963 = vadd.xlane.f32.xlu1 %v2962_v4  ;;  %2966 = vadd.xlane.f32.xlu0 %v2965_v27  ;;  %v2879_v4 = vmul.f32 %v9435_v22, %v9435_v22  ;;  %v3172_v35 = vmul.f32 %v3171_v1, %v9394_v11  ;;  %v3157_v27 = vmul.f32 0.5, %v3156_v46  ;;  %v3176_v1 = vand.u32 2147483648, %v9394_v11  ;;  %v8195_v22 = vpop.eup %8194 }
  0xb1   : > { %2960 = vadd.xlane.f32.xlu2 %v2959_v49  ;;  %v2950_v46 = vsel %vm517_vm0, %v2878_v37, 0.0 }
  0xb2   : > { %v2953_v42 = vsel %vm517_vm0, %v2879_v4, 0.0  ;;  %v3174_v50 = vsel %vm3173_vm1, %v9394_v11, %v3172_v35  ;;  %v3158_v49 = vsub.f32 1.5, %v3157_v27  ;;  %v9465_v27 = vpop.xlane.xlu2 %2924 }
  0xb3   : > { %v3177_v4 = vsel %vm3175_vm2, %v3176_v1, %v3174_v50  ;;  %v8197_v47 = vpop.eup %8196  ;;  %v2812_v1 = vld [vmem:[%s8989_s22 + $0x90] sm:$0xff]  ;;  %vm3125_vm2 = vcmp.eq.f32.partialorder %v9465_v27, inf }
  0xb4   : > { %v3159_v56 = vmul.f32 %v8193_v21, %v3158_v49  ;;  %v3385_v35 = vadd.f32 2.220446e-16, %v3177_v4  ;;  %v3131_v37 = vmul.f32 %v8197_v47, %v9458_v20  ;;  %v3164_v21 = vand.u32 2147483648, %v2934_v48  ;;  %v2811_v4 = vld [vmem:[%s8989_s22 + $0x88] sm:$0xff] }
  0xb6   : > { %8198 = vrcp.f32 %v3385_v35  ;;  %v3132_v51 = vmul.f32 %v8197_v47, %v3131_v37  ;;  %vm3632_vm6 = vweird.f32 %v3385_v35 }
  0xb7   : > { %8200 = vrsqrt.f32 %v9465_v27 }
  0xb8   : > { %2954 = vadd.xlane.f32.xlu1 %v2953_v42  ;;  %2957 = vadd.xlane.f32.xlu0 %v2956_v18  ;;  %v3143_v42 = vmul.f32 %v8195_v22, %v9437_v36  ;;  %v3160_v18 = vmul.f32 %v3159_v56, %v2934_v48 }
  0xb9   : > { %2951 = vadd.xlane.f32.xlu2 %v2950_v46  ;;  %v2813_v46 = vld [vmem:[%s8989_s22 + $0x98] sm:$0xff] }
  0xba   : > { %v3144_v33 = vmul.f32 %v8195_v22, %v3143_v42  ;;  %v3162_v11 = vsel %vm3161_vm3, %v2934_v48, %v3160_v18  ;;  %v9476_v63 = vpop.xlane.xlu2 %2921  ;;  %v9479_v18 = vsub.f32 %v2812_v1, %v8998_v0  ;;  %v9485_v48 = vsub.f32 %v2811_v4, %v8998_v0 }
  0xbb   : > { %v3165_v49 = vsel %vm3163_vm4, %v3164_v21, %v3162_v11  ;;  %v3133_v21 = vmul.f32 0.5, %v3132_v51  ;;  %8202 = vrsqrt.f32 %v9476_v63  ;;  %vm3127_vm3 = vcmp.eq.f32.partialorder %v9465_v27, 0.0 }
  0xbc   : > { %v3145_v50 = vmul.f32 0.5, %v3144_v33  ;;  %v8199_v19 = vpop.eup %8198  ;;  %v9474_v42 = vadd.f32 2.220446e-16, %v3165_v49  ;;  %17429 = vst [vmem:[#allocation52_spill] sm:$0xff] %v9479_v18  ;;  %v9482_v33 = vsub.f32 %v2813_v46, %v8998_v0  ;;  %v2876_v37 = vmul.f32 %v9479_v18, %v9479_v18 }
  0xbd   : > { %v9472_v56 = vpop.eup %8200  ;;  %17431 = vst [vmem:[#allocation54_spill] sm:$0xff] %v9485_v48  ;;  %v3628_v11 = vmul.f32 %v8199_v19, %v3385_v35  ;;  %v2875_v49 = vmul.f32 %v9485_v48, %v9485_v48  ;;  %v3638_v18 = vand.u32 2147483648, %v3385_v35  ;;  %vm3633_vm5 = vweird.f32 %v8199_v19 }
  0xbe   : > { %v3146_v9 = vsub.f32 1.5, %v3145_v50  ;;  %17430 = vst [vmem:[#allocation53_spill] sm:$0xff] %v9482_v33  ;;  %v2877_v50 = vmul.f32 %v9482_v33, %v9482_v33  ;;  %v3119_v1 = vmul.f32 %v9472_v56, %v9465_v27  ;;  %8204 = vrcp.f32 %v9474_v42  ;;  %vm3634_vm7 = vmor %vm3632_vm6, %vm3633_vm5 }
  0xbf   : > { %v3629_v46 = vsub.f32 1.0, %v3628_v11  ;;  %v2944_v51 = vsel %vm517_vm0, %v2876_v37, 0.0  ;;  %v2941_v33 = vsel %vm517_vm0, %v2875_v49, 0.0  ;;  %v3639_v49 = vor.u32 1.1754944e-38, %v3638_v18 }
  0xc0   : > { %v3147_v60 = vmul.f32 %v8195_v22, %v3146_v9  ;;  %v2947_v4 = vsel %vm517_vm0, %v2877_v50, 0.0  ;;  %2945 = vadd.xlane.f32.xlu1 %v2944_v51  ;;  %v3636_v9 = vand.u32 2147483647, %v3385_v35  ;;  %v3134_v22 = vsub.f32 1.5, %v3133_v21  ;;  %v9507_v50 = vpop.xlane.xlu0 %2918  ;;  %v1510_v51 = vld [vmem:[%s9504_s21] sm:$0xff] }
  0xc1   : > { %2948 = vadd.xlane.f32.xlu0 %v2947_v4  ;;  %v3630_v48 = vmul.f32 %v8199_v19, %v3629_v46  ;;  %2942 = vadd.xlane.f32.xlu2 %v2941_v33  ;;  %v3120_v11 = vmul.f32 %v9472_v56, %v3119_v1  ;;  %v9509_v46 = vpop.eup %8202  ;;  %v2810_v4 = vld [vmem:[%s8989_s22 + $0x80] sm:$0xff]  ;;  %8206 = vrsqrt.f32 %v9507_v50  ;;  %v9521_v18 = vsub.f32 %v1510_v51, %v8998_v0 }
  0xc2   : > { %v3148_v21 = vmul.f32 %v3147_v60, %v9437_v36  ;;  %vm3637_vm8 = vcmp.eq.f32.partialorder %v3636_v9, 8.507059e+37  ;;  %v3135_v25 = vmul.f32 %v8197_v47, %v3134_v22  ;;  %v9524_v60 = vsub.f32 %v2810_v4, %v8998_v0 }
  0xc3   : > { %v3631_v37 = vadd.f32 %v8199_v19, %v3630_v48  ;;  %v3121_v1 = vmul.f32 0.5, %v3120_v11  ;;  %17432 = vst [vmem:[#allocation55_spill] sm:$0xff] %v9521_v18  ;;  %v3107_v47 = vmul.f32 %v9509_v46, %v9476_v63  ;;  %v9537_v11 = vpop.xlane.xlu1 %2915  ;;  %vm3617_vm14 = vweird.f32 %v9474_v42 }
  0xc4   : > { %v9515_v54 = vpop.eup %8204  ;;  %17433 = vst [vmem:[#allocation56_spill] sm:$0xff] %v9524_v60  ;;  %v3150_v48 = vsel %vm3149_vm9, %v9437_v36, %v3148_v21  ;;  %v3136_v22 = vmul.f32 %v3135_v25, %v9458_v20  ;;  %v2874_v21 = vmul.f32 %v9524_v60, %v9524_v60  ;;  %8208 = vrsqrt.f32 %v9537_v11 }
  0xc5   : > { %v3635_v33 = vsel %vm3634_vm7, %v8199_v19, %v3631_v37  ;;  %v9527_v19 = vsub.f32 %v1511_v17, %v8998_v0  ;;  %v1577_v17 = vmul.f32 %v9521_v18, %v9521_v18  ;;  %vm3618_vm13 = vweird.f32 %v9515_v54 }
  0xc6   : > { %v3640_v57 = vsel %vm3637_vm8, %v3639_v49, %v3635_v33  ;;  %v3122_v49 = vsub.f32 1.5, %v3121_v1  ;;  %v3138_v1 = vsel %vm3137_vm11, %v9458_v20, %v3136_v22  ;;  %vm3619_vm15 = vmor %vm3617_vm14, %vm3618_vm13  ;;  %vm3113_vm4 = vcmp.eq.f32.partialorder %v9476_v63, inf }
  0xc7   : > { %v3641_v35 = vmul.f32 %v3640_v57, %v9010_v5  ;;  %17434 = vst [vmem:[#allocation57_spill] sm:$0xff] %v9527_v19  ;;  %v3613_v5 = vmul.f32 %v9515_v54, %v9474_v42  ;;  %v3152_v57 = vand.u32 2147483648, %v9437_v36  ;;  %v1578_v33 = vmul.f32 %v9527_v19, %v9527_v19 }
  0xc8   : > { %v1609_v25 = vsel %vm517_vm0, %v1577_v17, 0.0  ;;  %v3108_v36 = vmul.f32 %v9509_v46, %v3107_v47  ;;  %v3123_v60 = vmul.f32 %v9472_v56, %v3122_v49  ;;  %v3140_v17 = vand.u32 2147483648, %v9458_v20 }
  0xc9   : > { %v4056_v9 = vsel %vm517_vm0, %v3641_v35, 0  ;;  %v3153_v51 = vsel %vm3151_vm10, %v3152_v57, %v3150_v48  ;;  %v3614_v4 = vsub.f32 1.0, %v3613_v5  ;;  %v9551_v35 = vpop.eup %8206  ;;  %1610 = vadd.xlane.f32.xlu1 %v1609_v25  ;;  %v2938_v48 = vsel %vm517_vm0, %v2874_v21, 0.0 }
  0xca   : > { %v9539_v37 = vand.u32 4294901760, %v4056_v9  ;;  %v9558_v57 = vadd.f32 2.220446e-16, %v3153_v51  ;;  %2939 = vadd.xlane.f32.xlu0 %v2938_v48  ;;  %v1612_v5 = vsel %vm517_vm0, %v1578_v33, 0.0  ;;  %v3095_v47 = vmul.f32 %v9551_v35, %v9507_v50  ;;  %v9575_v33 = vpop.eup %8208  ;;  %v9579_v48 = vpop.xlane.xlu2 %2912 }
  0xcb   : > { %1613 = vadd.xlane.f32.xlu2 %v1612_v5  ;;  %v3615_v25 = vmul.f32 %v9515_v54, %v3614_v4  ;;  %v3141_v22 = vsel %vm3139_vm12, %v3140_v17, %v3138_v1  ;;  %v3109_v21 = vmul.f32 0.5, %v3108_v36  ;;  %v3621_v51 = vand.u32 2147483647, %v9474_v42 }
  0xcc   : > { %4107 = vmatpush.xpose.msra.mxu0 %v9539_v37  ;;  %8099 = vmatpush.xpose.msra.mxu2 %v9539_v37  ;;  %v3623_v49 = vand.u32 2147483648, %v9474_v42  ;;  %v9573_v20 = vsub.f32 %v4056_v9, %v9539_v37  ;;  %8210 = vrcp.f32 %v9558_v57  ;;  %v3124_v4 = vmul.f32 %v3123_v60, %v9465_v27 }
  0xcd   : > { %v3616_v56 = vadd.f32 %v9515_v54, %v3615_v25  ;;  %v3096_v36 = vmul.f32 %v9551_v35, %v3095_v47  ;;  %v9584_v42 = vadd.f32 2.220446e-16, %v3141_v22  ;;  %v3110_v9 = vsub.f32 1.5, %v3109_v21 }
  0xce   : > { %v3624_v17 = vor.u32 1.1754944e-38, %v3623_v49  ;;  %v16922_v5 = vand.u32 4294901760, %v9573_v20  ;;  %vm3622_vm1 = vcmp.eq.f32.partialorder %v3621_v51, 8.507059e+37  ;;  %v3083_v25 = vmul.f32 %v9575_v33, %v9537_v11 }
  0xcf   : > { %v3620_v1 = vsel %vm3619_vm15, %v9515_v54, %v3616_v56  ;;  %8212 = vrsqrt.f32 %v9579_v48  ;;  %v3126_v47 = vsel %vm3125_vm2, %v9465_v27, %v3124_v4  ;;  %v3097_v22 = vmul.f32 0.5, %v3096_v36 }
  0xd0   : > { %v3625_v60 = vsel %vm3622_vm1, %v3624_v17, %v3620_v1  ;;  %v4398_v19 = vsub.f32 %v9573_v20, %v16922_v5  ;;  %v3128_v51 = vand.u32 2147483648, %v9465_v27  ;;  %8214 = vrcp.f32 %v9584_v42 }
  0xd1   : > { %v3626_v54 = vmul.f32 %v3625_v60, %v9022_v10  ;;  %v3111_v1 = vmul.f32 %v9509_v46, %v3110_v9  ;;  %v3084_v10 = vmul.f32 %v9575_v33, %v3083_v25  ;;  %v3098_v17 = vsub.f32 1.5, %v3097_v22  ;;  %v1513_v60 = vld [vmem:[%s9504_s21 + $0x18] sm:$0xff]  ;;  %v1514_v46 = vld [vmem:[%s9504_s21 + $0x20] sm:$0xff] }
  0xd2   : > { %v4399_v56 = vand.u32 4294901760, %v4398_v19  ;;  %v8211_v21 = vpop.eup %8210  ;;  %v3129_v19 = vsel %vm3127_vm3, %v3128_v51, %v3126_v47  ;;  %v9622_v51 = vpop.xlane.xlu0 %2909  ;;  %v9625_v18 = vsub.f32 %v1513_v60, %v8998_v0  ;;  %vm3115_vm5 = vcmp.eq.f32.partialorder %v9476_v63, 0.0 }
  0xd3   : > { %v9598_v49 = vsel %vm517_vm0, %v3626_v54, 0  ;;  %v1512_v54 = vld [vmem:[%s9504_s21 + $0x10] sm:$0xff]  ;;  %v3598_v27 = vmul.f32 %v8211_v21, %v9558_v57  ;;  %v9614_v9 = vadd.f32 2.220446e-16, %v3129_v19  ;;  %v3112_v25 = vmul.f32 %v3111_v1, %v9476_v63 }
  0xd4   : > { %v9604_v4 = vand.u32 4294901760, %v9598_v49  ;;  %4400 = vmatpush.xpose.msra.mxu1 %v4399_v56  ;;  %8115 = vmatpush.xpose.msra.mxu3 %v4399_v56  ;;  %v3085_v56 = vmul.f32 0.5, %v3084_v10  ;;  %17435 = vst [vmem:[#allocation58_spill] sm:$0xff] %v9625_v18  ;;  %v9628_v59 = vsub.f32 %v1512_v54, %v8998_v0  ;;  %v3099_v1 = vmul.f32 %v9551_v35, %v3098_v17 }
  0xd5   : > { %v9606_v36 = vpop.eup %8212  ;;  %v3599_v5 = vsub.f32 1.0, %v3598_v27  ;;  %vm3603_vm6 = vweird.f32 %v8211_v21  ;;  %v3608_v10 = vand.u32 2147483648, %v9558_v57  ;;  %v9634_v19 = vsub.f32 %v1514_v46, %v8998_v0 }
  0xd6   : > { %4109 = vmatpush.xpose.msra.mxu0 %v9604_v4  ;;  %8100 = vmatpush.xpose.msra.mxu2 %v9604_v4  ;;  %v9618_v47 = vpop.eup %8214  ;;  %v3071_v22 = vmul.f32 %v9606_v36, %v9579_v48  ;;  %17436 = vst [vmem:[#allocation59_spill] sm:$0xff] %v9628_v59  ;;  %v3606_v14 = vand.u32 2147483647, %v9558_v57  ;;  %v1580_v60 = vmul.f32 %v9625_v18, %v9625_v18  ;;  %v3086_v27 = vsub.f32 1.5, %v3085_v56  ;;  %v9649_v18 = vpop.xlane.xlu1 %2906 }
  0xd7   : > { %17437 = vst [vmem:[#allocation60_spill] sm:$0xff] %v9634_v19  ;;  %v3600_v13 = vmul.f32 %v8211_v21, %v3599_v5  ;;  %v1579_v54 = vmul.f32 %v9628_v59, %v9628_v59  ;;  %8216 = vrsqrt.f32 %v9622_v51  ;;  %v1581_v35 = vmul.f32 %v9634_v19, %v9634_v19 }
  0xd8   : > { %v3583_v17 = vmul.f32 %v9618_v47, %v9584_v42  ;;  %v3072_v0 = vmul.f32 %v9606_v36, %v3071_v22  ;;  %vm3602_vm7 = vweird.f32 %v9558_v57  ;;  %v1618_v46 = vsel %vm517_vm0, %v1580_v60, 0.0 }
  0xd9   : > { %v3601_v5 = vadd.f32 %v8211_v21, %v3600_v13  ;;  %vm3604_vm8 = vmor %vm3602_vm7, %vm3603_vm6  ;;  %v3609_v56 = vor.u32 1.1754944e-38, %v3608_v10  ;;  %1619 = vadd.xlane.f32.xlu1 %v1618_v46  ;;  %v1615_v59 = vsel %vm517_vm0, %v1579_v54, 0.0  ;;  %v1621_v19 = vsel %vm517_vm0, %v1581_v35, 0.0 }
  0xda   : > { %v3584_v58 = vsub.f32 1.0, %v3583_v17  ;;  %8218 = vrcp.f32 %v9614_v9  ;;  %v3116_v22 = vand.u32 2147483648, %v9476_v63  ;;  %vm3607_vm9 = vcmp.eq.f32.partialorder %v3606_v14, 8.507059e+37  ;;  %1616 = vadd.xlane.f32.xlu0 %v1615_v59  ;;  %1622 = vadd.xlane.f32.xlu2 %v1621_v19  ;;  %v9663_v17 = vpop.xlane.xlu2 %2903 }
  0xdb   : > { %v3605_v13 = vsel %vm3604_vm8, %v8211_v21, %v3601_v5  ;;  %v3114_v57 = vsel %vm3113_vm4, %v9476_v63, %v3112_v25  ;;  %vm3588_vm10 = vweird.f32 %v9618_v47  ;;  %v3100_v54 = vmul.f32 %v3099_v1, %v9507_v50 }
  0xdc   : > { %v3610_v60 = vsel %vm3607_vm9, %v3609_v56, %v3605_v13  ;;  %v3585_v10 = vmul.f32 %v9618_v47, %v3584_v58  ;;  %v3087_v35 = vmul.f32 %v9575_v33, %v3086_v27  ;;  %v3591_v59 = vand.u32 2147483647, %v9584_v42  ;;  %v9694_v56 = vpop.xlane.xlu0 %2900 }
  0xdd   : > { %v3611_v21 = vmul.f32 %v3610_v60, %v9013_v6  ;;  %v9667_v14 = vpop.eup %8216  ;;  %v3073_v19 = vmul.f32 0.5, %v3072_v0  ;;  %vm3587_vm11 = vweird.f32 %v9584_v42  ;;  %v3593_v58 = vand.u32 2147483648, %v9584_v42 }
  0xde   : > { %v3586_v25 = vadd.f32 %v9618_v47, %v3585_v10  ;;  %v3117_v1 = vsel %vm3115_vm5, %v3116_v22, %v3114_v57  ;;  %8220 = vrsqrt.f32 %v9649_v18  ;;  %vm9676_vm12 = vmor %vm3587_vm11, %vm3588_vm10  ;;  %v9682_v27 = vsub.f32 %v9598_v49, %v9604_v4 }
  0xdf   : > { %v4050_v33 = vsel %vm517_vm0, %v3611_v21, 0  ;;  %8222 = vrsqrt.f32 %v9663_v17  ;;  %v3594_v42 = vor.u32 1.1754944e-38, %v3593_v58  ;;  %vm3101_vm13 = vcmp.eq.f32.partialorder %v9507_v50, inf }
  0xe0   : > { %v9685_v0 = vand.u32 4294901760, %v4050_v33  ;;  %v3590_v63 = vsel %vm9676_vm12, %v9618_v47, %v3586_v25  ;;  %v9690_v5 = vpop.eup %8218  ;;  %v3088_v46 = vmul.f32 %v3087_v35, %v9537_v11  ;;  %vm3592_vm14 = vcmp.eq.f32.partialorder %v3591_v59, 8.507059e+37 }
  0xe1   : > { %v16931_v49 = vand.u32 4294901760, %v9682_v27  ;;  %v3102_v22 = vsel %vm3101_vm13, %v9507_v50, %v3100_v54  ;;  %v3104_v13 = vand.u32 2147483648, %v9507_v50  ;;  %v3074_v57 = vsub.f32 1.5, %v3073_v19  ;;  %v9712_v54 = vpop.xlane.xlu1 %2897 }
  0xe2   : > { %4111 = vmatpush.xpose.msra.mxu0 %v9685_v0  ;;  %8101 = vmatpush.xpose.msra.mxu2 %v9685_v0  ;;  %v3595_v47 = vsel %vm3592_vm14, %v3594_v42, %v3590_v63  ;;  %v9701_v60 = vadd.f32 2.220446e-16, %v3117_v1  ;;  %v3059_v10 = vmul.f32 %v9667_v14, %v9622_v51  ;;  %vm3103_vm15 = vcmp.eq.f32.partialorder %v9507_v50, 0.0  ;;  %v9778_v32 = vpop.xlane.xlu2 %2894 }
  0xe3   : > { %v3596_v35 = vmul.f32 %v3595_v47, %v9033_v15  ;;  %v4404_v21 = vsub.f32 %v9682_v27, %v16931_v49  ;;  %vm3089_vm1 = vcmp.eq.f32.partialorder %v9537_v11, inf  ;;  %8224 = vrsqrt.f32 %v9694_v56 }
  0xe4   : > { %v9714_v59 = vpop.eup %8220  ;;  %v3105_v19 = vsel %vm3103_vm15, %v3104_v13, %v3102_v22  ;;  %v3090_v25 = vsel %vm3089_vm1, %v9537_v11, %v3088_v46  ;;  %v3092_v50 = vand.u32 2147483648, %v9537_v11  ;;  %v3075_v6 = vmul.f32 %v9606_v36, %v3074_v57  ;;  %v1516_v46 = vld [vmem:[%s9504_s21 + $0x30] sm:$0xff]  ;;  %v1515_v22 = vld [vmem:[%s9504_s21 + $0x28] sm:$0xff]  ;;  %v1517_v36 = vld [vmem:[%s9504_s21 + $0x38] sm:$0xff] }
  0xe5   : > { %v9718_v15 = vsel %vm517_vm0, %v3596_v35, 0  ;;  %v4405_v58 = vand.u32 4294901760, %v4404_v21  ;;  %v9720_v1 = vpop.eup %8222  ;;  %8226 = vrcp.f32 %v9701_v60  ;;  %vm3091_vm2 = vcmp.eq.f32.partialorder %v9537_v11, 0.0 }
  0xe6   : > { %v9725_v63 = vand.u32 4294901760, %v9718_v15  ;;  %vm3077_vm3 = vcmp.eq.f32.partialorder %v9579_v48, inf  ;;  %v3060_v42 = vmul.f32 %v9667_v14, %v3059_v10  ;;  %v9733_v13 = vadd.f32 2.220446e-16, %v3105_v19 }
  0xe7   : > { %4406 = vmatpush.xpose.msra.mxu1 %v4405_v58  ;;  %8116 = vmatpush.xpose.msra.mxu3 %v4405_v58  ;;  %v9735_v47 = vsel %vm3091_vm2, %v3092_v50, %v3090_v25  ;;  %v3568_v11 = vmul.f32 %v9690_v5, %v9614_v9  ;;  %v3047_v57 = vmul.f32 %v9714_v59, %v9649_v18  ;;  %8228 = vrsqrt.f32 %v9712_v54  ;;  %v9755_v58 = vld [vmem:[%s8995_s8] ss:$0 sm:$0xff] }
  0xe8   : > { %4113 = vmatpush.xpose.msra.mxu0 %v9725_v63  ;;  %8102 = vmatpush.xpose.msra.mxu2 %v9725_v63  ;;  %v3035_v10 = vmul.f32 %v9720_v1, %v9663_v17  ;;  %v9748_v35 = vsub.f32 %v4050_v33, %v9685_v0  ;;  %v3076_v19 = vmul.f32 %v3075_v6, %v9579_v48  ;;  %vm3079_vm4 = vcmp.eq.f32.partialorder %v9579_v48, 0.0 }
  0xe9   : > { %v9750_v21 = vpop.eup %8224  ;;  %v3569_v25 = vsub.f32 1.0, %v3568_v11  ;;  %v9758_v50 = vsub.f32 %v1516_v46, %v9755_v58  ;;  %v9761_v49 = vsub.f32 %v1515_v22, %v9755_v58  ;;  %v3061_v34 = vmul.f32 0.5, %v3060_v42 }
  0xea   : > { %vm3573_vm5 = vweird.f32 %v9690_v5  ;;  %v3578_v33 = vand.u32 2147483648, %v9614_v9  ;;  %v16943_v44 = vand.u32 4294901760, %v9748_v35  ;;  %v3576_v11 = vand.u32 2147483647, %v9614_v9 }
  0xeb   : > { %17440 = vst [vmem:[#allocation61_spill] sm:$0xff] %v9758_v50  ;;  %v3570_v6 = vmul.f32 %v9690_v5, %v3569_v25  ;;  %v1583_v30 = vmul.f32 %v9758_v50, %v9758_v50  ;;  %v1582_v46 = vmul.f32 %v9761_v49, %v9761_v49  ;;  %v9773_v22 = vpop.eup %8226  ;;  %v3048_v42 = vmul.f32 %v9714_v59, %v3047_v57  ;;  %v9786_v50 = vpop.xlane.xlu1 %2891 }
  0xec   : > { %17441 = vst [vmem:[#allocation62_spill] sm:$0xff] %v9761_v49  ;;  %v3023_v38 = vmul.f32 %v9750_v21, %v9694_v56  ;;  %v4410_v25 = vsub.f32 %v9748_v35, %v16943_v44  ;;  %v9784_v39 = vsub.f32 %v1517_v36, %v9755_v58  ;;  %vm3572_vm6 = vweird.f32 %v9614_v9 }
  0xed   : > { %v3571_v49 = vadd.f32 %v9690_v5, %v3570_v6  ;;  %v1627_v57 = vsel %vm517_vm0, %v1583_v30, 0.0  ;;  %v1624_v2 = vsel %vm517_vm0, %v1582_v46, 0.0  ;;  %v9792_v26 = vpop.eup %8228  ;;  %v3062_v61 = vsub.f32 1.5, %v3061_v34  ;;  %vm3574_vm7 = vmor %vm3572_vm6, %vm3573_vm5 }
  0xee   : > { %17442 = vst [vmem:[#allocation63_spill] sm:$0xff] %v9784_v39  ;;  %v3579_v44 = vor.u32 1.1754944e-38, %v3578_v33  ;;  %v4411_v23 = vand.u32 4294901760, %v4410_v25  ;;  %1628 = vadd.xlane.f32.xlu1 %v1627_v57  ;;  %1625 = vadd.xlane.f32.xlu0 %v1624_v2  ;;  %v1584_v36 = vmul.f32 %v9784_v39, %v9784_v39  ;;  %8230 = vrsqrt.f32 %v9778_v32 }
  0xef   : > { %v3575_v9 = vsel %vm3574_vm7, %v9690_v5, %v3571_v49  ;;  %vm3577_vm8 = vcmp.eq.f32.partialorder %v3576_v11, 8.507059e+37  ;;  %v3553_v30 = vmul.f32 %v9773_v22, %v9701_v60  ;;  %v3036_v34 = vmul.f32 %v9720_v1, %v3035_v10 }
  0xf0   : > { %8232 = vrsqrt.f32 %v9786_v50  ;;  %v3580_v6 = vsel %vm3577_vm8, %v3579_v44, %v3575_v9  ;;  %4412 = vmatpush.xpose.msra.mxu1 %v4411_v23  ;;  %8117 = vmatpush.xpose.msra.mxu3 %v4411_v23  ;;  %v1630_v2 = vsel %vm517_vm0, %v1584_v36, 0.0  ;;  %v3078_v33 = vsel %vm3077_vm3, %v9579_v48, %v3076_v19 }
  0xf1   : > { %v3049_v46 = vmul.f32 0.5, %v3048_v42  ;;  %v3581_v5 = vmul.f32 %v3580_v6, %v9016_v7  ;;  %1631 = vadd.xlane.f32.xlu2 %v1630_v2  ;;  %v3554_v49 = vsub.f32 1.0, %v3553_v30  ;;  %v3063_v11 = vmul.f32 %v9667_v14, %v3062_v61 }
  0xf2   : > { %v3024_v10 = vmul.f32 %v9750_v21, %v3023_v38  ;;  %vm3558_vm9 = vweird.f32 %v9773_v22  ;;  %v3563_v44 = vand.u32 2147483648, %v9701_v60  ;;  %v3561_v19 = vand.u32 2147483647, %v9701_v60 }
  0xf3   : > { %v9814_v23 = vsel %vm517_vm0, %v3581_v5, 0  ;;  %v3555_v25 = vmul.f32 %v9773_v22, %v3554_v49  ;;  %v9820_v7 = vsub.f32 %v9718_v15, %v9725_v63  ;;  %8234 = vrcp.f32 %v9733_v13 }
  0xf4   : > { %v9824_v61 = vadd.f32 2.220446e-16, %v9735_v47  ;;  %v17443_v38 = vand.u32 2147483648, %v9579_v48  ;;  %v9831_v42 = vand.u32 4294901760, %v9814_v23  ;;  %v9833_v57 = vpop.eup %8230  ;;  %v3037_v36 = vmul.f32 0.5, %v3036_v34 }
  0xf5   : > { %v3011_v15 = vmul.f32 %v9792_v26, %v9712_v54  ;;  %v3556_v9 = vadd.f32 %v9773_v22, %v3555_v25  ;;  %vm3557_vm10 = vweird.f32 %v9701_v60  ;;  %v3050_v30 = vsub.f32 1.5, %v3049_v46 }
  0xf6   : > { %v3081_v14 = vsel %vm3079_vm4, %v17443_v38, %v3078_v33  ;;  %17444 = vst [vmem:[#allocation64_spill] sm:$0xff] %v9831_v42  ;;  %v9839_v47 = vpop.eup %8232  ;;  %v3025_v6 = vmul.f32 0.5, %v3024_v10  ;;  %4115 = vmatpush.xpose.msra.mxu0 %v9831_v42  ;;  %8103 = vmatpush.xpose.msra.mxu2 %v9831_v42  ;;  %vm3559_vm11 = vmor %vm3557_vm10, %vm3558_vm9  ;;  %v3564_v48 = vor.u32 1.1754944e-38, %v3563_v44  ;;  %v16945_v34 = vand.u32 4294901760, %v9820_v7 }
  0xf7   : > { %v3064_v2 = vmul.f32 %v3063_v11, %v9622_v51  ;;  %vm3065_vm12 = vcmp.eq.f32.partialorder %v9622_v51, inf  ;;  %v3560_v60 = vsel %vm3559_vm11, %v9773_v22, %v3556_v9  ;;  %vm3562_vm13 = vcmp.eq.f32.partialorder %v3561_v19, 8.507059e+37 }
  0xf8   : > { %8236 = vrcp.f32 %v9824_v61  ;;  %vm3067_vm14 = vcmp.eq.f32.partialorder %v9622_v51, 0.0  ;;  %v3565_v33 = vsel %vm3562_vm13, %v3564_v48, %v3560_v60  ;;  %v4416_v46 = vsub.f32 %v9820_v7, %v16945_v34  ;;  %v1519_v48 = vld [vmem:[%s9504_s21 + $0x48] sm:$0xff] }
  0xf9   : > { %v9854_v5 = vadd.f32 2.220446e-16, %v3081_v14  ;;  %v3038_v49 = vsub.f32 1.5, %v3037_v36  ;;  %v2999_v11 = vmul.f32 %v9833_v57, %v9778_v32  ;;  %v3566_v10 = vmul.f32 %v3565_v33, %v9036_v16  ;;  %v9859_v44 = vpop.eup %8234 }
  0xfa   : > { %v3051_v22 = vmul.f32 %v9714_v59, %v3050_v30  ;;  %v3026_v25 = vsub.f32 1.5, %v3025_v6  ;;  %v3012_v19 = vmul.f32 %v9792_v26, %v3011_v15  ;;  %v4417_v38 = vand.u32 4294901760, %v4416_v46  ;;  %v1518_v46 = vld [vmem:[%s9504_s21 + $0x40] sm:$0xff] }
  0xfb   : > { %v3066_v14 = vsel %vm3065_vm12, %v9622_v51, %v3064_v2  ;;  %v3068_v36 = vand.u32 2147483648, %v9622_v51  ;;  %v2987_v16 = vmul.f32 %v9839_v47, %v9786_v50  ;;  %v9870_v9 = vsel %vm517_vm0, %v3566_v10, 0  ;;  %v1520_v10 = vld [vmem:[%s9504_s21 + $0x50] sm:$0xff] }
  0xfc   : > { %vm3053_vm15 = vcmp.eq.f32.partialorder %v9649_v18, inf  ;;  %v9877_v6 = vand.u32 4294901760, %v9870_v9  ;;  %4418 = vmatpush.xpose.msra.mxu1 %v4417_v38  ;;  %8118 = vmatpush.xpose.msra.mxu3 %v4417_v38  ;;  %8238 = vrcp.f32 %v9854_v5  ;;  %v3039_v2 = vmul.f32 %v9720_v1, %v3038_v49  ;;  %v9902_v49 = vpop.xlane.xlu2 %570 }
  0xfd   : > { %v3000_v60 = vmul.f32 %v9833_v57, %v2999_v11  ;;  %v3538_v33 = vmul.f32 %v9859_v44, %v9733_v13  ;;  %v9891_v30 = vsel %vm3067_vm14, %v3068_v36, %v3066_v14  ;;  %v3052_v38 = vmul.f32 %v3051_v22, %v9649_v18  ;;  %v9920_v14 = vpop.xlane.xlu0 %567 }
  0xfe   : > { %17445 = vst [vmem:[#allocation65_spill] sm:$0xff] %v9877_v6  ;;  %v9887_v34 = vpop.eup %8236  ;;  %v3027_v15 = vmul.f32 %v9750_v21, %v3026_v25  ;;  %v9895_v59 = vmul.f32 0.5, %v3012_v19  ;;  %4117 = vmatpush.xpose.msra.mxu0 %v9877_v6  ;;  %8104 = vmatpush.xpose.msra.mxu2 %v9877_v6  ;;  %vm3055_vm1 = vcmp.eq.f32.partialorder %v9649_v18, 0.0  ;;  %vm3041_vm2 = vcmp.eq.f32.partialorder %v9663_v17, inf }
  0xff   : > { %v2988_v1 = vmul.f32 %v9839_v47, %v2987_v16  ;;  %v3539_v51 = vsub.f32 1.0, %v3538_v33  ;;  %v9906_v11 = vsub.f32 %v9814_v23, %v9831_v42  ;;  %v9909_v21 = vsub.f32 %v1519_v48, %v9755_v58 }
 0x100   : > { %vm3543_vm3 = vweird.f32 %v9859_v44  ;;  %v3548_v22 = vand.u32 2147483648, %v9733_v13  ;;  %v9914_v25 = vsub.f32 %v1518_v46, %v9755_v58  ;;  %v9917_v19 = vsub.f32 %v1520_v10, %v9755_v58 }
 0x101   : > { %17446 = vst [vmem:[#allocation66_spill] sm:$0xff] %v9909_v21  ;;  %vm3029_vm4 = vcmp.eq.f32.partialorder %v9694_v56, inf  ;;  %v3540_v23 = vmul.f32 %v9859_v44, %v3539_v51  ;;  %v3546_v36 = vand.u32 2147483647, %v9733_v13  ;;  %v16951_v16 = vand.u32 4294901760, %v9906_v11 }
 0x102   : > { %17447 = vst [vmem:[#allocation67_spill] sm:$0xff] %v9914_v25  ;;  %v1586_v48 = vmul.f32 %v9909_v21, %v9909_v21  ;;  %8240 = vrsqrt.f32 %v9902_v49  ;;  %v1585_v33 = vmul.f32 %v9914_v25, %v9914_v25  ;;  %v1587_v46 = vmul.f32 %v9917_v19, %v9917_v19  ;;  %v9934_v39 = vpop.eup %8238 }
 0x103   : > { %17448 = vst [vmem:[#allocation68_spill] sm:$0xff] %v9917_v19  ;;  %v3523_v10 = vmul.f32 %v9887_v34, %v9824_v61  ;;  %v3541_v51 = vadd.f32 %v9859_v44, %v3540_v23  ;;  %vm3542_vm5 = vweird.f32 %v9733_v13  ;;  %v4422_v21 = vsub.f32 %v9906_v11, %v16951_v16 }
 0x104   : > { %v1636_v62 = vsel %vm517_vm0, %v1586_v48, 0.0  ;;  %vm3043_vm6 = vcmp.eq.f32.partialorder %v9663_v17, 0.0  ;;  %vm3031_vm7 = vcmp.eq.f32.partialorder %v9694_v56, 0.0  ;;  %8242 = vrsqrt.f32 %v9920_v14  ;;  %vm3544_vm8 = vmor %vm3542_vm5, %vm3543_vm3 }
 0x105   : > { %v3549_v19 = vor.u32 1.1754944e-38, %v3548_v22  ;;  %1637 = vadd.xlane.f32.xlu1 %v1636_v62  ;;  %v1633_v23 = vsel %vm517_vm0, %v1585_v33, 0.0  ;;  %v1639_v13 = vsel %vm517_vm0, %v1587_v46, 0.0  ;;  %v3545_v25 = vsel %vm3544_vm8, %v9859_v44, %v3541_v51 }
 0x106   : > { %vm3547_vm9 = vcmp.eq.f32.partialorder %v3546_v36, 8.507059e+37  ;;  %v4423_v16 = vand.u32 4294901760, %v4422_v21  ;;  %1634 = vadd.xlane.f32.xlu0 %v1633_v23  ;;  %1640 = vadd.xlane.f32.xlu2 %v1639_v13  ;;  %v3524_v48 = vsub.f32 1.0, %v3523_v10  ;;  %v3040_v24 = vmul.f32 %v3039_v2, %v9663_v17 }
 0x107   : > { %v3014_v45 = vsub.f32 1.5, %v9895_v59  ;;  %v3001_v42 = vmul.f32 0.5, %v3000_v60  ;;  %v3550_v12 = vsel %vm3547_vm9, %v3549_v19, %v3545_v25  ;;  %v3054_v62 = vsel %vm3053_vm15, %v9649_v18, %v3052_v38 }
 0x108   : > { %v3551_v22 = vmul.f32 %v3550_v12, %v9053_v28  ;;  %4424 = vmatpush.xpose.msra.mxu1 %v4423_v16  ;;  %8119 = vmatpush.xpose.msra.mxu3 %v4423_v16  ;;  %v3525_v44 = vmul.f32 %v9887_v34, %v3524_v48  ;;  %vm3528_vm10 = vweird.f32 %v9887_v34  ;;  %v9958_v21 = vpop.eup %8240  ;;  %v3028_v2 = vmul.f32 %v3027_v15, %v9694_v56 }
 0x109   : > { %v2989_v36 = vmul.f32 0.5, %v2988_v1  ;;  %v3531_v59 = vand.u32 2147483647, %v9824_v61  ;;  %v3533_v60 = vand.u32 2147483648, %v9824_v61  ;;  %vm3527_vm11 = vweird.f32 %v9824_v61 }
 0x10a   : > { %v4038_v25 = vsel %vm517_vm0, %v3551_v22, 0  ;;  %v3526_v38 = vadd.f32 %v9887_v34, %v3525_v44  ;;  %v9968_v28 = vsub.f32 %v9870_v9, %v9877_v6  ;;  %v9970_v12 = vpop.eup %8242  ;;  %v9973_v19 = vadd.f32 2.220446e-16, %v9891_v30  ;;  %vm3529_vm12 = vmor %vm3527_vm11, %vm3528_vm10 }
 0x10b   : > { %v17449_v15 = vand.u32 2147483648, %v9649_v18  ;;  %v3042_v16 = vsel %vm3041_vm2, %v9663_v17, %v3040_v24  ;;  %v9982_v33 = vand.u32 4294901760, %v4038_v25  ;;  %v3015_v61 = vmul.f32 %v9792_v26, %v3014_v45 }
 0x10c   : > { %v3002_v9 = vsub.f32 1.5, %v3001_v42  ;;  %v3530_v30 = vsel %vm3529_vm12, %v9887_v34, %v3526_v38  ;;  %v3534_v46 = vor.u32 1.1754944e-38, %v3533_v60  ;;  %v3030_v18 = vsel %vm3029_vm4, %v9694_v56, %v3028_v2 }
 0x10d   : > { %v3057_v1 = vsel %vm3055_vm1, %v17449_v15, %v3054_v62  ;;  %17450 = vst [vmem:[#allocation69_spill] sm:$0xff] %v9982_v33  ;;  %v819_v10 = vmul.f32 %v9958_v21, %v9902_v49  ;;  %4119 = vmatpush.xpose.msra.mxu0 %v9982_v33  ;;  %8105 = vmatpush.xpose.msra.mxu2 %v9982_v33  ;;  %vm3532_vm13 = vcmp.eq.f32.partialorder %v3531_v59, 8.507059e+37  ;;  %v16957_v24 = vand.u32 4294901760, %v9968_v28 }
 0x10e   : > { %vm3017_vm14 = vcmp.eq.f32.partialorder %v9712_v54, inf  ;;  %v2990_v26 = vsub.f32 1.5, %v2989_v36  ;;  %v3535_v45 = vsel %vm3532_vm13, %v3534_v46, %v3530_v30  ;;  %8244 = vrcp.f32 %v9973_v19 }
 0x10f   : > { %v807_v42 = vmul.f32 %v9970_v12, %v9920_v14  ;;  %v3536_v34 = vmul.f32 %v3535_v45, %v9056_v29  ;;  %v4428_v51 = vsub.f32 %v9968_v28, %v16957_v24  ;;  %v10004_v23 = vadd.f32 2.220446e-16, %v3057_v1 }
 0x110   : > { %v17451_v13 = vand.u32 2147483648, %v9663_v17  ;;  %v17452_v62 = vand.u32 2147483648, %v9694_v56  ;;  %v3016_v44 = vmul.f32 %v3015_v61, %v9712_v54  ;;  %v3003_v29 = vmul.f32 %v9833_v57, %v3002_v9 }
 0x111   : > { %v820_v2 = vmul.f32 %v9958_v21, %v819_v10  ;;  %v10018_v36 = vsel %vm517_vm0, %v3536_v34, 0  ;;  %v4429_v59 = vand.u32 4294901760, %v4428_v51  ;;  %vm3019_vm15 = vcmp.eq.f32.partialorder %v9712_v54, 0.0  ;;  %v10049_v10 = vpop.xlane.xlu2 %579  ;;  %v1522_v34 = vld [vmem:[%s9504_s21 + $0x60] sm:$0xff]  ;;  %v1521_v51 = vld [vmem:[%s9504_s21 + $0x58] sm:$0xff] }
 0x112   : > { %v3045_v48 = vsel %vm3043_vm6, %v17451_v13, %v3042_v16  ;;  %v3033_v22 = vsel %vm3031_vm7, %v17452_v62, %v3030_v18  ;;  %vm3005_vm1 = vcmp.eq.f32.partialorder %v9778_v32, inf  ;;  %v2991_v60 = vmul.f32 %v9839_v47, %v2990_v26  ;;  %v10036_v16 = vpop.xlane.xlu1 %576 }
 0x113   : > { %v10025_v56 = vand.u32 4294901760, %v10018_v36  ;;  %v10027_v38 = vadd.f32 2.220446e-16, %v3045_v48  ;;  %vm2993_vm2 = vcmp.eq.f32.partialorder %v9786_v50, inf  ;;  %v808_v15 = vmul.f32 %v9970_v12, %v807_v42  ;;  %4430 = vmatpush.xpose.msra.mxu1 %v4429_v59  ;;  %8120 = vmatpush.xpose.msra.mxu3 %v4429_v59 }
 0x114   : > { %8246 = vrcp.f32 %v10004_v23  ;;  %v10033_v1 = vadd.f32 2.220446e-16, %v3033_v22  ;;  %v3508_v61 = vmul.f32 %v9934_v39, %v9854_v5  ;;  %v10042_v9 = vpop.eup %8244  ;;  %v3018_v30 = vsel %vm3017_vm14, %v9712_v54, %v3016_v44  ;;  %v1523_v44 = vld [vmem:[%s9504_s21 + $0x68] sm:$0xff] }
 0x115   : > { %17453 = vst [vmem:[#allocation70_spill] sm:$0xff] %v10025_v56  ;;  %4121 = vmatpush.xpose.msra.mxu0 %v10025_v56  ;;  %8106 = vmatpush.xpose.msra.mxu2 %v10025_v56  ;;  %v3004_v46 = vmul.f32 %v3003_v29, %v9778_v32  ;;  %v821_v18 = vmul.f32 0.5, %v820_v2  ;;  %8248 = vrsqrt.f32 %v10036_v16  ;;  %v2992_v26 = vmul.f32 %v2991_v60, %v9786_v50  ;;  %v10068_v29 = vpop.xlane.xlu0 %573 }
 0x116   : > { %8250 = vrsqrt.f32 %v10049_v10  ;;  %v3509_v45 = vsub.f32 1.0, %v3508_v61  ;;  %v10054_v42 = vsub.f32 %v4038_v25, %v9982_v33  ;;  %vm3007_vm3 = vcmp.eq.f32.partialorder %v9778_v32, 0.0 }
 0x117   : > { %vm2995_vm4 = vcmp.eq.f32.partialorder %v9786_v50, 0.0  ;;  %v809_v13 = vmul.f32 0.5, %v808_v15  ;;  %v3518_v48 = vand.u32 2147483648, %v9854_v5  ;;  %v10062_v62 = vsub.f32 %v1522_v34, %v9755_v58 }
 0x118   : > { %v10065_v22 = vsub.f32 %v1521_v51, %v9755_v58  ;;  %v3510_v25 = vmul.f32 %v9934_v39, %v3509_v45  ;;  %vm3513_vm5 = vweird.f32 %v9934_v39  ;;  %v3516_v2 = vand.u32 2147483647, %v9854_v5 }
 0x119   : > { %17454 = vst [vmem:[#allocation71_spill] sm:$0xff] %v10062_v62  ;;  %v16959_v59 = vand.u32 4294901760, %v10054_v42  ;;  %v822_v60 = vsub.f32 1.5, %v821_v18  ;;  %v1589_v15 = vmul.f32 %v10062_v62, %v10062_v62  ;;  %v10079_v34 = vsub.f32 %v1523_v44, %v9755_v58 }
 0x11a   : > { %17455 = vst [vmem:[#allocation72_spill] sm:$0xff] %v10065_v22  ;;  %v1588_v61 = vmul.f32 %v10065_v22, %v10065_v22  ;;  %v10081_v51 = vpop.eup %8246  ;;  %v3511_v45 = vadd.f32 %v9934_v39, %v3510_v25  ;;  %vm3512_vm6 = vweird.f32 %v9854_v5  ;;  %v3493_v18 = vmul.f32 %v10042_v9, %v9973_v19 }
 0x11b   : > { %17456 = vst [vmem:[#allocation73_spill] sm:$0xff] %v10079_v34  ;;  %v4434_v24 = vsub.f32 %v10054_v42, %v16959_v59  ;;  %v10090_v47 = vpop.eup %8248  ;;  %8252 = vrsqrt.f32 %v10068_v29  ;;  %vm3514_vm7 = vmor %vm3512_vm6, %vm3513_vm5  ;;  %v3519_v44 = vor.u32 1.1754944e-38, %v3518_v48  ;;  %v1645_v57 = vsel %vm517_vm0, %v1589_v15, 0.0 }
 0x11c   : > { %v1642_v17 = vsel %vm517_vm0, %v1588_v61, 0.0  ;;  %v10095_v25 = vpop.eup %8250  ;;  %v3515_v5 = vsel %vm3514_vm7, %v9934_v39, %v3511_v45  ;;  %vm3517_vm8 = vcmp.eq.f32.partialorder %v3516_v2, 8.507059e+37  ;;  %1646 = vadd.xlane.f32.xlu1 %v1645_v57  ;;  %v1590_v59 = vmul.f32 %v10079_v34, %v10079_v34 }
 0x11d   : > { %v4435_v62 = vand.u32 4294901760, %v4434_v24  ;;  %1643 = vadd.xlane.f32.xlu0 %v1642_v17  ;;  %v17457_v22 = vand.u32 2147483648, %v9712_v54  ;;  %v3006_v15 = vsel %vm3005_vm1, %v9778_v32, %v3004_v46  ;;  %v3520_v61 = vsel %vm3517_vm8, %v3519_v44, %v3515_v5 }
 0x11e   : > { %v3494_v33 = vsub.f32 1.0, %v3493_v18  ;;  %v2994_v39 = vsel %vm2993_vm2, %v9786_v50, %v2992_v26  ;;  %v810_v24 = vsub.f32 1.5, %v809_v13  ;;  %v3521_v17 = vmul.f32 %v3520_v61, %v9060_v31 }
 0x11f   : > { %v3021_v48 = vsel %vm3019_vm15, %v17457_v22, %v3018_v30  ;;  %4436 = vmatpush.xpose.msra.mxu1 %v4435_v62  ;;  %8121 = vmatpush.xpose.msra.mxu3 %v4435_v62  ;;  %v1648_v57 = vsel %vm517_vm0, %v1590_v59, 0.0  ;;  %v823_v54 = vmul.f32 %v9958_v21, %v822_v60  ;;  %v843_v30 = vmul.f32 %v10090_v47, %v10036_v16 }
 0x120   : > { %v855_v46 = vmul.f32 %v10095_v25, %v10049_v10  ;;  %1649 = vadd.xlane.f32.xlu2 %v1648_v57  ;;  %v3495_v22 = vmul.f32 %v10042_v9, %v3494_v33  ;;  %v10119_v26 = vsel %vm517_vm0, %v3521_v17, 0  ;;  %vm3498_vm9 = vweird.f32 %v10042_v9 }
 0x121   : > { %v3501_v31 = vand.u32 2147483647, %v9973_v19  ;;  %v3503_v13 = vand.u32 2147483648, %v9973_v19  ;;  %v10124_v62 = vpop.eup %8252  ;;  %8254 = vrcp.f32 %v10027_v38  ;;  %v10127_v21 = vadd.f32 2.220446e-16, %v3021_v48 }
 0x122   : > { %vm825_vm10 = vcmp.eq.f32.partialorder %v9902_v49, inf  ;;  %v10131_v2 = vand.u32 4294901760, %v10119_v26  ;;  %v17459_v33 = vand.u32 2147483648, %v9778_v32  ;;  %v17460_v60 = vand.u32 2147483648, %v9786_v50 }
 0x123   : > { %v3496_v18 = vadd.f32 %v10042_v9, %v3495_v22  ;;  %vm3497_vm11 = vweird.f32 %v9973_v19  ;;  %v824_v44 = vmul.f32 %v823_v54, %v9902_v49  ;;  %v811_v5 = vmul.f32 %v9970_v12, %v810_v24 }
 0x124   : > { %17458 = vst [vmem:[#allocation74_spill] sm:$0xff] %v10131_v2  ;;  %v3009_v59 = vsel %vm3007_vm3, %v17459_v33, %v3006_v15  ;;  %v2997_v45 = vsel %vm2995_vm4, %v17460_v60, %v2994_v39  ;;  %4123 = vmatpush.xpose.msra.mxu0 %v10131_v2  ;;  %8107 = vmatpush.xpose.msra.mxu2 %v10131_v2  ;;  %vm3499_vm12 = vmor %vm3497_vm11, %vm3498_vm9  ;;  %v3504_v32 = vor.u32 1.1754944e-38, %v3503_v13  ;;  %v10155_v15 = vpop.xlane.xlu1 %585  ;;  %vm3502_vm13 = vcmp.eq.f32.partialorder %v3501_v31, 8.507059e+37 }
 0x125   : > { %v10151_v50 = vsub.f32 %v10018_v36, %v10025_v56  ;;  %v844_v48 = vmul.f32 %v10090_v47, %v843_v30  ;;  %v856_v19 = vmul.f32 %v10095_v25, %v855_v46  ;;  %v3500_v12 = vsel %vm3499_vm12, %v10042_v9, %v3496_v18 }
 0x126   : > { %v831_v61 = vmul.f32 %v10124_v62, %v10068_v29  ;;  %8256 = vrsqrt.f32 %v10155_v15  ;;  %v3505_v39 = vsel %vm3502_vm13, %v3504_v32, %v3500_v12  ;;  %v10163_v36 = vadd.f32 2.220446e-16, %v3009_v59 }
 0x127   : > { %17461 = vst [vmem:[#allocation75_spill] sm:$0xff] %v10151_v50  ;;  %v16963_v24 = vand.u32 4294901760, %v10151_v50  ;;  %8258 = vrcp.f32 %v10033_v1  ;;  %vm827_vm14 = vcmp.eq.f32.partialorder %v9902_v49, 0.0  ;;  %v3506_v17 = vmul.f32 %v3505_v39, %v9074_v40  ;;  %v10167_v57 = vpop.eup %8254  ;;  %v1525_v39 = vld [vmem:[%s9504_s21 + $0x78] sm:$0xff] }
 0x128   : > { %v10169_v9 = vadd.f32 2.220446e-16, %v2997_v45  ;;  %v828_v54 = vand.u32 2147483648, %v9902_v49  ;;  %vm813_vm15 = vcmp.eq.f32.partialorder %v9920_v14, inf  ;;  %v812_v46 = vmul.f32 %v811_v5, %v9920_v14 }
 0x129   : > { %v4440_v30 = vsub.f32 %v10151_v50, %v16963_v24  ;;  %v845_v22 = vmul.f32 0.5, %v844_v48  ;;  %v857_v31 = vmul.f32 0.5, %v856_v19  ;;  %v10178_v13 = vsel %vm517_vm0, %v3506_v17, 0  ;;  %v1524_v17 = vld [vmem:[%s9504_s21 + $0x70] sm:$0xff] }
 0x12a   : > { %8260 = vrcp.f32 %v10127_v21  ;;  %v826_v40 = vsel %vm825_vm10, %v9902_v49, %v824_v44  ;;  %v832_v33 = vmul.f32 %v10124_v62, %v831_v61  ;;  %v10186_v59 = vand.u32 4294901760, %v10178_v13  ;;  %v10205_v61 = vpop.xlane.xlu2 %588 }
 0x12b   : > { %8262 = vrcp.f32 %v10163_v36  ;;  %v4441_v60 = vand.u32 4294901760, %v4440_v30  ;;  %vm815_vm1 = vcmp.eq.f32.partialorder %v9920_v14, 0.0  ;;  %v816_v18 = vand.u32 2147483648, %v9920_v14 }
 0x12c   : > { %17462 = vst [vmem:[#allocation76_spill] sm:$0xff] %v10186_v59  ;;  %v10189_v45 = vpop.eup %8256  ;;  %8264 = vrcp.f32 %v10169_v9  ;;  %4125 = vmatpush.xpose.msra.mxu0 %v10186_v59  ;;  %8108 = vmatpush.xpose.msra.mxu2 %v10186_v59  ;;  %v3478_v44 = vmul.f32 %v10081_v51, %v10004_v23  ;;  %v829_v32 = vsel %vm827_vm14, %v828_v54, %v826_v40  ;;  %v846_v19 = vsub.f32 1.5, %v845_v22  ;;  %v1526_v40 = vld [vmem:[%s9504_s21 + $0x80] sm:$0xff] }
 0x12d   : > { %v10198_v5 = vpop.eup %8258  ;;  %v814_v48 = vsel %vm813_vm15, %v9920_v14, %v812_v46  ;;  %v858_v12 = vsub.f32 1.5, %v857_v31  ;;  %4442 = vmatpush.xpose.msra.mxu1 %v4441_v60  ;;  %8122 = vmatpush.xpose.msra.mxu3 %v4441_v60  ;;  %v10209_v30 = vmul.f32 0.5, %v832_v33  ;;  %8266 = vrsqrt.f32 %v10205_v61 }
 0x12e   : > { %v3479_v24 = vsub.f32 1.0, %v3478_v44  ;;  %v10214_v49 = vsub.f32 %v10119_v26, %v10131_v2  ;;  %v879_v54 = vmul.f32 %v10189_v45, %v10155_v15  ;;  %v3488_v46 = vand.u32 2147483648, %v10004_v23 }
 0x12f   : > { %v10220_v22 = vsub.f32 %v1525_v39, %v9755_v58  ;;  %v10223_v31 = vsub.f32 %v1524_v17, %v9755_v58  ;;  %vm3483_vm2 = vweird.f32 %v10081_v51  ;;  %v3486_v26 = vand.u32 2147483647, %v10004_v23 }
 0x130   : > { %17463 = vst [vmem:[#allocation77_spill] sm:$0xff] %v10214_v49  ;;  %v10226_v33 = vpop.eup %8260  ;;  %v3480_v60 = vmul.f32 %v10081_v51, %v3479_v24  ;;  %v16975_v44 = vand.u32 4294901760, %v10214_v49  ;;  %v847_v2 = vmul.f32 %v10090_v47, %v846_v19  ;;  %v859_v39 = vmul.f32 %v10095_v25, %v858_v12  ;;  %v10242_v24 = vpop.xlane.xlu0 %582 }
 0x131   : > { %17464 = vst [vmem:[#allocation78_spill] sm:$0xff] %v10220_v22  ;;  %v10232_v34 = vpop.eup %8262  ;;  %v1592_v17 = vmul.f32 %v10220_v22, %v10220_v22  ;;  %v1591_v56 = vmul.f32 %v10223_v31, %v10223_v31  ;;  %vm3482_vm3 = vweird.f32 %v10004_v23  ;;  %v10250_v25 = vsub.f32 %v1526_v40, %v9755_v58 }
 0x132   : > { %17465 = vst [vmem:[#allocation79_spill] sm:$0xff] %v10223_v31  ;;  %v10240_v6 = vpop.eup %8264  ;;  %v3481_v50 = vadd.f32 %v10081_v51, %v3480_v60  ;;  %v4446_v47 = vsub.f32 %v10214_v49, %v16975_v44  ;;  %v880_v19 = vmul.f32 %v10189_v45, %v879_v54  ;;  %8268 = vrsqrt.f32 %v10242_v24  ;;  %vm3484_vm4 = vmor %vm3482_vm3, %vm3483_vm2 }
 0x133   : > { %17466 = vst [vmem:[#allocation80_spill] sm:$0xff] %v10250_v25  ;;  %v3489_v12 = vor.u32 1.1754944e-38, %v3488_v46  ;;  %v1654_v22 = vsel %vm517_vm0, %v1592_v17, 0.0  ;;  %v10257_v60 = vpop.eup %8266  ;;  %vm3487_vm5 = vcmp.eq.f32.partialorder %v3486_v26, 8.507059e+37  ;;  %v1651_v40 = vsel %vm517_vm0, %v1591_v56, 0.0 }
 0x134   : > { %v3485_v23 = vsel %vm3484_vm4, %v10081_v51, %v3481_v50  ;;  %v4447_v31 = vand.u32 4294901760, %v4446_v47  ;;  %1655 = vadd.xlane.f32.xlu1 %v1654_v22  ;;  %vm849_vm6 = vcmp.eq.f32.partialorder %v10036_v16, inf  ;;  %vm851_vm7 = vcmp.eq.f32.partialorder %v10036_v16, 0.0  ;;  %1652 = vadd.xlane.f32.xlu0 %v1651_v40 }
 0x135   : > { %v852_v54 = vand.u32 2147483648, %v10036_v16  ;;  %v3490_v44 = vsel %vm3487_vm5, %v3489_v12, %v3485_v23  ;;  %v10264_v46 = vadd.f32 2.220446e-16, %v829_v32  ;;  %v834_v17 = vsub.f32 1.5, %v10209_v30 }
 0x136   : > { %v3491_v49 = vmul.f32 %v3490_v44, %v9077_v41  ;;  %4448 = vmatpush.xpose.msra.mxu1 %v4447_v31  ;;  %8123 = vmatpush.xpose.msra.mxu3 %v4447_v31  ;;  %v1593_v51 = vmul.f32 %v10250_v25, %v10250_v25  ;;  %v817_v56 = vsel %vm815_vm1, %v816_v18, %v814_v48  ;;  %v881_v26 = vmul.f32 0.5, %v880_v19  ;;  %v10278_v41 = vpop.xlane.xlu1 %594  ;;  %v1527_v25 = vld [vmem:[%s9504_s21 + $0x88] sm:$0xff] }
 0x137   : > { %v848_v50 = vmul.f32 %v847_v2, %v10036_v16  ;;  %v891_v22 = vmul.f32 %v10257_v60, %v10205_v61  ;;  %v3463_v32 = vmul.f32 %v10167_v57, %v10027_v38  ;;  %v860_v30 = vmul.f32 %v859_v39, %v10049_v10 }
 0x138   : > { %v10281_v31 = vsel %vm517_vm0, %v3491_v49, 0  ;;  %v1657_v44 = vsel %vm517_vm0, %v1593_v51, 0.0  ;;  %v10284_v14 = vpop.eup %8268  ;;  %vm861_vm8 = vcmp.eq.f32.partialorder %v10049_v10, inf  ;;  %8270 = vrsqrt.f32 %v10278_v41 }
 0x139   : > { %v10289_v2 = vand.u32 4294901760, %v10281_v31  ;;  %1658 = vadd.xlane.f32.xlu2 %v1657_v44  ;;  %v3464_v18 = vsub.f32 1.0, %v3463_v32  ;;  %vm863_vm9 = vcmp.eq.f32.partialorder %v10049_v10, 0.0  ;;  %v864_v48 = vand.u32 2147483648, %v10049_v10 }
 0x13a   : > { %v835_v49 = vmul.f32 %v10124_v62, %v834_v17  ;;  %vm837_vm10 = vcmp.eq.f32.partialorder %v10068_v29, inf  ;;  %v10295_v39 = vadd.f32 2.220446e-16, %v817_v56  ;;  %v850_v47 = vsel %vm849_vm6, %v10036_v16, %v848_v50  ;;  %v10311_v17 = vpop.xlane.xlu2 %597 }
 0x13b   : > { %17467 = vst [vmem:[#allocation81_spill] sm:$0xff] %v10289_v2  ;;  %vm839_vm11 = vcmp.eq.f32.partialorder %v10068_v29, 0.0  ;;  %v892_v19 = vmul.f32 %v10257_v60, %v891_v22  ;;  %4127 = vmatpush.xpose.msra.mxu0 %v10289_v2  ;;  %8109 = vmatpush.xpose.msra.mxu2 %v10289_v2  ;;  %8272 = vrcp.f32 %v10264_v46  ;;  %v862_v62 = vsel %vm861_vm8, %v10049_v10, %v860_v30 }
 0x13c   : > { %v882_v12 = vsub.f32 1.5, %v881_v26  ;;  %v3465_v23 = vmul.f32 %v10167_v57, %v3464_v18  ;;  %v867_v40 = vmul.f32 %v10284_v14, %v10242_v24  ;;  %vm3468_vm12 = vweird.f32 %v10167_v57 }
 0x13d   : > { %v3473_v51 = vand.u32 2147483648, %v10027_v38  ;;  %v10317_v56 = vsub.f32 %v10178_v13, %v10186_v59  ;;  %v853_v50 = vsel %vm851_vm7, %v852_v54, %v850_v47  ;;  %v836_v22 = vmul.f32 %v835_v49, %v10068_v29 }
 0x13e   : > { %8274 = vrsqrt.f32 %v10311_v17  ;;  %v3471_v32 = vand.u32 2147483647, %v10027_v38  ;;  %v10324_v30 = vpop.eup %8270  ;;  %v893_v26 = vmul.f32 0.5, %v892_v19  ;;  %v3466_v44 = vadd.f32 %v10167_v57, %v3465_v23 }
 0x13f   : > { %vm3467_vm13 = vweird.f32 %v10027_v38  ;;  %v16978_v18 = vand.u32 4294901760, %v10317_v56  ;;  %8276 = vrcp.f32 %v10295_v39  ;;  %v865_v16 = vsel %vm863_vm9, %v864_v48, %v862_v62  ;;  %v10350_v62 = vpop.xlane.xlu0 %591 }
 0x140   : > { %v840_v13 = vand.u32 2147483648, %v10068_v29  ;;  %v883_v54 = vmul.f32 %v10189_v45, %v882_v12  ;;  %vm3469_vm14 = vmor %vm3467_vm13, %vm3468_vm12  ;;  %v868_v49 = vmul.f32 %v10284_v14, %v867_v40  ;;  %v3474_v19 = vor.u32 1.1754944e-38, %v3473_v51 }
 0x141   : > { %v3470_v47 = vsel %vm3469_vm14, %v10167_v57, %v3466_v44  ;;  %v4452_v38 = vsub.f32 %v10317_v56, %v16978_v18  ;;  %v10341_v23 = vpop.eup %8272  ;;  %v10343_v10 = vadd.f32 2.220446e-16, %v853_v50  ;;  %v838_v45 = vsel %vm837_vm10, %v10068_v29, %v836_v22 }
 0x142   : > { %v915_v48 = vmul.f32 %v10324_v30, %v10278_v41  ;;  %vm3472_vm15 = vcmp.eq.f32.partialorder %v3471_v32, 8.507059e+37  ;;  %v894_v57 = vsub.f32 1.5, %v893_v26  ;;  %8278 = vrsqrt.f32 %v10350_v62 }
 0x143   : > { %17468 = vst [vmem:[#allocation82_spill] sm:$0xff] %v10343_v10  ;;  %v3475_v12 = vsel %vm3472_vm15, %v3474_v19, %v3470_v47  ;;  %v4453_v40 = vand.u32 4294901760, %v4452_v38  ;;  %v10355_v44 = vadd.f32 2.220446e-16, %v865_v16  ;;  %v884_v50 = vmul.f32 %v883_v54, %v10155_v15 }
 0x144   : > { %v10353_v51 = vpop.eup %8274  ;;  %vm885_vm1 = vcmp.eq.f32.partialorder %v10155_v15, inf  ;;  %v3476_v22 = vmul.f32 %v3475_v12, %v9081_v43  ;;  %vm887_vm2 = vcmp.eq.f32.partialorder %v10155_v15, 0.0  ;;  %v888_v18 = vand.u32 2147483648, %v10155_v15 }
 0x145   : > { %17469 = vst [vmem:[#allocation83_spill] sm:$0xff] %v10355_v44  ;;  %v869_v32 = vmul.f32 0.5, %v868_v49  ;;  %4454 = vmatpush.xpose.msra.mxu1 %v4453_v40  ;;  %8124 = vmatpush.xpose.msra.mxu3 %v4453_v40  ;;  %v3448_v26 = vmul.f32 %v10198_v5, %v10033_v1  ;;  %v10364_v47 = vpop.eup %8276  ;;  %8280 = vrcp.f32 %v10343_v10  ;;  %v841_v16 = vsel %vm839_vm11, %v840_v13, %v838_v45 }
 0x146   : > { %v916_v54 = vmul.f32 %v10324_v30, %v915_v48  ;;  %v10371_v43 = vsel %vm517_vm0, %v3476_v22, 0  ;;  %v895_v49 = vmul.f32 %v10257_v60, %v894_v57  ;;  %v927_v19 = vmul.f32 %v10353_v51, %v10311_v17 }
 0x147   : > { %v10377_v38 = vand.u32 4294901760, %v10371_v43  ;;  %v3449_v12 = vsub.f32 1.0, %v3448_v26  ;;  %8282 = vrcp.f32 %v10355_v44  ;;  %v886_v29 = vsel %vm885_vm1, %v10155_v15, %v884_v50  ;;  %v1528_v50 = vld [vmem:[%s9504_s21 + $0x90] sm:$0xff] }
 0x148   : > { %vm897_vm3 = vcmp.eq.f32.partialorder %v10205_v61, inf  ;;  %v10386_v13 = vsub.f32 %v10281_v31, %v10289_v2  ;;  %v10388_v60 = vpop.eup %8278  ;;  %v10390_v45 = vadd.f32 2.220446e-16, %v841_v16  ;;  %v870_v57 = vsub.f32 1.5, %v869_v32 }
 0x149   : > { %17470 = vst [vmem:[#allocation84_spill] sm:$0xff] %v10377_v38  ;;  %4129 = vmatpush.xpose.msra.mxu0 %v10377_v38  ;;  %8110 = vmatpush.xpose.msra.mxu2 %v10377_v38  ;;  %v3458_v40 = vand.u32 2147483648, %v10033_v1  ;;  %v917_v22 = vmul.f32 0.5, %v916_v54  ;;  %v3450_v26 = vmul.f32 %v10198_v5, %v3449_v12  ;;  %vm3453_vm4 = vweird.f32 %v10198_v5 }
 0x14a   : > { %v3456_v31 = vand.u32 2147483647, %v10033_v1  ;;  %v889_v16 = vsel %vm887_vm2, %v888_v18, %v886_v29  ;;  %v896_v32 = vmul.f32 %v895_v49, %v10205_v61  ;;  %vm899_vm5 = vcmp.eq.f32.partialorder %v10205_v61, 0.0 }
 0x14b   : > { %v928_v48 = vmul.f32 %v10353_v51, %v927_v19  ;;  %v16989_v44 = vand.u32 4294901760, %v10386_v13  ;;  %v10407_v54 = vpop.eup %8280  ;;  %v903_v12 = vmul.f32 %v10388_v60, %v10350_v62  ;;  %v3451_v10 = vadd.f32 %v10198_v5, %v3450_v26 }
 0x14c   : > { %17471 = vst [vmem:[#allocation85_spill] sm:$0xff] %v10407_v54  ;;  %vm3452_vm6 = vweird.f32 %v10033_v1  ;;  %v10414_v15 = vsub.f32 %v1528_v50, %v9755_v58  ;;  %v871_v18 = vmul.f32 %v10284_v14, %v870_v57  ;;  %v3459_v49 = vor.u32 1.1754944e-38, %v3458_v40  ;;  %v1529_v50 = vld [vmem:[%s9504_s21 + $0x98] sm:$0xff]  ;;  %v10429_v57 = vpop.xlane.xlu1 %603 }
 0x14d   : > { %vm3454_vm7 = vmor %vm3452_vm6, %vm3453_vm4  ;;  %v4458_v19 = vsub.f32 %v10386_v13, %v16989_v44  ;;  %v10421_v29 = vsub.f32 %v1527_v25, %v9755_v58  ;;  %v10423_v54 = vpop.eup %8282  ;;  %v918_v2 = vsub.f32 1.5, %v917_v22  ;;  %vm3457_vm8 = vcmp.eq.f32.partialorder %v3456_v31, 8.507059e+37  ;;  %v10435_v22 = vpop.xlane.xlu2 %606 }
 0x14e   : > { %17472 = vst [vmem:[#allocation86_spill] sm:$0xff] %v10414_v15  ;;  %v3455_v26 = vsel %vm3454_vm7, %v10198_v5, %v3451_v10  ;;  %v1595_v1 = vmul.f32 %v10414_v15, %v10414_v15  ;;  %v929_v14 = vmul.f32 0.5, %v928_v48  ;;  %v904_v25 = vmul.f32 %v10388_v60, %v903_v12 }
 0x14f   : > { %17473 = vst [vmem:[#allocation87_spill] sm:$0xff] %v10421_v29  ;;  %v3460_v40 = vsel %vm3457_vm8, %v3459_v49, %v3455_v26  ;;  %v4459_v59 = vand.u32 4294901760, %v4458_v19  ;;  %v1594_v58 = vmul.f32 %v10421_v29, %v10421_v29  ;;  %8284 = vrsqrt.f32 %v10429_v57  ;;  %v10444_v49 = vld [vmem:[%s8995_s8] ss:$0 sm:$0xff] }
 0x150   : > { %17474 = vst [vmem:[#allocation88_spill] sm:$0xff] %v10423_v54  ;;  %v3461_v5 = vmul.f32 %v3460_v40, %v9095_v52  ;;  %v1663_v10 = vsel %vm517_vm0, %v1595_v1, 0.0  ;;  %8286 = vrcp.f32 %v10390_v45  ;;  %v10440_v48 = vadd.f32 2.220446e-16, %v889_v16 }
 0x151   : > { %4460 = vmatpush.xpose.msra.mxu1 %v4459_v59  ;;  %8125 = vmatpush.xpose.msra.mxu3 %v4459_v59  ;;  %v1660_v31 = vsel %vm517_vm0, %v1594_v58, 0.0  ;;  %v10447_v12 = vsub.f32 %v1529_v50, %v10444_v49  ;;  %v898_v19 = vsel %vm897_vm3, %v10205_v61, %v896_v32  ;;  %v872_v52 = vmul.f32 %v871_v18, %v10242_v24 }
 0x152   : > { %17475 = vst [vmem:[#allocation89_spill] sm:$0xff] %v10440_v48  ;;  %v10454_v26 = vsel %vm517_vm0, %v3461_v5, 0  ;;  %1664 = vadd.xlane.f32.xlu1 %v1663_v10  ;;  %1661 = vadd.xlane.f32.xlu0 %v1660_v31  ;;  %v3433_v59 = vmul.f32 %v10226_v33, %v10127_v21  ;;  %v919_v16 = vmul.f32 %v10324_v30, %v918_v2  ;;  %v930_v1 = vsub.f32 1.5, %v929_v14 }
 0x153   : > { %17476 = vst [vmem:[#allocation90_spill] sm:$0xff] %v10447_v12  ;;  %v10460_v50 = vand.u32 4294901760, %v10454_v26  ;;  %v1596_v40 = vmul.f32 %v10447_v12, %v10447_v12  ;;  %vm873_vm9 = vcmp.eq.f32.partialorder %v10242_v24, inf  ;;  %vm875_vm10 = vcmp.eq.f32.partialorder %v10242_v24, 0.0 }
 0x154   : > { %v905_v32 = vmul.f32 0.5, %v904_v25  ;;  %8288 = vrsqrt.f32 %v10435_v22  ;;  %v876_v18 = vand.u32 2147483648, %v10242_v24  ;;  %v3434_v30 = vsub.f32 1.0, %v3433_v59 }
 0x155   : > { %17477 = vst [vmem:[#allocation91_spill] sm:$0xff] %v10460_v50  ;;  %8290 = vrcp.f32 %v10440_v48  ;;  %4131 = vmatpush.xpose.msra.mxu0 %v10460_v50  ;;  %8111 = vmatpush.xpose.msra.mxu2 %v10460_v50  ;;  %v1666_v2 = vsel %vm517_vm0, %v1596_v40, 0.0  ;;  %v10472_v14 = vpop.eup %8284  ;;  %v17478_v58 = vand.u32 2147483648, %v10205_v61  ;;  %vm921_vm11 = vcmp.eq.f32.partialorder %v10278_v41, inf }
 0x156   : > { %vm923_vm12 = vcmp.eq.f32.partialorder %v10278_v41, 0.0  ;;  %1667 = vadd.xlane.f32.xlu2 %v1666_v2  ;;  %v10482_v5 = vsub.f32 %v10371_v43, %v10377_v38  ;;  %v10484_v10 = vpop.eup %8286  ;;  %v874_v31 = vsel %vm873_vm9, %v10242_v24, %v872_v52  ;;  %v920_v59 = vmul.f32 %v919_v16, %v10278_v41 }
 0x157   : > { %v901_v25 = vsel %vm899_vm5, %v17478_v58, %v898_v19  ;;  %v931_v61 = vmul.f32 %v10353_v51, %v930_v1  ;;  %v3443_v19 = vand.u32 2147483648, %v10127_v21  ;;  %v906_v40 = vsub.f32 1.5, %v905_v32  ;;  %v10492_v58 = vpop.xlane.xlu0 %600  ;;  %v10507_v32 = vpop.xlane.xlu2 %519 }
 0x158   : > { %17479 = vst [vmem:[#allocation92_spill] sm:$0xff] %v10482_v5  ;;  %v3435_v2 = vmul.f32 %v10226_v33, %v3434_v30  ;;  %vm3438_vm13 = vweird.f32 %v10226_v33  ;;  %v3441_v43 = vand.u32 2147483647, %v10127_v21  ;;  %v10497_v44 = vadd.f32 2.220446e-16, %v901_v25 }
 0x159   : > { %v951_v52 = vmul.f32 %v10472_v14, %v10429_v57  ;;  %8292 = vrsqrt.f32 %v10492_v58  ;;  %v924_v1 = vand.u32 2147483648, %v10278_v41  ;;  %vm933_vm14 = vcmp.eq.f32.partialorder %v10311_v17, inf }
 0x15a   : > { %17480 = vst [vmem:[#allocation93_spill] sm:$0xff] %v10497_v44  ;;  %v10503_v16 = vpop.eup %8288  ;;  %v3436_v30 = vadd.f32 %v10226_v33, %v3435_v2  ;;  %vm3437_vm15 = vweird.f32 %v10127_v21  ;;  %v877_v15 = vsel %vm875_vm10, %v876_v18, %v874_v31  ;;  %v922_v51 = vsel %vm921_vm11, %v10278_v41, %v920_v59 }
 0x15b   : > { %v10511_v25 = vpop.eup %8290  ;;  %v932_v29 = vmul.f32 %v931_v61, %v10311_v17  ;;  %vm3439_vm1 = vmor %vm3437_vm15, %vm3438_vm13  ;;  %v3444_v12 = vor.u32 1.1754944e-38, %v3443_v19  ;;  %v907_v48 = vmul.f32 %v10388_v60, %v906_v40  ;;  %vm3442_vm2 = vcmp.eq.f32.partialorder %v3441_v43, 8.507059e+37 }
 0x15c   : > { %17481 = vst [vmem:[#allocation94_spill] sm:$0xff] %v10511_v25  ;;  %v3440_v2 = vsel %vm3439_vm1, %v10226_v33, %v3436_v30  ;;  %v17482_v21 = vand.u32 4294901760, %v10482_v5  ;;  %v952_v18 = vmul.f32 %v10472_v14, %v951_v52  ;;  %v963_v31 = vmul.f32 %v10503_v16, %v10435_v22 }
 0x15d   : > { %8294 = vrsqrt.f32 %v10507_v32  ;;  %v3445_v59 = vsel %vm3442_vm2, %v3444_v12, %v3440_v2  ;;  %v10530_v61 = vadd.f32 2.220446e-16, %v877_v15  ;;  %vm935_vm3 = vcmp.eq.f32.partialorder %v10311_v17, 0.0 }
 0x15e   : > { %v4464_v24 = vsub.f32 %v10482_v5, %v17482_v21  ;;  %v3446_v60 = vmul.f32 %v3445_v59, %v9098_v53  ;;  %8296 = vrcp.f32 %v10497_v44  ;;  %v925_v40 = vsel %vm923_vm12, %v924_v1, %v922_v51  ;;  %v10561_v21 = vpop.xlane.xlu1 %612 }
 0x15f   : > { %17483 = vst [vmem:[#allocation95_spill] sm:$0xff] %v10530_v61  ;;  %v10534_v19 = vpop.eup %8292  ;;  %v936_v43 = vand.u32 2147483648, %v10311_v17  ;;  %vm909_vm4 = vcmp.eq.f32.partialorder %v10350_v62, inf  ;;  %v934_v15 = vsel %vm933_vm14, %v10311_v17, %v932_v29  ;;  %vm911_vm5 = vcmp.eq.f32.partialorder %v10350_v62, 0.0 }
 0x160   : > { %v4465_v33 = vand.u32 4294901760, %v4464_v24  ;;  %v912_v53 = vand.u32 2147483648, %v10350_v62  ;;  %v10547_v12 = vsel %vm517_vm0, %v3446_v60, 0  ;;  %v3418_v41 = vmul.f32 %v10232_v34, %v10163_v36  ;;  %v1531_v60 = vld [vmem:[%s9504_s21 + $0xa8] sm:$0xff] }
 0x161   : > { %v908_v52 = vmul.f32 %v907_v48, %v10350_v62  ;;  %v953_v51 = vmul.f32 0.5, %v952_v18  ;;  %v964_v1 = vmul.f32 %v10503_v16, %v963_v31  ;;  %v10554_v29 = vand.u32 4294901760, %v10547_v12 }
 0x162   : > { %4466 = vmatpush.xpose.msra.mxu1 %v4465_v33  ;;  %8126 = vmatpush.xpose.msra.mxu3 %v4465_v33  ;;  %8298 = vrcp.f32 %v10530_v61  ;;  %v10557_v30 = vadd.f32 2.220446e-16, %v925_v40  ;;  %v939_v2 = vmul.f32 %v10534_v19, %v10492_v58  ;;  %v3419_v24 = vsub.f32 1.0, %v3418_v41  ;;  %v1530_v40 = vld [vmem:[%s9504_s21 + $0xa0] sm:$0xff] }
 0x163   : > { %v10563_v59 = vpop.eup %8294  ;;  %v937_v48 = vsel %vm935_vm3, %v936_v43, %v934_v15  ;;  %8300 = vrsqrt.f32 %v10561_v21  ;;  %4133 = vmatpush.xpose.msra.mxu0 %v10554_v29  ;;  %8112 = vmatpush.xpose.msra.mxu2 %v10554_v29  ;;  %v3428_v18 = vand.u32 2147483648, %v10163_v36  ;;  %v10573_v31 = vsub.f32 %v10454_v26, %v10460_v50  ;;  %v10586_v26 = vpop.xlane.xlu0 %609 }
 0x164   : > { %v3420_v33 = vmul.f32 %v10232_v34, %v3419_v24  ;;  %vm3422_vm6 = vweird.f32 %v10163_v36  ;;  %vm3423_vm7 = vweird.f32 %v10232_v34  ;;  %v3426_v17 = vand.u32 2147483647, %v10163_v36  ;;  %v10581_v43 = vpop.eup %8296  ;;  %v1532_v24 = vld [vmem:[%s9504_s21 + $0xb0] sm:$0xff] }
 0x165   : > { %17484 = vst [vmem:[#allocation96_spill] sm:$0xff] %v10573_v31  ;;  %v910_v15 = vsel %vm909_vm4, %v10350_v62, %v908_v52  ;;  %v954_v41 = vsub.f32 1.5, %v953_v51  ;;  %v965_v44 = vmul.f32 0.5, %v964_v1  ;;  %v17008_v25 = vand.u32 4294901760, %v10573_v31  ;;  %vm3424_vm8 = vmor %vm3422_vm6, %vm3423_vm7 }
 0x166   : > { %17485 = vst [vmem:[#allocation97_spill] sm:$0xff] %v10581_v43  ;;  %v940_v61 = vmul.f32 %v10534_v19, %v939_v2  ;;  %v615_v54 = vmul.f32 %v10563_v59, %v10507_v32  ;;  %v3421_v50 = vadd.f32 %v10232_v34, %v3420_v33  ;;  %v10595_v43 = vsub.f32 %v1531_v60, %v10444_v49 }
 0x167   : > { %8302 = vrsqrt.f32 %v10586_v26  ;;  %v3429_v52 = vor.u32 1.1754944e-38, %v3428_v18  ;;  %v4470_v51 = vsub.f32 %v10573_v31, %v17008_v25  ;;  %v10606_v1 = vsub.f32 %v1530_v40, %v10444_v49 }
 0x168   : > { %17486 = vst [vmem:[#allocation98_spill] sm:$0xff] %v10595_v43  ;;  %v10608_v2 = vpop.eup %8298  ;;  %v3425_v60 = vsel %vm3424_vm8, %v10232_v34, %v3421_v50  ;;  %vm3427_vm9 = vcmp.eq.f32.partialorder %v3426_v17, 8.507059e+37  ;;  %v1598_v33 = vmul.f32 %v10595_v43, %v10595_v43  ;;  %v10614_v38 = vsub.f32 %v1532_v24, %v10444_v49 }
 0x169   : > { %17487 = vst [vmem:[#allocation99_spill] sm:$0xff] %v10606_v1  ;;  %v10616_v36 = vpop.eup %8300  ;;  %v955_v18 = vmul.f32 %v10472_v14, %v954_v41  ;;  %v966_v5 = vsub.f32 1.5, %v965_v44  ;;  %v3430_v25 = vsel %vm3427_vm9, %v3429_v52, %v3425_v60  ;;  %v4471_v31 = vand.u32 4294901760, %v4470_v51 }
 0x16a   : > { %17488 = vst [vmem:[#allocation100_spill] sm:$0xff] %v10614_v38  ;;  %8304 = vrcp.f32 %v10557_v30  ;;  %v616_v40 = vmul.f32 %v10563_v59, %v615_v54  ;;  %v3431_v34 = vmul.f32 %v3430_v25, %v9102_v55  ;;  %v1672_v50 = vsel %vm517_vm0, %v1598_v33, 0.0 }
 0x16b   : > { %v10623_v17 = vadd.f32 2.220446e-16, %v937_v48  ;;  %v913_v24 = vsel %vm911_vm5, %v912_v53, %v910_v15  ;;  %4472 = vmatpush.xpose.msra.mxu1 %v4471_v31  ;;  %8127 = vmatpush.xpose.msra.mxu3 %v4471_v31  ;;  %v1597_v44 = vmul.f32 %v10606_v1, %v10606_v1  ;;  %v1599_v14 = vmul.f32 %v10614_v38, %v10614_v38  ;;  %v10652_v60 = vpop.xlane.xlu0 %522 }
 0x16c   : > { %v941_v41 = vmul.f32 0.5, %v940_v61  ;;  %v987_v54 = vmul.f32 %v10616_v36, %v10561_v21  ;;  %v10634_v55 = vsel %vm517_vm0, %v3431_v34, 0  ;;  %1673 = vadd.xlane.f32.xlu1 %v1672_v50  ;;  %v3403_v62 = vmul.f32 %v10240_v6, %v10169_v9 }
 0x16d   : > { %v10638_v25 = vpop.eup %8302  ;;  %v956_v53 = vmul.f32 %v955_v18, %v10429_v57  ;;  %vm957_vm10 = vcmp.eq.f32.partialorder %v10429_v57, inf  ;;  %vm959_vm11 = vcmp.eq.f32.partialorder %v10429_v57, 0.0  ;;  %v967_v61 = vmul.f32 %v10503_v16, %v966_v5 }
 0x16e   : > { %v960_v48 = vand.u32 2147483648, %v10429_v57  ;;  %v617_v31 = vmul.f32 0.5, %v616_v40  ;;  %v10646_v15 = vand.u32 4294901760, %v10634_v55  ;;  %v1669_v52 = vsel %vm517_vm0, %v1597_v44, 0.0  ;;  %v10659_v40 = vpop.xlane.xlu1 %525 }
 0x16f   : > { %8306 = vrcp.f32 %v10623_v17  ;;  %v10650_v51 = vadd.f32 2.220446e-16, %v913_v24  ;;  %1670 = vadd.xlane.f32.xlu0 %v1669_v52  ;;  %v1675_v33 = vsel %vm517_vm0, %v1599_v14, 0.0  ;;  %v3404_v18 = vsub.f32 1.0, %v3403_v62 }
 0x170   : > { %v10655_v34 = vpop.eup %8304  ;;  %vm969_vm12 = vcmp.eq.f32.partialorder %v10435_v22, inf  ;;  %v942_v5 = vsub.f32 1.5, %v941_v41  ;;  %v988_v16 = vmul.f32 %v10616_v36, %v987_v54  ;;  %4135 = vmatpush.xpose.msra.mxu0 %v10646_v15  ;;  %8113 = vmatpush.xpose.msra.mxu2 %v10646_v15  ;;  %v10665_v50 = vsub.f32 %v10547_v12, %v10554_v29 }
 0x171   : > { %v958_v24 = vsel %vm957_vm10, %v10429_v57, %v956_v53  ;;  %v968_v44 = vmul.f32 %v967_v61, %v10435_v22  ;;  %v975_v14 = vmul.f32 %v10638_v25, %v10586_v26  ;;  %8308 = vrsqrt.f32 %v10659_v40  ;;  %1676 = vadd.xlane.f32.xlu2 %v1675_v33 }
 0x172   : > { %v618_v41 = vsub.f32 1.5, %v617_v31  ;;  %8310 = vrsqrt.f32 %v10652_v60  ;;  %v3405_v54 = vmul.f32 %v10240_v6, %v3404_v18  ;;  %v3413_v12 = vand.u32 2147483648, %v10169_v9 }
 0x173   : > { %vm971_vm13 = vcmp.eq.f32.partialorder %v10435_v22, 0.0  ;;  %vm3408_vm14 = vweird.f32 %v10240_v6  ;;  %v3411_v62 = vand.u32 2147483647, %v10169_v9  ;;  %v17014_v53 = vand.u32 4294901760, %v10665_v50 }
 0x174   : > { %v961_v61 = vsel %vm959_vm11, %v960_v48, %v958_v24  ;;  %v972_v52 = vand.u32 2147483648, %v10435_v22  ;;  %v943_v31 = vmul.f32 %v10534_v19, %v942_v5  ;;  %v989_v33 = vmul.f32 0.5, %v988_v16  ;;  %v10703_v16 = vpop.xlane.xlu2 %528 }
 0x175   : > { %v10685_v38 = vpop.eup %8306  ;;  %v3406_v18 = vadd.f32 %v10240_v6, %v3405_v54  ;;  %vm3407_vm15 = vweird.f32 %v10169_v9  ;;  %v4476_v43 = vsub.f32 %v10665_v50, %v17014_v53  ;;  %v1271_v1 = vmul.f32 %v10364_v47, %v10295_v39 }
 0x176   : > { %17489 = vst [vmem:[#allocation101_spill] sm:$0xff] %v10685_v38  ;;  %v970_v57 = vsel %vm969_vm12, %v10435_v22, %v968_v44  ;;  %v976_v19 = vmul.f32 %v10638_v25, %v975_v14  ;;  %v619_v48 = vmul.f32 %v10563_v59, %v618_v41  ;;  %vm3409_vm1 = vmor %vm3407_vm15, %vm3408_vm14  ;;  %v3414_v5 = vor.u32 1.1754944e-38, %v3413_v12 }
 0x177   : > { %v10701_v9 = vpop.eup %8308  ;;  %v3410_v24 = vsel %vm3409_vm1, %v10240_v6, %v3406_v18  ;;  %vm3412_vm2 = vcmp.eq.f32.partialorder %v3411_v62, 8.507059e+37  ;;  %v4477_v54 = vand.u32 4294901760, %v4476_v43  ;;  %v1272_v53 = vsub.f32 1.0, %v1271_v1  ;;  %v1534_v18 = vld [vmem:[%s9504_s21 + $0xc0] sm:$0xff] }
 0x178   : > { %v10706_v38 = vpop.eup %8310  ;;  %v10708_v44 = vadd.f32 2.220446e-16, %v961_v61  ;;  %8312 = vrsqrt.f32 %v10703_v16  ;;  %v3415_v59 = vsel %vm3412_vm2, %v3414_v5, %v3410_v24  ;;  %v10714_v41 = vsel %vm971_vm13, %v972_v52, %v970_v57  ;;  %v1533_v57 = vld [vmem:[%s9504_s21 + $0xb8] sm:$0xff] }
 0x179   : > { %v10717_v12 = vmul.f32 %v943_v31, %v10492_v58  ;;  %v990_v6 = vsub.f32 1.5, %v989_v33  ;;  %v3416_v43 = vmul.f32 %v3415_v59, %v9129_v3  ;;  %4478 = vmatpush.xpose.msra.mxu1 %v4477_v54  ;;  %8128 = vmatpush.xpose.msra.mxu3 %v4477_v54  ;;  %v977_v1 = vmul.f32 0.5, %v976_v19 }
 0x17a   : > { %v620_v62 = vmul.f32 %v619_v48, %v10507_v32  ;;  %vm621_vm3 = vcmp.eq.f32.partialorder %v10507_v32, inf  ;;  %v1273_v61 = vmul.f32 %v10364_v47, %v1272_v53  ;;  %v639_v22 = vmul.f32 %v10701_v9, %v10659_v40 }
 0x17b   : > { %v627_v52 = vmul.f32 %v10706_v38, %v10652_v60  ;;  %v4011_v31 = vsel %vm517_vm0, %v3416_v43, 0  ;;  %vm1276_vm4 = vweird.f32 %v10364_v47  ;;  %vm945_vm5 = vcmp.eq.f32.partialorder %v10492_v58, inf }
 0x17c   : > { %v10730_v3 = vand.u32 4294901760, %v4011_v31  ;;  %v1274_v33 = vadd.f32 %v10364_v47, %v1273_v61  ;;  %vm1275_vm6 = vweird.f32 %v10295_v39  ;;  %v1279_v53 = vand.u32 2147483647, %v10295_v39  ;;  %v1535_v61 = vld [vmem:[%s9504_s21 + $0xc8] sm:$0xff] }
 0x17d   : > { %v991_v19 = vmul.f32 %v10616_v36, %v990_v6  ;;  %vm993_vm7 = vcmp.eq.f32.partialorder %v10561_v21, inf  ;;  %vm623_vm8 = vcmp.eq.f32.partialorder %v10507_v32, 0.0  ;;  %v624_v48 = vand.u32 2147483648, %v10507_v32  ;;  %vm10741_vm9 = vmor %vm1275_vm6, %vm1276_vm4 }
 0x17e   : > { %v1281_v24 = vand.u32 2147483648, %v10295_v39  ;;  %v10746_v54 = vpop.eup %8312  ;;  %v978_v59 = vsub.f32 1.5, %v977_v1  ;;  %4137 = vmatpush.xpose.msra.mxu0 %v10730_v3  ;;  %8114 = vmatpush.xpose.msra.mxu2 %v10730_v3  ;;  %v1278_v36 = vsel %vm10741_vm9, %v10364_v47, %v1274_v33  ;;  %v10755_v6 = vsub.f32 %v10634_v55, %v10646_v15 }
 0x17f   : > { %v10758_v43 = vsub.f32 %v1534_v18, %v10444_v49  ;;  %v622_v39 = vsel %vm621_vm3, %v10507_v32, %v620_v62  ;;  %v640_v1 = vmul.f32 %v10701_v9, %v639_v22  ;;  %v17493_v14 = vand.u32 4294901760, %v9573_v20 }
 0x180   : > { %v1282_v47 = vor.u32 1.1754944e-38, %v1281_v24  ;;  %v10769_v33 = vsub.f32 %v1533_v57, %v10444_v49  ;;  %v628_v55 = vmul.f32 %v10706_v38, %v627_v52  ;;  %vm1280_vm10 = vcmp.eq.f32.partialorder %v1279_v53, 8.507059e+37 }
 0x181   : > { %17492 = vst [vmem:[#allocation102_spill] sm:$0xff] %v10758_v43  ;;  %v17016_v18 = vand.u32 4294901760, %v10755_v6  ;;  %v1601_v5 = vmul.f32 %v10758_v43, %v10758_v43  ;;  %vm947_vm11 = vcmp.eq.f32.partialorder %v10492_v58, 0.0  ;;  %vm995_vm12 = vcmp.eq.f32.partialorder %v10561_v21, 0.0 }
 0x182   : > { %4622 = vmatpush.xpose.msrb.mxu2 %v9573_v20  ;;  %5057 = vmatpush.xpose.msrb.mxu0 %v17493_v14  ;;  %17494 = vst [vmem:[#allocation103_spill] sm:$0xff] %v10769_v33  ;;  %v651_v20 = vmul.f32 %v10746_v54, %v10703_v16  ;;  %v1283_v14 = vsel %vm1280_vm10, %v1282_v47, %v1278_v36  ;;  %v17497_v47 = vand.u32 4294901760, %v9682_v27  ;;  %vm981_vm13 = vcmp.eq.f32.partialorder %v10586_v26, inf }
 0x183   : > { %v1600_v62 = vmul.f32 %v10769_v33, %v10769_v33  ;;  %v10782_v22 = vsub.f32 %v1535_v61, %v10444_v49  ;;  %v992_v52 = vmul.f32 %v991_v19, %v10561_v21  ;;  %v979_v53 = vmul.f32 %v10638_v25, %v978_v59 }
 0x184   : > { %v10787_v57 = vmul.f32 %v1283_v14, %v9132_v8  ;;  %v4482_v24 = vsub.f32 %v10755_v6, %v17016_v18  ;;  %v625_v36 = vsel %vm623_vm8, %v624_v48, %v622_v39  ;;  %v1681_v61 = vsel %vm517_vm0, %v1601_v5, 0.0  ;;  %v10801_v14 = vpop.xlane.xlu1 %534 }
 0x185   : > { %17495 = vst [vmem:[#allocation104_spill] sm:$0xff] %v10782_v22  ;;  %v1678_v19 = vsel %vm517_vm0, %v1600_v62, 0.0  ;;  %v1602_v8 = vmul.f32 %v10782_v22, %v10782_v22  ;;  %v641_v25 = vmul.f32 0.5, %v640_v1  ;;  %v629_v59 = vmul.f32 0.5, %v628_v55  ;;  %1682 = vadd.xlane.f32.xlu1 %v1681_v61  ;;  %v10865_v22 = vpop.xlane.xlu2 %537 }
 0x186   : > { %17496 = vst [vmem:[#allocation105_spill] sm:$0xff] %v10787_v57  ;;  %4625 = vmatpush.xpose.msrb.mxu2 %v9682_v27  ;;  %5061 = vmatpush.xpose.msrb.mxu0 %v17497_v47  ;;  %v3898_v18 = vmul.f32 2000.0, %v10787_v57  ;;  %v4483_v32 = vand.u32 4294901760, %v4482_v24  ;;  %v652_v48 = vmul.f32 %v10746_v54, %v651_v20  ;;  %8314 = vrsqrt.f32 %v10801_v14 }
 0x187   : > { %1679 = vadd.xlane.f32.xlu0 %v1678_v19  ;;  %v1684_v27 = vsel %vm517_vm0, %v1602_v8, 0.0  ;;  %v10808_v39 = vsub.f32 %v4011_v31, %v10730_v3  ;;  %v996_v5 = vand.u32 2147483648, %v10561_v21  ;;  %v980_v1 = vmul.f32 %v979_v53, %v10586_v26  ;;  %v10828_v19 = vpop.xlane.xlu0 %531 }
 0x188   : > { %v3963_v55 = vsel %vm517_vm0, %v3898_v18, 0  ;;  %4484 = vmatpush.xpose.msra.mxu1 %v4483_v32  ;;  %8129 = vmatpush.xpose.msra.mxu3 %v4483_v32  ;;  %v946_v20 = vsel %vm945_vm5, %v10492_v58, %v10717_v12  ;;  %v10818_v62 = vadd.f32 2.220446e-16, %v625_v36  ;;  %v994_v18 = vsel %vm993_vm7, %v10561_v21, %v992_v52 }
 0x189   : > { %v10820_v24 = vand.u32 4294901760, %v3963_v55  ;;  %1685 = vadd.xlane.f32.xlu2 %v1684_v27  ;;  %v17017_v31 = vand.u32 4294901760, %v10808_v39  ;;  %v984_v53 = vand.u32 2147483648, %v10586_v26  ;;  %v642_v47 = vsub.f32 1.5, %v641_v25 }
 0x18a   : > { %4628 = vmatpush.xpose.msrb.mxu2 %v9748_v35  ;;  %v630_v61 = vsub.f32 1.5, %v629_v59  ;;  %v17499_v12 = vand.u32 4294901760, %v9748_v35  ;;  %v653_v36 = vmul.f32 0.5, %v652_v48  ;;  %8316 = vrsqrt.f32 %v10828_v19 }
 0x18b   : > { %17498 = vst [vmem:[#allocation106_spill] sm:$0xff] %v10820_v24  ;;  %v10834_v8 = vsub.f32 %v3963_v55, %v10820_v24  ;;  %v4488_v32 = vsub.f32 %v10808_v39, %v17017_v31  ;;  %8318 = vrcp.f32 %v10650_v51  ;;  %v982_v52 = vsel %vm981_vm13, %v10586_v26, %v980_v1 }
 0x18c   : > { %5065 = vmatpush.xpose.msrb.mxu0 %v17499_v12  ;;  %vm983_vm14 = vcmp.eq.f32.partialorder %v10586_v26, 0.0  ;;  %v10844_v35 = vpop.eup %8314  ;;  %v10847_v25 = vadd.f32 2.220446e-16, %v10714_v41  ;;  %8320 = vrcp.f32 %v10818_v62  ;;  %v17503_v27 = vand.u32 2147483648, %v10492_v58 }
 0x18d   : > { %17500 = vst [vmem:[#allocation107_spill] sm:$0xff] %v10834_v8  ;;  %v10851_v59 = vand.u32 4294901760, %v10834_v8  ;;  %v4489_v48 = vand.u32 4294901760, %v4488_v32  ;;  %8322 = vrcp.f32 %v10708_v44  ;;  %v997_v1 = vsel %vm995_vm12, %v996_v5, %v994_v18 }
 0x18e   : > { %17501 = vst [vmem:[#allocation108_spill] sm:$0xff] %v10847_v25  ;;  %4631 = vmatpush.xpose.msrb.mxu2 %v9820_v7  ;;  %v949_v26 = vsel %vm947_vm11, %v17503_v27, %v946_v20  ;;  %v17504_v41 = vand.u32 4294901760, %v9820_v7  ;;  %v985_v55 = vsel %vm983_vm14, %v984_v53, %v982_v52  ;;  %v643_v12 = vmul.f32 %v10701_v9, %v642_v47 }
 0x18f   : > { %17502 = vst [vmem:[#allocation109_spill] sm:$0xff] %v10851_v59  ;;  %v631_v32 = vmul.f32 %v10706_v38, %v630_v61  ;;  %v654_v31 = vsub.f32 1.5, %v653_v36  ;;  %4490 = vmatpush.xpose.msra.mxu1 %v4489_v48  ;;  %8130 = vmatpush.xpose.msra.mxu3 %v4489_v48  ;;  %v675_v58 = vmul.f32 %v10844_v35, %v10801_v14  ;;  %8324 = vrsqrt.f32 %v10865_v22 }
 0x190   : > { %5069 = vmatpush.xpose.msrb.mxu0 %v17504_v41  ;;  %v4269_v21 = vsub.f32 %v10834_v8, %v10851_v59  ;;  %v10874_v7 = vpop.eup %8316  ;;  %8326 = vrcp.f32 %v10847_v25  ;;  %v10877_v38 = vadd.f32 2.220446e-16, %v949_v26  ;;  %v10879_v9 = vadd.f32 2.220446e-16, %v997_v1 }
 0x191   : > { %vm645_vm15 = vcmp.eq.f32.partialorder %v10659_v40, inf  ;;  %v10883_v5 = vpop.eup %8318  ;;  %v10885_v20 = vadd.f32 2.220446e-16, %v985_v55  ;;  %vm647_vm1 = vcmp.eq.f32.partialorder %v10659_v40, 0.0  ;;  %v17508_v53 = vand.u32 4294901760, %v9906_v11 }
 0x192   : > { %17505 = vst [vmem:[#allocation110_spill] sm:$0xff] %v10879_v9  ;;  %4634 = vmatpush.xpose.msrb.mxu2 %v9906_v11  ;;  %v10888_v18 = vand.u32 4294901760, %v4269_v21  ;;  %4556 = vmatmul.f32.vlgmr.msra.gmra.mxu3 %v10820_v24  ;;  %v10895_v47 = vpop.eup %8320  ;;  %v644_v61 = vmul.f32 %v643_v12, %v10659_v40  ;;  %v648_v36 = vand.u32 2147483648, %v10659_v40  ;;  %v632_v52 = vmul.f32 %v631_v32, %v10652_v60  ;;  %v1536_v21 = vld [vmem:[%s9504_s21 + $0xd0] sm:$0xff] }
 0x193   : > { %4830 = vmatpush.xpose.msrb.mxu3 %v9539_v37  ;;  %5248 = vmatpush.xpose.msrb.mxu1 %v9539_v37  ;;  %17506 = vst [vmem:[#allocation111_spill] sm:$0xff] %v10885_v20  ;;  %v1286_v37 = vmul.f32 %v10341_v23, %v10264_v46  ;;  %v655_v48 = vmul.f32 %v10746_v54, %v654_v31  ;;  %v10901_v27 = vpop.eup %8322  ;;  %vm633_vm2 = vcmp.eq.f32.partialorder %v10652_v60, inf  ;;  %vm1290_vm3 = vweird.f32 %v10264_v46 }
 0x194   : > { %17507 = vst [vmem:[#allocation112_spill] sm:$0xff] %v10888_v18  ;;  %5073 = vmatpush.xpose.msrb.mxu0 %v17508_v53  ;;  %v676_v26 = vmul.f32 %v10844_v35, %v675_v58  ;;  %v663_v11 = vmul.f32 %v10874_v7, %v10828_v19  ;;  %4271 = vmatmul.f32.vlgmr.msra.gmra.mxu2 %v10888_v18  ;;  %vm1291_vm4 = vweird.f32 %v10341_v23  ;;  %v1294_v54 = vand.u32 2147483647, %v10264_v46  ;;  %v1537_v58 = vld [vmem:[%s9504_s21 + $0xd8] sm:$0xff] }
 0x195   : > { %v1287_v1 = vsub.f32 1.0, %v1286_v37  ;;  %v1296_v31 = vand.u32 2147483648, %v10264_v46  ;;  %v10915_v41 = vpop.eup %8324  ;;  %v1031_v55 = vmul.f32 %v10895_v47, %v10818_v62  ;;  %vm635_vm5 = vcmp.eq.f32.partialorder %v10652_v60, 0.0  ;;  %vm10942_vm7 = vmor %vm1290_vm3, %vm1291_vm4  ;;  %v1538_v46 = vld [vmem:[%s9504_s21 + $0xe0] sm:$0xff] }
 0x196   : > { %4637 = vmatpush.xpose.msrb.mxu2 %v9968_v28  ;;  %v636_v12 = vand.u32 2147483648, %v10652_v60  ;;  %v17509_v37 = vand.u32 4294901760, %v9968_v28  ;;  %v646_v53 = vsel %vm645_vm15, %v10659_v40, %v644_v61  ;;  %v634_v33 = vsel %vm633_vm2, %v10652_v60, %v632_v52 }
 0x197   : > { %4832 = vmatpush.xpose.msrb.mxu3 %v9604_v4  ;;  %5250 = vmatpush.xpose.msrb.mxu1 %v9604_v4  ;;  %v1288_v32 = vmul.f32 %v10341_v23, %v1287_v1  ;;  %v10926_v4 = vpop.eup %8326  ;;  %v656_v43 = vmul.f32 %v655_v48, %v10703_v16  ;;  %vm657_vm6 = vcmp.eq.f32.partialorder %v10703_v16, inf  ;;  %v677_v1 = vmul.f32 0.5, %v676_v26 }
 0x198   : > { %5077 = vmatpush.xpose.msrb.mxu0 %v17509_v37  ;;  %17510 = vst [vmem:[#allocation113_spill] sm:$0xff] %v10926_v4  ;;  %v664_v18 = vmul.f32 %v10874_v7, %v663_v11  ;;  %v1297_v61 = vor.u32 1.1754944e-38, %v1296_v31  ;;  %v687_v52 = vmul.f32 %v10915_v41, %v10865_v22  ;;  %vm10949_vm8 = vcmp.eq.f32.partialorder %v1294_v54, 8.507059e+37 }
 0x199   : > { %v1289_v28 = vadd.f32 %v10341_v23, %v1288_v32  ;;  %v10954_v26 = vsub.f32 %v1537_v58, %v10444_v49  ;;  %v10957_v11 = vsub.f32 %v1536_v21, %v10444_v49  ;;  %v1032_v32 = vsub.f32 1.0, %v1031_v55 }
 0x19a   : > { %v649_v31 = vsel %vm647_vm1, %v648_v36, %v646_v53  ;;  %vm659_vm9 = vcmp.eq.f32.partialorder %v10703_v16, 0.0  ;;  %v660_v54 = vand.u32 2147483648, %v10703_v16  ;;  %4640 = vmatpush.xpose.msrb.mxu2 %v10054_v42  ;;  %v637_v58 = vsel %vm635_vm5, %v636_v12, %v634_v33  ;;  %v17519_v12 = vld [vmem:[#allocation7_spill] sm:$0xff] }
 0x19b   : > { %4834 = vmatpush.xpose.msrb.mxu3 %v9685_v0  ;;  %17515 = vst [vmem:[#allocation114_spill] sm:$0xff] %v10954_v26  ;;  %5252 = vmatpush.xpose.msrb.mxu1 %v9685_v0  ;;  %v658_v21 = vsel %vm657_vm6, %v10703_v16, %v656_v43  ;;  %v1293_v0 = vsel %vm10942_vm7, %v10341_v23, %v1289_v28  ;;  %v17517_v36 = vand.u32 4294901760, %v10054_v42  ;;  %v678_v55 = vsub.f32 1.5, %v677_v1  ;;  %v17521_v1 = vld [vmem:[#allocation75_spill] sm:$0xff] }
 0x19c   : > { %17516 = vst [vmem:[#allocation115_spill] sm:$0xff] %v10957_v11  ;;  %v1604_v40 = vmul.f32 %v10954_v26, %v10954_v26  ;;  %v665_v53 = vmul.f32 0.5, %v664_v18  ;;  %v1298_v60 = vsel %vm10949_vm8, %v1297_v61, %v1293_v0  ;;  %v10981_v33 = vsub.f32 %v1538_v46, %v10444_v49 }
 0x19d   : > { %5081 = vmatpush.xpose.msrb.mxu0 %v17517_v36  ;;  %v688_v43 = vmul.f32 %v10915_v41, %v687_v52  ;;  %v10986_v23 = vmul.f32 %v1298_v60, %v17519_v12  ;;  %v1603_v42 = vmul.f32 %v10957_v11, %v10957_v11  ;;  %8328 = vrcp.f32 %v10877_v38  ;;  %v17538_v11 = vld [vmem:[#allocation70_spill] sm:$0xff] }
 0x19e   : > { %17518 = vst [vmem:[#allocation116_spill] sm:$0xff] %v10981_v33  ;;  %v1690_v28 = vsel %vm517_vm0, %v1604_v40, 0.0  ;;  %v10993_v18 = vadd.f32 2.220446e-16, %v649_v31  ;;  %4643 = vmatpush.xpose.msrb.mxu2 %v17521_v1  ;;  %8330 = vrcp.f32 %v10879_v9  ;;  %v10997_v37 = vadd.f32 2.220446e-16, %v637_v58  ;;  %v17523_v58 = vld [vmem:[#allocation64_spill] sm:$0xff] }
 0x19f   : > { %4836 = vmatpush.xpose.msrb.mxu3 %v9725_v63  ;;  %17520 = vst [vmem:[#allocation7_spill] sm:$0xff] %v10986_v23  ;;  %5254 = vmatpush.xpose.msrb.mxu1 %v9725_v63  ;;  %v3899_v61 = vmul.f32 2000.0, %v10986_v23  ;;  %v1687_v52 = vsel %vm517_vm0, %v1603_v42, 0.0  ;;  %v17522_v48 = vand.u32 4294901760, %v17521_v1  ;;  %8332 = vrcp.f32 %v10885_v20  ;;  %v11032_v42 = vpop.xlane.xlu0 %540 }
 0x1a0   : > { %1691 = vadd.xlane.f32.xlu1 %v1690_v28  ;;  %v661_v63 = vsel %vm659_vm9, %v660_v54, %v658_v21  ;;  %v679_v46 = vmul.f32 %v10844_v35, %v678_v55  ;;  %1688 = vadd.xlane.f32.xlu0 %v1687_v52  ;;  %v1605_v31 = vmul.f32 %v10981_v33, %v10981_v33  ;;  %v666_v40 = vsub.f32 1.5, %v665_v53  ;;  %v17525_v54 = vld [vmem:[#allocation77_spill] sm:$0xff]  ;;  %v11023_v21 = vpop.xlane.xlu1 %543 }
 0x1a1   : > { %5085 = vmatpush.xpose.msrb.mxu0 %v17522_v48  ;;  %v1033_v0 = vmul.f32 %v10895_v47, %v1032_v32  ;;  %v689_v36 = vmul.f32 0.5, %v688_v43  ;;  %v3966_v60 = vsel %vm517_vm0, %v3899_v61, 0  ;;  %v1041_v12 = vand.u32 2147483648, %v10818_v62 }
 0x1a2   : > { %8334 = vrcp.f32 %v10993_v18  ;;  %v11015_v16 = vand.u32 4294901760, %v3966_v60  ;;  %v1693_v35 = vsel %vm517_vm0, %v1605_v31, 0.0  ;;  %4646 = vmatpush.xpose.msrb.mxu2 %v17525_v54  ;;  %vm1035_vm10 = vweird.f32 %v10818_v62  ;;  %v17529_v31 = vld [vmem:[#allocation65_spill] sm:$0xff] }
 0x1a3   : > { %4838 = vmatpush.xpose.msrb.mxu3 %v17523_v58  ;;  %5256 = vmatpush.xpose.msrb.mxu1 %v17523_v58  ;;  %8336 = vrcp.f32 %v10997_v37  ;;  %v11021_v32 = vadd.f32 2.220446e-16, %v661_v63  ;;  %v17526_v55 = vand.u32 4294901760, %v17525_v54  ;;  %v11027_v53 = vpop.eup %8328  ;;  %v680_v28 = vmul.f32 %v679_v46, %v10801_v14 }
 0x1a4   : > { %17524 = vst [vmem:[#allocation75_spill] sm:$0xff] %v11015_v16  ;;  %1694 = vadd.xlane.f32.xlu2 %v1693_v35  ;;  %8338 = vrsqrt.f32 %v11023_v21  ;;  %v11035_v1 = vsub.f32 %v3966_v60, %v11015_v16  ;;  %4560 = vmatmul.f32.gmra.mxu3 %v11015_v16  ;;  %v11038_v61 = vpop.eup %8330  ;;  %v667_v52 = vmul.f32 %v10874_v7, %v666_v40  ;;  %v690_v48 = vsub.f32 1.5, %v689_v36 }
 0x1a5   : > { %5089 = vmatpush.xpose.msrb.mxu0 %v17526_v55  ;;  %17528 = vst [vmem:[#allocation77_spill] sm:$0xff] %v11038_v61  ;;  %8340 = vrsqrt.f32 %v11032_v42  ;;  %v1034_v63 = vadd.f32 %v10895_v47, %v1033_v0  ;;  %v11045_v46 = vpop.eup %8332  ;;  %vm1036_vm11 = vweird.f32 %v10895_v47  ;;  %v1039_v60 = vand.u32 2147483647, %v10818_v62 }
 0x1a6   : > { %17527 = vst [vmem:[#allocation64_spill] sm:$0xff] %v11035_v1  ;;  %v11048_v58 = vand.u32 4294901760, %v11035_v1  ;;  %v1042_v35 = vor.u32 1.1754944e-38, %v1041_v12  ;;  %4649 = vmatpush.xpose.msrb.mxu2 %v10317_v56  ;;  %8342 = vrcp.f32 %v11021_v32  ;;  %vm681_vm12 = vcmp.eq.f32.partialorder %v10801_v14, inf  ;;  %vm1037_vm14 = vmor %vm1035_vm10, %vm1036_vm11  ;;  %v11064_v12 = vpop.xlane.xlu2 %546 }
 0x1a7   : > { %4840 = vmatpush.xpose.msrb.mxu3 %v17529_v31  ;;  %5258 = vmatpush.xpose.msrb.mxu1 %v17529_v31  ;;  %17530 = vst [vmem:[#allocation65_spill] sm:$0xff] %v11045_v46  ;;  %vm683_vm13 = vcmp.eq.f32.partialorder %v10801_v14, 0.0  ;;  %v17532_v0 = vand.u32 4294901760, %v10317_v56  ;;  %v684_v36 = vand.u32 2147483648, %v10801_v14  ;;  %v1038_v55 = vsel %vm1037_vm14, %v10895_v47, %v1034_v63  ;;  %v17598_v46 = vld [vmem:[#allocation10_spill] sm:$0xff] }
 0x1a8   : > { %17531 = vst [vmem:[#allocation117_spill] sm:$0xff] %v11048_v58  ;;  %v11061_v40 = vpop.eup %8334  ;;  %v4277_v54 = vsub.f32 %v11035_v1, %v11048_v58  ;;  %vm1040_vm15 = vcmp.eq.f32.partialorder %v1039_v60, 8.507059e+37  ;;  %v668_v62 = vmul.f32 %v667_v52, %v10828_v19  ;;  %v691_v43 = vmul.f32 %v10915_v41, %v690_v48  ;;  %v17535_v52 = vld [vmem:[#allocation22_spill] sm:$0xff] }
 0x1a9   : > { %5093 = vmatpush.xpose.msrb.mxu0 %v17532_v0  ;;  %v11069_v31 = vpop.eup %8336  ;;  %8344 = vrsqrt.f32 %v11064_v12  ;;  %v1043_v56 = vsel %vm1040_vm15, %v1042_v35, %v1038_v55  ;;  %v17533_v0 = vld [vmem:[#allocation69_spill] sm:$0xff]  ;;  %v682_v47 = vsel %vm681_vm12, %v10801_v14, %v680_v28  ;;  %vm669_vm1 = vcmp.eq.f32.partialorder %v10828_v19, inf }
 0x1aa   : > { %v11076_v7 = vpop.eup %8338  ;;  %v11082_v63 = vand.u32 4294901760, %v4277_v54  ;;  %v11085_v60 = vmul.f32 %v1043_v56, %v17535_v52  ;;  %4652 = vmatpush.xpose.msrb.mxu2 %v10386_v13  ;;  %v11092_v48 = vmul.f32 %v11061_v40, %v10993_v18  ;;  %vm671_vm2 = vcmp.eq.f32.partialorder %v10828_v19, 0.0 }
 0x1ab   : > { %4842 = vmatpush.xpose.msrb.mxu3 %v17533_v0  ;;  %5260 = vmatpush.xpose.msrb.mxu1 %v17533_v0  ;;  %v11088_v41 = vpop.eup %8340  ;;  %v672_v35 = vand.u32 2147483648, %v10828_v19  ;;  %vm693_vm3 = vcmp.eq.f32.partialorder %v10865_v22, inf  ;;  %v17537_v28 = vand.u32 4294901760, %v10386_v13  ;;  %v11101_v54 = vmul.f32 %v11069_v31, %v10997_v37 }
 0x1ac   : > { %17534 = vst [vmem:[#allocation69_spill] sm:$0xff] %v11082_v63  ;;  %vm695_vm4 = vcmp.eq.f32.partialorder %v10865_v22, 0.0  ;;  %4279 = vmatmul.f32.gmra.mxu2 %v11082_v63  ;;  %v3882_v55 = vmul.f32 2000.0, %v11085_v60  ;;  %v1301_v56 = vmul.f32 %v10484_v10, %v10390_v45  ;;  %v11108_v0 = vpop.eup %8342  ;;  %v685_v13 = vsel %vm683_vm13, %v684_v36, %v682_v47  ;;  %v1540_v36 = vld [vmem:[%s9504_s21 + $0xf0] sm:$0xff] }
 0x1ad   : > { %17536 = vst [vmem:[#allocation22_spill] sm:$0xff] %v11085_v60  ;;  %5097 = vmatpush.xpose.msrb.mxu0 %v17537_v28  ;;  %v670_v52 = vsel %vm669_vm1, %v10828_v19, %v668_v62  ;;  %v692_v28 = vmul.f32 %v691_v43, %v10865_v22  ;;  %v696_v33 = vand.u32 2147483648, %v10865_v22  ;;  %v711_v26 = vmul.f32 %v11076_v7, %v11023_v21  ;;  %v1539_v62 = vld [vmem:[%s9504_s21 + $0xe8] sm:$0xff]  ;;  %v17539_v43 = vld [vmem:[#allocation92_spill] sm:$0xff] }
 0x1ae   : > { %v699_v23 = vmul.f32 %v11088_v41, %v11032_v42  ;;  %v11124_v14 = vsel %vm517_vm0, %v3882_v55, 0  ;;  %vm1305_vm5 = vweird.f32 %v10390_v45  ;;  %4655 = vmatpush.xpose.msrb.mxu2 %v17539_v43  ;;  %v1302_v63 = vsub.f32 1.0, %v1301_v56 }
 0x1af   : > { %4844 = vmatpush.xpose.msrb.mxu3 %v17538_v11  ;;  %5262 = vmatpush.xpose.msrb.mxu1 %v17538_v11  ;;  %v11130_v47 = vpop.eup %8344  ;;  %v11133_v11 = vand.u32 4294901760, %v11124_v14  ;;  %vm1306_vm6 = vweird.f32 %v10484_v10  ;;  %v1309_v16 = vand.u32 2147483647, %v10390_v45  ;;  %v17541_v55 = vand.u32 4294901760, %v17539_v43 }
 0x1b0   : > { %v1076_v24 = vmul.f32 %v11108_v0, %v11021_v32  ;;  %v11141_v1 = vadd.f32 2.220446e-16, %v685_v13  ;;  %v673_v8 = vsel %vm671_vm2, %v672_v35, %v670_v52  ;;  %v1311_v58 = vand.u32 2147483648, %v10390_v45  ;;  %v1541_v13 = vld [vmem:[%s9504_s21 + $0xf8] sm:$0xff]  ;;  %vm11167_vm8 = vmor %vm1305_vm5, %vm1306_vm6 }
 0x1b1   : > { %17540 = vst [vmem:[#allocation70_spill] sm:$0xff] %v11133_v11  ;;  %5101 = vmatpush.xpose.msrb.mxu0 %v17541_v55  ;;  %v694_v56 = vsel %vm693_vm3, %v10865_v22, %v692_v28  ;;  %4492 = vmatmul.f32.vlgmr.msra.gmra.mxu1 %v11133_v11  ;;  %v1303_v59 = vmul.f32 %v10484_v10, %v1302_v63  ;;  %vm1050_vm7 = vweird.f32 %v10997_v37  ;;  %v17546_v28 = vld [vmem:[#allocation74_spill] sm:$0xff]  ;;  %vm11174_vm9 = vcmp.eq.f32.partialorder %v1309_v16, 8.507059e+37 }
 0x1b2   : > { %v11152_v43 = vsub.f32 %v1540_v36, %v10444_v49  ;;  %v11155_v55 = vsub.f32 %v1539_v62, %v10444_v49  ;;  %v712_v19 = vmul.f32 %v11076_v7, %v711_v26  ;;  %v700_v35 = vmul.f32 %v11088_v41, %v699_v23  ;;  %v17549_v62 = vld [vmem:[#allocation96_spill] sm:$0xff]  ;;  %v17556_v23 = vld [vmem:[#allocation81_spill] sm:$0xff] }
 0x1b3   : > { %v723_v52 = vmul.f32 %v11130_v47, %v11064_v12  ;;  %v1312_v49 = vor.u32 1.1754944e-38, %v1311_v58  ;;  %4846 = vmatpush.xpose.msrb.mxu3 %v17546_v28  ;;  %5264 = vmatpush.xpose.msrb.mxu1 %v17546_v28  ;;  %v1304_v26 = vadd.f32 %v10484_v10, %v1303_v59  ;;  %v1062_v58 = vsub.f32 1.0, %v11092_v48  ;;  %v8768_v28 = vld [vmem:[%s8995_s8] ss:$0 sm:$0xff]  ;;  %s14676_s8 = scalar_lea.vmem %s16887_s7, %s8979_s16  ;;  %s7880_s16 = scalar_lea.sflag [#allocation3], %s360_s17 }
 0x1b4   : > { %17542 = vst [vmem:[#allocation92_spill] sm:$0xff] %v11152_v43  ;;  %v1607_v36 = vmul.f32 %v11152_v43, %v11152_v43  ;;  %v1606_v45 = vmul.f32 %v11155_v55, %v11155_v55  ;;  %4658 = vmatpush.xpose.msrb.mxu2 %v17549_v62  ;;  %v1047_v57 = vsub.f32 1.0, %v11101_v54  ;;  %v1077_v61 = vsub.f32 1.0, %v1076_v24 }
 0x1b5   : > { %17543 = vst [vmem:[#allocation118_spill] sm:$0xff] %v11155_v55  ;;  %v11186_v9 = vsub.f32 %v1541_v13, %v8768_v28  ;;  %v17551_v59 = vand.u32 4294901760, %v17549_v62  ;;  %8346 = vrcp.f32 %v11141_v1  ;;  %v11191_v16 = vadd.f32 2.220446e-16, %v673_v8  ;;  %v17552_v62 = vld [vmem:[#allocation76_spill] sm:$0xff]  ;;  %v17553_v28 = vld [vmem:[#allocation9_spill] sm:$0xff] }
 0x1b6   : > { %v1308_v43 = vsel %vm11167_vm8, %v10484_v10, %v1304_v26  ;;  %v1699_v55 = vsel %vm517_vm0, %v1607_v36, 0.0  ;;  %v697_v48 = vsel %vm695_vm4, %v696_v33, %v694_v56  ;;  %v713_v24 = vmul.f32 0.5, %v712_v19 }
 0x1b7   : > { %17550 = vst [vmem:[#allocation74_spill] sm:$0xff] %v11186_v9  ;;  %5105 = vmatpush.xpose.msrb.mxu0 %v17551_v59  ;;  %v701_v54 = vmul.f32 0.5, %v700_v35  ;;  %v1313_v13 = vsel %vm11174_vm9, %v1312_v49, %v1308_v43  ;;  %1700 = vadd.xlane.f32.xlu1 %v1699_v55  ;;  %v724_v8 = vmul.f32 %v11130_v47, %v723_v52  ;;  %v1696_v10 = vsel %vm517_vm0, %v1606_v45, 0.0 }
 0x1b8   : > { %4848 = vmatpush.xpose.msrb.mxu3 %v17552_v62  ;;  %v11204_v59 = vmul.f32 %v1313_v13, %v17553_v28  ;;  %v1608_v63 = vmul.f32 %v11186_v9, %v11186_v9  ;;  %5266 = vmatpush.xpose.msrb.mxu1 %v17552_v62  ;;  %v11212_v22 = vmul.f32 %v11061_v40, %v1062_v58  ;;  %v17555_v55 = vand.u32 4294901760, %v10665_v50  ;;  %v11233_v58 = vpop.xlane.xlu1 %552  ;;  %v17569_v28 = vld [vmem:[#allocation24_spill] sm:$0xff] }
 0x1b9   : > { %4661 = vmatpush.xpose.msrb.mxu2 %v10665_v50  ;;  %v1048_v33 = vmul.f32 %v11069_v31, %v1047_v57  ;;  %v11216_v56 = vmul.f32 %v11108_v0, %v1077_v61  ;;  %1697 = vadd.xlane.f32.xlu0 %v1696_v10  ;;  %8348 = vrcp.f32 %v11191_v16  ;;  %v11226_v57 = vadd.f32 2.220446e-16, %v697_v48 }
 0x1ba   : > { %17554 = vst [vmem:[#allocation96_spill] sm:$0xff] %v11204_v59  ;;  %v3900_v35 = vmul.f32 2000.0, %v11204_v59  ;;  %v1702_v52 = vsel %vm517_vm0, %v1608_v63, 0.0  ;;  %v714_v61 = vsub.f32 1.5, %v713_v24  ;;  %vm717_vm10 = vcmp.eq.f32.partialorder %v11023_v21, inf  ;;  %v11243_v24 = vpop.xlane.xlu0 %549 }
 0x1bb   : > { %5109 = vmatpush.xpose.msrb.mxu0 %v17555_v55  ;;  %1703 = vadd.xlane.f32.xlu2 %v1702_v52  ;;  %v11230_v50 = vpop.eup %8346  ;;  %v702_v36 = vsub.f32 1.5, %v701_v54  ;;  %v725_v45 = vmul.f32 0.5, %v724_v8  ;;  %v11238_v48 = vsub.f32 %v11124_v14, %v11133_v11  ;;  %8350 = vrsqrt.f32 %v11233_v58 }
 0x1bc   : > { %4850 = vmatpush.xpose.msrb.mxu3 %v17556_v23  ;;  %v3969_v13 = vsel %vm517_vm0, %v3900_v35, 0  ;;  %5268 = vmatpush.xpose.msrb.mxu1 %v17556_v23  ;;  %v1049_v54 = vadd.f32 %v11069_v31, %v1048_v33  ;;  %vm1051_vm11 = vweird.f32 %v11069_v31  ;;  %v17559_v8 = vand.u32 4294901760, %v10755_v6 }
 0x1bd   : > { %17557 = vst [vmem:[#allocation76_spill] sm:$0xff] %v11238_v48  ;;  %4664 = vmatpush.xpose.msrb.mxu2 %v10755_v6  ;;  %v11245_v62 = vand.u32 4294901760, %v3969_v13  ;;  %vm705_vm12 = vcmp.eq.f32.partialorder %v11032_v42, inf  ;;  %8352 = vrsqrt.f32 %v11243_v24  ;;  %v11254_v14 = vand.u32 4294901760, %v11238_v48  ;;  %vm11258_vm13 = vmor %vm1050_vm7, %vm1051_vm11 }
 0x1be   : > { %v1054_v10 = vand.u32 2147483647, %v10997_v37  ;;  %v715_v63 = vmul.f32 %v11076_v7, %v714_v61  ;;  %vm719_vm14 = vcmp.eq.f32.partialorder %v11023_v21, 0.0  ;;  %v1053_v33 = vsel %vm11258_vm13, %v11069_v31, %v1049_v54  ;;  %v17565_v61 = vld [vmem:[#allocation84_spill] sm:$0xff] }
 0x1bf   : > { %17558 = vst [vmem:[#allocation9_spill] sm:$0xff] %v11245_v62  ;;  %5113 = vmatpush.xpose.msrb.mxu0 %v17559_v8  ;;  %v11266_v6 = vsub.f32 %v3969_v13, %v11245_v62  ;;  %v17564_v55 = vand.u32 2147483648, %v10997_v37  ;;  %4564 = vmatmul.f32.gmra.mxu3 %v11245_v62  ;;  %v11274_v52 = vpop.eup %8348  ;;  %v703_v23 = vmul.f32 %v11088_v41, %v702_v36  ;;  %v726_v8 = vsub.f32 1.5, %v725_v45  ;;  %v11292_v45 = vpop.xlane.xlu2 %555 }
 0x1c0   : > { %17560 = vst [vmem:[#allocation81_spill] sm:$0xff] %v11254_v14  ;;  %v4141_v7 = vsub.f32 %v11238_v48, %v11254_v14  ;;  %vm1055_vm15 = vcmp.eq.f32.partialorder %v1054_v10, 8.507059e+37  ;;  %4852 = vmatpush.xpose.msrb.mxu3 %v17565_v61  ;;  %5270 = vmatpush.xpose.msrb.mxu1 %v17565_v61  ;;  %v1106_v31 = vmul.f32 %v11230_v50, %v11141_v1  ;;  %8354 = vrcp.f32 %v11226_v57  ;;  %v17572_v61 = vld [vmem:[#allocation85_spill] sm:$0xff] }
 0x1c1   : > { %17563 = vst [vmem:[#allocation119_spill] sm:$0xff] %v11266_v6  ;;  %v1057_v35 = vor.u32 1.1754944e-38, %v17564_v55  ;;  %v11285_v37 = vand.u32 4294901760, %v11266_v6  ;;  %4667 = vmatpush.xpose.msrb.mxu2 %v10808_v39  ;;  %v17567_v41 = vand.u32 4294901760, %v10808_v39  ;;  %vm707_vm1 = vcmp.eq.f32.partialorder %v11032_v42, 0.0  ;;  %v11299_v55 = vpop.eup %8350 }
 0x1c2   : > { %v11294_v54 = vand.u32 4294901760, %v4141_v7  ;;  %8356 = vrsqrt.f32 %v11292_v45  ;;  %vm1065_vm2 = vweird.f32 %v10993_v18  ;;  %v704_v7 = vmul.f32 %v703_v23, %v11032_v42 }
 0x1c3   : > { %17566 = vst [vmem:[#allocation84_spill] sm:$0xff] %v11285_v37  ;;  %v1058_v13 = vsel %vm1055_vm15, %v1057_v35, %v1053_v33  ;;  %5117 = vmatpush.xpose.msrb.mxu0 %v17567_v41  ;;  %v716_v33 = vmul.f32 %v715_v63, %v11023_v21  ;;  %v4285_v39 = vsub.f32 %v11266_v6, %v11285_v37  ;;  %v17571_v35 = vld [vmem:[#allocation82_spill] sm:$0xff]  ;;  %v11307_v36 = vpop.eup %8352  ;;  %vm1321_vm4 = vweird.f32 %v17572_v61 }
 0x1c4   : > { %17568 = vst [vmem:[#allocation120_spill] sm:$0xff] %v11294_v54  ;;  %v11297_v10 = vmul.f32 %v1058_v13, %v17569_v28  ;;  %v1316_v41 = vmul.f32 %v17572_v61, %v17571_v35  ;;  %v727_v13 = vmul.f32 %v11130_v47, %v726_v8  ;;  %4143 = vmatmul.f32.vlgmr.msra.gmra.mxu0 %v11294_v54  ;;  %vm1320_vm3 = vweird.f32 %v17571_v35  ;;  %v17573_v28 = vld [vmem:[#allocation91_spill] sm:$0xff] }
 0x1c5   : > { %4854 = vmatpush.xpose.msrb.mxu3 %v17573_v28  ;;  %v11316_v19 = vand.u32 4294901760, %v4285_v39  ;;  %v1324_v43 = vand.u32 2147483647, %v17571_v35  ;;  %5272 = vmatpush.xpose.msrb.mxu1 %v17573_v28  ;;  %v1107_v23 = vsub.f32 1.0, %v1106_v31  ;;  %v747_v47 = vmul.f32 %v11299_v55, %v11233_v58  ;;  %vm11344_vm6 = vmor %vm1320_vm3, %vm1321_vm4 }
 0x1c6   : > { %17570 = vst [vmem:[#allocation24_spill] sm:$0xff] %v11297_v10  ;;  %v3883_v63 = vmul.f32 2000.0, %v11297_v10  ;;  %v1317_v49 = vsub.f32 1.0, %v1316_v41  ;;  %v1326_v26 = vand.u32 2147483648, %v17571_v35  ;;  %v11325_v9 = vpop.eup %8354  ;;  %v718_v39 = vsel %vm717_vm10, %v11023_v21, %v716_v33 }
 0x1c7   : > { %17574 = vst [vmem:[#allocation82_spill] sm:$0xff] %v11316_v19  ;;  %v735_v41 = vmul.f32 %v11307_v36, %v11243_v24  ;;  %4287 = vmatmul.f32.gmra.mxu2 %v11316_v19  ;;  %v708_v59 = vand.u32 2147483648, %v11032_v42  ;;  %vm729_vm5 = vcmp.eq.f32.partialorder %v11064_v12, inf  ;;  %v728_v62 = vmul.f32 %v727_v13, %v11064_v12 }
 0x1c8   : > { %v3918_v8 = vsel %vm517_vm0, %v3883_v63, 0  ;;  %v1318_v31 = vmul.f32 %v17572_v61, %v1317_v49  ;;  %v1091_v63 = vmul.f32 %v11274_v52, %v11191_v16  ;;  %v1327_v19 = vor.u32 1.1754944e-38, %v1326_v26  ;;  %v11349_v54 = vpop.eup %8356 }
 0x1c9   : > { %v11333_v28 = vand.u32 4294901760, %v3918_v8  ;;  %4856 = vmatpush.xpose.msrb.mxu3 %v10554_v29  ;;  %v706_v49 = vsel %vm705_vm12, %v11032_v42, %v704_v7  ;;  %vm1325_vm7 = vcmp.eq.f32.partialorder %v1324_v43, 8.507059e+37  ;;  %v11358_v35 = vmul.f32 %v11230_v50, %v1107_v23  ;;  %5274 = vmatpush.xpose.msrb.mxu1 %v10554_v29 }
 0x1ca   : > { %v1319_v6 = vadd.f32 %v17572_v61, %v1318_v31  ;;  %v17578_v26 = vand.u32 2147483648, %v11023_v21  ;;  %vm731_vm8 = vcmp.eq.f32.partialorder %v11064_v12, 0.0  ;;  %v748_v11 = vmul.f32 %v11299_v55, %v747_v47 }
 0x1cb   : > { %17575 = vst [vmem:[#allocation85_spill] sm:$0xff] %v11333_v28  ;;  %4496 = vmatmul.f32.gmra.mxu1 %v11333_v28  ;;  %v1121_v7 = vmul.f32 %v11325_v9, %v11226_v57  ;;  %v732_v13 = vand.u32 2147483648, %v11064_v12  ;;  %v736_v43 = vmul.f32 %v11307_v36, %v735_v41  ;;  %v1092_v31 = vsub.f32 1.0, %v1091_v63 }
 0x1cc   : > { %v721_v37 = vsel %vm719_vm14, %v17578_v26, %v718_v39  ;;  %v1323_v23 = vsel %vm11344_vm6, %v17572_v61, %v1319_v6  ;;  %v709_v21 = vsel %vm707_vm1, %v708_v59, %v706_v49  ;;  %v759_v47 = vmul.f32 %v11349_v54, %v11292_v45  ;;  %v17579_v26 = vld [vmem:[#allocation8_spill] sm:$0xff] }
 0x1cd   : > { %v1328_v39 = vsel %vm1325_vm7, %v1327_v19, %v1323_v23  ;;  %4858 = vmatpush.xpose.msrb.mxu3 %v10646_v15  ;;  %v11379_v29 = vadd.f32 2.220446e-16, %v721_v37  ;;  %v730_v41 = vsel %vm729_vm5, %v11064_v12, %v728_v62  ;;  %v11388_v6 = vsub.f32 %v3918_v8, %v11333_v28  ;;  %5276 = vmatpush.xpose.msrb.mxu1 %v10646_v15 }
 0x1ce   : > { %v11385_v48 = vmul.f32 %v1328_v39, %v17579_v26  ;;  %v749_v42 = vmul.f32 0.5, %v748_v11  ;;  %v1064_v59 = vadd.f32 %v11061_v40, %v11212_v22  ;;  %vm1066_vm9 = vweird.f32 %v11061_v40  ;;  %v11405_v22 = vpop.xlane.xlu1 %561 }
 0x1cf   : > { %17581 = vst [vmem:[#allocation8_spill] sm:$0xff] %v11388_v6  ;;  %v1069_v19 = vand.u32 2147483647, %v10993_v18  ;;  %v1122_v37 = vsub.f32 1.0, %v1121_v7  ;;  %v11395_v61 = vadd.f32 2.220446e-16, %v709_v21  ;;  %v737_v62 = vmul.f32 0.5, %v736_v43  ;;  %vm11400_vm10 = vmor %vm1065_vm2, %vm1066_vm9 }
 0x1d0   : > { %17580 = vst [vmem:[#allocation91_spill] sm:$0xff] %v11385_v48  ;;  %v3901_v63 = vmul.f32 2000.0, %v11385_v48  ;;  %v760_v11 = vmul.f32 %v11349_v54, %v759_v47  ;;  %v11408_v33 = vand.u32 4294901760, %v11388_v6  ;;  %v1068_v15 = vsel %vm11400_vm10, %v11061_v40, %v1064_v59 }
 0x1d1   : > { %vm1070_vm11 = vcmp.eq.f32.partialorder %v1069_v19, 8.507059e+37  ;;  %4860 = vmatpush.xpose.msrb.mxu3 %v10730_v3  ;;  %v733_v49 = vsel %vm731_vm8, %v732_v13, %v730_v41  ;;  %8358 = vrsqrt.f32 %v11405_v22  ;;  %v17585_v43 = vand.u32 2147483648, %v10993_v18  ;;  %5278 = vmatpush.xpose.msrb.mxu1 %v10730_v3  ;;  %v11443_v19 = vpop.xlane.xlu0 %558 }
 0x1d2   : > { %17584 = vst [vmem:[#allocation121_spill] sm:$0xff] %v11408_v33  ;;  %v3972_v7 = vsel %vm517_vm0, %v3901_v63, 0  ;;  %8360 = vrcp.f32 %v11379_v29  ;;  %v750_v21 = vsub.f32 1.5, %v749_v42  ;;  %v4149_v40 = vsub.f32 %v11388_v6, %v11408_v33 }
 0x1d3   : > { %v1072_v23 = vor.u32 1.1754944e-38, %v17585_v43  ;;  %v11421_v47 = vand.u32 4294901760, %v3972_v7  ;;  %v11427_v12 = vmul.f32 %v11274_v52, %v1092_v31  ;;  %v11430_v13 = vmul.f32 %v11325_v9, %v1122_v37  ;;  %v17589_v37 = vld [vmem:[#allocation23_spill] sm:$0xff]  ;;  %v17593_v43 = vld [vmem:[#allocation88_spill] sm:$0xff] }
 0x1d4   : > { %v738_v39 = vsub.f32 1.5, %v737_v62  ;;  %v11432_v18 = vadd.f32 2.220446e-16, %v733_v49  ;;  %v761_v26 = vmul.f32 0.5, %v760_v11  ;;  %v11437_v59 = vand.u32 4294901760, %v4149_v40 }
 0x1d5   : > { %17586 = vst [vmem:[#allocation122_spill] sm:$0xff] %v11421_v47  ;;  %v1073_v41 = vsel %vm1070_vm11, %v1072_v23, %v1068_v15  ;;  %v11435_v42 = vsub.f32 %v3972_v7, %v11421_v47  ;;  %4568 = vmatmul.f32.gmra.mxu3 %v11421_v47  ;;  %8362 = vrcp.f32 %v11395_v61  ;;  %v751_v63 = vmul.f32 %v11299_v55, %v750_v21  ;;  %v17592_v7 = vld [vmem:[#allocation83_spill] sm:$0xff] }
 0x1d6   : > { %17588 = vst [vmem:[#allocation124_spill] sm:$0xff] %v11437_v59  ;;  %v11446_v62 = vmul.f32 %v1073_v41, %v17589_v37  ;;  %vm753_vm12 = vcmp.eq.f32.partialorder %v11233_v58, inf  ;;  %8364 = vrsqrt.f32 %v11443_v19  ;;  %4151 = vmatmul.f32.gmra.mxu0 %v11437_v59  ;;  %vm755_vm13 = vcmp.eq.f32.partialorder %v11233_v58, 0.0 }
 0x1d7   : > { %17587 = vst [vmem:[#allocation123_spill] sm:$0xff] %v11435_v42  ;;  %v11452_v8 = vand.u32 4294901760, %v11435_v42  ;;  %v11455_v11 = vpop.eup %8358  ;;  %v739_v15 = vmul.f32 %v11307_v36, %v738_v39  ;;  %v1331_v55 = vmul.f32 %v17593_v43, %v17592_v7  ;;  %vm1080_vm14 = vweird.f32 %v11021_v32 }
 0x1d8   : > { %17590 = vst [vmem:[#allocation23_spill] sm:$0xff] %v11446_v62  ;;  %v3884_v49 = vmul.f32 2000.0, %v11446_v62  ;;  %v11462_v23 = vpop.eup %8360  ;;  %8366 = vrcp.f32 %v11432_v18  ;;  %v762_v21 = vsub.f32 1.5, %v761_v26  ;;  %vm1335_vm15 = vweird.f32 %v17592_v7 }
 0x1d9   : > { %17591 = vst [vmem:[#allocation125_spill] sm:$0xff] %v11452_v8  ;;  %v4293_v40 = vsub.f32 %v11435_v42, %v11452_v8  ;;  %v1332_v36 = vsub.f32 1.0, %v1331_v55  ;;  %vm1336_vm1 = vweird.f32 %v17593_v43  ;;  %v1339_v39 = vand.u32 2147483647, %v17592_v7 }
 0x1da   : > { %v3921_v41 = vsel %vm517_vm0, %v3884_v49, 0  ;;  %v752_v37 = vmul.f32 %v751_v63, %v11233_v58  ;;  %v783_v3 = vmul.f32 %v11455_v11, %v11405_v22  ;;  %v11483_v47 = vmul.f32 %v11462_v23, %v11379_v29  ;;  %vm11500_vm4 = vmor %vm1335_vm15, %vm1336_vm1 }
 0x1db   : > { %v11475_v31 = vand.u32 4294901760, %v4293_v40  ;;  %v11477_v26 = vand.u32 4294901760, %v3921_v41  ;;  %v11479_v59 = vpop.eup %8362  ;;  %v740_v49 = vmul.f32 %v739_v15, %v11243_v24  ;;  %v1333_v55 = vmul.f32 %v17593_v43, %v1332_v36 }
 0x1dc   : > { %v1341_v42 = vand.u32 2147483648, %v17592_v7  ;;  %v11488_v63 = vpop.eup %8364  ;;  %v756_v8 = vand.u32 2147483648, %v11233_v58  ;;  %vm741_vm2 = vcmp.eq.f32.partialorder %v11243_v24, inf  ;;  %vm743_vm3 = vcmp.eq.f32.partialorder %v11243_v24, 0.0 }
 0x1dd   : > { %17594 = vst [vmem:[#allocation83_spill] sm:$0xff] %v11475_v31  ;;  %v763_v40 = vmul.f32 %v11349_v54, %v762_v21  ;;  %4295 = vmatmul.f32.gmra.mxu2 %v11475_v31  ;;  %4500 = vmatmul.f32.gmra.mxu1 %v11477_v26  ;;  %v744_v36 = vand.u32 2147483648, %v11243_v24  ;;  %v1334_v48 = vadd.f32 %v17593_v43, %v1333_v55  ;;  %vm1340_vm5 = vcmp.eq.f32.partialorder %v1339_v39, 8.507059e+37  ;;  %v11521_v39 = vpop.xlane.xlu2 %564 }
 0x1de   : > { %17595 = vst [vmem:[#allocation88_spill] sm:$0xff] %v11477_v26  ;;  %v1342_v28 = vor.u32 1.1754944e-38, %v1341_v42  ;;  %v11506_v6 = vpop.eup %8366  ;;  %v11510_v54 = vmul.f32 %v11479_v59, %v11395_v61  ;;  %v754_v7 = vsel %vm753_vm12, %v11233_v58, %v752_v37  ;;  %vm765_vm6 = vcmp.eq.f32.partialorder %v11292_v45, inf }
 0x1df   : > { %v784_v21 = vmul.f32 %v11455_v11, %v783_v3  ;;  %v742_v31 = vsel %vm741_vm2, %v11243_v24, %v740_v49  ;;  %vm767_vm7 = vcmp.eq.f32.partialorder %v11292_v45, 0.0  ;;  %v771_v42 = vmul.f32 %v11488_v63, %v11443_v19 }
 0x1e0   : > { %v1338_v55 = vsel %vm11500_vm4, %v17593_v43, %v1334_v48  ;;  %v764_v33 = vmul.f32 %v763_v40, %v11292_v45  ;;  %v768_v37 = vand.u32 2147483648, %v11292_v45  ;;  %8368 = vrsqrt.f32 %v11521_v39 }
 0x1e1   : > { %v1343_v3 = vsel %vm1340_vm5, %v1342_v28, %v1338_v55  ;;  %v11531_v49 = vmul.f32 %v11506_v6, %v11432_v18  ;;  %v757_v14 = vsel %vm755_vm13, %v756_v8, %v754_v7  ;;  %v11539_v15 = vsub.f32 %v3921_v41, %v11477_v26 }
 0x1e2   : > { %v11536_v20 = vmul.f32 %v1343_v3, %v17598_v46  ;;  %v745_v48 = vsel %vm743_vm3, %v744_v36, %v742_v31  ;;  %v785_v43 = vmul.f32 0.5, %v784_v21  ;;  %v1079_v28 = vadd.f32 %v11108_v0, %v11216_v56 }
 0x1e3   : > { %17600 = vst [vmem:[#allocation126_spill] sm:$0xff] %v11539_v15  ;;  %vm1081_vm8 = vweird.f32 %v11108_v0  ;;  %v772_v40 = vmul.f32 %v11488_v63, %v771_v42  ;;  %v11549_v8 = vand.u32 4294901760, %v11539_v15  ;;  %v1084_v46 = vand.u32 2147483647, %v11021_v32 }
 0x1e4   : > { %17599 = vst [vmem:[#allocation10_spill] sm:$0xff] %v11536_v20  ;;  %v3902_v58 = vmul.f32 2000.0, %v11536_v20  ;;  %vm1082_vm9 = vmor %vm1080_vm14, %vm1081_vm8  ;;  %v11554_v24 = vadd.f32 2.220446e-16, %v757_v14  ;;  %v766_v56 = vsel %vm765_vm6, %v11292_v45, %v764_v33  ;;  %v17603_v41 = vand.u32 2147483648, %v11021_v32 }
 0x1e5   : > { %17601 = vst [vmem:[#allocation127_spill] sm:$0xff] %v11549_v8  ;;  %v1083_v31 = vsel %vm1082_vm9, %v11108_v0, %v1079_v28  ;;  %v11562_v7 = vadd.f32 2.220446e-16, %v745_v48  ;;  %v4157_v42 = vsub.f32 %v11539_v15, %v11549_v8  ;;  %vm1085_vm10 = vcmp.eq.f32.partialorder %v1084_v46, 8.507059e+37  ;;  %v11670_v15 = vpop.xlane.xlu2 %2978 }
 0x1e6   : > { %17602 = vst [vmem:[#allocation128_spill] sm:$0xff] %v11554_v24  ;;  %v1087_v36 = vor.u32 1.1754944e-38, %v17603_v41  ;;  %v3975_v21 = vsel %vm517_vm0, %v3902_v58, 0  ;;  %v11567_v55 = vpop.eup %8368  ;;  %v786_v3 = vsub.f32 1.5, %v785_v43  ;;  %v1152_v0 = vsub.f32 1.0, %v11483_v47  ;;  %v17607_v41 = vld [vmem:[#allocation25_spill] sm:$0xff] }
 0x1e7   : > { %v11570_v20 = vand.u32 4294901760, %v3975_v21  ;;  %v769_v32 = vsel %vm767_vm7, %v768_v37, %v766_v56  ;;  %v773_v48 = vmul.f32 0.5, %v772_v40  ;;  %v11575_v28 = vand.u32 4294901760, %v4157_v42 }
 0x1e8   : > { %v1088_v33 = vsel %vm1085_vm10, %v1087_v36, %v1083_v31  ;;  %v1137_v58 = vsub.f32 1.0, %v11510_v54  ;;  %8370 = vrcp.f32 %v11554_v24  ;;  %v1167_v47 = vsub.f32 1.0, %v11531_v49  ;;  %v17609_v54 = vld [vmem:[#allocation95_spill] sm:$0xff]  ;;  %v11596_v31 = vpop.xlane.xlu1 %2981 }
 0x1e9   : > { %17604 = vst [vmem:[#allocation129_spill] sm:$0xff] %v11570_v20  ;;  %v11580_v46 = vsub.f32 %v3975_v21, %v11570_v20  ;;  %v11583_v43 = vmul.f32 %v1088_v33, %v17607_v41  ;;  %4572 = vmatmul.f32.gmra.mxu3 %v11570_v20  ;;  %8372 = vrcp.f32 %v11562_v7  ;;  %v795_v45 = vmul.f32 %v11567_v55, %v11521_v39  ;;  %v11605_v33 = vpop.xlane.xlu0 %2984 }
 0x1ea   : > { %17605 = vst [vmem:[#allocation130_spill] sm:$0xff] %v11575_v28  ;;  %4159 = vmatmul.f32.gmra.mxu0 %v11575_v28  ;;  %v1346_v37 = vmul.f32 %v10608_v2, %v17609_v54  ;;  %v11593_v40 = vadd.f32 2.220446e-16, %v769_v32  ;;  %v787_v56 = vmul.f32 %v11455_v11, %v786_v3  ;;  %v774_v21 = vsub.f32 1.5, %v773_v48 }
 0x1eb   : > { %17606 = vst [vmem:[#allocation131_spill] sm:$0xff] %v11580_v46  ;;  %v11599_v36 = vand.u32 4294901760, %v11580_v46  ;;  %v3885_v49 = vmul.f32 2000.0, %v11583_v43  ;;  %8374 = vrsqrt.f32 %v11596_v31  ;;  %vm1350_vm11 = vweird.f32 %v17609_v54 }
 0x1ec   : > { %17608 = vst [vmem:[#allocation25_spill] sm:$0xff] %v11583_v43  ;;  %v1347_v42 = vsub.f32 1.0, %v1346_v37  ;;  %vm1095_vm12 = vweird.f32 %v11191_v16  ;;  %vm1351_vm13 = vweird.f32 %v10608_v2  ;;  %v1354_v32 = vand.u32 2147483647, %v17609_v54 }
 0x1ed   : > { %17610 = vst [vmem:[#allocation95_spill] sm:$0xff] %v11599_v36  ;;  %v4301_v11 = vsub.f32 %v11580_v46, %v11599_v36  ;;  %v3924_v3 = vsel %vm517_vm0, %v3885_v49, 0  ;;  %v11613_v48 = vmul.f32 %v11462_v23, %v1152_v0  ;;  %v796_v41 = vmul.f32 %v11567_v55, %v795_v45  ;;  %vm11641_vm15 = vmor %vm1350_vm11, %vm1351_vm13 }
 0x1ee   : > { %8376 = vrsqrt.f32 %v11605_v33  ;;  %v11617_v37 = vand.u32 4294901760, %v3924_v3  ;;  %v11619_v14 = vpop.eup %8370  ;;  %v1348_v49 = vmul.f32 %v10608_v2, %v1347_v42  ;;  %v1356_v20 = vand.u32 2147483648, %v17609_v54 }
 0x1ef   : > { %8378 = vrcp.f32 %v11593_v40  ;;  %v11622_v28 = vand.u32 4294901760, %v4301_v11  ;;  %v11626_v46 = vpop.eup %8372  ;;  %v11629_v0 = vmul.f32 %v11479_v59, %v1137_v58  ;;  %v11632_v45 = vmul.f32 %v11506_v6, %v1167_v47 }
 0x1f0   : > { %17611 = vst [vmem:[#allocation132_spill] sm:$0xff] %v11617_v37  ;;  %v788_v36 = vmul.f32 %v787_v56, %v11405_v22  ;;  %vm789_vm14 = vcmp.eq.f32.partialorder %v11405_v22, inf  ;;  %4504 = vmatmul.f32.gmra.mxu1 %v11617_v37  ;;  %v775_v58 = vmul.f32 %v11488_v63, %v774_v21  ;;  %v1349_v47 = vadd.f32 %v10608_v2, %v1348_v49 }
 0x1f1   : > { %17612 = vst [vmem:[#allocation133_spill] sm:$0xff] %v11622_v28  ;;  %4303 = vmatmul.f32.gmra.mxu2 %v11622_v28  ;;  %vm11648_vm1 = vcmp.eq.f32.partialorder %v1354_v32, 8.507059e+37  ;;  %v1357_v11 = vor.u32 1.1754944e-38, %v1356_v20  ;;  %v11652_v26 = vpop.eup %8374  ;;  %vm791_vm2 = vcmp.eq.f32.partialorder %v11405_v22, 0.0  ;;  %v792_v54 = vand.u32 2147483648, %v11405_v22 }
 0x1f2   : > { %v797_v8 = vmul.f32 0.5, %v796_v41  ;;  %vm777_vm3 = vcmp.eq.f32.partialorder %v11443_v19, inf  ;;  %vm779_vm4 = vcmp.eq.f32.partialorder %v11443_v19, 0.0  ;;  %v780_v63 = vand.u32 2147483648, %v11443_v19 }
 0x1f3   : > { %v1353_v21 = vsel %vm11641_vm15, %v10608_v2, %v1349_v47  ;;  %v790_v49 = vsel %vm789_vm14, %v11405_v22, %v788_v36  ;;  %v776_v42 = vmul.f32 %v775_v58, %v11443_v19  ;;  %v3347_v2 = vmul.f32 %v11652_v26, %v11596_v31  ;;  %v17617_v47 = vld [vmem:[#allocation12_spill] sm:$0xff] }
 0x1f4   : > { %v11663_v20 = vpop.eup %8376  ;;  %v1358_v28 = vsel %vm11648_vm1, %v1357_v11, %v1353_v21  ;;  %8380 = vrsqrt.f32 %v11670_v15  ;;  %v1196_v36 = vmul.f32 %v11619_v14, %v11554_v24  ;;  %v798_v41 = vsub.f32 1.5, %v797_v8 }
 0x1f5   : > { %v11674_v43 = vpop.eup %8378  ;;  %v11681_v32 = vmul.f32 %v1358_v28, %v17617_v47  ;;  %v11686_v62 = vsub.f32 %v3924_v3, %v11617_v37  ;;  %v1094_v56 = vadd.f32 %v11274_v52, %v11427_v12  ;;  %v3359_v58 = vmul.f32 %v11663_v20, %v11605_v33 }
 0x1f6   : > { %vm1096_vm5 = vweird.f32 %v11274_v52  ;;  %v1099_v28 = vand.u32 2147483647, %v11191_v16  ;;  %v1181_v21 = vmul.f32 %v11626_v46, %v11562_v7  ;;  %v11699_v8 = vmul.f32 %v11674_v43, %v11593_v40 }
 0x1f7   : > { %17618 = vst [vmem:[#allocation12_spill] sm:$0xff] %v11681_v32  ;;  %v3903_v11 = vmul.f32 2000.0, %v11681_v32  ;;  %v793_v3 = vsel %vm791_vm2, %v792_v54, %v790_v49  ;;  %v11704_v12 = vand.u32 4294901760, %v11686_v62  ;;  %vm11708_vm6 = vmor %vm1095_vm12, %vm1096_vm5  ;;  %v778_v32 = vsel %vm777_vm3, %v11443_v19, %v776_v42 }
 0x1f8   : > { %17619 = vst [vmem:[#allocation134_spill] sm:$0xff] %v11686_v62  ;;  %vm801_vm7 = vcmp.eq.f32.partialorder %v11521_v39, inf  ;;  %v3348_v37 = vmul.f32 %v11652_v26, %v3347_v2  ;;  %v17623_v54 = vand.u32 2147483648, %v11191_v16  ;;  %v1098_v42 = vsel %vm11708_vm6, %v11274_v52, %v1094_v56 }
 0x1f9   : > { %17620 = vst [vmem:[#allocation135_spill] sm:$0xff] %v11704_v12  ;;  %v3978_v22 = vsel %vm517_vm0, %v3903_v11, 0  ;;  %v4165_v25 = vsub.f32 %v11686_v62, %v11704_v12  ;;  %v11730_v24 = vadd.f32 2.220446e-16, %v793_v3  ;;  %v799_v2 = vmul.f32 %v11567_v55, %v798_v41  ;;  %v11759_v3 = vpop.xlane.xlu1 %2972 }
 0x1fa   : > { %v1102_v49 = vor.u32 1.1754944e-38, %v17623_v54  ;;  %v11721_v4 = vand.u32 4294901760, %v3978_v22  ;;  %v11728_v60 = vpop.eup %8380  ;;  %v3360_v16 = vmul.f32 %v11663_v20, %v3359_v58  ;;  %vm1100_vm8 = vcmp.eq.f32.partialorder %v1099_v28, 8.507059e+37  ;;  %v17632_v58 = vld [vmem:[#allocation94_spill] sm:$0xff] }
 0x1fb   : > { %17625 = vst [vmem:[#allocation137_spill] sm:$0xff] %v11730_v24  ;;  %v1197_v11 = vsub.f32 1.0, %v1196_v36  ;;  %v781_v54 = vsel %vm779_vm4, %v780_v63, %v778_v32  ;;  %vm803_vm9 = vcmp.eq.f32.partialorder %v11521_v39, 0.0  ;;  %v11740_v47 = vand.u32 4294901760, %v4165_v25  ;;  %v17629_v63 = vld [vmem:[#allocation27_spill] sm:$0xff]  ;;  %v17631_v25 = vld [vmem:[#allocation89_spill] sm:$0xff] }
 0x1fc   : > { %17624 = vst [vmem:[#allocation136_spill] sm:$0xff] %v11721_v4  ;;  %v11738_v10 = vsub.f32 %v3978_v22, %v11721_v4  ;;  %4576 = vmatmul.f32.gmra.mxu3 %v11721_v4  ;;  %v1182_v52 = vsub.f32 1.0, %v1181_v21  ;;  %v1212_v56 = vsub.f32 1.0, %v11699_v8  ;;  %v3349_v55 = vmul.f32 0.5, %v3348_v37 }
 0x1fd   : > { %17627 = vst [vmem:[#allocation139_spill] sm:$0xff] %v11740_v47  ;;  %v1103_v41 = vsel %vm1100_vm8, %v1102_v49, %v1098_v42  ;;  %v3335_v36 = vmul.f32 %v11728_v60, %v11670_v15  ;;  %4167 = vmatmul.f32.gmra.mxu0 %v11740_v47  ;;  %v1361_v28 = vmul.f32 %v17632_v58, %v17631_v25  ;;  %8382 = vrcp.f32 %v11730_v24 }
 0x1fe   : > { %17626 = vst [vmem:[#allocation138_spill] sm:$0xff] %v11738_v10  ;;  %v11747_v19 = vand.u32 4294901760, %v11738_v10  ;;  %v11751_v32 = vmul.f32 %v1103_v41, %v17629_v63  ;;  %v11756_v21 = vadd.f32 2.220446e-16, %v781_v54  ;;  %v800_v37 = vmul.f32 %v799_v2, %v11521_v39 }
 0x1ff   : > { %v3361_v8 = vmul.f32 0.5, %v3360_v16  ;;  %vm1110_vm10 = vweird.f32 %v11141_v1  ;;  %8384 = vrsqrt.f32 %v11759_v3  ;;  %v1362_v42 = vsub.f32 1.0, %v1361_v28 }
 0x200   : > { %17628 = vst [vmem:[#allocation140_spill] sm:$0xff] %v11747_v19  ;;  %v4309_v22 = vsub.f32 %v11738_v10, %v11747_v19  ;;  %v3886_v49 = vmul.f32 2000.0, %v11751_v32  ;;  %vm1365_vm11 = vweird.f32 %v17631_v25  ;;  %vm1366_vm12 = vweird.f32 %v17632_v58 }
 0x201   : > { %17630 = vst [vmem:[#allocation27_spill] sm:$0xff] %v11751_v32  ;;  %v1369_v54 = vand.u32 2147483647, %v17631_v25  ;;  %v1371_v2 = vand.u32 2147483648, %v17631_v25  ;;  %v3350_v16 = vsub.f32 1.5, %v3349_v55  ;;  %v3336_v41 = vmul.f32 %v11728_v60, %v3335_v36  ;;  %vm11792_vm13 = vmor %vm1365_vm11, %vm1366_vm12 }
 0x202   : > { %v11771_v63 = vand.u32 4294901760, %v4309_v22  ;;  %v3927_v47 = vsel %vm517_vm0, %v3886_v49, 0  ;;  %v11775_v4 = vmul.f32 %v11619_v14, %v1197_v11  ;;  %8386 = vrcp.f32 %v11756_v21 }
 0x203   : > { %v11778_v28 = vand.u32 4294901760, %v3927_v47  ;;  %v1363_v10 = vmul.f32 %v17632_v58, %v1362_v42  ;;  %v11782_v19 = vmul.f32 %v11626_v46, %v1182_v52  ;;  %v802_v55 = vsel %vm801_vm7, %v11521_v39, %v800_v37  ;;  %v11796_v49 = vpop.eup %8382  ;;  %v11802_v37 = vpop.xlane.xlu0 %2975 }
 0x204   : > { %17633 = vst [vmem:[#allocation89_spill] sm:$0xff] %v11771_v63  ;;  %v3362_v36 = vsub.f32 1.5, %v3361_v8  ;;  %4311 = vmatmul.f32.gmra.mxu2 %v11771_v63  ;;  %v1372_v22 = vor.u32 1.1754944e-38, %v1371_v2  ;;  %v11799_v52 = vmul.f32 %v11674_v43, %v1212_v56  ;;  %vm1370_vm14 = vcmp.eq.f32.partialorder %v1369_v54, 8.507059e+37 }
 0x205   : > { %17634 = vst [vmem:[#allocation94_spill] sm:$0xff] %v11778_v28  ;;  %4508 = vmatmul.f32.gmra.mxu1 %v11778_v28  ;;  %v1364_v8 = vadd.f32 %v17632_v58, %v1363_v10  ;;  %v11806_v25 = vpop.eup %8384  ;;  %v3351_v63 = vmul.f32 %v11652_v26, %v3350_v16  ;;  %vm3353_vm15 = vcmp.eq.f32.partialorder %v11596_v31, inf  ;;  %v3337_v2 = vmul.f32 0.5, %v3336_v41 }
 0x206   : > { %17637 = vst [vmem:[#allocation141_spill] sm:$0xff] %v11796_v49  ;;  %8388 = vrsqrt.f32 %v11802_v37  ;;  %v17638_v42 = vand.u32 2147483648, %v11521_v39  ;;  %vm3355_vm1 = vcmp.eq.f32.partialorder %v11596_v31, 0.0  ;;  %v3356_v10 = vand.u32 2147483648, %v11596_v31 }
 0x207   : > { %v1368_v26 = vsel %vm11792_vm13, %v17632_v58, %v1364_v8  ;;  %v11823_v54 = vmul.f32 %v11796_v49, %v11730_v24  ;;  %v3363_v16 = vmul.f32 %v11663_v20, %v3362_v36  ;;  %vm3365_vm2 = vcmp.eq.f32.partialorder %v11605_v33, inf  ;;  %v11869_v24 = vpop.xlane.xlu2 %2969 }
 0x208   : > { %v805_v62 = vsel %vm803_vm9, %v17638_v42, %v802_v55  ;;  %v1373_v41 = vsel %vm1370_vm14, %v1372_v22, %v1368_v26  ;;  %v11827_v56 = vpop.eup %8386  ;;  %v3311_v39 = vmul.f32 %v11806_v25, %v11759_v3  ;;  %v17640_v55 = vld [vmem:[#allocation11_spill] sm:$0xff]  ;;  %v11835_v11 = vsub.f32 %v3927_v47, %v11778_v28 }
 0x209   : > { %17639 = vst [vmem:[#allocation142_spill] sm:$0xff] %v11827_v56  ;;  %v11832_v42 = vmul.f32 %v1373_v41, %v17640_v55  ;;  %v1109_v58 = vadd.f32 %v11230_v50, %v11358_v35  ;;  %v11839_v8 = vadd.f32 2.220446e-16, %v805_v62  ;;  %v3352_v20 = vmul.f32 %v3351_v63, %v11596_v31 }
 0x20a   : > { %17642 = vst [vmem:[#allocation143_spill] sm:$0xff] %v11835_v11  ;;  %v3338_v36 = vsub.f32 1.5, %v3337_v2  ;;  %vm1111_vm3 = vweird.f32 %v11230_v50  ;;  %vm3367_vm4 = vcmp.eq.f32.partialorder %v11605_v33, 0.0  ;;  %v11846_v26 = vand.u32 4294901760, %v11835_v11 }
 0x20b   : > { %17641 = vst [vmem:[#allocation11_spill] sm:$0xff] %v11832_v42  ;;  %v3904_v22 = vmul.f32 2000.0, %v11832_v42  ;;  %vm11850_vm5 = vmor %vm1110_vm10, %vm1111_vm3  ;;  %v1114_v35 = vand.u32 2147483647, %v11141_v1  ;;  %v17647_v62 = vand.u32 2147483648, %v11141_v1  ;;  %v11861_v41 = vmul.f32 %v11827_v56, %v11756_v21 }
 0x20c   : > { %17643 = vst [vmem:[#allocation144_spill] sm:$0xff] %v11839_v8  ;;  %v11857_v2 = vpop.eup %8388  ;;  %v3364_v55 = vmul.f32 %v3363_v16, %v11605_v33  ;;  %v3368_v42 = vand.u32 2147483648, %v11605_v33  ;;  %v1113_v28 = vsel %vm11850_vm5, %v11230_v50, %v1109_v58  ;;  %v3312_v12 = vmul.f32 %v11806_v25, %v3311_v39 }
 0x20d   : > { %17644 = vst [vmem:[#allocation145_spill] sm:$0xff] %v11846_v26  ;;  %v1117_v63 = vor.u32 1.1754944e-38, %v17647_v62  ;;  %v3981_v1 = vsel %vm517_vm0, %v3904_v22, 0  ;;  %v4173_v62 = vsub.f32 %v11835_v11, %v11846_v26  ;;  %vm1115_vm6 = vcmp.eq.f32.partialorder %v1114_v35, 8.507059e+37  ;;  %v17650_v22 = vld [vmem:[#allocation26_spill] sm:$0xff] }
 0x20e   : > { %v3354_v16 = vsel %vm3353_vm15, %v11596_v31, %v3352_v20  ;;  %8390 = vrsqrt.f32 %v11869_v24  ;;  %v11878_v49 = vand.u32 4294901760, %v3981_v1  ;;  %v3339_v50 = vmul.f32 %v11728_v60, %v3338_v36 }
 0x20f   : > { %v1118_v47 = vsel %vm1115_vm6, %v1117_v63, %v1113_v28  ;;  %v3323_v39 = vmul.f32 %v11857_v2, %v11802_v37  ;;  %v11883_v58 = vand.u32 4294901760, %v4173_v62  ;;  %8392 = vrcp.f32 %v11839_v8 }
 0x210   : > { %17648 = vst [vmem:[#allocation146_spill] sm:$0xff] %v11878_v49  ;;  %v11886_v32 = vmul.f32 %v1118_v47, %v17650_v22  ;;  %v11892_v11 = vsub.f32 %v3981_v1, %v11878_v49  ;;  %4580 = vmatmul.f32.gmra.mxu3 %v11878_v49  ;;  %vm3341_vm7 = vcmp.eq.f32.partialorder %v11670_v15, inf  ;;  %v3344_v60 = vand.u32 2147483648, %v11670_v15  ;;  %v17654_v47 = vld [vmem:[#allocation93_spill] sm:$0xff] }
 0x211   : > { %17649 = vst [vmem:[#allocation147_spill] sm:$0xff] %v11883_v58  ;;  %v3313_v28 = vmul.f32 0.5, %v3312_v12  ;;  %4175 = vmatmul.f32.gmra.mxu0 %v11883_v58  ;;  %vm1125_vm8 = vweird.f32 %v11226_v57  ;;  %v1227_v63 = vsub.f32 1.0, %v11861_v41  ;;  %v3357_v62 = vsel %vm3355_vm1, %v3356_v10, %v3354_v16  ;;  %v17655_v22 = vld [vmem:[#allocation97_spill] sm:$0xff] }
 0x212   : > { %17651 = vst [vmem:[#allocation26_spill] sm:$0xff] %v11886_v32  ;;  %v3887_v36 = vmul.f32 2000.0, %v11886_v32  ;;  %v11904_v1 = vand.u32 4294901760, %v11892_v11  ;;  %v1376_v20 = vmul.f32 %v17655_v22, %v17654_v47  ;;  %v3366_v12 = vsel %vm3365_vm2, %v11605_v33, %v3364_v55  ;;  %v11940_v33 = vpop.xlane.xlu1 %2963 }
 0x213   : > { %17652 = vst [vmem:[#allocation148_spill] sm:$0xff] %v11892_v11  ;;  %v3340_v35 = vmul.f32 %v3339_v50, %v11670_v15  ;;  %v3324_v58 = vmul.f32 %v11857_v2, %v3323_v39  ;;  %vm1380_vm9 = vweird.f32 %v17654_v47  ;;  %v11921_v26 = vadd.f32 2.220446e-16, %v3357_v62 }
 0x214   : > { %17653 = vst [vmem:[#allocation149_spill] sm:$0xff] %v11904_v1  ;;  %v3930_v49 = vsel %vm517_vm0, %v3887_v36, 0  ;;  %v11914_v41 = vpop.eup %8390  ;;  %v4317_v31 = vsub.f32 %v11892_v11, %v11904_v1  ;;  %v1377_v16 = vsub.f32 1.0, %v1376_v20  ;;  %v3314_v32 = vsub.f32 1.5, %v3313_v28 }
 0x215   : > { %v11918_v10 = vand.u32 4294901760, %v3930_v49  ;;  %vm1381_vm10 = vweird.f32 %v17655_v22  ;;  %v1384_v55 = vand.u32 2147483647, %v17654_v47  ;;  %v11925_v50 = vpop.eup %8392  ;;  %v3369_v39 = vsel %vm3367_vm4, %v3368_v42, %v3366_v12 }
 0x216   : > { %17657 = vst [vmem:[#allocation97_spill] sm:$0xff] %v11925_v50  ;;  %v11929_v36 = vand.u32 4294901760, %v4317_v31  ;;  %v1378_v20 = vmul.f32 %v17655_v22, %v1377_v16  ;;  %v1386_v11 = vand.u32 2147483648, %v17654_v47  ;;  %v3342_v28 = vsel %vm3341_vm7, %v11670_v15, %v3340_v35  ;;  %vm11944_vm12 = vmor %vm1380_vm9, %vm1381_vm10 }
 0x217   : > { %17656 = vst [vmem:[#allocation93_spill] sm:$0xff] %v11918_v10  ;;  %4512 = vmatmul.f32.gmra.mxu1 %v11918_v10  ;;  %vm3343_vm11 = vcmp.eq.f32.partialorder %v11670_v15, 0.0  ;;  %v3325_v62 = vmul.f32 0.5, %v3324_v58  ;;  %v3299_v1 = vmul.f32 %v11914_v41, %v11869_v24  ;;  %8394 = vrsqrt.f32 %v11940_v33 }
 0x218   : > { %17658 = vst [vmem:[#allocation150_spill] sm:$0xff] %v11929_v36  ;;  %4319 = vmatmul.f32.gmra.mxu2 %v11929_v36  ;;  %v1379_v35 = vadd.f32 %v17655_v22, %v1378_v20  ;;  %vm1385_vm13 = vcmp.eq.f32.partialorder %v1384_v55, 8.507059e+37  ;;  %v1387_v15 = vor.u32 1.1754944e-38, %v1386_v11  ;;  %v11952_v58 = vmul.f32 %v11827_v56, %v1227_v63 }
 0x219   : > { %v11956_v12 = vmul.f32 %v11925_v50, %v11839_v8  ;;  %v11958_v47 = vadd.f32 2.220446e-16, %v3369_v39  ;;  %v3315_v31 = vmul.f32 %v11806_v25, %v3314_v32  ;;  %8396 = vrcp.f32 %v11921_v26  ;;  %v11970_v39 = vpop.xlane.xlu0 %2966  ;;  %v17663_v8 = vld [vmem:[#allocation13_spill] sm:$0xff] }
 0x21a   : > { %17661 = vst [vmem:[#allocation151_spill] sm:$0xff] %v11952_v58  ;;  %v3345_v16 = vsel %vm3343_vm11, %v3344_v60, %v3342_v28  ;;  %vm3317_vm14 = vcmp.eq.f32.partialorder %v11759_v3, inf  ;;  %v1383_v11 = vsel %vm11944_vm12, %v17655_v22, %v1379_v35  ;;  %v3326_v55 = vsub.f32 1.5, %v3325_v62 }
 0x21b   : > { %v3300_v63 = vmul.f32 %v11914_v41, %v3299_v1  ;;  %v1388_v20 = vsel %vm1385_vm13, %v1387_v15, %v1383_v11  ;;  %v11968_v36 = vsub.f32 %v3930_v49, %v11918_v10  ;;  %v1124_v25 = vadd.f32 %v11325_v9, %v11430_v13 }
 0x21c   : > { %v11973_v32 = vmul.f32 %v1388_v20, %v17663_v8  ;;  %vm1126_vm15 = vweird.f32 %v11325_v9  ;;  %v1129_v60 = vand.u32 2147483647, %v11226_v57  ;;  %v11979_v22 = vadd.f32 2.220446e-16, %v3345_v16 }
 0x21d   : > { %17662 = vst [vmem:[#allocation152_spill] sm:$0xff] %v11968_v36  ;;  %v3316_v1 = vmul.f32 %v3315_v31, %v11759_v3  ;;  %vm3319_vm1 = vcmp.eq.f32.partialorder %v11759_v3, 0.0  ;;  %8398 = vrsqrt.f32 %v11970_v39  ;;  %v11985_v49 = vand.u32 4294901760, %v11968_v36  ;;  %vm1127_vm2 = vmor %vm1125_vm8, %vm1126_vm15  ;;  %v11989_v8 = vpop.eup %8394 }
 0x21e   : > { %17664 = vst [vmem:[#allocation13_spill] sm:$0xff] %v11973_v32  ;;  %v3905_v13 = vmul.f32 2000.0, %v11973_v32  ;;  %v1128_v28 = vsel %vm1127_vm2, %v11325_v9, %v1124_v25  ;;  %vm1130_vm3 = vcmp.eq.f32.partialorder %v1129_v60, 8.507059e+37  ;;  %v17666_v62 = vand.u32 2147483648, %v11226_v57 }
 0x21f   : > { %17665 = vst [vmem:[#allocation153_spill] sm:$0xff] %v11985_v49  ;;  %8400 = vrcp.f32 %v11958_v47  ;;  %v3327_v35 = vmul.f32 %v11857_v2, %v3326_v55  ;;  %v3301_v15 = vmul.f32 0.5, %v3300_v63  ;;  %v4181_v31 = vsub.f32 %v11968_v36, %v11985_v49  ;;  %v11999_v16 = vpop.eup %8396  ;;  %v17669_v2 = vld [vmem:[#allocation28_spill] sm:$0xff] }
 0x220   : > { %v1132_v42 = vor.u32 1.1754944e-38, %v17666_v62  ;;  %v3320_v11 = vand.u32 2147483648, %v11759_v3  ;;  %vm3329_vm4 = vcmp.eq.f32.partialorder %v11802_v37, inf  ;;  %v3984_v9 = vsel %vm517_vm0, %v3905_v13, 0 }
 0x221   : > { %v3275_v57 = vmul.f32 %v11989_v8, %v11940_v33  ;;  %v12006_v25 = vand.u32 4294901760, %v3984_v9  ;;  %v12008_v60 = vand.u32 4294901760, %v4181_v31  ;;  %8402 = vrcp.f32 %v11979_v22 }
 0x222   : > { %v1133_v20 = vsel %vm1130_vm3, %v1132_v42, %v1128_v28  ;;  %v3318_v63 = vsel %vm3317_vm14, %v11759_v3, %v3316_v1  ;;  %vm3331_vm5 = vcmp.eq.f32.partialorder %v11802_v37, 0.0  ;;  %v1391_v13 = vmul.f32 %v10883_v5, %v10650_v51 }
 0x223   : > { %17667 = vst [vmem:[#allocation154_spill] sm:$0xff] %v12006_v25  ;;  %v12011_v55 = vmul.f32 %v1133_v20, %v17669_v2  ;;  %v12020_v28 = vpop.eup %8398  ;;  %v3328_v62 = vmul.f32 %v3327_v35, %v11802_v37  ;;  %v3302_v42 = vsub.f32 1.5, %v3301_v15  ;;  %v12024_v31 = vsub.f32 %v3984_v9, %v12006_v25  ;;  %4183 = vmatmul.f32.gmra.mxu0 %v12008_v60  ;;  %v12033_v15 = vpop.xlane.xlu2 %2960 }
 0x224   : > { %17668 = vst [vmem:[#allocation155_spill] sm:$0xff] %v12008_v60  ;;  %4584 = vmatmul.f32.gmra.mxu3 %v12006_v25  ;;  %v1392_v1 = vsub.f32 1.0, %v1391_v13  ;;  %vm1395_vm6 = vweird.f32 %v10650_v51  ;;  %vm1396_vm7 = vweird.f32 %v10883_v5  ;;  %v1399_v2 = vand.u32 2147483647, %v10650_v51 }
 0x225   : > { %17670 = vst [vmem:[#allocation28_spill] sm:$0xff] %v12011_v55  ;;  %v3888_v20 = vmul.f32 2000.0, %v12011_v55  ;;  %v8401_v32 = vpop.eup %8400  ;;  %v3276_v35 = vmul.f32 %v11989_v8, %v3275_v57  ;;  %v12036_v9 = vand.u32 4294901760, %v12024_v31  ;;  %v1401_v25 = vand.u32 2147483648, %v10650_v51  ;;  %vm12057_vm9 = vmor %vm1395_vm6, %vm1396_vm7 }
 0x226   : > { %17671 = vst [vmem:[#allocation156_spill] sm:$0xff] %v12024_v31  ;;  %v3332_v13 = vand.u32 2147483648, %v11802_v37  ;;  %8404 = vrsqrt.f32 %v12033_v15  ;;  %v1393_v36 = vmul.f32 %v10883_v5, %v1392_v1  ;;  %vm3305_vm8 = vcmp.eq.f32.partialorder %v11869_v24, inf }
 0x227   : > { %17672 = vst [vmem:[#allocation157_spill] sm:$0xff] %v12036_v9  ;;  %v12039_v60 = vsel %vm517_vm0, %v3888_v20, 0  ;;  %v3287_v57 = vmul.f32 %v12020_v28, %v11970_v39  ;;  %v4325_v20 = vsub.f32 %v12024_v31, %v12036_v9  ;;  %v1402_v55 = vor.u32 1.1754944e-38, %v1401_v25  ;;  %v12061_v50 = vpop.eup %8402 }
 0x228   : > { %v12045_v10 = vand.u32 4294901760, %v12039_v60  ;;  %v3321_v1 = vsel %vm3319_vm1, %v3320_v11, %v3318_v63  ;;  %v1394_v56 = vadd.f32 %v10883_v5, %v1393_v36  ;;  %vm1400_vm10 = vcmp.eq.f32.partialorder %v1399_v2, 8.507059e+37 }
 0x229   : > { %v3868_v31 = vmul.f32 %v8401_v32, %v11958_v47  ;;  %v3330_v51 = vsel %vm3329_vm4, %v11802_v37, %v3328_v62  ;;  %v3303_v9 = vmul.f32 %v11914_v41, %v3302_v42  ;;  %v3277_v58 = vmul.f32 0.5, %v3276_v35 }
 0x22a   : > { %17673 = vst [vmem:[#allocation158_spill] sm:$0xff] %v12045_v10  ;;  %4516 = vmatmul.f32.gmra.mxu1 %v12045_v10  ;;  %v12072_v25 = vand.u32 4294901760, %v4325_v20  ;;  %v1398_v3 = vsel %vm12057_vm9, %v10883_v5, %v1394_v56  ;;  %vm3872_vm11 = vweird.f32 %v11958_v47  ;;  %vm3873_vm12 = vweird.f32 %v8401_v32  ;;  %v17677_v56 = vld [vmem:[#allocation15_spill] sm:$0xff]  ;;  %v17682_v20 = vld [vmem:[#allocation41_spill] sm:$0xff] }
 0x22b   : > { %v3869_v11 = vsub.f32 1.0, %v3868_v31  ;;  %v3288_v36 = vmul.f32 %v12020_v28, %v3287_v57  ;;  %v1403_v63 = vsel %vm1400_vm10, %v1402_v55, %v1398_v3  ;;  %v3876_v62 = vand.u32 2147483647, %v11958_v47  ;;  %vm12098_vm14 = vmor %vm3872_vm11, %vm3873_vm12 }
 0x22c   : > { %17676 = vst [vmem:[#allocation159_spill] sm:$0xff] %v12072_v25  ;;  %4327 = vmatmul.f32.gmra.mxu2 %v12072_v25  ;;  %v3878_v41 = vand.u32 2147483648, %v11958_v47  ;;  %v12082_v42 = vpop.eup %8404  ;;  %vm1140_vm13 = vweird.f32 %v11395_v61  ;;  %v12085_v2 = vadd.f32 2.220446e-16, %v3321_v1  ;;  %v12089_v49 = vmul.f32 %v1403_v63, %v17677_v56 }
 0x22d   : > { %v3870_v31 = vmul.f32 %v8401_v32, %v3869_v11  ;;  %v3333_v35 = vsel %vm3331_vm5, %v3332_v13, %v3330_v51  ;;  %v3304_v55 = vmul.f32 %v3303_v9, %v11869_v24  ;;  %v3278_v3 = vsub.f32 1.5, %v3277_v58 }
 0x22e   : > { %17678 = vst [vmem:[#allocation15_spill] sm:$0xff] %v12089_v49  ;;  %v3879_v1 = vor.u32 1.1754944e-38, %v3878_v41  ;;  %v3906_v63 = vmul.f32 2000.0, %v12089_v49  ;;  %vm3877_vm15 = vcmp.eq.f32.partialorder %v3876_v62, 8.507059e+37  ;;  %vm3307_vm1 = vcmp.eq.f32.partialorder %v11869_v24, 0.0 }
 0x22f   : > { %v3871_v56 = vadd.f32 %v8401_v32, %v3870_v31  ;;  %v12104_v37 = vmul.f32 0.5, %v3288_v36  ;;  %v3263_v9 = vmul.f32 %v12082_v42, %v12033_v15  ;;  %v3853_v47 = vmul.f32 %v11999_v16, %v11921_v26 }
 0x230   : > { %vm3857_vm2 = vweird.f32 %v11921_v26  ;;  %v3987_v13 = vsel %vm517_vm0, %v3906_v63, 0  ;;  %v3861_v51 = vand.u32 2147483647, %v11921_v26  ;;  %v3863_v11 = vand.u32 2147483648, %v11921_v26 }
 0x231   : > { %v3875_v58 = vsel %vm12098_vm14, %v8401_v32, %v3871_v56  ;;  %v12116_v62 = vand.u32 4294901760, %v3987_v13  ;;  %v3854_v41 = vsub.f32 1.0, %v3853_v47  ;;  %vm3858_vm3 = vweird.f32 %v11999_v16  ;;  %v12126_v32 = vpop.xlane.xlu1 %2954 }
 0x232   : > { %v3880_v36 = vsel %vm3877_vm15, %v3879_v1, %v3875_v58  ;;  %v12119_v31 = vadd.f32 2.220446e-16, %v3333_v35  ;;  %v3306_v57 = vsel %vm3305_vm8, %v11869_v24, %v3304_v55  ;;  %v3279_v63 = vmul.f32 %v11989_v8, %v3278_v3  ;;  %vm12140_vm5 = vmor %vm3857_vm2, %vm3858_vm3 }
 0x233   : > { %17681 = vst [vmem:[#allocation160_spill] sm:$0xff] %v12116_v62  ;;  %vm3281_vm4 = vcmp.eq.f32.partialorder %v11940_v33, inf  ;;  %v3881_v56 = vmul.f32 %v3880_v36, %v17682_v20  ;;  %v3290_v5 = vsub.f32 1.5, %v12104_v37  ;;  %8406 = vrsqrt.f32 %v12126_v32  ;;  %4588 = vmatmul.f32.gmra.mxu3 %v12116_v62 }
 0x234   : > { %v12132_v1 = vsub.f32 %v3987_v13, %v12116_v62  ;;  %v3855_v35 = vmul.f32 %v11999_v16, %v3854_v41  ;;  %v3264_v55 = vmul.f32 %v12082_v42, %v3263_v9  ;;  %vm12144_vm6 = vcmp.eq.f32.partialorder %v3861_v51, 8.507059e+37 }
 0x235   : > { %v4104_v8 = vsel %vm517_vm0, %v3881_v56, 0  ;;  %v3864_v47 = vor.u32 1.1754944e-38, %v3863_v11  ;;  %vm3283_vm7 = vcmp.eq.f32.partialorder %v11940_v33, 0.0  ;;  %v12157_v26 = vsub.f32 %v12039_v60, %v12045_v10 }
 0x236   : > { %17683 = vst [vmem:[#allocation41_spill] sm:$0xff] %v12132_v1  ;;  %v12150_v13 = vand.u32 4294901760, %v12132_v1  ;;  %v12152_v58 = vand.u32 4294901760, %v4104_v8  ;;  %v3856_v9 = vadd.f32 %v11999_v16, %v3855_v35  ;;  %v3280_v36 = vmul.f32 %v3279_v63, %v11940_v33 }
 0x237   : > { %17690 = vst [vmem:[#allocation163_spill] sm:$0xff] %v12157_v26  ;;  %v1139_v51 = vadd.f32 %v11479_v59, %v11629_v0  ;;  %vm1141_vm8 = vweird.f32 %v11479_v59  ;;  %v1144_v11 = vand.u32 2147483647, %v11395_v61  ;;  %v12174_v63 = vand.u32 4294901760, %v12157_v26 }
 0x238   : > { %17688 = vst [vmem:[#allocation161_spill] sm:$0xff] %v12150_v13  ;;  %v4333_v41 = vsub.f32 %v12132_v1, %v12150_v13  ;;  %5409 = vmatpush.xpose.msra.mxu2 %v12152_v58  ;;  %v12168_v20 = vsub.f32 %v4104_v8, %v12152_v58  ;;  %v3860_v60 = vsel %vm12140_vm5, %v11999_v16, %v3856_v9  ;;  %vm12178_vm9 = vmor %vm1140_vm13, %vm1141_vm8  ;;  %v3265_v56 = vmul.f32 0.5, %v3264_v55  ;;  %v17695_v9 = vld [vmem:[#allocation40_spill] sm:$0xff] }
 0x239   : > { %17689 = vst [vmem:[#allocation162_spill] sm:$0xff] %v12152_v58  ;;  %6132 = vmatpush.xpose.msra.mxu1 %v12152_v58  ;;  %v3865_v35 = vsel %vm12144_vm6, %v3864_v47, %v3860_v60  ;;  %v1143_v8 = vsel %vm12178_vm9, %v11479_v59, %v1139_v51  ;;  %vm1145_vm10 = vcmp.eq.f32.partialorder %v1144_v11, 8.507059e+37  ;;  %v12188_v16 = vpop.eup %8406  ;;  %v4189_v25 = vsub.f32 %v12157_v26, %v12174_v63 }
 0x23a   : > { %17691 = vst [vmem:[#allocation164_spill] sm:$0xff] %v12174_v63  ;;  %v12190_v3 = vand.u32 4294901760, %v4333_v41  ;;  %v3866_v49 = vmul.f32 %v3865_v35, %v17695_v9  ;;  %v17696_v62 = vand.u32 2147483648, %v11395_v61  ;;  %5924 = vmatpush.xpose.msra.mxu0 %v12168_v20  ;;  %8408 = vrcp.f32 %v12085_v2  ;;  %v17700_v41 = vld [vmem:[#allocation30_spill] sm:$0xff]  ;;  %v12227_v35 = vpop.xlane.xlu0 %2957 }
 0x23b   : > { %v17697_v37 = vand.u32 2147483648, %v11869_v24  ;;  %vm3293_vm11 = vcmp.eq.f32.partialorder %v11970_v39, inf  ;;  %8410 = vrcp.f32 %v12119_v31  ;;  %v3291_v11 = vmul.f32 %v12020_v28, %v3290_v5 }
 0x23c   : > { %17694 = vst [vmem:[#allocation165_spill] sm:$0xff] %v12190_v3  ;;  %v1147_v55 = vor.u32 1.1754944e-38, %v17696_v62  ;;  %4335 = vmatmul.f32.gmra.mxu2 %v12190_v3  ;;  %v12208_v61 = vsel %vm517_vm0, %v3866_v49, 0  ;;  %v12210_v62 = vand.u32 4294901760, %v4189_v25  ;;  %vm3295_vm12 = vcmp.eq.f32.partialorder %v11970_v39, 0.0 }
 0x23d   : > { %v3309_v59 = vsel %vm3307_vm1, %v17697_v37, %v3306_v57  ;;  %v3239_v24 = vmul.f32 %v12188_v16, %v12126_v32  ;;  %v12217_v57 = vand.u32 4294901760, %v12208_v61  ;;  %v3282_v25 = vsel %vm3281_vm4, %v11940_v33, %v3280_v36 }
 0x23e   : > { %17698 = vst [vmem:[#allocation40_spill] sm:$0xff] %v12210_v62  ;;  %v1148_v51 = vsel %vm1145_vm10, %v1147_v55, %v1143_v8  ;;  %v12222_v0 = vadd.f32 2.220446e-16, %v3309_v59  ;;  %v3266_v49 = vsub.f32 1.5, %v3265_v56  ;;  %4191 = vmatmul.f32.gmra.mxu0 %v12210_v62  ;;  %v1406_v28 = vmul.f32 %v10655_v34, %v10557_v30 }
 0x23f   : > { %17699 = vst [vmem:[#allocation166_spill] sm:$0xff] %v12217_v57  ;;  %v12220_v60 = vmul.f32 %v1148_v51, %v17700_v41  ;;  %8412 = vrsqrt.f32 %v12227_v35  ;;  %5411 = vmatpush.xpose.msra.mxu2 %v12217_v57  ;;  %vm1410_vm13 = vweird.f32 %v10557_v30  ;;  %vm1411_vm14 = vweird.f32 %v10655_v34  ;;  %6134 = vmatpush.xpose.msra.mxu1 %v12217_v57 }
 0x240   : > { %v1407_v36 = vsub.f32 1.0, %v1406_v28  ;;  %v1414_v56 = vand.u32 2147483647, %v10557_v30  ;;  %v1416_v8 = vand.u32 2147483648, %v10557_v30  ;;  %v3838_v9 = vmul.f32 %v12061_v50, %v11979_v22  ;;  %v12242_v55 = vpop.eup %8408  ;;  %vm12262_vm2 = vmor %vm1410_vm13, %vm1411_vm14 }
 0x241   : > { %v3889_v5 = vmul.f32 2000.0, %v12220_v60  ;;  %v17701_v37 = vand.u32 2147483648, %v11940_v33  ;;  %v3292_v51 = vmul.f32 %v3291_v11, %v11970_v39  ;;  %v3240_v41 = vmul.f32 %v12188_v16, %v3239_v24  ;;  %v12251_v47 = vpop.eup %8410 }
 0x242   : > { %v1408_v62 = vmul.f32 %v10655_v34, %v1407_v36  ;;  %vm3842_vm15 = vweird.f32 %v11979_v22  ;;  %vm3843_vm1 = vweird.f32 %v12061_v50  ;;  %v1417_v11 = vor.u32 1.1754944e-38, %v1416_v8 }
 0x243   : > { %v3285_v59 = vsel %vm3283_vm7, %v17701_v37, %v3282_v25  ;;  %v3936_v28 = vsel %vm517_vm0, %v3889_v5, 0  ;;  %v3839_v24 = vsub.f32 1.0, %v3838_v9  ;;  %v3846_v25 = vand.u32 2147483647, %v11979_v22  ;;  %vm12291_vm6 = vmor %vm3842_vm15, %vm3843_vm1 }
 0x244   : > { %v12253_v3 = vand.u32 4294901760, %v3936_v28  ;;  %v3848_v5 = vand.u32 2147483648, %v11979_v22  ;;  %vm1155_vm3 = vweird.f32 %v11379_v29  ;;  %v3267_v36 = vmul.f32 %v12082_v42, %v3266_v49  ;;  %v12282_v49 = vpop.xlane.xlu2 %2951 }
 0x245   : > { %v1409_v37 = vadd.f32 %v10655_v34, %v1408_v62  ;;  %vm1415_vm4 = vcmp.eq.f32.partialorder %v1414_v56, 8.507059e+37  ;;  %v17172_v30 = vand.u32 4294901760, %v12168_v20  ;;  %v12273_v1 = vpop.eup %8412  ;;  %v12275_v13 = vadd.f32 2.220446e-16, %v3285_v59 }
 0x246   : > { %17702 = vst [vmem:[#allocation30_spill] sm:$0xff] %v12253_v3  ;;  %4520 = vmatmul.f32.gmra.mxu1 %v12253_v3  ;;  %v3294_v8 = vsel %vm3293_vm11, %v11970_v39, %v3292_v51  ;;  %vm3269_vm5 = vcmp.eq.f32.partialorder %v12033_v15, inf  ;;  %v3840_v9 = vmul.f32 %v12061_v50, %v3839_v24  ;;  %v3241_v42 = vmul.f32 0.5, %v3240_v41 }
 0x247   : > { %v1413_v62 = vsel %vm12262_vm2, %v10655_v34, %v1409_v37  ;;  %v3849_v59 = vor.u32 1.1754944e-38, %v3848_v5  ;;  %v5700_v51 = vsub.f32 %v12168_v20, %v17172_v30  ;;  %vm3271_vm7 = vcmp.eq.f32.partialorder %v12033_v15, 0.0  ;;  %v17708_v5 = vld [vmem:[#allocation14_spill] sm:$0xff] }
 0x248   : > { %8414 = vrsqrt.f32 %v12282_v49  ;;  %v1418_v41 = vsel %vm1415_vm4, %v1417_v11, %v1413_v62  ;;  %v3841_v34 = vadd.f32 %v12061_v50, %v3840_v9  ;;  %vm3847_vm8 = vcmp.eq.f32.partialorder %v3846_v25, 8.507059e+37  ;;  %v17711_v62 = vld [vmem:[#allocation42_spill] sm:$0xff] }
 0x249   : > { %v17707_v33 = vand.u32 2147483648, %v11970_v39  ;;  %v3268_v24 = vmul.f32 %v3267_v36, %v12033_v15  ;;  %v12307_v37 = vmul.f32 %v1418_v41, %v17708_v5  ;;  %v5701_v10 = vand.u32 4294901760, %v5700_v51 }
 0x24a   : > { %v3272_v30 = vand.u32 2147483648, %v12033_v15  ;;  %v3251_v26 = vmul.f32 %v12273_v1, %v12227_v35  ;;  %v3845_v11 = vsel %vm12291_vm6, %v12061_v50, %v3841_v34  ;;  %v12317_v25 = vsub.f32 %v12208_v61, %v12217_v57 }
 0x24b   : > { %v3297_v22 = vsel %vm3295_vm12, %v17707_v33, %v3294_v8  ;;  %17709 = vst [vmem:[#allocation14_spill] sm:$0xff] %v12307_v37  ;;  %8416 = vrcp.f32 %v12222_v0  ;;  %v3242_v39 = vsub.f32 1.5, %v3241_v42  ;;  %v3907_v36 = vmul.f32 2000.0, %v12307_v37  ;;  %5702 = vmatpush.xpose.msra.mxu3 %v5701_v10 }
 0x24c   : > { %17710 = vst [vmem:[#allocation167_spill] sm:$0xff] %v12317_v25  ;;  %v3850_v8 = vsel %vm3847_vm8, %v3849_v59, %v3845_v11  ;;  %8418 = vrcp.f32 %v12275_v13  ;;  %v12322_v9 = vadd.f32 2.220446e-16, %v3297_v22  ;;  %v17175_v56 = vand.u32 4294901760, %v12317_v25  ;;  %5927 = vmatpush.xpose.msra.mxu0 %v12317_v25 }
 0x24d   : > { %v3851_v51 = vmul.f32 %v3850_v8, %v17711_v62  ;;  %v3270_v50 = vsel %vm3269_vm5, %v12033_v15, %v3268_v24  ;;  %v3990_v61 = vsel %vm517_vm0, %v3907_v36, 0  ;;  %v12332_v42 = vsub.f32 %v3936_v28, %v12253_v3  ;;  %v12349_v28 = vpop.xlane.xlu1 %2945 }
 0x24e   : > { %v1154_v10 = vadd.f32 %v11462_v23, %v11613_v48  ;;  %v12336_v59 = vpop.eup %8414  ;;  %v3252_v41 = vmul.f32 %v12273_v1, %v3251_v26  ;;  %v12339_v34 = vand.u32 4294901760, %v3990_v61  ;;  %v5706_v22 = vsub.f32 %v12317_v25, %v17175_v56 }
 0x24f   : > { %17712 = vst [vmem:[#allocation42_spill] sm:$0xff] %v12332_v42  ;;  %v12342_v33 = vsel %vm517_vm0, %v3851_v51, 0  ;;  %v3243_v24 = vmul.f32 %v12188_v16, %v3242_v39  ;;  %vm3245_vm9 = vcmp.eq.f32.partialorder %v12126_v32, inf  ;;  %v12355_v26 = vand.u32 4294901760, %v12332_v42 }
 0x250   : > { %17713 = vst [vmem:[#allocation168_spill] sm:$0xff] %v12339_v34  ;;  %v12352_v48 = vand.u32 4294901760, %v12342_v33  ;;  %vm1156_vm10 = vweird.f32 %v11462_v23  ;;  %8420 = vrsqrt.f32 %v12349_v28  ;;  %v12360_v5 = vsub.f32 %v3990_v61, %v12339_v34  ;;  %4592 = vmatmul.f32.gmra.mxu3 %v12339_v34 }
 0x251   : > { %17715 = vst [vmem:[#allocation170_spill] sm:$0xff] %v12355_v26  ;;  %v5707_v11 = vand.u32 4294901760, %v5706_v22  ;;  %vm12364_vm11 = vmor %vm1155_vm3, %vm1156_vm10  ;;  %v1159_v39 = vand.u32 2147483647, %v11379_v29  ;;  %v12370_v36 = vpop.eup %8416  ;;  %v3227_v8 = vmul.f32 %v12336_v59, %v12282_v49  ;;  %v4197_v62 = vsub.f32 %v12332_v42, %v12355_v26 }
 0x252   : > { %17714 = vst [vmem:[#allocation169_spill] sm:$0xff] %v12352_v48  ;;  %5413 = vmatpush.xpose.msra.mxu2 %v12352_v48  ;;  %v1158_v51 = vsel %vm12364_vm11, %v11462_v23, %v1154_v10  ;;  %v17719_v61 = vand.u32 2147483648, %v11379_v29  ;;  %6136 = vmatpush.xpose.msra.mxu1 %v12352_v48  ;;  %v12383_v56 = vpop.eup %8418  ;;  %v3253_v37 = vmul.f32 0.5, %v3252_v41  ;;  %v12386_v34 = vand.u32 4294901760, %v12360_v5  ;;  %v17722_v41 = vld [vmem:[#allocation29_spill] sm:$0xff] }
 0x253   : > { %17716 = vst [vmem:[#allocation171_spill] sm:$0xff] %v12360_v5  ;;  %5708 = vmatpush.xpose.msra.mxu3 %v5707_v11  ;;  %vm1160_vm12 = vcmp.eq.f32.partialorder %v1159_v39, 8.507059e+37  ;;  %v3823_v3 = vmul.f32 %v12251_v47, %v12119_v31  ;;  %v3273_v16 = vsel %vm3271_vm7, %v3272_v30, %v3270_v50  ;;  %v3244_v23 = vmul.f32 %v3243_v24, %v12126_v32  ;;  %v12409_v39 = vpop.xlane.xlu0 %2948 }
 0x254   : > { %v1162_v22 = vor.u32 1.1754944e-38, %v17719_v61  ;;  %17720 = vst [vmem:[#allocation172_spill] sm:$0xff] %v12386_v34  ;;  %v12393_v29 = vand.u32 4294901760, %v4197_v62  ;;  %v4341_v61 = vsub.f32 %v12360_v5, %v12386_v34  ;;  %vm3827_vm13 = vweird.f32 %v12119_v31 }
 0x255   : > { %v3824_v26 = vsub.f32 1.0, %v3823_v3  ;;  %v3228_v11 = vmul.f32 %v12336_v59, %v3227_v8  ;;  %vm3828_vm14 = vweird.f32 %v12251_v47  ;;  %v3831_v15 = vand.u32 2147483647, %v12119_v31 }
 0x256   : > { %17721 = vst [vmem:[#allocation173_spill] sm:$0xff] %v12393_v29  ;;  %v1163_v10 = vsel %vm1160_vm12, %v1162_v22, %v1158_v51  ;;  %4199 = vmatmul.f32.gmra.mxu0 %v12393_v29  ;;  %v3833_v30 = vand.u32 2147483648, %v12119_v31  ;;  %v12406_v50 = vpop.eup %8420  ;;  %vm3247_vm15 = vcmp.eq.f32.partialorder %v12126_v32, 0.0  ;;  %v3254_v24 = vsub.f32 1.5, %v3253_v37  ;;  %vm12420_vm1 = vmor %vm3827_vm13, %vm3828_vm14 }
 0x257   : > { %v12398_v42 = vmul.f32 %v1163_v10, %v17722_v41  ;;  %v12411_v3 = vand.u32 4294901760, %v4341_v61  ;;  %v3825_v8 = vmul.f32 %v12251_v47, %v3824_v26  ;;  %v3248_v51 = vand.u32 2147483648, %v12126_v32 }
 0x258   : > { %8422 = vrsqrt.f32 %v12409_v39  ;;  %v3834_v37 = vor.u32 1.1754944e-38, %v3833_v30  ;;  %vm3832_vm2 = vcmp.eq.f32.partialorder %v3831_v15, 8.507059e+37  ;;  %v12430_v41 = vadd.f32 2.220446e-16, %v3273_v16 }
 0x259   : > { %17723 = vst [vmem:[#allocation29_spill] sm:$0xff] %v12411_v3  ;;  %v3890_v62 = vmul.f32 2000.0, %v12398_v42  ;;  %8424 = vrcp.f32 %v12322_v9  ;;  %4343 = vmatmul.f32.gmra.mxu2 %v12411_v3  ;;  %v3826_v26 = vadd.f32 %v12251_v47, %v3825_v8  ;;  %v3229_v22 = vmul.f32 0.5, %v3228_v11  ;;  %v17727_v11 = vld [vmem:[#allocation101_spill] sm:$0xff]  ;;  %v17728_v8 = vld [vmem:[#allocation44_spill] sm:$0xff] }
 0x25a   : > { %v3203_v31 = vmul.f32 %v12406_v50, %v12349_v28  ;;  %v3246_v30 = vsel %vm3245_vm9, %v12126_v32, %v3244_v23  ;;  %v3255_v3 = vmul.f32 %v12273_v1, %v3254_v24  ;;  %vm3257_vm3 = vcmp.eq.f32.partialorder %v12227_v35, inf }
 0x25b   : > { %v12427_v61 = vsel %vm517_vm0, %v3890_v62, 0  ;;  %v3830_v16 = vsel %vm12420_vm1, %v12251_v47, %v3826_v26  ;;  %v1421_v15 = vmul.f32 %v17727_v11, %v10623_v17  ;;  %vm1425_vm4 = vweird.f32 %v10623_v17 }
 0x25c   : > { %v12435_v29 = vand.u32 4294901760, %v12427_v61  ;;  %v3835_v62 = vsel %vm3832_vm2, %v3834_v37, %v3830_v16  ;;  %vm1426_vm5 = vweird.f32 %v17727_v11  ;;  %v1431_v23 = vand.u32 2147483648, %v10623_v17 }
 0x25d   : > { %v3836_v1 = vmul.f32 %v3835_v62, %v17728_v8  ;;  %v1422_v24 = vsub.f32 1.0, %v1421_v15  ;;  %v1429_v5 = vand.u32 2147483647, %v10623_v17  ;;  %v3808_v47 = vmul.f32 %v12242_v55, %v12085_v2  ;;  %vm12475_vm10 = vmor %vm1425_vm4, %vm1426_vm5 }
 0x25e   : > { %17726 = vst [vmem:[#allocation174_spill] sm:$0xff] %v12435_v29  ;;  %4524 = vmatmul.f32.gmra.mxu1 %v12435_v29  ;;  %v12455_v10 = vpop.eup %8422  ;;  %vm1170_vm6 = vweird.f32 %v11432_v18  ;;  %v3230_v26 = vsub.f32 1.5, %v3229_v22  ;;  %v3204_v37 = vmul.f32 %v12406_v50, %v3203_v31  ;;  %v1432_v16 = vor.u32 1.1754944e-38, %v1431_v23  ;;  %v17736_v22 = vld [vmem:[#allocation16_spill] sm:$0xff] }
 0x25f   : > { %vm3812_vm7 = vweird.f32 %v12085_v2  ;;  %v12460_v34 = vpop.eup %8424  ;;  %vm3259_vm8 = vcmp.eq.f32.partialorder %v12227_v35, 0.0  ;;  %v12464_v15 = vsel %vm517_vm0, %v3836_v1, 0  ;;  %v1423_v62 = vmul.f32 %v17727_v11, %v1422_v24 }
 0x260   : > { %v3809_v8 = vsub.f32 1.0, %v3808_v47  ;;  %vm3813_vm9 = vweird.f32 %v12242_v55  ;;  %v12469_v63 = vand.u32 4294901760, %v12464_v15  ;;  %v3816_v31 = vand.u32 2147483647, %v12085_v2 }
 0x261   : > { %v3818_v23 = vand.u32 2147483648, %v12085_v2  ;;  %v12483_v1 = vsub.f32 %v12342_v33, %v12352_v48  ;;  %v3215_v24 = vmul.f32 %v12455_v10, %v12409_v39  ;;  %v1424_v47 = vadd.f32 %v17727_v11, %v1423_v62  ;;  %vm12500_vm13 = vmor %vm3812_vm7, %vm3813_vm9 }
 0x262   : > { %17729 = vst [vmem:[#allocation101_spill] sm:$0xff] %v12469_v63  ;;  %vm12488_vm11 = vcmp.eq.f32.partialorder %v1429_v5, 8.507059e+37  ;;  %v3810_v17 = vmul.f32 %v12242_v55, %v3809_v8  ;;  %v3249_v58 = vsel %vm3247_vm15, %v3248_v51, %v3246_v30  ;;  %v3256_v25 = vmul.f32 %v3255_v3, %v12227_v35  ;;  %5415 = vmatpush.xpose.msra.mxu2 %v12469_v63 }
 0x263   : > { %vm3233_vm12 = vcmp.eq.f32.partialorder %v12282_v49, inf  ;;  %v3819_v5 = vor.u32 1.1754944e-38, %v3818_v23  ;;  %v17196_v62 = vand.u32 4294901760, %v12483_v1  ;;  %5930 = vmatpush.xpose.msra.mxu0 %v12483_v1  ;;  %v3205_v8 = vmul.f32 0.5, %v3204_v37  ;;  %6138 = vmatpush.xpose.msra.mxu1 %v12469_v63 }
 0x264   : > { %v1428_v32 = vsel %vm12475_vm10, %v17727_v11, %v1424_v47  ;;  %v3811_v3 = vadd.f32 %v12242_v55, %v3810_v17  ;;  %vm3817_vm14 = vcmp.eq.f32.partialorder %v3816_v31, 8.507059e+37  ;;  %v3231_v2 = vmul.f32 %v12336_v59, %v3230_v26  ;;  %v17738_v17 = vld [vmem:[#allocation43_spill] sm:$0xff] }
 0x265   : > { %v3236_v51 = vand.u32 2147483648, %v12282_v49  ;;  %v1433_v30 = vsel %vm12488_vm11, %v1432_v16, %v1428_v32  ;;  %v5712_v37 = vsub.f32 %v12483_v1, %v17196_v62  ;;  %8426 = vrcp.f32 %v12430_v41 }
 0x266   : > { %v3216_v11 = vmul.f32 %v12455_v10, %v3215_v24  ;;  %v12521_v23 = vmul.f32 %v1433_v30, %v17736_v22  ;;  %v3815_v59 = vsel %vm12500_vm13, %v12242_v55, %v3811_v3  ;;  %v12526_v26 = vadd.f32 2.220446e-16, %v3249_v58 }
 0x267   : > { %v3258_v57 = vsel %vm3257_vm3, %v12227_v35, %v3256_v25  ;;  %vm3235_vm15 = vcmp.eq.f32.partialorder %v12282_v49, 0.0  ;;  %v3820_v16 = vsel %vm3817_vm14, %v3819_v5, %v3815_v59  ;;  %v5713_v31 = vand.u32 4294901760, %v5712_v37 }
 0x268   : > { %17737 = vst [vmem:[#allocation44_spill] sm:$0xff] %v12521_v23  ;;  %v3206_v47 = vsub.f32 1.5, %v3205_v8  ;;  %v3908_v24 = vmul.f32 2000.0, %v12521_v23  ;;  %v3821_v32 = vmul.f32 %v3820_v16, %v17738_v17  ;;  %v12536_v30 = vsub.f32 %v12427_v61, %v12435_v29 }
 0x269   : > { %v3232_v58 = vmul.f32 %v3231_v2, %v12282_v49  ;;  %vm3209_vm1 = vcmp.eq.f32.partialorder %v12349_v28, inf  ;;  %5714 = vmatpush.xpose.msra.mxu3 %v5713_v31  ;;  %v1169_v55 = vadd.f32 %v11506_v6, %v11632_v45  ;;  %vm1171_vm2 = vweird.f32 %v11506_v6  ;;  %v12571_v31 = vpop.xlane.xlu2 %2942 }
 0x26a   : > { %17739 = vst [vmem:[#allocation16_spill] sm:$0xff] %v12536_v30  ;;  %v1174_v25 = vand.u32 2147483647, %v11432_v18  ;;  %v3217_v33 = vmul.f32 0.5, %v3216_v11  ;;  %v3993_v5 = vsel %vm517_vm0, %v3908_v24, 0  ;;  %v12546_v8 = vsel %vm517_vm0, %v3821_v32, 0  ;;  %vm12553_vm3 = vmor %vm1170_vm6, %vm1171_vm2 }
 0x26b   : > { %v12549_v61 = vand.u32 4294901760, %v12536_v30  ;;  %v17743_v45 = vand.u32 2147483648, %v12227_v35  ;;  %v3212_v37 = vand.u32 2147483648, %v12349_v28  ;;  %v12562_v11 = vand.u32 4294901760, %v3993_v5  ;;  %v12567_v59 = vpop.eup %8426 }
 0x26c   : > { %v12565_v22 = vand.u32 4294901760, %v12546_v8  ;;  %v3207_v16 = vmul.f32 %v12406_v50, %v3206_v47  ;;  %vm3211_vm4 = vcmp.eq.f32.partialorder %v12349_v28, 0.0  ;;  %v1173_v35 = vsel %vm12553_vm3, %v11506_v6, %v1169_v55  ;;  %v12591_v55 = vpop.xlane.xlu1 %1610 }
 0x26d   : > { %17740 = vst [vmem:[#allocation43_spill] sm:$0xff] %v12549_v61  ;;  %v3261_v2 = vsel %vm3259_vm8, %v17743_v45, %v3258_v57  ;;  %v4205_v24 = vsub.f32 %v12536_v30, %v12549_v61  ;;  %vm1175_vm5 = vcmp.eq.f32.partialorder %v1174_v25, 8.507059e+37  ;;  %8428 = vrsqrt.f32 %v12571_v31  ;;  %4596 = vmatmul.f32.gmra.mxu3 %v12562_v11 }
 0x26e   : > { %17744 = vst [vmem:[#allocation175_spill] sm:$0xff] %v12562_v11  ;;  %v12580_v57 = vsub.f32 %v3993_v5, %v12562_v11  ;;  %5417 = vmatpush.xpose.msra.mxu2 %v12565_v22  ;;  %v17747_v50 = vand.u32 2147483648, %v11432_v18  ;;  %v3793_v17 = vmul.f32 %v12370_v36, %v12222_v0  ;;  %v3234_v6 = vsel %vm3233_vm12, %v12282_v49, %v3232_v58  ;;  %v17750_v58 = vld [vmem:[#allocation31_spill] sm:$0xff]  ;;  %v17767_v11 = vld [vmem:[#allocation18_spill] sm:$0xff] }
 0x26f   : > { %17745 = vst [vmem:[#allocation176_spill] sm:$0xff] %v12565_v22  ;;  %v3218_v32 = vsub.f32 1.5, %v3217_v33  ;;  %v12593_v25 = vand.u32 4294901760, %v4205_v24  ;;  %vm3797_vm6 = vweird.f32 %v12222_v0  ;;  %6140 = vmatpush.xpose.msra.mxu1 %v12565_v22  ;;  %vm3798_vm7 = vweird.f32 %v12370_v36 }
 0x270   : > { %17746 = vst [vmem:[#allocation177_spill] sm:$0xff] %v12580_v57  ;;  %v1177_v47 = vor.u32 1.1754944e-38, %v17747_v50  ;;  %v12598_v18 = vand.u32 4294901760, %v12580_v57  ;;  %v3794_v3 = vsub.f32 1.0, %v3793_v17  ;;  %v3208_v45 = vmul.f32 %v3207_v16, %v12349_v28  ;;  %vm12625_vm8 = vmor %vm3797_vm6, %vm3798_vm7 }
 0x271   : > { %17748 = vst [vmem:[#allocation178_spill] sm:$0xff] %v12593_v25  ;;  %4207 = vmatmul.f32.gmra.mxu0 %v12593_v25  ;;  %v3801_v24 = vand.u32 2147483647, %v12222_v0  ;;  %v3803_v50 = vand.u32 2147483648, %v12222_v0  ;;  %8430 = vrsqrt.f32 %v12591_v55  ;;  %v12616_v16 = vadd.f32 2.220446e-16, %v3261_v2 }
 0x272   : > { %17749 = vst [vmem:[#allocation179_spill] sm:$0xff] %v12598_v18  ;;  %v1178_v5 = vsel %vm1175_vm5, %v1177_v47, %v1173_v35  ;;  %v4349_v62 = vsub.f32 %v12580_v57, %v12598_v18  ;;  %v3795_v35 = vmul.f32 %v12370_v36, %v3794_v3  ;;  %v12614_v47 = vsub.f32 %v12464_v15, %v12469_v63 }
 0x273   : > { %v12604_v33 = vmul.f32 %v1178_v5, %v17750_v58  ;;  %v3237_v17 = vsel %vm3235_vm15, %v3236_v51, %v3234_v6  ;;  %v3804_v3 = vor.u32 1.1754944e-38, %v3803_v50  ;;  %v12629_v23 = vpop.eup %8428  ;;  %vm12634_vm9 = vcmp.eq.f32.partialorder %v3801_v24, 8.507059e+37  ;;  %v17758_v58 = vld [vmem:[#allocation45_spill] sm:$0xff] }
 0x274   : > { %17751 = vst [vmem:[#allocation31_spill] sm:$0xff] %v12614_v47  ;;  %v12631_v15 = vand.u32 4294901760, %v4349_v62  ;;  %v3796_v2 = vadd.f32 %v12370_v36, %v3795_v35  ;;  %v17199_v49 = vand.u32 4294901760, %v12614_v47  ;;  %5933 = vmatpush.xpose.msra.mxu0 %v12614_v47  ;;  %8432 = vrcp.f32 %v12526_v26 }
 0x275   : > { %v3891_v5 = vmul.f32 2000.0, %v12604_v33  ;;  %v3210_v0 = vsel %vm3209_vm1, %v12349_v28, %v3208_v45  ;;  %v3219_v51 = vmul.f32 %v12455_v10, %v3218_v32  ;;  %8434 = vrcp.f32 %v12616_v16 }
 0x276   : > { %17754 = vst [vmem:[#allocation180_spill] sm:$0xff] %v12631_v15  ;;  %4351 = vmatmul.f32.gmra.mxu2 %v12631_v15  ;;  %v3800_v50 = vsel %vm12625_vm8, %v12370_v36, %v3796_v2  ;;  %v5718_v45 = vsub.f32 %v12614_v47, %v17199_v49  ;;  %v12660_v10 = vadd.f32 2.220446e-16, %v3237_v17  ;;  %vm3221_vm10 = vcmp.eq.f32.partialorder %v12409_v39, inf }
 0x277   : > { %v12646_v62 = vsel %vm517_vm0, %v3891_v5, 0  ;;  %v3191_v32 = vmul.f32 %v12629_v23, %v12571_v31  ;;  %v3805_v35 = vsel %vm12634_vm9, %v3804_v3, %v3800_v50  ;;  %v12667_v5 = vpop.eup %8430  ;;  %v3213_v36 = vsel %vm3211_vm4, %v3212_v37, %v3210_v0  ;;  %v12679_v3 = vpop.xlane.xlu2 %1613 }
 0x278   : > { %v12651_v24 = vand.u32 4294901760, %v12646_v62  ;;  %v3806_v2 = vmul.f32 %v3805_v35, %v17758_v58  ;;  %v5719_v49 = vand.u32 4294901760, %v5718_v45  ;;  %v1436_v17 = vmul.f32 %v11027_v53, %v10877_v38 }
 0x279   : > { %v3220_v6 = vmul.f32 %v3219_v51, %v12409_v39  ;;  %vm1440_vm11 = vweird.f32 %v10877_v38  ;;  %vm1441_vm12 = vweird.f32 %v11027_v53  ;;  %v1446_v25 = vand.u32 2147483648, %v10877_v38 }
 0x27a   : > { %17757 = vst [vmem:[#allocation181_spill] sm:$0xff] %v12651_v24  ;;  %4528 = vmatmul.f32.gmra.mxu1 %v12651_v24  ;;  %v12682_v28 = vsel %vm517_vm0, %v3806_v2, 0  ;;  %5720 = vmatpush.xpose.msra.mxu3 %v5719_v49  ;;  %v1437_v37 = vsub.f32 1.0, %v1436_v17  ;;  %v1444_v0 = vand.u32 2147483647, %v10877_v38  ;;  %v3778_v50 = vmul.f32 %v12460_v34, %v12322_v9  ;;  %v12687_v45 = vpop.eup %8432  ;;  %v12697_v49 = vpop.xlane.xlu0 %2939  ;;  %vm12710_vm1 = vmor %vm1440_vm11, %vm1441_vm12 }
 0x27b   : > { %vm1185_vm13 = vweird.f32 %v11562_v7  ;;  %v1706_v51 = vmul.f32 %v12667_v5, %v12591_v55  ;;  %8436 = vrsqrt.f32 %v12679_v3  ;;  %v12694_v35 = vand.u32 4294901760, %v12682_v28  ;;  %v12702_v15 = vpop.eup %8434 }
 0x27c   : > { %vm3782_vm14 = vweird.f32 %v12322_v9  ;;  %v1438_v58 = vmul.f32 %v11027_v53, %v1437_v37  ;;  %v3779_v2 = vsub.f32 1.0, %v3778_v50  ;;  %vm3783_vm15 = vweird.f32 %v12460_v34 }
 0x27d   : > { %17759 = vst [vmem:[#allocation45_spill] sm:$0xff] %v12694_v35  ;;  %v3786_v17 = vand.u32 2147483647, %v12322_v9  ;;  %8438 = vrsqrt.f32 %v12697_v49  ;;  %5419 = vmatpush.xpose.msra.mxu2 %v12694_v35  ;;  %v1447_v37 = vor.u32 1.1754944e-38, %v1446_v25  ;;  %v3788_v50 = vand.u32 2147483648, %v12322_v9  ;;  %6142 = vmatpush.xpose.msra.mxu1 %v12694_v35  ;;  %vm12734_vm4 = vmor %vm3782_vm14, %vm3783_vm15 }
 0x27e   : > { %v12717_v57 = vsub.f32 %v12546_v8, %v12565_v22  ;;  %v3192_v18 = vmul.f32 %v12629_v23, %v3191_v32  ;;  %v1439_v29 = vadd.f32 %v11027_v53, %v1438_v58  ;;  %vm12722_vm2 = vcmp.eq.f32.partialorder %v1444_v0, 8.507059e+37 }
 0x27f   : > { %v3780_v38 = vmul.f32 %v12460_v34, %v3779_v2  ;;  %8440 = vrcp.f32 %v12660_v10  ;;  %vm3223_vm3 = vcmp.eq.f32.partialorder %v12409_v39, 0.0  ;;  %v1707_v25 = vmul.f32 %v12667_v5, %v1706_v51 }
 0x280   : > { %17762 = vst [vmem:[#allocation182_spill] sm:$0xff] %v12717_v57  ;;  %v3789_v32 = vor.u32 1.1754944e-38, %v3788_v50  ;;  %v17214_v0 = vand.u32 4294901760, %v12717_v57  ;;  %5936 = vmatpush.xpose.msra.mxu0 %v12717_v57  ;;  %v1443_v2 = vsel %vm12710_vm1, %v11027_v53, %v1439_v29  ;;  %vm3787_vm5 = vcmp.eq.f32.partialorder %v3786_v17, 8.507059e+37 }
 0x281   : > { %v3781_v51 = vadd.f32 %v12460_v34, %v3780_v38  ;;  %v12745_v61 = vpop.eup %8436  ;;  %v12747_v9 = vadd.f32 2.220446e-16, %v3213_v36  ;;  %v1448_v50 = vsel %vm12722_vm2, %v1447_v37, %v1443_v2  ;;  %v3222_v53 = vsel %vm3221_vm10, %v12409_v39, %v3220_v6 }
 0x282   : > { %v5724_v58 = vsub.f32 %v12717_v57, %v17214_v0  ;;  %v3193_v29 = vmul.f32 0.5, %v3192_v18  ;;  %v12759_v17 = vmul.f32 %v1448_v50, %v17767_v11  ;;  %v1708_v30 = vmul.f32 0.5, %v1707_v25  ;;  %v17770_v50 = vld [vmem:[#allocation47_spill] sm:$0xff] }
 0x283   : > { %v3785_v36 = vsel %vm12734_vm4, %v12460_v34, %v3781_v51  ;;  %v12764_v38 = vpop.eup %8438  ;;  %v12768_v0 = vsub.f32 %v12646_v62, %v12651_v24  ;;  %v1718_v6 = vmul.f32 %v12745_v61, %v12679_v3  ;;  %v1184_v8 = vadd.f32 %v11626_v46, %v11782_v19  ;;  %v12778_v51 = vpop.xlane.xlu1 %1619 }
 0x284   : > { %17768 = vst [vmem:[#allocation18_spill] sm:$0xff] %v12759_v17  ;;  %v3790_v37 = vsel %vm3787_vm5, %v3789_v32, %v3785_v36  ;;  %v5725_v2 = vand.u32 4294901760, %v5724_v58  ;;  %v3909_v18 = vmul.f32 2000.0, %v12759_v17  ;;  %vm1186_vm6 = vweird.f32 %v11626_v46 }
 0x285   : > { %17769 = vst [vmem:[#allocation183_spill] sm:$0xff] %v12768_v0  ;;  %v3791_v11 = vmul.f32 %v3790_v37, %v17770_v50  ;;  %v12776_v34 = vpop.eup %8440  ;;  %v12781_v25 = vand.u32 4294901760, %v12768_v0  ;;  %v1189_v62 = vand.u32 2147483647, %v11562_v7  ;;  %v17772_v32 = vand.u32 2147483648, %v11562_v7  ;;  %vm1187_vm7 = vmor %vm1185_vm13, %vm1186_vm6 }
 0x286   : > { %5726 = vmatpush.xpose.msra.mxu3 %v5725_v2  ;;  %v3194_v36 = vsub.f32 1.5, %v3193_v29  ;;  %v3179_v37 = vmul.f32 %v12764_v38, %v12697_v49  ;;  %v3996_v19 = vsel %vm517_vm0, %v3909_v18, 0  ;;  %v1709_v2 = vsub.f32 1.5, %v1708_v30  ;;  %v12804_v18 = vpop.xlane.xlu0 %1616 }
 0x287   : > { %17771 = vst [vmem:[#allocation47_spill] sm:$0xff] %v12781_v25  ;;  %v1192_v58 = vor.u32 1.1754944e-38, %v17772_v32  ;;  %v12791_v50 = vsel %vm517_vm0, %v3791_v11, 0  ;;  %v12795_v22 = vand.u32 4294901760, %v3996_v19  ;;  %v4213_v29 = vsub.f32 %v12768_v0, %v12781_v25 }
 0x288   : > { %v12798_v17 = vand.u32 4294901760, %v12791_v50  ;;  %v1719_v32 = vmul.f32 %v12745_v61, %v1718_v6  ;;  %8442 = vrsqrt.f32 %v12778_v51  ;;  %v1188_v11 = vsel %vm1187_vm7, %v11626_v46, %v1184_v8  ;;  %v17778_v8 = vld [vmem:[#allocation33_spill] sm:$0xff] }
 0x289   : > { %17773 = vst [vmem:[#allocation184_spill] sm:$0xff] %v12795_v22  ;;  %vm1190_vm8 = vcmp.eq.f32.partialorder %v1189_v62, 8.507059e+37  ;;  %8444 = vrsqrt.f32 %v12804_v18  ;;  %v12809_v7 = vsub.f32 %v3996_v19, %v12795_v22  ;;  %v12812_v30 = vand.u32 4294901760, %v4213_v29  ;;  %4600 = vmatmul.f32.gmra.mxu3 %v12795_v22 }
 0x28a   : > { %17774 = vst [vmem:[#allocation185_spill] sm:$0xff] %v12798_v17  ;;  %5421 = vmatpush.xpose.msra.mxu2 %v12798_v17  ;;  %v1193_v24 = vsel %vm1190_vm8, %v1192_v58, %v1188_v11  ;;  %v17777_v6 = vand.u32 2147483648, %v12409_v39  ;;  %v3195_v46 = vmul.f32 %v12629_v23, %v3194_v36  ;;  %v3763_v19 = vmul.f32 %v12383_v56, %v12275_v13 }
 0x28b   : > { %17775 = vst [vmem:[#allocation186_spill] sm:$0xff] %v12809_v7  ;;  %v12821_v62 = vmul.f32 %v1193_v24, %v17778_v8  ;;  %6144 = vmatpush.xpose.msra.mxu1 %v12798_v17  ;;  %v3180_v29 = vmul.f32 %v12764_v38, %v3179_v37  ;;  %v12828_v58 = vand.u32 4294901760, %v12809_v7  ;;  %4215 = vmatmul.f32.gmra.mxu0 %v12812_v30  ;;  %vm3767_vm9 = vweird.f32 %v12275_v13 }
 0x28c   : > { %17776 = vst [vmem:[#allocation187_spill] sm:$0xff] %v12812_v30  ;;  %v3225_v0 = vsel %vm3223_vm3, %v17777_v6, %v3222_v53  ;;  %vm3768_vm10 = vweird.f32 %v12383_v56  ;;  %v3764_v23 = vsub.f32 1.0, %v3763_v19  ;;  %v3771_v24 = vand.u32 2147483647, %v12275_v13 }
 0x28d   : > { %17779 = vst [vmem:[#allocation33_spill] sm:$0xff] %v12821_v62  ;;  %v3892_v39 = vmul.f32 2000.0, %v12821_v62  ;;  %v3773_v53 = vand.u32 2147483648, %v12275_v13  ;;  %v1710_v36 = vmul.f32 %v12667_v5, %v1709_v2  ;;  %v12837_v11 = vmul.f32 0.5, %v1719_v32  ;;  %vm12867_vm13 = vmor %vm3767_vm9, %vm3768_vm10 }
 0x28e   : > { %17780 = vst [vmem:[#allocation188_spill] sm:$0xff] %v12828_v58  ;;  %v4357_v37 = vsub.f32 %v12809_v7, %v12828_v58  ;;  %v12843_v6 = vsub.f32 %v12682_v28, %v12694_v35  ;;  %v12845_v8 = vpop.eup %8442  ;;  %8446 = vrcp.f32 %v12747_v9  ;;  %v12848_v19 = vadd.f32 2.220446e-16, %v3225_v0  ;;  %v17786_v35 = vld [vmem:[#allocation46_spill] sm:$0xff] }
 0x28f   : > { %vm3197_vm11 = vcmp.eq.f32.partialorder %v12571_v31, inf  ;;  %vm1712_vm12 = vcmp.eq.f32.partialorder %v12591_v55, inf  ;;  %v12853_v5 = vsel %vm517_vm0, %v3892_v39, 0  ;;  %v3765_v2 = vmul.f32 %v12383_v56, %v3764_v23  ;;  %v12856_v32 = vpop.eup %8444 }
 0x290   : > { %17781 = vst [vmem:[#allocation189_spill] sm:$0xff] %v12843_v6  ;;  %v12858_v30 = vand.u32 4294901760, %v4357_v37  ;;  %v12861_v28 = vand.u32 4294901760, %v12853_v5  ;;  %v3774_v22 = vor.u32 1.1754944e-38, %v3773_v53  ;;  %v17229_v39 = vand.u32 4294901760, %v12843_v6  ;;  %5939 = vmatpush.xpose.msra.mxu0 %v12843_v6 }
 0x291   : > { %v3196_v23 = vmul.f32 %v3195_v46, %v12571_v31  ;;  %v12874_v37 = vmul.f32 0.5, %v3180_v29  ;;  %v3766_v7 = vadd.f32 %v12383_v56, %v3765_v2  ;;  %vm3772_vm14 = vcmp.eq.f32.partialorder %v3771_v24, 8.507059e+37 }
 0x292   : > { %17782 = vst [vmem:[#allocation190_spill] sm:$0xff] %v12858_v30  ;;  %v1711_v58 = vmul.f32 %v1710_v36, %v12591_v55  ;;  %v1721_v13 = vsub.f32 1.5, %v12837_v11  ;;  %v1742_v25 = vmul.f32 %v12845_v8, %v12778_v51  ;;  %4359 = vmatmul.f32.gmra.mxu2 %v12858_v30  ;;  %4532 = vmatmul.f32.gmra.mxu1 %v12861_v28  ;;  %vm3199_vm15 = vcmp.eq.f32.partialorder %v12571_v31, 0.0  ;;  %v12900_v30 = vpop.xlane.xlu2 %1622 }
 0x293   : > { %17783 = vst [vmem:[#allocation191_spill] sm:$0xff] %v12861_v28  ;;  %v5730_v46 = vsub.f32 %v12843_v6, %v17229_v39  ;;  %vm1714_vm1 = vcmp.eq.f32.partialorder %v12591_v55, 0.0  ;;  %v1730_v29 = vmul.f32 %v12856_v32, %v12804_v18  ;;  %v3770_v24 = vsel %vm12867_vm13, %v12383_v56, %v3766_v7 }
 0x294   : > { %v1451_v53 = vmul.f32 %v10901_v27, %v10708_v44  ;;  %vm1455_vm2 = vweird.f32 %v10708_v44  ;;  %v3775_v36 = vsel %vm3772_vm14, %v3774_v22, %v3770_v24  ;;  %vm1456_vm3 = vweird.f32 %v10901_v27  ;;  %v12898_v39 = vpop.eup %8446 }
 0x295   : > { %v5731_v11 = vand.u32 4294901760, %v5730_v46  ;;  %v1459_v2 = vand.u32 2147483647, %v10708_v44  ;;  %v3776_v63 = vmul.f32 %v3775_v36, %v17786_v35  ;;  %v1461_v56 = vand.u32 2147483648, %v10708_v44  ;;  %vm12923_vm6 = vmor %vm1455_vm2, %vm1456_vm3  ;;  %v17793_v44 = vld [vmem:[#allocation128_spill] sm:$0xff] }
 0x296   : > { %v1452_v48 = vsub.f32 1.0, %v1451_v53  ;;  %v3748_v7 = vmul.f32 %v12567_v59, %v12430_v41  ;;  %v1743_v0 = vmul.f32 %v12845_v8, %v1742_v25  ;;  %8448 = vrsqrt.f32 %v12900_v30  ;;  %v17796_v25 = vld [vmem:[#allocation17_spill] sm:$0xff] }
 0x297   : > { %5732 = vmatpush.xpose.msra.mxu3 %v5731_v11  ;;  %vm3752_vm4 = vweird.f32 %v12430_v41  ;;  %vm3753_vm5 = vweird.f32 %v12567_v59  ;;  %v12911_v22 = vsel %vm517_vm0, %v3776_v63, 0  ;;  %v3756_v24 = vand.u32 2147483647, %v12430_v41 }
 0x298   : > { %v1453_v35 = vmul.f32 %v10901_v27, %v1452_v48  ;;  %v3749_v46 = vsub.f32 1.0, %v3748_v7  ;;  %v1731_v53 = vmul.f32 %v12856_v32, %v1730_v29  ;;  %v12917_v36 = vand.u32 4294901760, %v12911_v22  ;;  %vm12951_vm9 = vmor %vm3752_vm4, %vm3753_vm5 }
 0x299   : > { %v1462_v63 = vor.u32 1.1754944e-38, %v1461_v56  ;;  %v3758_v11 = vand.u32 2147483648, %v12430_v41  ;;  %vm12929_vm7 = vcmp.eq.f32.partialorder %v1459_v2, 8.507059e+37  ;;  %v12936_v6 = vsub.f32 %v12791_v50, %v12798_v17 }
 0x29a   : > { %17787 = vst [vmem:[#allocation46_spill] sm:$0xff] %v12917_v36  ;;  %v1454_v48 = vadd.f32 %v10901_v27, %v1453_v35  ;;  %v3750_v29 = vmul.f32 %v12567_v59, %v3749_v46  ;;  %vm1200_vm8 = vweird.f32 %v17793_v44  ;;  %v3198_v56 = vsel %vm3197_vm11, %v12571_v31, %v3196_v23  ;;  %5423 = vmatpush.xpose.msra.mxu2 %v12917_v36 }
 0x29b   : > { %17792 = vst [vmem:[#allocation192_spill] sm:$0xff] %v12936_v6  ;;  %v1713_v35 = vsel %vm1712_vm12, %v12591_v55, %v1711_v58  ;;  %v3759_v46 = vor.u32 1.1754944e-38, %v3758_v11  ;;  %6146 = vmatpush.xpose.msra.mxu1 %v12917_v36  ;;  %vm3757_vm10 = vcmp.eq.f32.partialorder %v3756_v24, 8.507059e+37  ;;  %v17239_v2 = vand.u32 4294901760, %v12936_v6  ;;  %5942 = vmatpush.xpose.msra.mxu0 %v12936_v6 }
 0x29c   : > { %v1458_v23 = vsel %vm12923_vm6, %v10901_v27, %v1454_v48  ;;  %v3751_v58 = vadd.f32 %v12567_v59, %v3750_v29  ;;  %v12962_v17 = vpop.eup %8448  ;;  %v3182_v41 = vsub.f32 1.5, %v12874_v37  ;;  %v1722_v57 = vmul.f32 %v12745_v61, %v1721_v13 }
 0x29d   : > { %v1744_v11 = vmul.f32 0.5, %v1743_v0  ;;  %v1463_v47 = vsel %vm12929_vm7, %v1462_v63, %v1458_v23  ;;  %v1732_v62 = vmul.f32 0.5, %v1731_v53  ;;  %v5736_v48 = vsub.f32 %v12936_v6, %v17239_v2  ;;  %v17812_v2 = vld [vmem:[#allocation32_spill] sm:$0xff] }
 0x29e   : > { %v12969_v27 = vmul.f32 %v1463_v47, %v17796_v25  ;;  %v3755_v24 = vsel %vm12951_vm9, %v12567_v59, %v3751_v58  ;;  %8450 = vrcp.f32 %v12848_v19  ;;  %v17798_v61 = vand.u32 2147483648, %v12571_v31  ;;  %v17800_v59 = vld [vmem:[#allocation48_spill] sm:$0xff] }
 0x29f   : > { %v3760_v13 = vsel %vm3757_vm10, %v3759_v46, %v3755_v24  ;;  %v17799_v0 = vand.u32 2147483648, %v12591_v55  ;;  %v5737_v7 = vand.u32 4294901760, %v5736_v48  ;;  %v3183_v50 = vmul.f32 %v12764_v38, %v3182_v41 }
 0x2a0   : > { %17797 = vst [vmem:[#allocation128_spill] sm:$0xff] %v12969_v27  ;;  %v3201_v37 = vsel %vm3199_vm15, %v17798_v61, %v3198_v56  ;;  %v3910_v53 = vmul.f32 2000.0, %v12969_v27  ;;  %v3761_v63 = vmul.f32 %v3760_v13, %v17800_v59  ;;  %v1723_v23 = vmul.f32 %v1722_v57, %v12679_v3 }
 0x2a1   : > { %v1716_v47 = vsel %vm1714_vm1, %v17799_v0, %v1713_v35  ;;  %v1745_v58 = vsub.f32 1.5, %v1744_v11  ;;  %v12994_v31 = vsub.f32 %v12853_v5, %v12861_v28  ;;  %v1733_v56 = vsub.f32 1.5, %v1732_v62  ;;  %5738 = vmatpush.xpose.msra.mxu3 %v5737_v7  ;;  %v13012_v62 = vpop.xlane.xlu1 %1628 }
 0x2a2   : > { %v12988_v29 = vadd.f32 2.220446e-16, %v1716_v47  ;;  %v3999_v55 = vsel %vm517_vm0, %v3910_v53, 0  ;;  %v12998_v35 = vsel %vm517_vm0, %v3761_v63, 0  ;;  %vm1724_vm11 = vcmp.eq.f32.partialorder %v12679_v3, inf }
 0x2a3   : > { %17801 = vst [vmem:[#allocation17_spill] sm:$0xff] %v12994_v31  ;;  %v1754_v38 = vmul.f32 %v12962_v17, %v12900_v30  ;;  %v13004_v57 = vand.u32 4294901760, %v3999_v55  ;;  %v13007_v46 = vand.u32 4294901760, %v12998_v35  ;;  %v13009_v5 = vadd.f32 2.220446e-16, %v3201_v37 }
 0x2a4   : > { %8452 = vrcp.f32 %v12988_v29  ;;  %vm1726_vm12 = vcmp.eq.f32.partialorder %v12679_v3, 0.0  ;;  %v13015_v41 = vand.u32 4294901760, %v12994_v31  ;;  %v1199_v11 = vadd.f32 %v11619_v14, %v11775_v4  ;;  %v13019_v25 = vpop.eup %8450 }
 0x2a5   : > { %17802 = vst [vmem:[#allocation48_spill] sm:$0xff] %v13004_v57  ;;  %v13022_v24 = vmul.f32 %v3183_v50, %v12697_v49  ;;  %v1727_v48 = vand.u32 2147483648, %v12679_v3  ;;  %v13026_v61 = vsub.f32 %v3999_v55, %v13004_v57  ;;  %5425 = vmatpush.xpose.msra.mxu2 %v13007_v46  ;;  %vm1201_vm13 = vweird.f32 %v11619_v14  ;;  %4604 = vmatmul.f32.gmra.mxu3 %v13004_v57 }
 0x2a6   : > { %17803 = vst [vmem:[#allocation193_spill] sm:$0xff] %v13007_v46  ;;  %v1725_v4 = vsel %vm1724_vm11, %v12679_v3, %v1723_v23  ;;  %v13035_v37 = vmul.f32 %v12845_v8, %v1745_v58  ;;  %v13038_v13 = vmul.f32 %v12856_v32, %v1733_v56  ;;  %v4221_v0 = vsub.f32 %v12994_v31, %v13015_v41  ;;  %vm13044_vm14 = vmor %vm1200_vm8, %vm1201_vm13 }
 0x2a7   : > { %17804 = vst [vmem:[#allocation194_spill] sm:$0xff] %v13015_v41  ;;  %6148 = vmatpush.xpose.msra.mxu1 %v13007_v46  ;;  %v13050_v53 = vmul.f32 %v12962_v17, %v1754_v38  ;;  %8454 = vrsqrt.f32 %v13012_v62  ;;  %v13054_v8 = vand.u32 4294901760, %v13026_v61  ;;  %v1204_v32 = vand.u32 2147483647, %v17793_v44 }
 0x2a8   : > { %17805 = vst [vmem:[#allocation195_spill] sm:$0xff] %v13026_v61  ;;  %vm3185_vm15 = vcmp.eq.f32.partialorder %v12697_v49, inf  ;;  %v13058_v63 = vand.u32 4294901760, %v4221_v0  ;;  %v1203_v7 = vsel %vm13044_vm14, %v11619_v14, %v1199_v11  ;;  %v17810_v50 = vand.u32 2147483648, %v17793_v44  ;;  %v13075_v44 = vpop.xlane.xlu0 %1625 }
 0x2a9   : > { %17808 = vst [vmem:[#allocation196_spill] sm:$0xff] %v13054_v8  ;;  %v3733_v58 = vmul.f32 %v12702_v15, %v12616_v16  ;;  %v4365_v56 = vsub.f32 %v13026_v61, %v13054_v8  ;;  %vm2126_vm1 = vweird.f32 %v12988_v29  ;;  %v2130_v38 = vand.u32 2147483647, %v12988_v29 }
 0x2aa   : > { %v8453_v59 = vpop.eup %8452  ;;  %17809 = vst [vmem:[#allocation197_spill] sm:$0xff] %v13058_v63  ;;  %v1207_v23 = vor.u32 1.1754944e-38, %v17810_v50  ;;  %v2132_v0 = vand.u32 2147483648, %v12988_v29  ;;  %4223 = vmatmul.f32.gmra.mxu0 %v13058_v63  ;;  %vm1205_vm2 = vcmp.eq.f32.partialorder %v1204_v32, 8.507059e+37  ;;  %vm3737_vm3 = vweird.f32 %v12616_v16 }
 0x2ab   : > { %v2122_v55 = vmul.f32 %v8453_v59, %v12988_v29  ;;  %v3734_v14 = vsub.f32 1.0, %v3733_v58  ;;  %v13077_v11 = vand.u32 4294901760, %v4365_v56  ;;  %vm2127_vm4 = vweird.f32 %v8453_v59 }
 0x2ac   : > { %v1208_v50 = vsel %vm1205_vm2, %v1207_v23, %v1203_v7  ;;  %8456 = vrsqrt.f32 %v13075_v44  ;;  %vm3738_vm5 = vweird.f32 %v12702_v15  ;;  %vm13088_vm6 = vcmp.eq.f32.partialorder %v2130_v38, 8.507059e+37  ;;  %vm13100_vm8 = vmor %vm2126_vm1, %vm2127_vm4  ;;  %v17822_v7 = vld [vmem:[#allocation50_spill] sm:$0xff] }
 0x2ad   : > { %17811 = vst [vmem:[#allocation198_spill] sm:$0xff] %v13077_v11  ;;  %v2123_v47 = vsub.f32 1.0, %v2122_v55  ;;  %v13081_v27 = vmul.f32 %v1208_v50, %v17812_v2  ;;  %v3735_v57 = vmul.f32 %v12702_v15, %v3734_v14  ;;  %v13085_v32 = vpop.eup %8454  ;;  %4367 = vmatmul.f32.gmra.mxu2 %v13077_v11  ;;  %vm13092_vm7 = vmor %vm3737_vm3, %vm3738_vm5  ;;  %v3741_v2 = vand.u32 2147483647, %v12616_v16 }
 0x2ae   : > { %v3743_v23 = vand.u32 2147483648, %v12616_v16  ;;  %v2133_v14 = vor.u32 1.1754944e-38, %v2132_v0  ;;  %v13108_v50 = vsub.f32 %v12911_v22, %v12917_v36  ;;  %v1728_v16 = vsel %vm1726_vm12, %v1727_v48, %v1725_v4 }
 0x2af   : > { %17813 = vst [vmem:[#allocation32_spill] sm:$0xff] %v13081_v27  ;;  %v2124_v58 = vmul.f32 %v8453_v59, %v2123_v47  ;;  %v3893_v38 = vmul.f32 2000.0, %v13081_v27  ;;  %v3736_v47 = vadd.f32 %v12702_v15, %v3735_v57  ;;  %vm3742_vm9 = vcmp.eq.f32.partialorder %v3741_v2, 8.507059e+37 }
 0x2b0   : > { %17820 = vst [vmem:[#allocation199_spill] sm:$0xff] %v13108_v50  ;;  %v3744_v63 = vor.u32 1.1754944e-38, %v3743_v23  ;;  %v1778_v29 = vmul.f32 %v13085_v32, %v13012_v62  ;;  %v17247_v0 = vand.u32 4294901760, %v13108_v50  ;;  %5945 = vmatpush.xpose.msra.mxu0 %v13108_v50  ;;  %v13127_v4 = vadd.f32 2.220446e-16, %v1728_v16 }
 0x2b1   : > { %v2125_v11 = vadd.f32 %v8453_v59, %v2124_v58  ;;  %v13115_v61 = vsel %vm517_vm0, %v3893_v38, 0  ;;  %v3740_v57 = vsel %vm13092_vm7, %v12702_v15, %v3736_v47  ;;  %8458 = vrcp.f32 %v13009_v5 }
 0x2b2   : > { %v13125_v3 = vand.u32 4294901760, %v13115_v61  ;;  %v3745_v48 = vsel %vm3742_vm9, %v3744_v63, %v3740_v57  ;;  %v13129_v58 = vpop.eup %8456  ;;  %v5742_v23 = vsub.f32 %v13108_v50, %v17247_v0  ;;  %8460 = vrcp.f32 %v13127_v4  ;;  %v13163_v57 = vpop.xlane.xlu2 %1631 }
 0x2b3   : > { %v2129_v22 = vsel %vm13100_vm8, %v8453_v59, %v2125_v11  ;;  %v3746_v2 = vmul.f32 %v3745_v48, %v17822_v7  ;;  %v13142_v59 = vsel %vm3185_vm15, %v12697_v49, %v13022_v24  ;;  %v17823_v11 = vld [vmem:[#allocation55_spill] sm:$0xff]  ;;  %v13150_v56 = vmul.f32 %v13035_v37, %v12778_v51  ;;  %v17825_v7 = vld [vmem:[#allocation108_spill] sm:$0xff] }
 0x2b4   : > { %17821 = vst [vmem:[#allocation200_spill] sm:$0xff] %v13125_v3  ;;  %v2134_v15 = vsel %vm13088_vm6, %v2133_v14, %v2129_v22  ;;  %4536 = vmatmul.f32.gmra.mxu1 %v13125_v3  ;;  %v13154_v14 = vmul.f32 %v13038_v13, %v12804_v18  ;;  %v5743_v24 = vand.u32 4294901760, %v5742_v23  ;;  %v13160_v47 = vmul.f32 0.5, %v13050_v53  ;;  %v17824_v22 = vld [vmem:[#allocation22_spill] sm:$0xff]  ;;  %v17826_v53 = vld [vmem:[#allocation113_spill] sm:$0xff] }
 0x2b5   : > { %v2135_v55 = vmul.f32 %v2134_v15, %v17823_v11  ;;  %v13157_v38 = vsel %vm517_vm0, %v3746_v2, 0  ;;  %v1779_v16 = vmul.f32 %v13085_v32, %v1778_v29  ;;  %v1766_v13 = vmul.f32 %v13129_v58, %v13075_v44 }
 0x2b6   : > { %v13167_v37 = vand.u32 4294901760, %v13157_v38  ;;  %8462 = vrsqrt.f32 %v13163_v57  ;;  %5744 = vmatpush.xpose.msra.mxu3 %v5743_v24  ;;  %v2145_v15 = vand.u32 2147483647, %v13127_v4  ;;  %v1466_v2 = vmul.f32 %v17826_v53, %v17825_v7 }
 0x2b7   : > { %v2601_v48 = vsub.f32 %v17824_v22, %v2135_v55  ;;  %vm1748_vm10 = vcmp.eq.f32.partialorder %v12778_v51, inf  ;;  %vm2141_vm11 = vweird.f32 %v13127_v4  ;;  %v1474_v23 = vand.u32 2147483647, %v17825_v7  ;;  %v13181_v55 = vpop.eup %8458 }
 0x2b8   : > { %5427 = vmatpush.xpose.msra.mxu2 %v13167_v37  ;;  %v1476_v11 = vand.u32 2147483648, %v17825_v7  ;;  %6150 = vmatpush.xpose.msra.mxu1 %v13167_v37  ;;  %vm1736_vm12 = vcmp.eq.f32.partialorder %v12804_v18, inf  ;;  %v1467_v24 = vsub.f32 1.0, %v1466_v2  ;;  %vm1470_vm13 = vweird.f32 %v17825_v7 }
 0x2b9   : > { %v2633_v29 = vand.u32 2147483647, %v2601_v48  ;;  %vm1471_vm14 = vweird.f32 %v17826_v53  ;;  %v3718_v22 = vmul.f32 %v12687_v45, %v12526_v26  ;;  %v8461_v48 = vpop.eup %8460  ;;  %v2147_v63 = vand.u32 2147483648, %v13127_v4 }
 0x2ba   : > { %vm3722_vm15 = vweird.f32 %v12526_v26  ;;  %vm3723_vm1 = vweird.f32 %v12687_v45  ;;  %v2137_v8 = vmul.f32 %v8461_v48, %v13127_v4  ;;  %v1468_v2 = vmul.f32 %v17826_v53, %v1467_v24  ;;  %vm13199_vm4 = vmor %vm1470_vm13, %vm1471_vm14 }
 0x2bb   : > { %v2665_v0 = vsel %vm517_vm0, %v2633_v29, 0.0  ;;  %vm13194_vm2 = vcmp.eq.f32.partialorder %v1474_v23, 8.507059e+37  ;;  %v3719_v28 = vsub.f32 1.0, %v3718_v22  ;;  %vm1750_vm3 = vcmp.eq.f32.partialorder %v12778_v51, 0.0  ;;  %vm13218_vm6 = vmor %vm3722_vm15, %vm3723_vm1 }
 0x2bc   : > { %2666 = vadd.xlane.f32.xlu0 %v2665_v0  ;;  %v1477_v31 = vor.u32 1.1754944e-38, %v1476_v11  ;;  %v3726_v41 = vand.u32 2147483647, %v12526_v26  ;;  %v3728_v0 = vand.u32 2147483648, %v12526_v26  ;;  %v13207_v36 = vsub.f32 %v12998_v35, %v13007_v46  ;;  %v13209_v23 = vpop.eup %8462  ;;  %v17837_v11 = vld [vmem:[#allocation49_spill] sm:$0xff] }
 0x2bd   : > { %v2138_v24 = vsub.f32 1.0, %v2137_v8  ;;  %vm2142_vm5 = vweird.f32 %v8461_v48  ;;  %v1469_v22 = vadd.f32 %v17826_v53, %v1468_v2  ;;  %v3720_v50 = vmul.f32 %v12687_v45, %v3719_v28 }
 0x2be   : > { %v1757_v27 = vsub.f32 1.5, %v13160_v47  ;;  %v1780_v6 = vmul.f32 0.5, %v1779_v16  ;;  %v3729_v35 = vor.u32 1.1754944e-38, %v3728_v0  ;;  %v17261_v46 = vand.u32 4294901760, %v13207_v36  ;;  %5948 = vmatpush.xpose.msra.mxu0 %v13207_v36  ;;  %vm13233_vm9 = vmor %vm2141_vm11, %vm2142_vm5 }
 0x2bf   : > { %v2139_v8 = vmul.f32 %v8461_v48, %v2138_v24  ;;  %v1473_v28 = vsel %vm13199_vm4, %v17826_v53, %v1469_v22  ;;  %v3721_v47 = vadd.f32 %v12687_v45, %v3720_v50  ;;  %vm3727_vm7 = vcmp.eq.f32.partialorder %v3726_v41, 8.507059e+37  ;;  %v17835_v53 = vld [vmem:[#allocation19_spill] sm:$0xff]  ;;  %v13254_v24 = vpop.xlane.xlu1 %1637 }
 0x2c0   : > { %vm3187_vm8 = vcmp.eq.f32.partialorder %v12697_v49, 0.0  ;;  %v1767_v26 = vmul.f32 %v13129_v58, %v1766_v13  ;;  %v2148_v2 = vor.u32 1.1754944e-38, %v2147_v63  ;;  %v1478_v0 = vsel %vm13194_vm2, %v1477_v31, %v1473_v28 }
 0x2c1   : > { %v5748_v50 = vsub.f32 %v13207_v36, %v17261_v46  ;;  %v2140_v41 = vadd.f32 %v8461_v48, %v2139_v8  ;;  %vm2146_vm13 = vcmp.eq.f32.partialorder %v2145_v15, 8.507059e+37  ;;  %v13243_v29 = vmul.f32 %v1478_v0, %v17835_v53  ;;  %v17838_v0 = vld [vmem:[#allocation57_spill] sm:$0xff] }
 0x2c2   : > { %v3725_v4 = vsel %vm13218_vm6, %v12687_v45, %v3721_v47  ;;  %vm1738_vm11 = vcmp.eq.f32.partialorder %v12804_v18, 0.0  ;;  %v1739_v63 = vand.u32 2147483648, %v12804_v18  ;;  %v1749_v31 = vsel %vm1748_vm10, %v12778_v51, %v13150_v56 }
 0x2c3   : > { %17836 = vst [vmem:[#allocation50_spill] sm:$0xff] %v13243_v29  ;;  %v3730_v13 = vsel %vm3727_vm7, %v3729_v35, %v3725_v4  ;;  %v5749_v7 = vand.u32 4294901760, %v5748_v50  ;;  %v2144_v15 = vsel %vm13233_vm9, %v8461_v48, %v2140_v41  ;;  %v3911_v22 = vmul.f32 2000.0, %v13243_v29 }
 0x2c4   : > { %v3731_v45 = vmul.f32 %v3730_v13, %v17837_v11  ;;  %v1737_v35 = vsel %vm1736_vm12, %v12804_v18, %v13154_v14  ;;  %v1758_v8 = vmul.f32 %v12962_v17, %v1757_v27  ;;  %v1781_v28 = vsub.f32 1.5, %v1780_v6  ;;  %v17840_v6 = vld [vmem:[#allocation24_spill] sm:$0xff] }
 0x2c5   : > { %v2149_v47 = vsel %vm2146_vm13, %v2148_v2, %v2144_v15  ;;  %5750 = vmatpush.xpose.msra.mxu3 %v5749_v7  ;;  %vm1215_vm10 = vweird.f32 %v11593_v40  ;;  %v1768_v56 = vmul.f32 0.5, %v1767_v26  ;;  %v4002_v48 = vsel %vm517_vm0, %v3911_v22, 0 }
 0x2c6   : > { %v2150_v16 = vmul.f32 %v2149_v47, %v17838_v0  ;;  %v13269_v50 = vsel %vm517_vm0, %v3731_v45, 0  ;;  %v1790_v41 = vmul.f32 %v13209_v23, %v13163_v57  ;;  %8464 = vrsqrt.f32 %v13254_v24 }
 0x2c7   : > { %v13274_v14 = vand.u32 4294901760, %v4002_v48  ;;  %v13277_v17 = vand.u32 4294901760, %v13269_v50  ;;  %v1740_v26 = vsel %vm1738_vm11, %v1739_v63, %v1737_v35  ;;  %v17841_v2 = vand.u32 2147483648, %v12778_v51 }
 0x2c8   : > { %v2602_v27 = vsub.f32 %v17840_v6, %v2150_v16  ;;  %v13288_v4 = vsub.f32 %v13115_v61, %v13125_v3  ;;  %v1759_v13 = vmul.f32 %v1758_v8, %v12900_v30  ;;  %v13295_v15 = vadd.f32 2.220446e-16, %v1740_v26 }
 0x2c9   : > { %17839 = vst [vmem:[#allocation55_spill] sm:$0xff] %v13274_v14  ;;  %v1752_v53 = vsel %vm1750_vm3, %v17841_v2, %v1749_v31  ;;  %v13292_v7 = vsub.f32 %v4002_v48, %v13274_v14  ;;  %5429 = vmatpush.xpose.msra.mxu2 %v13277_v17  ;;  %4608 = vmatmul.f32.gmra.mxu3 %v13274_v14  ;;  %vm1760_vm12 = vcmp.eq.f32.partialorder %v12900_v30, inf  ;;  %v1769_v63 = vsub.f32 1.5, %v1768_v56  ;;  %v13335_v48 = vpop.xlane.xlu0 %1634 }
 0x2ca   : > { %17842 = vst [vmem:[#allocation22_spill] sm:$0xff] %v13288_v4  ;;  %v13297_v18 = vadd.f32 2.220446e-16, %v1752_v53  ;;  %v1782_v51 = vmul.f32 %v13085_v32, %v1781_v28  ;;  %v2634_v61 = vand.u32 2147483647, %v2602_v27  ;;  %6152 = vmatpush.xpose.msra.mxu1 %v13277_v17  ;;  %v1791_v31 = vmul.f32 %v13209_v23, %v1790_v41 }
 0x2cb   : > { %17843 = vst [vmem:[#allocation108_spill] sm:$0xff] %v13292_v7  ;;  %v13305_v22 = vand.u32 4294901760, %v13292_v7  ;;  %8466 = vrcp.f32 %v13295_v15  ;;  %v13309_v11 = vand.u32 4294901760, %v13288_v4  ;;  %v17846_v45 = vand.u32 2147483648, %v12697_v49 }
 0x2cc   : > { %v2668_v28 = vsel %vm517_vm0, %v2634_v61, 0.0  ;;  %v13321_v47 = vpop.eup %8464  ;;  %v1761_v56 = vsel %vm1760_vm12, %v12900_v30, %v1759_v13  ;;  %vm1762_vm14 = vcmp.eq.f32.partialorder %v12900_v30, 0.0  ;;  %v2160_v49 = vand.u32 2147483647, %v13295_v15 }
 0x2cd   : > { %17844 = vst [vmem:[#allocation113_spill] sm:$0xff] %v13305_v22  ;;  %v13316_v32 = vsel %vm3187_vm8, %v17846_v45, %v13142_v59  ;;  %2669 = vadd.xlane.f32.xlu1 %v2668_v28  ;;  %v4373_v0 = vsub.f32 %v13292_v7, %v13305_v22  ;;  %8468 = vrcp.f32 %v13297_v18  ;;  %v13330_v59 = vmul.f32 %v1782_v51, %v13012_v62 }
 0x2ce   : > { %17845 = vst [vmem:[#allocation19_spill] sm:$0xff] %v13309_v11  ;;  %v13333_v16 = vmul.f32 %v13129_v58, %v1769_v63  ;;  %v2162_v41 = vand.u32 2147483648, %v13295_v15  ;;  %v1214_v6 = vadd.f32 %v11674_v43, %v11799_v52  ;;  %v13340_v27 = vmul.f32 0.5, %v1791_v31 }
 0x2cf   : > { %8470 = vrsqrt.f32 %v13335_v48  ;;  %v13343_v26 = vand.u32 4294901760, %v4373_v0  ;;  %v4229_v2 = vsub.f32 %v13288_v4, %v13309_v11  ;;  %v13349_v58 = vmul.f32 %v13321_v47, %v13254_v24 }
 0x2d0   : > { %vm2156_vm15 = vweird.f32 %v13295_v15  ;;  %vm1216_vm1 = vweird.f32 %v11674_v43  ;;  %v1219_v53 = vand.u32 2147483647, %v11593_v40  ;;  %vm13355_vm2 = vcmp.eq.f32.partialorder %v2160_v49, 8.507059e+37 }
 0x2d1   : > { %17847 = vst [vmem:[#allocation49_spill] sm:$0xff] %v13343_v26  ;;  %v8467_v52 = vpop.eup %8466  ;;  %4375 = vmatmul.f32.gmra.mxu2 %v13343_v26  ;;  %vm2171_vm3 = vweird.f32 %v13297_v18  ;;  %v13360_v51 = vand.u32 4294901760, %v4229_v2  ;;  %vm13364_vm4 = vmor %vm1215_vm10, %vm1216_vm1  ;;  %v17853_v61 = vand.u32 2147483648, %v11593_v40  ;;  %v2163_v28 = vor.u32 1.1754944e-38, %v2162_v41  ;;  %v17854_v26 = vld [vmem:[#allocation34_spill] sm:$0xff] }
 0x2d2   : > { %v2152_v45 = vmul.f32 %v8467_v52, %v13295_v15  ;;  %v2175_v0 = vand.u32 2147483647, %v13297_v18  ;;  %v1218_v49 = vsel %vm13364_vm4, %v11674_v43, %v1214_v6  ;;  %vm1784_vm5 = vcmp.eq.f32.partialorder %v13012_v62, inf }
 0x2d3   : > { %17850 = vst [vmem:[#allocation57_spill] sm:$0xff] %v13360_v51  ;;  %v1222_v31 = vor.u32 1.1754944e-38, %v17853_v61  ;;  %v8469_v2 = vpop.eup %8468  ;;  %vm2157_vm6 = vweird.f32 %v8467_v52  ;;  %v2177_v46 = vand.u32 2147483648, %v13297_v18  ;;  %4231 = vmatmul.f32.gmra.mxu0 %v13360_v51  ;;  %vm1220_vm7 = vcmp.eq.f32.partialorder %v1219_v53, 8.507059e+37 }
 0x2d4   : > { %v3703_v40 = vmul.f32 %v12776_v34, %v12660_v10  ;;  %v2153_v61 = vsub.f32 1.0, %v2152_v45  ;;  %v2167_v41 = vmul.f32 %v8469_v2, %v13297_v18  ;;  %vm3707_vm8 = vweird.f32 %v12660_v10  ;;  %vm13393_vm11 = vmor %vm2156_vm15, %vm2157_vm6 }
 0x2d5   : > { %vm3708_vm9 = vweird.f32 %v12776_v34  ;;  %v13383_v43 = vpop.eup %8470  ;;  %v1223_v6 = vsel %vm1220_vm7, %v1222_v31, %v1218_v49  ;;  %v3711_v8 = vand.u32 2147483647, %v12660_v10  ;;  %v3713_v35 = vand.u32 2147483648, %v12660_v10 }
 0x2d6   : > { %v3704_v63 = vsub.f32 1.0, %v3703_v40  ;;  %v2154_v29 = vmul.f32 %v8467_v52, %v2153_v61  ;;  %v2168_v53 = vsub.f32 1.0, %v2167_v41  ;;  %vm2172_vm13 = vweird.f32 %v8469_v2  ;;  %vm13407_vm10 = vmor %vm3707_vm8, %vm3708_vm9 }
 0x2d7   : > { %v13388_v51 = vmul.f32 %v1223_v6, %v17854_v26  ;;  %v2178_v14 = vor.u32 1.1754944e-38, %v2177_v46  ;;  %v3714_v49 = vor.u32 1.1754944e-38, %v3713_v35  ;;  %v13400_v40 = vsub.f32 %v13157_v38, %v13167_v37  ;;  %vm13417_vm12 = vmor %vm2171_vm3, %vm2172_vm13 }
 0x2d8   : > { %v3705_v31 = vmul.f32 %v12776_v34, %v3704_v63  ;;  %v2155_v61 = vadd.f32 %v8467_v52, %v2154_v29  ;;  %v2169_v41 = vmul.f32 %v8469_v2, %v2168_v53  ;;  %v17859_v46 = vand.u32 2147483648, %v12900_v30 }
 0x2d9   : > { %v3894_v26 = vmul.f32 2000.0, %v13388_v51  ;;  %vm3712_vm15 = vcmp.eq.f32.partialorder %v3711_v8, 8.507059e+37  ;;  %v17267_v10 = vand.u32 4294901760, %v13400_v40  ;;  %5951 = vmatpush.xpose.msra.mxu0 %v13400_v40  ;;  %v13453_v15 = vsel %vm1784_vm5, %v13012_v62, %v13330_v59  ;;  %v17867_v59 = vld [vmem:[#allocation111_spill] sm:$0xff] }
 0x2da   : > { %v1764_v35 = vsel %vm1762_vm14, %v17859_v46, %v1761_v56  ;;  %v3706_v29 = vadd.f32 %v12776_v34, %v3705_v31  ;;  %v2159_v63 = vsel %vm13393_vm11, %v8467_v52, %v2155_v61  ;;  %v2170_v30 = vadd.f32 %v8469_v2, %v2169_v41  ;;  %v17863_v52 = vld [vmem:[#allocation59_spill] sm:$0xff] }
 0x2db   : > { %v13423_v6 = vadd.f32 2.220446e-16, %v1764_v35  ;;  %vm2176_vm14 = vcmp.eq.f32.partialorder %v2175_v0, 8.507059e+37  ;;  %v13429_v18 = vsel %vm517_vm0, %v3894_v26, 0  ;;  %v2164_v56 = vsel %vm13355_vm2, %v2163_v28, %v2159_v63  ;;  %v17864_v41 = vld [vmem:[#allocation51_spill] sm:$0xff]  ;;  %v17866_v35 = vld [vmem:[#allocation58_spill] sm:$0xff] }
 0x2dc   : > { %v13434_v53 = vand.u32 4294901760, %v13429_v18  ;;  %v3710_v8 = vsel %vm13407_vm10, %v12776_v34, %v3706_v29  ;;  %v5754_v45 = vsub.f32 %v13400_v40, %v17267_v10  ;;  %v2165_v31 = vmul.f32 %v2164_v56, %v17863_v52  ;;  %v17869_v52 = vld [vmem:[#allocation25_spill] sm:$0xff] }
 0x2dd   : > { %v2174_v0 = vsel %vm13417_vm12, %v8469_v2, %v2170_v30  ;;  %v3715_v61 = vsel %vm3712_vm15, %v3714_v49, %v3710_v8  ;;  %8472 = vrcp.f32 %v13423_v6  ;;  %v1771_v2 = vmul.f32 %v13333_v16, %v13075_v44  ;;  %v17865_v49 = vld [vmem:[#allocation23_spill] sm:$0xff]  ;;  %v17868_v30 = vld [vmem:[#allocation65_spill] sm:$0xff]  ;;  %v13472_v8 = vpop.xlane.xlu2 %1640 }
 0x2de   : > { %17862 = vst [vmem:[#allocation24_spill] sm:$0xff] %v13434_v53  ;;  %v2179_v28 = vsel %vm2176_vm14, %v2178_v14, %v2174_v0  ;;  %4540 = vmatmul.f32.gmra.mxu1 %v13434_v53  ;;  %v3716_v26 = vmul.f32 %v3715_v61, %v17864_v41  ;;  %v5755_v34 = vand.u32 4294901760, %v5754_v45  ;;  %v2603_v46 = vsub.f32 %v17865_v49, %v2165_v31 }
 0x2df   : > { %v2180_v38 = vmul.f32 %v2179_v28, %v17866_v35  ;;  %vm1772_vm1 = vcmp.eq.f32.partialorder %v13075_v44, inf  ;;  %v1793_v14 = vsub.f32 1.5, %v13340_v27  ;;  %v13463_v29 = vmul.f32 %v13321_v47, %v13349_v58 }
 0x2e0   : > { %v13466_v63 = vsel %vm517_vm0, %v3716_v26, 0  ;;  %5756 = vmatpush.xpose.msra.mxu3 %v5755_v34  ;;  %v1481_v56 = vmul.f32 %v17868_v30, %v17867_v59  ;;  %v1802_v16 = vmul.f32 %v13383_v43, %v13335_v48  ;;  %v2635_v45 = vand.u32 2147483647, %v2603_v46 }
 0x2e1   : > { %v2604_v31 = vsub.f32 %v17869_v52, %v2180_v38  ;;  %v13476_v27 = vand.u32 4294901760, %v13466_v63  ;;  %8474 = vrsqrt.f32 %v13472_v8  ;;  %vm2186_vm2 = vweird.f32 %v13423_v6 }
 0x2e2   : > { %v1482_v58 = vsub.f32 1.0, %v1481_v56  ;;  %vm1485_vm3 = vweird.f32 %v17867_v59  ;;  %v2671_v61 = vsel %vm517_vm0, %v2635_v45, 0.0  ;;  %vm1486_vm4 = vweird.f32 %v17868_v30 }
 0x2e3   : > { %v8473_v0 = vpop.eup %8472  ;;  %v2636_v28 = vand.u32 2147483647, %v2604_v31  ;;  %5431 = vmatpush.xpose.msra.mxu2 %v13476_v27  ;;  %v1489_v41 = vand.u32 2147483647, %v17867_v59  ;;  %6154 = vmatpush.xpose.msra.mxu1 %v13476_v27  ;;  %v2190_v34 = vand.u32 2147483647, %v13423_v6  ;;  %vm13493_vm6 = vmor %vm1485_vm3, %vm1486_vm4  ;;  %v3688_v45 = vmul.f32 %v13019_v25, %v12848_v19 }
 0x2e4   : > { %2672 = vadd.xlane.f32.xlu2 %v2671_v61  ;;  %v2182_v26 = vmul.f32 %v8473_v0, %v13423_v6  ;;  %v2192_v49 = vand.u32 2147483648, %v13423_v6  ;;  %v1483_v46 = vmul.f32 %v17868_v30, %v1482_v58  ;;  %vm2187_vm5 = vweird.f32 %v8473_v0 }
 0x2e5   : > { %v2674_v35 = vsel %vm517_vm0, %v2636_v28, 0.0  ;;  %v1491_v56 = vand.u32 2147483648, %v17867_v59  ;;  %vm1786_vm7 = vcmp.eq.f32.partialorder %v13012_v62, 0.0  ;;  %vm1774_vm8 = vcmp.eq.f32.partialorder %v13075_v44, 0.0  ;;  %vm13516_vm10 = vmor %vm2186_vm2, %vm2187_vm5 }
 0x2e6   : > { %2675 = vadd.xlane.f32.xlu0 %v2674_v35  ;;  %v2183_v52 = vsub.f32 1.0, %v2182_v26  ;;  %v1484_v31 = vadd.f32 %v17868_v30, %v1483_v46  ;;  %vm1490_vm9 = vcmp.eq.f32.partialorder %v1489_v41, 8.507059e+37  ;;  %vm3692_vm13 = vweird.f32 %v12848_v19 }
 0x2e7   : > { %v1492_v58 = vor.u32 1.1754944e-38, %v1491_v56  ;;  %v3689_v61 = vsub.f32 1.0, %v3688_v45  ;;  %vm3693_vm11 = vweird.f32 %v13019_v25  ;;  %v3696_v59 = vand.u32 2147483647, %v12848_v19  ;;  %v13506_v28 = vpop.eup %8474 }
 0x2e8   : > { %v1803_v10 = vmul.f32 %v13383_v43, %v1802_v16  ;;  %v2184_v13 = vmul.f32 %v8473_v0, %v2183_v52  ;;  %v1488_v26 = vsel %vm13493_vm6, %v17868_v30, %v1484_v31  ;;  %v3698_v46 = vand.u32 2147483648, %v12848_v19  ;;  %v17874_v30 = vld [vmem:[#allocation21_spill] sm:$0xff]  ;;  %vm13532_vm15 = vmor %vm3692_vm13, %vm3693_vm11 }
 0x2e9   : > { %v2193_v35 = vor.u32 1.1754944e-38, %v2192_v49  ;;  %v1493_v56 = vsel %vm1490_vm9, %v1492_v58, %v1488_v26  ;;  %v3690_v45 = vmul.f32 %v13019_v25, %v3689_v61  ;;  %v13523_v16 = vsub.f32 %v13269_v50, %v13277_v17  ;;  %v13545_v58 = vpop.xlane.xlu1 %1646 }
 0x2ea   : > { %v2185_v52 = vadd.f32 %v8473_v0, %v2184_v13  ;;  %vm2191_vm12 = vcmp.eq.f32.partialorder %v2190_v34, 8.507059e+37  ;;  %v13526_v38 = vmul.f32 %v1493_v56, %v17874_v30  ;;  %v3699_v49 = vor.u32 1.1754944e-38, %v3698_v46  ;;  %v17878_v56 = vld [vmem:[#allocation60_spill] sm:$0xff] }
 0x2eb   : > { %v1773_v31 = vsel %vm1772_vm1, %v13075_v44, %v1771_v2  ;;  %v3691_v50 = vadd.f32 %v13019_v25, %v3690_v45  ;;  %vm3697_vm14 = vcmp.eq.f32.partialorder %v3696_v59, 8.507059e+37  ;;  %v17268_v13 = vand.u32 4294901760, %v13523_v16  ;;  %5954 = vmatpush.xpose.msra.mxu0 %v13523_v16 }
 0x2ec   : > { %17875 = vst [vmem:[#allocation34_spill] sm:$0xff] %v13526_v38  ;;  %v1794_v34 = vmul.f32 %v13209_v23, %v1793_v14  ;;  %v1826_v19 = vmul.f32 %v13506_v28, %v13472_v8  ;;  %v2189_v61 = vsel %vm13516_vm10, %v8473_v0, %v2185_v52  ;;  %v3912_v26 = vmul.f32 2000.0, %v13526_v38  ;;  %v17880_v0 = vld [vmem:[#allocation53_spill] sm:$0xff] }
 0x2ed   : > { %v1816_v2 = vmul.f32 0.5, %v13463_v29  ;;  %v2194_v46 = vsel %vm2191_vm12, %v2193_v35, %v2189_v61  ;;  %v3695_v59 = vsel %vm13532_vm15, %v13019_v25, %v3691_v50  ;;  %v5760_v23 = vsub.f32 %v13523_v16, %v17268_v13  ;;  %v17881_v50 = vld [vmem:[#allocation27_spill] sm:$0xff] }
 0x2ee   : > { %v1804_v14 = vmul.f32 0.5, %v1803_v10  ;;  %v2195_v45 = vmul.f32 %v2194_v46, %v17878_v56  ;;  %v4005_v30 = vsel %vm517_vm0, %v3912_v26, 0  ;;  %v3700_v41 = vsel %vm3697_vm14, %v3699_v49, %v3695_v59 }
 0x2ef   : > { %vm1230_vm1 = vweird.f32 %v11756_v21  ;;  %8476 = vrsqrt.f32 %v13545_v58  ;;  %v13561_v29 = vand.u32 4294901760, %v4005_v30  ;;  %v3701_v35 = vmul.f32 %v3700_v41, %v17880_v0  ;;  %v17888_v0 = vld [vmem:[#allocation141_spill] sm:$0xff] }
 0x2f0   : > { %v5761_v52 = vand.u32 4294901760, %v5760_v23  ;;  %v13565_v25 = vadd.f32 2.220446e-16, %v13316_v32  ;;  %v1795_v6 = vmul.f32 %v1794_v34, %v13163_v57  ;;  %v1827_v10 = vmul.f32 %v13506_v28, %v1826_v19 }
 0x2f1   : > { %17879 = vst [vmem:[#allocation59_spill] sm:$0xff] %v13561_v29  ;;  %v2605_v61 = vsub.f32 %v17881_v50, %v2195_v45  ;;  %v13571_v49 = vsub.f32 %v4005_v30, %v13561_v29  ;;  %v13574_v26 = vsel %vm517_vm0, %v3701_v35, 0  ;;  %v17883_v46 = vand.u32 2147483648, %v13075_v44  ;;  %4612 = vmatmul.f32.gmra.mxu3 %v13561_v29 }
 0x2f2   : > { %5762 = vmatpush.xpose.msra.mxu3 %v5761_v52  ;;  %v17884_v32 = vand.u32 2147483648, %v13012_v62  ;;  %v1817_v19 = vsub.f32 1.5, %v1816_v2  ;;  %v13586_v56 = vand.u32 4294901760, %v13574_v26  ;;  %vm1796_vm2 = vcmp.eq.f32.partialorder %v13163_v57, inf }
 0x2f3   : > { %17882 = vst [vmem:[#allocation51_spill] sm:$0xff] %v13571_v49  ;;  %v1776_v59 = vsel %vm1774_vm8, %v17883_v46, %v1773_v31  ;;  %v2637_v23 = vand.u32 2147483647, %v2605_v61  ;;  %v1805_v30 = vsub.f32 1.5, %v1804_v14  ;;  %v13593_v44 = vand.u32 4294901760, %v13571_v49  ;;  %v13628_v61 = vpop.xlane.xlu0 %1643 }
 0x2f4   : > { %v1788_v34 = vsel %vm1786_vm7, %v17884_v32, %v13453_v15  ;;  %v13588_v45 = vadd.f32 2.220446e-16, %v1776_v59  ;;  %v13597_v41 = vmul.f32 0.5, %v1827_v10  ;;  %5433 = vmatpush.xpose.msra.mxu2 %v13586_v56  ;;  %v13604_v15 = vsub.f32 %v13429_v18, %v13434_v53  ;;  %6156 = vmatpush.xpose.msra.mxu1 %v13586_v56  ;;  %v17890_v32 = vld [vmem:[#allocation151_spill] sm:$0xff] }
 0x2f5   : > { %17885 = vst [vmem:[#allocation23_spill] sm:$0xff] %v13593_v44  ;;  %v13595_v31 = vadd.f32 2.220446e-16, %v1788_v34  ;;  %v2677_v62 = vsel %vm517_vm0, %v2637_v23, 0.0  ;;  %v13607_v2 = vpop.eup %8476  ;;  %v17887_v14 = vsub.f32 1.0, %v11823_v54  ;;  %v4381_v10 = vsub.f32 %v13571_v49, %v13593_v44  ;;  %v17891_v34 = vld [vmem:[#allocation142_spill] sm:$0xff] }
 0x2f6   : > { %8478 = vrcp.f32 %v13588_v45  ;;  %17886 = vst [vmem:[#allocation58_spill] sm:$0xff] %v13604_v15  ;;  %2678 = vadd.xlane.f32.xlu1 %v2677_v62  ;;  %v13622_v18 = vsel %vm1796_vm2, %v13163_v57, %v1795_v6  ;;  %v13626_v50 = vmul.f32 %v13321_v47, %v1817_v19  ;;  %v13631_v46 = vmul.f32 %v13383_v43, %v1805_v30 }
 0x2f7   : > { %v13612_v35 = vmul.f32 %v17888_v0, %v17887_v14  ;;  %8480 = vrcp.f32 %v13595_v31  ;;  %v13634_v59 = vand.u32 4294901760, %v4381_v10  ;;  %v1229_v23 = vadd.f32 %v17891_v34, %v17890_v32 }
 0x2f8   : > { %8482 = vrcp.f32 %v13565_v25  ;;  %v13641_v62 = vmul.f32 %v13607_v2, %v13545_v58  ;;  %v2205_v47 = vand.u32 2147483647, %v13588_v45  ;;  %v13645_v19 = vand.u32 4294901760, %v13604_v15 }
 0x2f9   : > { %8484 = vrsqrt.f32 %v13628_v61  ;;  %17889 = vst [vmem:[#allocation111_spill] sm:$0xff] %v13634_v59  ;;  %vm1798_vm3 = vcmp.eq.f32.partialorder %v13163_v57, 0.0  ;;  %4383 = vmatmul.f32.gmra.mxu2 %v13634_v59  ;;  %vm2201_vm4 = vweird.f32 %v13588_v45  ;;  %vm1231_vm5 = vweird.f32 %v17891_v34 }
 0x2fa   : > { %17892 = vst [vmem:[#allocation65_spill] sm:$0xff] %v13645_v19  ;;  %v1234_v43 = vand.u32 2147483647, %v11756_v21  ;;  %v17893_v30 = vand.u32 2147483648, %v11756_v21  ;;  %v2207_v32 = vand.u32 2147483648, %v13588_v45  ;;  %vm2216_vm6 = vweird.f32 %v13595_v31  ;;  %vm13660_vm7 = vmor %vm1230_vm1, %vm1231_vm5 }
 0x2fb   : > { %v4237_v13 = vsub.f32 %v13604_v15, %v13645_v19  ;;  %v3673_v52 = vmul.f32 %v12898_v39, %v12747_v9  ;;  %v2220_v38 = vand.u32 2147483647, %v13595_v31  ;;  %v1233_v59 = vsel %vm13660_vm7, %v17891_v34, %v1229_v23 }
 0x2fc   : > { %v1237_v14 = vor.u32 1.1754944e-38, %v17893_v30  ;;  %v8479_v10 = vpop.eup %8478  ;;  %vm1235_vm8 = vcmp.eq.f32.partialorder %v1234_v43, 8.507059e+37  ;;  %vm13673_vm13 = vcmp.eq.f32.partialorder %v2205_v47, 8.507059e+37  ;;  %v2222_v7 = vand.u32 2147483648, %v13595_v31  ;;  %v17899_v43 = vld [vmem:[#allocation36_spill] sm:$0xff] }
 0x2fd   : > { %v8481_v54 = vpop.eup %8480  ;;  %v2197_v30 = vmul.f32 %v8479_v10, %v13588_v45  ;;  %vm2202_vm9 = vweird.f32 %v8479_v10  ;;  %v13681_v53 = vand.u32 4294901760, %v4237_v13  ;;  %v3674_v6 = vsub.f32 1.0, %v3673_v52 }
 0x2fe   : > { %v13671_v29 = vpop.eup %8482  ;;  %v2212_v49 = vmul.f32 %v8481_v54, %v13595_v31  ;;  %v1238_v3 = vsel %vm1235_vm8, %v1237_v14, %v1233_v59  ;;  %v2208_v34 = vor.u32 1.1754944e-38, %v2207_v32  ;;  %vm2217_vm11 = vweird.f32 %v8481_v54  ;;  %vm13688_vm10 = vmor %vm2201_vm4, %vm2202_vm9 }
 0x2ff   : > { %v13679_v44 = vpop.eup %8484  ;;  %v2198_v22 = vsub.f32 1.0, %v2197_v30  ;;  %17898 = vst [vmem:[#allocation25_spill] sm:$0xff] %v13681_v53  ;;  %v13684_v15 = vmul.f32 %v1238_v3, %v17899_v43  ;;  %4239 = vmatmul.f32.gmra.mxu0 %v13681_v53  ;;  %v3675_v13 = vmul.f32 %v12898_v39, %v3674_v6  ;;  %vm3677_vm12 = vweird.f32 %v12747_v9  ;;  %vm13704_vm1 = vmor %vm2216_vm6, %vm2217_vm11 }
 0x300   : > { %v2213_v23 = vsub.f32 1.0, %v2212_v49  ;;  %vm3678_vm15 = vweird.f32 %v12898_v39  ;;  %v2223_v52 = vor.u32 1.1754944e-38, %v2222_v7  ;;  %v3681_v45 = vand.u32 2147483647, %v12747_v9 }
 0x301   : > { %v2199_v47 = vmul.f32 %v8479_v10, %v2198_v22  ;;  %v3895_v3 = vmul.f32 2000.0, %v13684_v15  ;;  %vm13697_vm14 = vmor %vm3677_vm12, %vm3678_vm15  ;;  %v3676_v32 = vadd.f32 %v12898_v39, %v3675_v13  ;;  %v3683_v30 = vand.u32 2147483648, %v12747_v9 }
 0x302   : > { %v2214_v49 = vmul.f32 %v8481_v54, %v2213_v23  ;;  %v13712_v7 = vsub.f32 %v13466_v63, %v13476_v27  ;;  %vm2221_vm2 = vcmp.eq.f32.partialorder %v2220_v38, 8.507059e+37  ;;  %vm3682_vm4 = vcmp.eq.f32.partialorder %v3681_v45, 8.507059e+37 }
 0x303   : > { %v2200_v59 = vadd.f32 %v8479_v10, %v2199_v47  ;;  %v13715_v23 = vsel %vm517_vm0, %v3895_v3, 0  ;;  %v3680_v9 = vsel %vm13697_vm14, %v12898_v39, %v3676_v32  ;;  %v3684_v47 = vor.u32 1.1754944e-38, %v3683_v30  ;;  %v17912_v32 = vld [vmem:[#allocation97_spill] sm:$0xff] }
 0x304   : > { %v2215_v6 = vadd.f32 %v8481_v54, %v2214_v49  ;;  %v13720_v43 = vand.u32 4294901760, %v13715_v23  ;;  %5957 = vmatpush.xpose.msra.mxu0 %v13712_v7  ;;  %v17289_v13 = vand.u32 4294901760, %v13712_v7  ;;  %v17907_v4 = vand.u32 2147483648, %v13163_v57  ;;  %v17908_v49 = vld [vmem:[#allocation62_spill] sm:$0xff] }
 0x305   : > { %v2204_v31 = vsel %vm13688_vm10, %v8479_v10, %v2200_v59  ;;  %v3685_v22 = vsel %vm3682_vm4, %v3684_v47, %v3680_v9  ;;  %v1851_v21 = vmul.f32 %v13607_v2, %v13641_v62  ;;  %v17910_v59 = vld [vmem:[#allocation52_spill] sm:$0xff]  ;;  %vm1808_vm5 = vcmp.eq.f32.partialorder %v13335_v48, inf }
 0x306   : > { %17906 = vst [vmem:[#allocation21_spill] sm:$0xff] %v13720_v43  ;;  %v2209_v63 = vsel %vm13673_vm13, %v2208_v34, %v2204_v31  ;;  %v2219_v38 = vsel %vm13704_vm1, %v8481_v54, %v2215_v6  ;;  %v1800_v10 = vsel %vm1798_vm3, %v17907_v4, %v13622_v18  ;;  %4544 = vmatmul.f32.gmra.mxu1 %v13720_v43  ;;  %v17909_v54 = vld [vmem:[#allocation61_spill] sm:$0xff]  ;;  %v17911_v18 = vsub.f32 1.0, %v11956_v12  ;;  %v17913_v6 = vld [vmem:[#allocation26_spill] sm:$0xff]  ;;  %v17914_v9 = vld [vmem:[#allocation28_spill] sm:$0xff] }
 0x307   : > { %v2210_v3 = vmul.f32 %v2209_v63, %v17908_v49  ;;  %v2224_v39 = vsel %vm2221_vm2, %v2223_v52, %v2219_v38  ;;  %v13738_v45 = vadd.f32 2.220446e-16, %v1800_v10  ;;  %v3686_v14 = vmul.f32 %v3685_v22, %v17910_v59 }
 0x308   : > { %v2225_v34 = vmul.f32 %v2224_v39, %v17909_v54  ;;  %v5766_v57 = vsub.f32 %v13712_v7, %v17289_v13  ;;  %v13750_v52 = vmul.f32 %v17912_v32, %v17911_v18  ;;  %v13762_v12 = vmul.f32 %v13626_v50, %v13254_v24  ;;  %v13781_v54 = vpop.xlane.xlu2 %1649 }
 0x309   : > { %v2606_v31 = vsub.f32 %v17913_v6, %v2210_v3  ;;  %8486 = vrcp.f32 %v13738_v45  ;;  %v13758_v63 = vsel %vm517_vm0, %v3686_v14, 0  ;;  %v13766_v4 = vmul.f32 %v13631_v46, %v13335_v48 }
 0x30a   : > { %v2607_v47 = vsub.f32 %v17914_v9, %v2225_v34  ;;  %v5767_v38 = vand.u32 4294901760, %v5766_v57  ;;  %v13769_v49 = vand.u32 4294901760, %v13758_v63  ;;  %vm1820_vm3 = vcmp.eq.f32.partialorder %v13254_v24, inf }
 0x30b   : > { %v2638_v10 = vand.u32 2147483647, %v2606_v31  ;;  %v17916_v3 = vsub.f32 1.5, %v13597_v41  ;;  %v13777_v22 = vmul.f32 0.5, %v1851_v21  ;;  %v1838_v50 = vmul.f32 %v13679_v44, %v13628_v61  ;;  %v17918_v41 = vld [vmem:[#allocation77_spill] sm:$0xff] }
 0x30c   : > { %17915 = vst [vmem:[#allocation60_spill] sm:$0xff] %v13769_v49  ;;  %v2639_v46 = vand.u32 2147483647, %v2607_v47  ;;  %5768 = vmatpush.xpose.msra.mxu3 %v5767_v38  ;;  %8488 = vrsqrt.f32 %v13781_v54  ;;  %5435 = vmatpush.xpose.msra.mxu2 %v13769_v49  ;;  %vm2231_vm6 = vweird.f32 %v13738_v45  ;;  %v2235_v14 = vand.u32 2147483647, %v13738_v45  ;;  %v13800_v47 = vpop.xlane.xlu1 %1655 }
 0x30d   : > { %v13775_v39 = vmul.f32 %v13506_v28, %v17916_v3  ;;  %v2680_v34 = vsel %vm517_vm0, %v2638_v10, 0.0  ;;  %v17917_v28 = vld [vmem:[#allocation110_spill] sm:$0xff]  ;;  %6158 = vmatpush.xpose.msra.mxu1 %v13769_v49  ;;  %v3658_v18 = vmul.f32 %v13181_v55, %v13009_v5  ;;  %vm1501_vm8 = vweird.f32 %v17918_v41 }
 0x30e   : > { %v1496_v21 = vmul.f32 %v17918_v41, %v17917_v28  ;;  %2681 = vadd.xlane.f32.xlu2 %v2680_v34  ;;  %v2683_v59 = vsel %vm517_vm0, %v2639_v46, 0.0  ;;  %v1506_v57 = vand.u32 2147483648, %v17917_v28  ;;  %vm1500_vm7 = vweird.f32 %v17917_v28 }
 0x30f   : > { %v8487_v6 = vpop.eup %8486  ;;  %2684 = vadd.xlane.f32.xlu0 %v2683_v59  ;;  %v1504_v9 = vand.u32 2147483647, %v17917_v28  ;;  %vm1810_vm9 = vcmp.eq.f32.partialorder %v13335_v48, 0.0  ;;  %v2237_v10 = vand.u32 2147483648, %v13738_v45  ;;  %vm3662_vm13 = vweird.f32 %v13009_v5  ;;  %vm13808_vm12 = vmor %vm1500_vm7, %vm1501_vm8 }
 0x310   : > { %v1497_v31 = vsub.f32 1.0, %v1496_v21  ;;  %v2227_v38 = vmul.f32 %v8487_v6, %v13738_v45  ;;  %vm3663_vm11 = vweird.f32 %v13181_v55  ;;  %vm2232_vm10 = vweird.f32 %v8487_v6 }
 0x311   : > { %v3659_v46 = vsub.f32 1.0, %v3658_v18  ;;  %v3666_v34 = vand.u32 2147483647, %v13009_v5  ;;  %v1507_v59 = vor.u32 1.1754944e-38, %v1506_v57  ;;  %v3668_v13 = vand.u32 2147483648, %v13009_v5  ;;  %vm13828_vm1 = vmor %vm3662_vm13, %vm3663_vm11 }
 0x312   : > { %v1498_v3 = vmul.f32 %v17918_v41, %v1497_v31  ;;  %v2228_v21 = vsub.f32 1.0, %v2227_v38  ;;  %v13815_v30 = vsub.f32 %v13574_v26, %v13586_v56  ;;  %v13817_v62 = vpop.eup %8488  ;;  %vm1822_vm15 = vcmp.eq.f32.partialorder %v13254_v24, 0.0  ;;  %vm13837_vm2 = vmor %vm2231_vm6, %vm2232_vm10 }
 0x313   : > { %8490 = vrsqrt.f32 %v13800_v47  ;;  %vm1505_vm14 = vcmp.eq.f32.partialorder %v1504_v9, 8.507059e+37  ;;  %v3660_v31 = vmul.f32 %v13181_v55, %v3659_v46  ;;  %v1839_v38 = vmul.f32 %v13679_v44, %v1838_v50 }
 0x314   : > { %v1499_v18 = vadd.f32 %v17918_v41, %v1498_v3  ;;  %v2229_v57 = vmul.f32 %v8487_v6, %v2228_v21  ;;  %v3669_v53 = vor.u32 1.1754944e-38, %v3668_v13  ;;  %v17293_v19 = vand.u32 4294901760, %v13815_v30  ;;  %5960 = vmatpush.xpose.msra.mxu0 %v13815_v30 }
 0x315   : > { %v2238_v50 = vor.u32 1.1754944e-38, %v2237_v10  ;;  %v3661_v3 = vadd.f32 %v13181_v55, %v3660_v31  ;;  %vm3667_vm4 = vcmp.eq.f32.partialorder %v3666_v34, 8.507059e+37  ;;  %vm2236_vm7 = vcmp.eq.f32.partialorder %v2235_v14, 8.507059e+37  ;;  %v17925_v10 = vld [vmem:[#allocation20_spill] sm:$0xff]  ;;  %v17927_v14 = vld [vmem:[#allocation137_spill] sm:$0xff] }
 0x316   : > { %v1503_v5 = vsel %vm13808_vm12, %v17918_v41, %v1499_v18  ;;  %v2230_v13 = vadd.f32 %v8487_v6, %v2229_v57  ;;  %v5772_v21 = vsub.f32 %v13815_v30, %v17293_v19  ;;  %v1821_v45 = vsel %vm1820_vm3, %v13254_v24, %v13762_v12 }
 0x317   : > { %v1508_v46 = vsel %vm1505_vm14, %v1507_v59, %v1503_v5  ;;  %vm1832_vm6 = vcmp.eq.f32.partialorder %v13472_v8, inf  ;;  %v3665_v41 = vsel %vm13828_vm1, %v13181_v55, %v3661_v3  ;;  %vm1245_vm8 = vweird.f32 %v17927_v14  ;;  %v13870_v5 = vpop.xlane.xlu0 %1652  ;;  %v17928_v3 = vld [vmem:[#allocation54_spill] sm:$0xff] }
 0x318   : > { %v13854_v28 = vmul.f32 %v1508_v46, %v17925_v10  ;;  %v1809_v34 = vsel %vm1808_vm5, %v13335_v48, %v13766_v4  ;;  %v2234_v59 = vsel %vm13837_vm2, %v8487_v6, %v2230_v13  ;;  %v3670_v12 = vsel %vm3667_vm4, %v3669_v53, %v3665_v41  ;;  %v17929_v6 = vld [vmem:[#allocation63_spill] sm:$0xff] }
 0x319   : > { %v5773_v18 = vand.u32 4294901760, %v5772_v21  ;;  %v13866_v31 = vpop.eup %8490  ;;  %v1831_v57 = vmul.f32 %v13775_v39, %v13472_v8  ;;  %v2239_v55 = vsel %vm2236_vm7, %v2238_v50, %v2234_v59  ;;  %v3671_v46 = vmul.f32 %v3670_v12, %v17928_v3 }
 0x31a   : > { %17926 = vst [vmem:[#allocation53_spill] sm:$0xff] %v13854_v28  ;;  %v3913_v26 = vmul.f32 2000.0, %v13854_v28  ;;  %v1853_v10 = vsub.f32 1.5, %v13777_v22  ;;  %v1840_v4 = vmul.f32 0.5, %v1839_v38  ;;  %8492 = vrsqrt.f32 %v13870_v5  ;;  %v17943_v28 = vld [vmem:[#allocation81_spill] sm:$0xff] }
 0x31b   : > { %v2240_v53 = vmul.f32 %v2239_v55, %v17929_v6  ;;  %5774 = vmatpush.xpose.msra.mxu3 %v5773_v18  ;;  %v1862_v9 = vmul.f32 %v13817_v62, %v13781_v54  ;;  %v13881_v13 = vsel %vm517_vm0, %v3671_v46, 0  ;;  %v17930_v50 = vand.u32 2147483648, %v13335_v48 }
 0x31c   : > { %v4008_v39 = vsel %vm517_vm0, %v3913_v26, 0  ;;  %v1886_v22 = vmul.f32 %v13866_v31, %v13800_v47  ;;  %v13893_v59 = vand.u32 4294901760, %v13881_v13  ;;  %v13901_v48 = vsub.f32 %v13715_v23, %v13720_v43 }
 0x31d   : > { %v1812_v21 = vsel %vm1810_vm9, %v17930_v50, %v1809_v34  ;;  %v2608_v38 = vsub.f32 %v12220_v60, %v2240_v53  ;;  %v13890_v41 = vand.u32 4294901760, %v4008_v39  ;;  %v1854_v34 = vmul.f32 %v13607_v2, %v1853_v10 }
 0x31e   : > { %v13897_v55 = vadd.f32 2.220446e-16, %v1812_v21  ;;  %17932 = vst [vmem:[#allocation141_spill] sm:$0xff] %v13901_v48  ;;  %5437 = vmatpush.xpose.msra.mxu2 %v13893_v59  ;;  %v17934_v3 = vand.u32 2147483648, %v13254_v24  ;;  %v1841_v6 = vsub.f32 1.5, %v1840_v4  ;;  %v1863_v23 = vmul.f32 %v13817_v62, %v1862_v9  ;;  %6160 = vmatpush.xpose.msra.mxu1 %v13893_v59  ;;  %v13930_v9 = vpop.xlane.xlu2 %1658 }
 0x31f   : > { %17931 = vst [vmem:[#allocation27_spill] sm:$0xff] %v13890_v41  ;;  %v2640_v26 = vand.u32 2147483647, %v2608_v38  ;;  %v13905_v60 = vsub.f32 %v4008_v39, %v13890_v41  ;;  %4616 = vmatmul.f32.gmra.mxu3 %v13890_v41  ;;  %v13922_v10 = vsel %vm1832_vm6, %v13472_v8, %v1831_v57  ;;  %v1887_v24 = vmul.f32 %v13866_v31, %v1886_v22  ;;  %v13976_v12 = vpop.xlane.xlu0 %1661 }
 0x320   : > { %v1824_v46 = vsel %vm1822_vm15, %v17934_v3, %v1821_v45  ;;  %8494 = vrcp.f32 %v13897_v55  ;;  %v13917_v2 = vpop.eup %8492  ;;  %vm1834_vm3 = vcmp.eq.f32.partialorder %v13472_v8, 0.0  ;;  %v2250_v39 = vand.u32 2147483647, %v13897_v55  ;;  %17942 = vst [vmem:[#allocation61_spill] sm:$0xff] %v13976_v12 }
 0x321   : > { %17933 = vst [vmem:[#allocation151_spill] sm:$0xff] %v13905_v60  ;;  %v2686_v45 = vsel %vm517_vm0, %v2640_v26, 0.0  ;;  %v13927_v4 = vand.u32 4294901760, %v13905_v60  ;;  %v2252_v50 = vand.u32 2147483648, %v13897_v55  ;;  %v13934_v21 = vadd.f32 2.220446e-16, %v1824_v46 }
 0x322   : > { %2687 = vadd.xlane.f32.xlu1 %v2686_v45  ;;  %v13937_v57 = vand.u32 4294901760, %v13901_v48  ;;  %v13940_v22 = vmul.f32 %v1854_v34, %v13545_v58  ;;  %v1244_v26 = vadd.f32 %v17888_v0, %v13612_v35  ;;  %vm1246_vm5 = vweird.f32 %v17888_v0 }
 0x323   : > { %17935 = vst [vmem:[#allocation142_spill] sm:$0xff] %v13927_v4  ;;  %v4389_v38 = vsub.f32 %v13905_v60, %v13927_v4  ;;  %v13948_v3 = vmul.f32 %v13679_v44, %v1841_v6  ;;  %v13950_v45 = vmul.f32 0.5, %v1863_v23  ;;  %v13954_v46 = vmul.f32 %v13917_v2, %v13870_v5  ;;  %vm13959_vm9 = vmor %vm1245_vm8, %vm1246_vm5 }
 0x324   : > { %17936 = vst [vmem:[#allocation36_spill] sm:$0xff] %v13937_v57  ;;  %8496 = vrcp.f32 %v13934_v21  ;;  %v13963_v35 = vmul.f32 0.5, %v1887_v24  ;;  %v4245_v6 = vsub.f32 %v13901_v48, %v13937_v57  ;;  %vm2246_vm13 = vweird.f32 %v13897_v55 }
 0x325   : > { %8498 = vrsqrt.f32 %v13930_v9  ;;  %v13966_v44 = vand.u32 4294901760, %v4389_v38  ;;  %vm13971_vm11 = vcmp.eq.f32.partialorder %v2250_v39, 8.507059e+37  ;;  %v2253_v18 = vor.u32 1.1754944e-38, %v2252_v50 }
 0x326   : > { %v8495_v23 = vpop.eup %8494  ;;  %v1249_v53 = vand.u32 2147483647, %v17927_v14  ;;  %vm2261_vm10 = vweird.f32 %v13934_v21  ;;  %v2265_v38 = vand.u32 2147483647, %v13934_v21  ;;  %v1248_v39 = vsel %vm13959_vm9, %v17888_v0, %v1244_v26 }
 0x327   : > { %17939 = vst [vmem:[#allocation62_spill] sm:$0xff] %v13966_v44  ;;  %4391 = vmatmul.f32.gmra.mxu2 %v13966_v44  ;;  %v2242_v24 = vmul.f32 %v8495_v23, %v13897_v55  ;;  %4864 = vmatmul.f32.vlgmr.msrb.gmra.mxu3 %v17943_v28  ;;  %v13986_v41 = vand.u32 4294901760, %v4245_v6  ;;  %v17945_v50 = vand.u32 2147483648, %v17927_v14  ;;  %v3643_v44 = vmul.f32 %v13671_v29, %v13565_v25  ;;  %v14068_v19 = vpop.xlane.xlu0 %1670 }
 0x328   : > { %vm1250_vm12 = vcmp.eq.f32.partialorder %v1249_v53, 8.507059e+37  ;;  %vm2247_vm15 = vweird.f32 %v8495_v23  ;;  %vm3647_vm14 = vweird.f32 %v13565_v25  ;;  %vm3648_vm1 = vweird.f32 %v13671_v29 }
 0x329   : > { %17944 = vst [vmem:[#allocation52_spill] sm:$0xff] %v13986_v41  ;;  %v1252_v12 = vor.u32 1.1754944e-38, %v17945_v50  ;;  %v2243_v60 = vsub.f32 1.0, %v2242_v24  ;;  %vm1856_vm2 = vcmp.eq.f32.partialorder %v13545_v58, inf  ;;  %4247 = vmatmul.f32.gmra.mxu0 %v13986_v41  ;;  %v3644_v26 = vsub.f32 1.0, %v3643_v44  ;;  %vm14010_vm6 = vmor %vm2246_vm13, %vm2247_vm15  ;;  %v17950_v44 = vld [vmem:[#allocation35_spill] sm:$0xff] }
 0x32a   : > { %v8497_v4 = vpop.eup %8496  ;;  %v3651_v53 = vand.u32 2147483647, %v13565_v25  ;;  %v3653_v14 = vand.u32 2147483648, %v13565_v25  ;;  %vm14001_vm4 = vcmp.eq.f32.partialorder %v2265_v38, 8.507059e+37  ;;  %v2267_v28 = vand.u32 2147483648, %v13934_v21  ;;  %vm14022_vm5 = vmor %vm3647_vm14, %vm3648_vm1 }
 0x32b   : > { %v1253_v0 = vsel %vm1250_vm12, %v1252_v12, %v1248_v39  ;;  %v13998_v34 = vpop.eup %8498  ;;  %v2244_v6 = vmul.f32 %v8495_v23, %v2243_v60  ;;  %v2257_v24 = vmul.f32 %v8497_v4, %v13934_v21  ;;  %vm1844_vm7 = vcmp.eq.f32.partialorder %v13628_v61, inf }
 0x32c   : > { %vm2262_vm8 = vweird.f32 %v8497_v4  ;;  %v14015_v60 = vmul.f32 %v1253_v0, %v17950_v44  ;;  %v3645_v38 = vmul.f32 %v13671_v29, %v3644_v26  ;;  %v3654_v39 = vor.u32 1.1754944e-38, %v3653_v14  ;;  %v14043_v44 = vpop.xlane.xlu2 %1667 }
 0x32d   : > { %v2245_v41 = vadd.f32 %v8495_v23, %v2244_v6  ;;  %v2258_v43 = vsub.f32 1.0, %v2257_v24  ;;  %v14028_v55 = vsub.f32 %v13758_v63, %v13769_v49  ;;  %v17953_v0 = vand.u32 2147483648, %v13472_v8  ;;  %vm14056_vm13 = vmor %vm2261_vm10, %vm2262_vm8 }
 0x32e   : > { %v3896_v14 = vmul.f32 2000.0, %v14015_v60  ;;  %v3646_v6 = vadd.f32 %v13671_v29, %v3645_v38  ;;  %vm14037_vm9 = vcmp.eq.f32.partialorder %v3651_v53, 8.507059e+37  ;;  %v2268_v49 = vor.u32 1.1754944e-38, %v2267_v28 }
 0x32f   : > { %v1836_v26 = vsel %vm1834_vm3, %v17953_v0, %v13922_v10  ;;  %v2249_v63 = vsel %vm14010_vm6, %v8495_v23, %v2245_v41  ;;  %v2259_v57 = vmul.f32 %v8497_v4, %v2258_v43  ;;  %v17312_v8 = vand.u32 4294901760, %v14028_v55  ;;  %v17956_v10 = vld [vmem:[#allocation76_spill] sm:$0xff]  ;;  %v17957_v0 = vld [vmem:[#allocation121_spill] sm:$0xff]  ;;  %5963 = vmatpush.xpose.msra.mxu0 %v14028_v55  ;;  %v17960_v41 = vld [vmem:[#allocation67_spill] sm:$0xff] }
 0x330   : > { %v14041_v24 = vadd.f32 2.220446e-16, %v1836_v26  ;;  %4670 = vmatmul.f32.vlgmr.msrb.gmra.mxu2 %v17956_v10  ;;  %4870 = vmatmul.f32.gmra.mxu3 %v17957_v0  ;;  %vm1846_vm3 = vcmp.eq.f32.partialorder %v13628_v61, 0.0  ;;  %v2254_v53 = vsel %vm13971_vm11, %v2253_v18, %v2249_v63  ;;  %v14061_v43 = vsel %vm517_vm0, %v3896_v14, 0 }
 0x331   : > { %v3650_v28 = vsel %vm14022_vm5, %v13671_v29, %v3646_v6  ;;  %v2255_v18 = vmul.f32 %v2254_v53, %v17960_v41  ;;  %v2260_v21 = vadd.f32 %v8497_v4, %v2259_v57  ;;  %v14072_v23 = vand.u32 4294901760, %v14061_v43  ;;  %v17962_v29 = vld [vmem:[#allocation56_spill] sm:$0xff] }
 0x332   : > { %8500 = vrcp.f32 %v14041_v24  ;;  %v3655_v12 = vsel %vm14037_vm9, %v3654_v39, %v3650_v28  ;;  %v1875_v26 = vmul.f32 %v13917_v2, %v13954_v46  ;;  %v5778_v14 = vsub.f32 %v14028_v55, %v17312_v8  ;;  %v17978_v8 = vld [vmem:[#allocation68_spill] sm:$0xff] }
 0x333   : > { %17961 = vst [vmem:[#allocation97_spill] sm:$0xff] %v14072_v23  ;;  %8502 = vrsqrt.f32 %v14043_v44  ;;  %v3656_v48 = vmul.f32 %v3655_v12, %v17962_v29  ;;  %v1843_v57 = vmul.f32 %v13948_v3, %v13628_v61  ;;  %v1865_v6 = vsub.f32 1.5, %v13950_v45  ;;  %4548 = vmatmul.f32.gmra.mxu1 %v14072_v23  ;;  %v17963_v45 = vld [vmem:[#allocation66_spill] sm:$0xff] }
 0x334   : > { %v2609_v63 = vsub.f32 %v12398_v42, %v2255_v18  ;;  %v2264_v39 = vsel %vm14056_vm13, %v8497_v4, %v2260_v21  ;;  %vm1858_vm11 = vcmp.eq.f32.partialorder %v13545_v58, 0.0  ;;  %8504 = vrsqrt.f32 %v14068_v19 }
 0x335   : > { %v2269_v46 = vsel %vm14001_vm4, %v2268_v49, %v2264_v39  ;;  %v14095_v25 = vsel %vm517_vm0, %v3656_v48, 0  ;;  %v5779_v3 = vand.u32 4294901760, %v5778_v14  ;;  %v14101_v42 = vsel %vm1856_vm2, %v13545_v58, %v13940_v22 }
 0x336   : > { %v2641_v4 = vand.u32 2147483647, %v2609_v63  ;;  %v2270_v53 = vmul.f32 %v2269_v46, %v17963_v45  ;;  %v14105_v38 = vand.u32 4294901760, %v14095_v25  ;;  %v1889_v49 = vsub.f32 1.5, %v13963_v35 }
 0x337   : > { %v1876_v50 = vmul.f32 0.5, %v1875_v26  ;;  %v1898_v41 = vmul.f32 %v13998_v34, %v13930_v9  ;;  %5780 = vmatpush.xpose.msra.mxu3 %v5779_v3  ;;  %v14114_v18 = vsub.f32 %v13881_v13, %v13893_v59  ;;  %v1845_v22 = vsel %vm1844_vm7, %v13628_v61, %v1843_v57  ;;  %v17964_v26 = vld [vmem:[#allocation127_spill] sm:$0xff]  ;;  %v17966_v57 = vld [vmem:[#allocation144_spill] sm:$0xff] }
 0x338   : > { %v14107_v28 = vpop.eup %8500  ;;  %vm1868_vm10 = vcmp.eq.f32.partialorder %v13781_v54, inf  ;;  %v2689_v21 = vsel %vm517_vm0, %v2641_v4, 0.0  ;;  %v2610_v12 = vsub.f32 %v12604_v33, %v2270_v53  ;;  %5439 = vmatpush.xpose.msra.mxu2 %v14105_v38  ;;  %4876 = vmatmul.f32.gmra.mxu3 %v17964_v26  ;;  %v1866_v13 = vmul.f32 %v13817_v62, %v1865_v6  ;;  %v17967_v3 = vld [vmem:[#allocation8_spill] sm:$0xff] }
 0x339   : > { %v2272_v35 = vmul.f32 %v14107_v28, %v14041_v24  ;;  %v14126_v29 = vpop.eup %8502  ;;  %2690 = vadd.xlane.f32.xlu2 %v2689_v21  ;;  %vm2276_vm12 = vweird.f32 %v14041_v24  ;;  %v2282_v48 = vand.u32 2147483648, %v14041_v24  ;;  %v17965_v14 = vand.u32 4294901760, %v12168_v20  ;;  %4675 = vmatmul.f32.gmra.mxu2 %v17967_v3  ;;  %v18020_v3 = vld [vmem:[#allocation71_spill] sm:$0xff] }
 0x33a   : > { %v17311_v33 = vand.u32 4294901760, %v14114_v18  ;;  %vm1260_vm15 = vweird.f32 %v17966_v57  ;;  %v2642_v63 = vand.u32 2147483647, %v2610_v12  ;;  %vm2277_vm14 = vweird.f32 %v14107_v28  ;;  %5966 = vmatpush.xpose.msra.mxu0 %v14114_v18  ;;  %v14139_v62 = vpop.eup %8504  ;;  %6162 = vmatpush.xpose.msra.mxu1 %v14105_v38 }
 0x33b   : > { %v2273_v39 = vsub.f32 1.0, %v2272_v35  ;;  %v2280_v46 = vand.u32 2147483647, %v14041_v24  ;;  %v1890_v6 = vmul.f32 %v13866_v31, %v1889_v49  ;;  %v1877_v20 = vsub.f32 1.5, %v1876_v50  ;;  %vm14159_vm1 = vmor %vm2276_vm12, %vm2277_vm14 }
 0x33c   : > { %6359 = vmatpush.xpose.msrb.mxu2 %v17965_v14  ;;  %v1899_v4 = vmul.f32 %v13998_v34, %v1898_v41  ;;  %v5784_v45 = vsub.f32 %v14114_v18, %v17311_v33  ;;  %v1934_v53 = vmul.f32 %v14126_v29, %v14043_v44  ;;  %v2692_v21 = vsel %vm517_vm0, %v2642_v63, 0.0  ;;  %v14163_v41 = vpop.f32.mrf.mxu2  ;;  %v17971_v63 = vld [vmem:[#allocation167_spill] sm:$0xff] }
 0x33d   : > { %v2274_v12 = vmul.f32 %v14107_v28, %v2273_v39  ;;  %v17968_v35 = vand.u32 2147483648, %v13628_v61  ;;  %2693 = vadd.xlane.f32.xlu0 %v2692_v21  ;;  %v2283_v50 = vor.u32 1.1754944e-38, %v2282_v48  ;;  %v17972_v39 = vand.u32 4294901760, %v17971_v63 }
 0x33e   : > { %v5785_v14 = vand.u32 4294901760, %v5784_v45  ;;  %v14171_v61 = vsub.f32 %v14061_v43, %v14072_v23  ;;  %v1946_v24 = vmul.f32 %v14139_v62, %v14068_v19  ;;  %vm2281_vm2 = vcmp.eq.f32.partialorder %v2280_v46, 8.507059e+37 }
 0x33f   : > { %v1848_v31 = vsel %vm1846_vm3, %v17968_v35, %v1845_v22  ;;  %v2275_v21 = vadd.f32 %v14107_v28, %v2274_v12  ;;  %v1867_v48 = vmul.f32 %v1866_v13, %v13781_v54  ;;  %vm1870_vm4 = vcmp.eq.f32.partialorder %v13781_v54, 0.0  ;;  %v17988_v22 = vld [vmem:[#allocation145_spill] sm:$0xff] }
 0x340   : > { %6363 = vmatpush.xpose.msrb.mxu2 %v17972_v39  ;;  %v14167_v33 = vadd.f32 2.220446e-16, %v1848_v31  ;;  %17973 = vst [vmem:[#allocation26_spill] sm:$0xff] %v14171_v61  ;;  %v1891_v45 = vmul.f32 %v1890_v6, %v13800_v47  ;;  %vm1892_vm7 = vcmp.eq.f32.partialorder %v13800_v47, inf  ;;  %5786 = vmatpush.xpose.msra.mxu3 %v5785_v14  ;;  %v14187_v12 = vand.u32 4294901760, %v14171_v61  ;;  %v17976_v6 = vld [vmem:[#allocation135_spill] sm:$0xff] }
 0x341   : > { %v2279_v35 = vsel %vm14159_vm1, %v14107_v28, %v2275_v21  ;;  %v17975_v13 = vand.u32 2147483648, %v13545_v58  ;;  %4882 = vmatmul.f32.gmra.mxu3 %v17976_v6  ;;  %v1878_v31 = vmul.f32 %v13917_v2, %v1877_v20  ;;  %v1900_v14 = vmul.f32 0.5, %v1899_v4  ;;  %v14255_v28 = vpop.f32.mrf.mxu1 }
 0x342   : > { %8506 = vrcp.f32 %v14167_v33  ;;  %17974 = vst [vmem:[#allocation28_spill] sm:$0xff] %v14187_v12  ;;  %v1935_v63 = vmul.f32 %v14126_v29, %v1934_v53  ;;  %v2284_v39 = vsel %vm2281_vm2, %v2283_v50, %v2279_v35  ;;  %v17977_v49 = vand.u32 4294901760, %v12483_v1 }
 0x343   : > { %v1860_v46 = vsel %vm1858_vm11, %v17975_v13, %v14101_v42  ;;  %v1947_v21 = vmul.f32 %v14139_v62, %v1946_v24  ;;  %v2285_v43 = vmul.f32 %v2284_v39, %v17978_v8  ;;  %v4253_v58 = vsub.f32 %v14171_v61, %v14187_v12  ;;  %v17979_v42 = vld [vmem:[#allocation126_spill] sm:$0xff]  ;;  %v17980_v8 = vld [vmem:[#allocation33_spill] sm:$0xff] }
 0x344   : > { %6367 = vmatpush.xpose.msrb.mxu2 %v17977_v49  ;;  %v1869_v2 = vsel %vm1868_vm10, %v13781_v54, %v1867_v48  ;;  %v14211_v1 = vsel %vm1892_vm7, %v13800_v47, %v1891_v45  ;;  %v14213_v20 = vadd.f32 2.220446e-16, %v1860_v46  ;;  %vm1261_vm6 = vweird.f32 %v17912_v32 }
 0x345   : > { %4680 = vmatmul.f32.gmra.mxu2 %v17979_v42  ;;  %vm1880_vm8 = vcmp.eq.f32.partialorder %v13870_v5, inf  ;;  %v2611_v4 = vsub.f32 %v17980_v8, %v2285_v43  ;;  %v14218_v53 = vand.u32 4294901760, %v4253_v58  ;;  %v1259_v50 = vadd.f32 %v17912_v32, %v13750_v52  ;;  %vm14227_vm5 = vmor %vm1260_vm15, %vm1261_vm6  ;;  %v17984_v43 = vld [vmem:[#allocation31_spill] sm:$0xff]  ;;  %v14241_v8 = vpop.f32.mrf.mxu2 }
 0x346   : > { %v1264_v24 = vand.u32 2147483647, %v17966_v57  ;;  %v1879_v35 = vmul.f32 %v1878_v31, %v13870_v5  ;;  %v1901_v45 = vsub.f32 1.5, %v1900_v14  ;;  %v1936_v13 = vmul.f32 0.5, %v1935_v63 }
 0x347   : > { %17981 = vst [vmem:[#allocation110_spill] sm:$0xff] %v14218_v53  ;;  %8508 = vrcp.f32 %v14213_v20  ;;  %v17985_v39 = vand.u32 4294901760, %v17984_v43  ;;  %v14233_v49 = vmul.f32 0.5, %v1947_v21  ;;  %v2643_v52 = vand.u32 2147483647, %v2611_v4  ;;  %4255 = vmatmul.f32.gmra.mxu0 %v14218_v53  ;;  %v14243_v43 = vpop.f32.mrf.mxu3 }
 0x348   : > { %v8507_v48 = vpop.eup %8506  ;;  %v2295_v31 = vand.u32 2147483647, %v14167_v33  ;;  %vm2291_vm9 = vweird.f32 %v14167_v33  ;;  %v2297_v63 = vand.u32 2147483648, %v14167_v33  ;;  %vm1894_vm13 = vcmp.eq.f32.partialorder %v13800_v47, 0.0 }
 0x349   : > { %6371 = vmatpush.xpose.msrb.mxu2 %v17985_v39  ;;  %v2287_v58 = vmul.f32 %v8507_v48, %v14167_v33  ;;  %vm2292_vm3 = vweird.f32 %v8507_v48  ;;  %vm1882_vm11 = vcmp.eq.f32.partialorder %v13870_v5, 0.0  ;;  %v2695_v21 = vsel %vm517_vm0, %v2643_v52, 0.0  ;;  %4888 = vmatmul.f32.gmra.mxu3 %v17988_v22  ;;  %v17998_v33 = vld [vmem:[#allocation37_spill] sm:$0xff] }
 0x34a   : > { %v1263_v39 = vsel %vm14227_vm5, %v17912_v32, %v1259_v50  ;;  %vm14251_vm10 = vcmp.eq.f32.partialorder %v1264_v24, 8.507059e+37  ;;  %v1902_v53 = vmul.f32 %v13998_v34, %v1901_v45  ;;  %v1937_v42 = vsub.f32 1.5, %v1936_v13  ;;  %2696 = vadd.xlane.f32.xlu1 %v2695_v21  ;;  %v17990_v32 = vld [vmem:[#allocation182_spill] sm:$0xff]  ;;  %vm14280_vm15 = vmor %vm2291_vm9, %vm2292_vm3 }
 0x34b   : > { %v2288_v4 = vsub.f32 1.0, %v2287_v58  ;;  %v17989_v6 = vand.u32 2147483648, %v17966_v57  ;;  %v14263_v58 = vsub.f32 %v14095_v25, %v14105_v38  ;;  %v17991_v50 = vand.u32 4294901760, %v17990_v32  ;;  %v18002_v25 = vld [vmem:[#allocation72_spill] sm:$0xff] }
 0x34c   : > { %v1949_v24 = vsub.f32 1.5, %v14233_v49  ;;  %vm14268_vm12 = vcmp.eq.f32.partialorder %v2295_v31, 8.507059e+37  ;;  %v17994_v34 = vand.u32 2147483648, %v13781_v54  ;;  %v2298_v13 = vor.u32 1.1754944e-38, %v2297_v63 }
 0x34d   : > { %v1267_v52 = vor.u32 1.1754944e-38, %v17989_v6  ;;  %6375 = vmatpush.xpose.msrb.mxu2 %v17991_v50  ;;  %v2289_v46 = vmul.f32 %v8507_v48, %v2288_v4  ;;  %v17995_v6 = vld [vmem:[#allocation134_spill] sm:$0xff]  ;;  %v8509_v45 = vpop.eup %8508  ;;  %v17314_v31 = vand.u32 4294901760, %v14263_v58  ;;  %5969 = vmatpush.xpose.msra.mxu0 %v14263_v58  ;;  %vm1904_vm14 = vcmp.eq.f32.partialorder %v13930_v9, inf }
 0x34e   : > { %v1872_v57 = vsel %vm1870_vm4, %v17994_v34, %v1869_v2  ;;  %4685 = vmatmul.f32.gmra.mxu2 %v17995_v6  ;;  %v2302_v2 = vmul.f32 %v8509_v45, %v14213_v20  ;;  %vm2306_vm1 = vweird.f32 %v14213_v20  ;;  %v2310_v63 = vand.u32 2147483647, %v14213_v20  ;;  %v14313_v6 = vpop.xlane.xlu1 %1664 }
 0x34f   : > { %v1268_v49 = vsel %vm14251_vm10, %v1267_v52, %v1263_v39  ;;  %v14287_v21 = vadd.f32 2.220446e-16, %v1872_v57  ;;  %v2290_v54 = vadd.f32 %v8507_v48, %v2289_v46  ;;  %v2312_v14 = vand.u32 2147483648, %v14213_v20  ;;  %v17999_v52 = vld [vmem:[#allocation189_spill] sm:$0xff]  ;;  %18001 = vst [vmem:[#allocation77_spill] sm:$0xff] %v14313_v6 }
 0x350   : > { %v14294_v4 = vmul.f32 %v1268_v49, %v17998_v33  ;;  %v5790_v39 = vsub.f32 %v14263_v58, %v17314_v31  ;;  %v18000_v32 = vand.u32 4294901760, %v17999_v52  ;;  %v2303_v46 = vsub.f32 1.0, %v2302_v2 }
 0x351   : > { %8510 = vrcp.f32 %v14287_v21  ;;  %v2294_v50 = vsel %vm14280_vm15, %v8507_v48, %v2290_v54  ;;  %vm2307_vm2 = vweird.f32 %v8509_v45  ;;  %v1881_v57 = vsel %vm1880_vm8, %v13870_v5, %v1879_v35 }
 0x352   : > { %6379 = vmatpush.xpose.msrb.mxu2 %v18000_v32  ;;  %v3897_v34 = vmul.f32 2000.0, %v14294_v4  ;;  %v1903_v49 = vmul.f32 %v1902_v53, %v13930_v9  ;;  %v2299_v33 = vsel %vm14268_vm12, %v2298_v13, %v2294_v50  ;;  %v5791_v31 = vand.u32 4294901760, %v5790_v39  ;;  %v18003_v32 = vld [vmem:[#allocation153_spill] sm:$0xff]  ;;  %vm14323_vm7 = vmor %vm2306_vm1, %vm2307_vm2  ;;  %v14333_v13 = vpop.f32.mrf.mxu2  ;;  %v4561_v39 = vpop.f32.mrf.mxu3  ;;  %v18009_v50 = vld [vmem:[#allocation192_spill] sm:$0xff] }
 0x353   : > { %v1938_v52 = vmul.f32 %v14126_v29, %v1937_v42  ;;  %v2300_v48 = vmul.f32 %v2299_v33, %v18002_v25  ;;  %v2304_v54 = vmul.f32 %v8509_v45, %v2303_v46  ;;  %4894 = vmatmul.f32.gmra.mxu3 %v18003_v32  ;;  %vm1906_vm4 = vcmp.eq.f32.partialorder %v13930_v9, 0.0  ;;  %v18013_v33 = vld [vmem:[#allocation143_spill] sm:$0xff] }
 0x354   : > { %v3960_v2 = vsel %vm517_vm0, %v3897_v34, 0  ;;  %v1950_v35 = vmul.f32 %v14139_v62, %v1949_v24  ;;  %vm14327_vm6 = vcmp.eq.f32.partialorder %v2310_v63, 8.507059e+37  ;;  %v2313_v29 = vor.u32 1.1754944e-38, %v2312_v14  ;;  %5792 = vmatpush.xpose.msra.mxu3 %v5791_v31  ;;  %v18011_v62 = vld [vmem:[#allocation32_spill] sm:$0xff]  ;;  %v18012_v34 = vld [vmem:[#allocation162_spill] sm:$0xff]  ;;  %v14344_v14 = vpop.f32.mrf.mxu0  ;;  %v14346_v31 = vpop.f32.mrf.mxu1 }
 0x355   : > { %v14331_v42 = vand.u32 4294901760, %v3960_v2  ;;  %v18010_v46 = vand.u32 4294901760, %v18009_v50  ;;  %v2612_v20 = vsub.f32 %v18011_v62, %v2300_v48  ;;  %v2305_v24 = vadd.f32 %v8509_v45, %v2304_v54 }
 0x356   : > { %vm2321_vm8 = vweird.f32 %v14287_v21  ;;  %v14342_v63 = vadd.f32 %v14243_v43, %v14163_v41  ;;  %4690 = vmatmul.f32.gmra.mxu2 %v18013_v33  ;;  %v2325_v48 = vand.u32 2147483647, %v14287_v21  ;;  %v18014_v54 = vand.u32 2147483648, %v13870_v5 }
 0x357   : > { %18008 = vst [vmem:[#allocation20_spill] sm:$0xff] %v14331_v42  ;;  %6383 = vmatpush.xpose.msrb.mxu2 %v18010_v46  ;;  %v14349_v25 = vpop.eup %8510  ;;  %4552 = vmatmul.f32.gmra.mxu1 %v14331_v42  ;;  %v14358_v41 = vsub.f32 %v3960_v2, %v14331_v42  ;;  %v18016_v43 = vand.u32 2147483648, %v13800_v47  ;;  %v2644_v62 = vand.u32 2147483647, %v2612_v20  ;;  %v2327_v33 = vand.u32 2147483648, %v14287_v21  ;;  %v18018_v47 = vld [vmem:[#allocation199_spill] sm:$0xff] }
 0x358   : > { %6550 = vmatpush.xpose.msrb.mxu3 %v18012_v34  ;;  %v1884_v50 = vsel %vm1882_vm11, %v18014_v54, %v1881_v57  ;;  %v2309_v34 = vsel %vm14323_vm7, %v8509_v45, %v2305_v24  ;;  %v2317_v6 = vmul.f32 %v14349_v25, %v14287_v21  ;;  %vm2322_vm5 = vweird.f32 %v14349_v25  ;;  %v18021_v54 = vld [vmem:[#allocation166_spill] sm:$0xff] }
 0x359   : > { %18015 = vst [vmem:[#allocation137_spill] sm:$0xff] %v14358_v41  ;;  %v1896_v46 = vsel %vm1894_vm13, %v18016_v43, %v14211_v1  ;;  %v2314_v5 = vsel %vm14327_vm6, %v2313_v29, %v2309_v34  ;;  %v14373_v57 = vadd.f32 2.220446e-16, %v1884_v50  ;;  %v14376_v2 = vand.u32 4294901760, %v14358_v41  ;;  %vm14403_vm11 = vmor %vm2321_vm8, %vm2322_vm5 }
 0x35a   : > { %v18019_v1 = vand.u32 4294901760, %v18018_v47  ;;  %v2698_v45 = vsel %vm517_vm0, %v2644_v62, 0.0  ;;  %v2315_v20 = vmul.f32 %v2314_v5, %v18020_v3  ;;  %v2318_v24 = vsub.f32 1.0, %v2317_v6  ;;  %v18022_v62 = vld [vmem:[#allocation164_spill] sm:$0xff]  ;;  %v4565_v5 = vpop.f32.mrf.mxu3  ;;  %v18029_v3 = vld [vmem:[#allocation169_spill] sm:$0xff] }
 0x35b   : > { %18017 = vst [vmem:[#allocation54_spill] sm:$0xff] %v14376_v2  ;;  %v14383_v43 = vadd.f32 2.220446e-16, %v1896_v46  ;;  %v1905_v53 = vsel %vm1904_vm14, %v13930_v9, %v1903_v49  ;;  %vm1940_vm9 = vcmp.eq.f32.partialorder %v14043_v44, inf  ;;  %vm1942_vm3 = vcmp.eq.f32.partialorder %v14043_v44, 0.0  ;;  %2699 = vadd.xlane.f32.xlu2 %v2698_v45  ;;  %4900 = vmatmul.f32.gmra.mxu3 %v18022_v62  ;;  %v18035_v62 = vld [vmem:[#allocation38_spill] sm:$0xff] }
 0x35c   : > { %6387 = vmatpush.xpose.msrb.mxu2 %v18019_v1  ;;  %6552 = vmatpush.xpose.msrb.mxu3 %v18021_v54  ;;  %8512 = vrcp.f32 %v14373_v57  ;;  %v1939_v29 = vmul.f32 %v1938_v52, %v14043_v44  ;;  %v2613_v50 = vsub.f32 %v13388_v51, %v2315_v20  ;;  %v2319_v6 = vmul.f32 %v14349_v25, %v2318_v24  ;;  %v14408_v52 = vpop.f32.mrf.mxu2  ;;  %v14422_v20 = vpop.f32.mrf.mxu1  ;;  %v18030_v24 = vld [vmem:[#allocation152_spill] sm:$0xff] }
 0x35d   : > { %v4261_v46 = vsub.f32 %v14358_v41, %v14376_v2  ;;  %v1951_v49 = vmul.f32 %v1950_v35, %v14068_v19  ;;  %vm1952_vm13 = vcmp.eq.f32.partialorder %v14068_v19, inf  ;;  %v2328_v51 = vor.u32 1.1754944e-38, %v2327_v33  ;;  %v14420_v33 = vpop.f32.mrf.mxu0 }
 0x35e   : > { %8514 = vrcp.f32 %v14383_v43  ;;  %v18025_v47 = vand.u32 4294901760, %v13207_v36  ;;  %v2645_v35 = vand.u32 2147483647, %v2613_v50  ;;  %v2320_v1 = vadd.f32 %v14349_v25, %v2319_v6  ;;  %4695 = vmatmul.f32.gmra.mxu2 %v18030_v24 }
 0x35f   : > { %vm14413_vm10 = vcmp.eq.f32.partialorder %v2325_v48, 8.507059e+37  ;;  %v14417_v21 = vand.u32 4294901760, %v4261_v46  ;;  %v1943_v36 = vand.u32 2147483648, %v14043_v44  ;;  %vm1954_vm12 = vcmp.eq.f32.partialorder %v14068_v19, 0.0  ;;  %v18031_v48 = vld [vmem:[#allocation70_spill] sm:$0xff]  ;;  %v14435_v46 = vpop.xlane.xlu1 %1673 }
 0x360   : > { %6391 = vmatpush.xpose.msrb.mxu2 %v18025_v47  ;;  %6554 = vmatpush.xpose.msrb.mxu3 %v18029_v3  ;;  %v1955_v54 = vand.u32 2147483648, %v14068_v19  ;;  %v14430_v50 = vadd.f32 %v4561_v39, %v14241_v8  ;;  %v1941_v6 = vsel %vm1940_vm9, %v14043_v44, %v1939_v29  ;;  %18032 = vst [vmem:[#allocation35_spill] sm:$0xff] %v14435_v46  ;;  %v2701_v47 = vsel %vm517_vm0, %v2645_v35, 0.0  ;;  %v18034_v39 = vld [vmem:[#allocation39_spill] sm:$0xff] }
 0x361   : > { %18028 = vst [vmem:[#allocation63_spill] sm:$0xff] %v14417_v21  ;;  %5280 = vmatmul.f32.vlgmr.msrb.gmra.mxu1 %v18031_v48  ;;  %v2324_v3 = vsel %vm14403_vm11, %v14349_v25, %v2320_v1  ;;  %4263 = vmatmul.f32.gmra.mxu0 %v14417_v21  ;;  %v18033_v24 = vand.u32 2147483648, %v13930_v9  ;;  %v18036_v32 = vpack.c.bf16 %v18034_v39, %v18035_v62  ;;  %vm2336_vm15 = vweird.f32 %v14373_v57  ;;  %v18043_v21 = vld [vmem:[#allocation163_spill] sm:$0xff] }
 0x362   : > { %v14449_v29 = vpop.eup %8512  ;;  %v1953_v35 = vsel %vm1952_vm13, %v14068_v19, %v1951_v49  ;;  %2702 = vadd.xlane.f32.xlu0 %v2701_v47  ;;  %v2329_v25 = vsel %vm14413_vm10, %v2328_v51, %v2324_v3  ;;  %v2340_v34 = vand.u32 2147483647, %v14373_v57  ;;  %v18037_v9 = vand.u32 4294901760, %v13400_v40 }
 0x363   : > { %v1908_v8 = vsel %vm1906_vm4, %v18033_v24, %v1905_v53  ;;  %7263 = vmatpush.bf16.msrb.mxu1 %v18036_v32  ;;  %v18038_v53 = vld [vmem:[#allocation73_spill] sm:$0xff]  ;;  %v2332_v32 = vmul.f32 %v14449_v29, %v14373_v57  ;;  %v2342_v1 = vand.u32 2147483648, %v14373_v57  ;;  %vm2351_vm14 = vweird.f32 %v14383_v43  ;;  %v14513_v57 = vpop.xlane.xlu2 %1676 }
 0x364   : > { %6395 = vmatpush.xpose.msrb.mxu2 %v18037_v9  ;;  %v2330_v62 = vmul.f32 %v2329_v25, %v18038_v53  ;;  %v18039_v24 = vld [vmem:[#allocation101_spill] sm:$0xff]  ;;  %v14465_v49 = vadd.f32 2.220446e-16, %v1908_v8  ;;  %v8515_v45 = vpop.eup %8514  ;;  %v2355_v51 = vand.u32 2147483647, %v14383_v43  ;;  %v14470_v47 = vadd.f32 %v4565_v5, %v14333_v13  ;;  %v18040_v8 = vld [vmem:[#allocation170_spill] sm:$0xff]  ;;  %v4304_v53 = vpop.f32.mrf.mxu2  ;;  %18049 = vst [vmem:[#allocation76_spill] sm:$0xff] %v14513_v57 }
 0x365   : > { %6556 = vmatpush.xpose.msrb.mxu3 %v18039_v24  ;;  %v1944_v40 = vsel %vm1942_vm3, %v1943_v36, %v1941_v6  ;;  %v2333_v39 = vsub.f32 1.0, %v2332_v32  ;;  %vm2337_vm1 = vweird.f32 %v14449_v29  ;;  %v2347_v25 = vmul.f32 %v8515_v45, %v14383_v43  ;;  %v4569_v13 = vpop.f32.mrf.mxu3  ;;  %v18042_v32 = vld [vmem:[#allocation176_spill] sm:$0xff]  ;;  %v14488_v24 = vpop.f32.mrf.mxu0 }
 0x366   : > { %v2614_v3 = vsub.f32 %v13684_v15, %v2330_v62  ;;  %4906 = vmatmul.f32.gmra.mxu3 %v18040_v8  ;;  %vm2352_vm2 = vweird.f32 %v8515_v45  ;;  %v2357_v9 = vand.u32 2147483648, %v14383_v43  ;;  %8516 = vrcp.f32 %v14465_v49  ;;  %v14490_v46 = vpop.f32.mrf.mxu1  ;;  %4700 = vmatmul.f32.gmra.mxu2 %v18043_v21  ;;  %vm14497_vm4 = vmor %vm2336_vm15, %vm2337_vm1  ;;  %v18055_v43 = vld [vmem:[#allocation45_spill] sm:$0xff]  ;;  %v18128_v8 = vld [vmem:[#allocation24_spill] sm:$0xff] }
 0x367   : > { %v1956_v44 = vsel %vm1954_vm12, %v1955_v54, %v1953_v35  ;;  %v18041_v5 = vand.u32 4294901760, %v13523_v16  ;;  %v2334_v36 = vmul.f32 %v14449_v29, %v2333_v39  ;;  %v2348_v6 = vsub.f32 1.0, %v2347_v25  ;;  %v18048_v35 = vld [vmem:[#allocation85_spill] sm:$0xff]  ;;  %vm14518_vm6 = vmor %vm2351_vm14, %vm2352_vm2 }
 0x368   : > { %v2646_v15 = vand.u32 2147483647, %v2614_v3  ;;  %v14485_v62 = vadd.f32 2.220446e-16, %v1944_v40  ;;  %vm14501_vm7 = vcmp.eq.f32.partialorder %v2340_v34, 8.507059e+37  ;;  %v2343_v54 = vor.u32 1.1754944e-38, %v2342_v1 }
 0x369   : > { %6399 = vmatpush.xpose.msrb.mxu2 %v18041_v5  ;;  %6558 = vmatpush.xpose.msrb.mxu3 %v18042_v32  ;;  %v14507_v40 = vadd.f32 %v4569_v13, %v14408_v52  ;;  %v2335_v39 = vadd.f32 %v14449_v29, %v2334_v36  ;;  %v2349_v25 = vmul.f32 %v8515_v45, %v2348_v6  ;;  %v2358_v52 = vor.u32 1.1754944e-38, %v2357_v9  ;;  %v14526_v5 = vpop.xlane.xlu1 %1682  ;;  %v18056_v32 = vld [vmem:[#allocation5_spill] sm:$0xff] }
 0x36a   : > { %5284 = vmatmul.f32.gmra.mxu1 %v18048_v35  ;;  %v2704_v3 = vsel %vm517_vm0, %v2646_v15, 0.0  ;;  %5119 = vmatmul.f32.vlgmr.msrb.gmra.mxu0 %v18031_v48  ;;  %8518 = vrcp.f32 %v14485_v62  ;;  %v14522_v1 = vadd.f32 2.220446e-16, %v1956_v44  ;;  %v18052_v13 = vand.u32 4294901760, %v13712_v7  ;;  %18053 = vst [vmem:[#allocation121_spill] sm:$0xff] %v14526_v5  ;;  %v14528_v15 = vpop.xlane.xlu0 %1679 }
 0x36b   : > { %2705 = vadd.xlane.f32.xlu1 %v2704_v3  ;;  %18054 = vst [vmem:[#allocation67_spill] sm:$0xff] %v14528_v15  ;;  %v2339_v36 = vsel %vm14497_vm4, %v14449_v29, %v2335_v39  ;;  %v2350_v6 = vadd.f32 %v8515_v45, %v2349_v25  ;;  %vm2356_vm8 = vcmp.eq.f32.partialorder %v2355_v51, 8.507059e+37  ;;  %v18057_v3 = vld [vmem:[#allocation6_spill] sm:$0xff]  ;;  %v18059_v15 = vld [vmem:[#allocation79_spill] sm:$0xff]  ;;  %v2372_v16 = vand.u32 2147483648, %v14465_v49  ;;  %v14587_v57 = vpop.xlane.xlu2 %1685 }
 0x36c   : > { %v18058_v9 = vpack.c.bf16 %v18056_v32, %v18057_v3  ;;  %v8517_v44 = vpop.eup %8516  ;;  %v2344_v7 = vsel %vm14501_vm7, %v2343_v54, %v2339_v36  ;;  %8520 = vrcp.f32 %v14522_v1  ;;  %v18060_v39 = vld [vmem:[#allocation43_spill] sm:$0xff]  ;;  %vm2366_vm5 = vweird.f32 %v14465_v49  ;;  %v4312_v19 = vpop.f32.mrf.mxu2  ;;  %18072 = vst [vmem:[#allocation56_spill] sm:$0xff] %v14587_v57  ;;  %v18111_v57 = vld [vmem:[#allocation58_spill] sm:$0xff] }
 0x36d   : > { %6403 = vmatpush.xpose.msrb.mxu2 %v18052_v13  ;;  %6560 = vmatpush.xpose.msrb.mxu3 %v18055_v43  ;;  %v2370_v13 = vand.u32 2147483647, %v14465_v49  ;;  %v2345_v5 = vmul.f32 %v2344_v7, %v18059_v15  ;;  %v2354_v29 = vsel %vm14518_vm6, %v8515_v45, %v2350_v6  ;;  %v2362_v51 = vmul.f32 %v8517_v44, %v14465_v49  ;;  %v4573_v54 = vpop.f32.mrf.mxu3  ;;  %v18062_v45 = vld [vmem:[#allocation78_spill] sm:$0xff]  ;;  %v14556_v3 = vpop.f32.mrf.mxu0  ;;  %v18064_v7 = vld [vmem:[#allocation185_spill] sm:$0xff] }
 0x36e   : > { %7174 = vmatpush.bf16.msrb.mxu0 %v18058_v9  ;;  %4912 = vmatmul.f32.gmra.mxu3 %v18060_v39  ;;  %v2359_v25 = vsel %vm2356_vm8, %v2358_v52, %v2354_v29  ;;  %vm2367_vm9 = vweird.f32 %v8517_v44  ;;  %v18061_v36 = vand.u32 4294901760, %v13815_v30  ;;  %v14554_v32 = vadd.f32 %v4573_v54, %v4304_v53  ;;  %v14558_v52 = vpop.f32.mrf.mxu1  ;;  %v18063_v9 = vld [vmem:[#allocation42_spill] sm:$0xff]  ;;  %v18067_v29 = vld [vmem:[#allocation88_spill] sm:$0xff] }
 0x36f   : > { %v2615_v34 = vsub.f32 %v14015_v60, %v2345_v5  ;;  %v2360_v15 = vmul.f32 %v2359_v25, %v18062_v45  ;;  %v2363_v6 = vsub.f32 1.0, %v2362_v51  ;;  %4705 = vmatmul.f32.gmra.mxu2 %v18063_v9  ;;  %vm14562_vm3 = vcmp.eq.f32.partialorder %v2370_v13, 8.507059e+37  ;;  %vm14575_vm13 = vmor %vm2366_vm5, %vm2367_vm9 }
 0x370   : > { %v14550_v43 = vpop.eup %8518  ;;  %v2417_v53 = vand.u32 2147483648, %v14485_v62  ;;  %v2373_v54 = vor.u32 1.1754944e-38, %v2372_v16  ;;  %vm2411_vm11 = vweird.f32 %v14485_v62  ;;  %vm2426_vm12 = vweird.f32 %v14522_v1 }
 0x371   : > { %6407 = vmatpush.xpose.msrb.mxu2 %v18061_v36  ;;  %6562 = vmatpush.xpose.msrb.mxu3 %v18064_v7  ;;  %v2407_v60 = vmul.f32 %v14550_v43, %v14485_v62  ;;  %v2647_v5 = vand.u32 2147483647, %v2615_v34  ;;  %v2616_v51 = vsub.f32 %v14294_v4, %v2360_v15  ;;  %v2364_v25 = vmul.f32 %v8517_v44, %v2363_v6  ;;  %v18071_v7 = vld [vmem:[#allocation46_spill] sm:$0xff]  ;;  %v14591_v39 = vpop.xlane.xlu1 %1691 }
 0x372   : > { %5288 = vmatmul.f32.gmra.mxu1 %v18067_v29  ;;  %5123 = vmatmul.f32.gmra.mxu0 %v18048_v35  ;;  %v8521_v36 = vpop.eup %8520  ;;  %vm2412_vm10 = vweird.f32 %v14550_v43  ;;  %v2415_v34 = vand.u32 2147483647, %v14485_v62  ;;  %v18070_v4 = vand.u32 4294901760, %v14028_v55  ;;  %v2418_v9 = vor.u32 1.1754944e-38, %v2417_v53  ;;  %18073 = vst [vmem:[#allocation66_spill] sm:$0xff] %v14591_v39  ;;  %v14593_v55 = vpop.xlane.xlu0 %1688 }
 0x373   : > { %v2408_v45 = vsub.f32 1.0, %v2407_v60  ;;  %v2707_v16 = vsel %vm517_vm0, %v2647_v5, 0.0  ;;  %v2648_v15 = vand.u32 2147483647, %v2616_v51  ;;  %v2365_v6 = vadd.f32 %v8517_v44, %v2364_v25  ;;  %18074 = vst [vmem:[#allocation127_spill] sm:$0xff] %v14593_v55  ;;  %vm14602_vm15 = vmor %vm2411_vm11, %vm2412_vm10 }
 0x374   : > { %v2422_v49 = vmul.f32 %v8521_v36, %v14522_v1  ;;  %2708 = vadd.xlane.f32.xlu2 %v2707_v16  ;;  %vm2427_vm14 = vweird.f32 %v8521_v36  ;;  %vm14610_vm1 = vcmp.eq.f32.partialorder %v2415_v34, 8.507059e+37  ;;  %v2432_v62 = vand.u32 2147483648, %v14522_v1  ;;  %v4320_v13 = vpop.f32.mrf.mxu2 }
 0x375   : > { %6411 = vmatpush.xpose.msrb.mxu2 %v18070_v4  ;;  %6564 = vmatpush.xpose.msrb.mxu3 %v18071_v7  ;;  %v2409_v60 = vmul.f32 %v14550_v43, %v2408_v45  ;;  %v2710_v5 = vsel %vm517_vm0, %v2648_v15, 0.0  ;;  %v2369_v51 = vsel %vm14575_vm13, %v8517_v44, %v2365_v6  ;;  %v18077_v45 = vld [vmem:[#allocation47_spill] sm:$0xff]  ;;  %v4577_v15 = vpop.f32.mrf.mxu3  ;;  %v18080_v6 = vand.u32 4294901760, %v14114_v18  ;;  %vm14634_vm2 = vmor %vm2426_vm12, %vm2427_vm14 }
 0x376   : > { %v2423_v53 = vsub.f32 1.0, %v2422_v49  ;;  %4918 = vmatmul.f32.gmra.mxu3 %v18077_v45  ;;  %2711 = vadd.xlane.f32.xlu0 %v2710_v5  ;;  %v2374_v4 = vsel %vm14562_vm3, %v2373_v54, %v2369_v51  ;;  %v18081_v49 = vld [vmem:[#allocation80_spill] sm:$0xff]  ;;  %v2430_v5 = vand.u32 2147483647, %v14522_v1  ;;  %v14619_v30 = vadd.f32 %v4577_v15, %v4312_v19  ;;  %v14621_v54 = vpop.f32.mrf.mxu0  ;;  %v14623_v34 = vpop.f32.mrf.mxu1  ;;  %v18083_v51 = vld [vmem:[#allocation193_spill] sm:$0xff]  ;;  %v18090_v44 = vld [vmem:[#allocation91_spill] sm:$0xff] }
 0x377   : > { %v2410_v16 = vadd.f32 %v14550_v43, %v2409_v60  ;;  %v2375_v7 = vmul.f32 %v2374_v4, %v18081_v49  ;;  %v18082_v60 = vld [vmem:[#allocation16_spill] sm:$0xff]  ;;  %vm2761_vm7 = vcmask 23568   ;;  %v18121_v45 = vld [vmem:[#allocation117_spill] sm:$0xff] }
 0x378   : > { %v2424_v55 = vmul.f32 %v8521_v36, %v2423_v53  ;;  %4710 = vmatmul.f32.gmra.mxu2 %v18082_v60  ;;  %v18087_v53 = vld [vmem:[#allocation105_spill] sm:$0xff]  ;;  %vm2431_vm4 = vcmp.eq.f32.partialorder %v2430_v5, 8.507059e+37 }
 0x379   : > { %6415 = vmatpush.xpose.msrb.mxu2 %v18080_v6  ;;  %6566 = vmatpush.xpose.msrb.mxu3 %v18083_v51  ;;  %v2414_v18 = vsel %vm14602_vm15, %v14550_v43, %v2410_v16  ;;  %v18084_v6 = vld [vmem:[#allocation132_spill] sm:$0xff]  ;;  %v2617_v4 = vsub.f32 %v18087_v53, %v2375_v7  ;;  %v18088_v51 = vld [vmem:[#allocation90_spill] sm:$0xff]  ;;  %v2433_v43 = vor.u32 1.1754944e-38, %v2432_v62  ;;  %v18089_v16 = vand.u32 4294901760, %v14263_v58  ;;  %v14662_v5 = vpop.xlane.xlu1 %1700 }
 0x37a   : > { %5292 = vmatmul.f32.gmra.mxu1 %v18084_v6  ;;  %v2419_v15 = vsel %vm14610_vm1, %v2418_v9, %v2414_v18  ;;  %5127 = vmatmul.f32.gmra.mxu0 %v18067_v29  ;;  %v2425_v49 = vadd.f32 %v8521_v36, %v2424_v55  ;;  %v18091_v18 = vld [vmem:[#allocation194_spill] sm:$0xff]  ;;  %18096 = vst [vmem:[#allocation68_spill] sm:$0xff] %v14662_v5  ;;  %v14664_v19 = vpop.xlane.xlu0 %1697 }
 0x37b   : > { %v2420_v25 = vmul.f32 %v2419_v15, %v18088_v51  ;;  %v2649_v39 = vand.u32 2147483647, %v2617_v4  ;;  %18097 = vst [vmem:[#allocation33_spill] sm:$0xff] %v14664_v19 }
 0x37c   : > { %v2429_v1 = vsel %vm14634_vm2, %v8521_v36, %v2425_v49  ;;  %v4328_v53 = vpop.f32.mrf.mxu2  ;;  %v18093_v36 = vld [vmem:[#allocation183_spill] sm:$0xff] }
 0x37d   : > { %6419 = vmatpush.xpose.msrb.mxu2 %v18089_v16  ;;  %6568 = vmatpush.xpose.msrb.mxu3 %v13167_v37  ;;  %v2713_v7 = vsel %vm517_vm0, %v2649_v39, 0.0  ;;  %v2620_v9 = vsub.f32 %v18090_v44, %v2420_v25  ;;  %v2434_v55 = vsel %vm2431_vm4, %v2433_v43, %v2429_v1  ;;  %v4581_v62 = vpop.f32.mrf.mxu3  ;;  %v14659_v37 = vpop.xlane.xlu2 %1694  ;;  %v18095_v39 = vld [vmem:[#allocation94_spill] sm:$0xff] }
 0x37e   : > { %4924 = vmatmul.f32.gmra.mxu3 %v18091_v18  ;;  %2714 = vadd.xlane.f32.xlu0 %v2713_v7  ;;  %v14651_v15 = vadd.f32 %v4581_v62, %v4320_v13  ;;  %v14653_v58 = vpop.f32.mrf.mxu0  ;;  %v14655_v4 = vpop.f32.mrf.mxu1  ;;  %18094 = vst [vmem:[#allocation167_spill] sm:$0xff] %v14659_v37  ;;  %v18098_v13 = vld [vmem:[#allocation99_spill] sm:$0xff]  ;;  %v18099_v43 = vld [vmem:[#allocation10_spill] sm:$0xff] }
 0x37f   : > { %v2652_v49 = vand.u32 2147483647, %v2620_v9  ;;  %v2435_v51 = vmul.f32 %v2434_v55, %v18098_v13  ;;  %v18101_v9 = vld [vmem:[#allocation17_spill] sm:$0xff] }
 0x380   : > { %18092 = vst [vmem:[#allocation144_spill] sm:$0xff] %v14651_v15  ;;  %4715 = vmatmul.f32.gmra.mxu2 %v18093_v36  ;;  %v18102_v55 = vld [vmem:[#allocation93_spill] sm:$0xff] }
 0x381   : > { %6570 = vmatpush.xpose.msrb.mxu3 %v13277_v17  ;;  %v2722_v25 = vsel %vm517_vm0, %v2652_v49, 0.0  ;;  %v2621_v16 = vsub.f32 %v18099_v43, %v2435_v51  ;;  %v2670_v13 = vpop.xlane.xlu1 %2669 }
 0x382   : > { %5296 = vmatmul.f32.gmra.mxu1 %v18095_v39  ;;  %5131 = vmatmul.f32.gmra.mxu0 %v18084_v6  ;;  %v2667_v49 = vpop.xlane.xlu0 %2666  ;;  %2763 = vst.msk [vmem:[%s14676_s8 + $0x8] sm:$0xff] %vm2761_vm7, %v2670_v13  ;;  %v18108_v13 = vld [vmem:[#allocation158_spill] sm:$0xff] }
 0x383   : > { %v2653_v62 = vand.u32 2147483647, %v2621_v16  ;;  %2762 = vst.msk [vmem:[%s14676_s8] sm:$0xff] %vm2761_vm7, %v2667_v49  ;;  %v18107_v49 = vld [vmem:[#allocation22_spill] sm:$0xff] }
 0x384   : > { %v4336_v17 = vpop.f32.mrf.mxu2 }
 0x385   : > { %6572 = vmatpush.xpose.msrb.mxu3 %v13476_v27  ;;  %v4585_v1 = vpop.f32.mrf.mxu3  ;;  %v14688_v51 = vpop.xlane.xlu2 %1703 }
 0x386   : > { %4930 = vmatmul.f32.gmra.mxu3 %v13309_v11  ;;  %2723 = vadd.xlane.f32.xlu0 %v2722_v25  ;;  %v14678_v7 = vadd.f32 %v4585_v1, %v4328_v53  ;;  %v14680_v44 = vpop.f32.mrf.mxu0  ;;  %v14682_v27 = vpop.f32.mrf.mxu1  ;;  %18103 = vst [vmem:[#allocation182_spill] sm:$0xff] %v14688_v51  ;;  %v18104_v53 = vld [vmem:[#allocation60_spill] sm:$0xff]  ;;  %v2725_v25 = vsel %vm517_vm0, %v2653_v62, 0.0  ;;  %v18118_v11 = vld [vmem:[#allocation109_spill] sm:$0xff] }
 0x388   : > { %18100 = vst [vmem:[#allocation31_spill] sm:$0xff] %v14678_v7  ;;  %4720 = vmatmul.f32.gmra.mxu2 %v18101_v9 }
 0x389   : > { %6574 = vmatpush.xpose.msrb.mxu3 %v13586_v56  ;;  %v18105_v56 = vld [vmem:[#allocation65_spill] sm:$0xff] }
 0x38a   : > { %5300 = vmatmul.f32.gmra.mxu1 %v18102_v55  ;;  %5135 = vmatmul.f32.gmra.mxu0 %v18095_v39  ;;  %v2676_v62 = vpop.xlane.xlu0 %2675 }
 0x38b   : > { %2765 = vst.msk [vmem:[%s14676_s8 + $0x18] sm:$0xff] %vm2761_vm7, %v2676_v62  ;;  %v18112_v62 = vld [vmem:[#allocation30_spill] sm:$0xff] }
 0x38c   : > { %v4344_v43 = vpop.f32.mrf.mxu2 }
 0x38d   : > { %6576 = vmatpush.xpose.msrb.mxu3 %v18104_v53  ;;  %v4589_v16 = vpop.f32.mrf.mxu3  ;;  %v2679_v53 = vpop.xlane.xlu1 %2678 }
 0x38e   : > { %4936 = vmatmul.f32.gmra.mxu3 %v18105_v56  ;;  %2726 = vadd.xlane.f32.xlu0 %v2725_v25  ;;  %v14697_v1 = vadd.f32 %v4589_v16, %v4336_v17  ;;  %v14699_v5 = vpop.f32.mrf.mxu0  ;;  %v14701_v51 = vpop.f32.mrf.mxu1  ;;  %2766 = vst.msk [vmem:[%s14676_s8 + $0x20] sm:$0xff] %vm2761_vm7, %v2679_v53  ;;  %v18109_v17 = vld [vmem:[#allocation36_spill] sm:$0xff]  ;;  %v18115_v56 = vld [vmem:[#allocation174_spill] sm:$0xff] }
 0x38f   : > { %v2673_v25 = vpop.xlane.xlu2 %2672 }
 0x390   : > { %18106 = vst [vmem:[#allocation37_spill] sm:$0xff] %v14697_v1  ;;  %4725 = vmatmul.f32.gmra.mxu2 %v18107_v49 }
 0x391   : > { %6578 = vmatpush.xpose.msrb.mxu3 %v13893_v59  ;;  %2764 = vst.msk [vmem:[%s14676_s8 + $0x10] sm:$0xff] %vm2761_vm7, %v2673_v25 }
 0x392   : > { %5304 = vmatmul.f32.gmra.mxu1 %v18108_v13  ;;  %5139 = vmatmul.f32.gmra.mxu0 %v18102_v55 }
 0x394   : > { %v4352_v59 = vpop.f32.mrf.mxu2 }
 0x395   : > { %6580 = vmatpush.xpose.msrb.mxu3 %v14105_v38  ;;  %v4593_v16 = vpop.f32.mrf.mxu3  ;;  %v2685_v38 = vpop.xlane.xlu0 %2684 }
 0x396   : > { %4942 = vmatmul.f32.gmra.mxu3 %v18109_v17  ;;  %v14715_v19 = vadd.f32 %v4593_v16, %v4344_v43  ;;  %v14717_v37 = vpop.f32.mrf.mxu0  ;;  %v14722_v53 = vpop.f32.mrf.mxu1  ;;  %2768 = vst.msk [vmem:[%s14676_s8 + $0x30] sm:$0xff] %vm2761_vm7, %v2685_v38  ;;  %v18114_v17 = vld [vmem:[#allocation141_spill] sm:$0xff] }
 0x397   : > { %v2682_v25 = vpop.xlane.xlu2 %2681  ;;  %v2688_v49 = vpop.xlane.xlu1 %2687 }
 0x398   : > { %18110 = vst [vmem:[#allocation189_spill] sm:$0xff] %v14715_v19  ;;  %4730 = vmatmul.f32.gmra.mxu2 %v18111_v57 }
 0x399   : > { %2767 = vst.msk [vmem:[%s14676_s8 + $0x28] sm:$0xff] %vm2761_vm7, %v2682_v25 }
 0x39a   : > { %5308 = vmatmul.f32.gmra.mxu1 %v18112_v62  ;;  %5143 = vmatmul.f32.gmra.mxu0 %v18108_v13  ;;  %2769 = vst.msk [vmem:[%s14676_s8 + $0x38] sm:$0xff] %vm2761_vm7, %v2688_v49 }
 0x39c   : > { %v4360_v43 = vpop.f32.mrf.mxu2 }
 0x39d   : > { %v4597_v16 = vpop.f32.mrf.mxu3 }
 0x39e   : > { %4948 = vmatmul.f32.gmra.mxu3 %v14187_v12  ;;  %v14731_v57 = vadd.f32 %v4597_v16, %v4352_v59  ;;  %v14736_v9 = vpop.f32.mrf.mxu0  ;;  %v14738_v38 = vpop.f32.mrf.mxu1  ;;  %v18117_v59 = vld [vmem:[#allocation181_spill] sm:$0xff] }
 0x3a0   : > { %18113 = vst [vmem:[#allocation72_spill] sm:$0xff] %v14731_v57  ;;  %4735 = vmatmul.f32.gmra.mxu2 %v18114_v17 }
 0x3a2   : > { %5312 = vmatmul.f32.gmra.mxu1 %v18115_v56  ;;  %5147 = vmatmul.f32.gmra.mxu0 %v18112_v62 }
 0x3a4   : > { %v4368_v25 = vpop.f32.mrf.mxu2 }
 0x3a5   : > { %v4601_v49 = vpop.f32.mrf.mxu3 }
 0x3a6   : > { %4954 = vmatmul.f32.gmra.mxu3 %v14376_v2  ;;  %v14741_v12 = vadd.f32 %v4601_v49, %v4360_v43  ;;  %v14746_v16 = vpop.f32.mrf.mxu0  ;;  %v14748_v17 = vpop.f32.mrf.mxu1  ;;  %v18120_v43 = vld [vmem:[#allocation191_spill] sm:$0xff] }
 0x3a8   : > { %18116 = vst [vmem:[#allocation192_spill] sm:$0xff] %v14741_v12  ;;  %4740 = vmatmul.f32.gmra.mxu2 %v14171_v61 }
 0x3aa   : > { %5316 = vmatmul.f32.gmra.mxu1 %v18117_v59  ;;  %5151 = vmatmul.f32.gmra.mxu0 %v18115_v56 }
 0x3ac   : > { %v4376_v36 = vpop.f32.mrf.mxu2  ;;  %v2691_v49 = vpop.xlane.xlu2 %2690 }
 0x3ad   : > { %v4605_v2 = vpop.f32.mrf.mxu3  ;;  %2770 = vst.msk [vmem:[%s14676_s8 + $0x40] sm:$0xff] %vm2761_vm7, %v2691_v49  ;;  %v18125_v49 = vld [vmem:[#allocation84_spill] sm:$0xff] }
 0x3ae   : > { %4960 = vmatmul.f32.gmra.mxu3 %v18118_v11  ;;  %v14751_v18 = vadd.f32 %v4605_v2, %v4368_v25  ;;  %v14758_v61 = vpop.f32.mrf.mxu0  ;;  %v14763_v2 = vpop.f32.mrf.mxu1 }
 0x3b0   : > { %18119 = vst [vmem:[#allocation32_spill] sm:$0xff] %v14751_v18  ;;  %4745 = vmatmul.f32.gmra.mxu2 %v14358_v41  ;;  %v2694_v60 = vpop.xlane.xlu0 %2693  ;;  %v18123_v41 = vld [vmem:[#allocation107_spill] sm:$0xff]  ;;  %v18124_v18 = vld [vmem:[#allocation200_spill] sm:$0xff] }
 0x3b1   : > { %2771 = vst.msk [vmem:[%s14676_s8 + $0x48] sm:$0xff] %vm2761_vm7, %v2694_v60  ;;  %v18127_v60 = vld [vmem:[#allocation64_spill] sm:$0xff] }
 0x3b2   : > { %5320 = vmatmul.f32.gmra.mxu1 %v18120_v43  ;;  %5155 = vmatmul.f32.gmra.mxu0 %v18117_v59 }
 0x3b4   : > { %v4384_v11 = vpop.f32.mrf.mxu2 }
 0x3b5   : > { %v4609_v12 = vpop.f32.mrf.mxu3 }
 0x3b6   : > { %4966 = vmatmul.f32.gmra.mxu3 %v18121_v45  ;;  %v14765_v25 = vadd.f32 %v4609_v12, %v4376_v36  ;;  %v14771_v21 = vpop.f32.mrf.mxu0  ;;  %v14778_v36 = vpop.f32.mrf.mxu1 }
 0x3b8   : > { %18122 = vst [vmem:[#allocation162_spill] sm:$0xff] %v14765_v25  ;;  %4750 = vmatmul.f32.gmra.mxu2 %v18123_v41  ;;  %v18129_v41 = vld [vmem:[#allocation125_spill] sm:$0xff] }
 0x3b9   : > { %v18131_v25 = vld [vmem:[#allocation21_spill] sm:$0xff] }
 0x3ba   : > { %5324 = vmatmul.f32.gmra.mxu1 %v18124_v18  ;;  %5159 = vmatmul.f32.gmra.mxu0 %v18120_v43  ;;  %v18137_v43 = vld [vmem:[#allocation149_spill] sm:$0xff] }
 0x3bc   : > { %v4392_v19 = vpop.f32.mrf.mxu2 }
 0x3bd   : > { %v4613_v57 = vpop.f32.mrf.mxu3  ;;  %v2697_v12 = vpop.xlane.xlu1 %2696 }
 0x3be   : > { %4972 = vmatmul.f32.gmra.mxu3 %v18125_v49  ;;  %v14773_v45 = vadd.f32 %v4613_v57, %v4384_v11  ;;  %2772 = vst.msk [vmem:[%s14676_s8 + $0x50] sm:$0xff] %vm2761_vm7, %v2697_v12  ;;  %v18130_v49 = vld [vmem:[#allocation119_spill] sm:$0xff]  ;;  %v14786_v11 = vpop.f32.mrf.mxu0  ;;  %v4494_v12 = vadd.f32 %v14255_v28, %v14344_v14  ;;  %v18135_v28 = vld [vmem:[#allocation140_spill] sm:$0xff]  ;;  %v4498_v14 = vadd.f32 %v14346_v31, %v14420_v33  ;;  %v18138_v33 = vld [vmem:[#allocation138_spill] sm:$0xff] }
 0x3bf   : > { %v4502_v31 = vadd.f32 %v14422_v20, %v14488_v24  ;;  %v18141_v24 = vld [vmem:[#allocation148_spill] sm:$0xff] }
 0x3c0   : > { %18126 = vst [vmem:[#allocation199_spill] sm:$0xff] %v14773_v45  ;;  %4755 = vmatmul.f32.gmra.mxu2 %v18127_v60  ;;  %v14788_v45 = vpop.f32.mrf.mxu1 }
 0x3c2   : > { %5328 = vmatmul.f32.gmra.mxu1 %v18128_v8  ;;  %5163 = vmatmul.f32.gmra.mxu0 %v18124_v18  ;;  %v18133_v18 = vld [vmem:[#allocation95_spill] sm:$0xff] }
 0x3c4   : > { %v4671_v60 = vpop.f32.mrf.mxu2 }
 0x3c5   : > { %v4617_v57 = vpop.f32.mrf.mxu3 }
 0x3c6   : > { %4978 = vmatmul.f32.gmra.mxu3 %v18129_v41  ;;  %v14790_v1 = vadd.f32 %v4617_v57, %v4392_v19  ;;  %v14800_v57 = vpop.f32.mrf.mxu0 }
 0x3c8   : > { %4760 = vmatmul.f32.gmra.mxu2 %v18130_v49  ;;  %18132 = vst [vmem:[#allocation71_spill] sm:$0xff] %v14790_v1  ;;  %v18134_v49 = vld [vmem:[#allocation123_spill] sm:$0xff] }
 0x3ca   : > { %5332 = vmatmul.f32.gmra.mxu1 %v18131_v25  ;;  %5167 = vmatmul.f32.gmra.mxu0 %v18128_v8  ;;  %v4672_v8 = vadd.f32 %v4671_v60, %v4494_v12 }
 0x3cc   : > { %v4676_v7 = vpop.f32.mrf.mxu2 }
 0x3cd   : > { %v4865_v22 = vpop.f32.mrf.mxu3 }
 0x3ce   : > { %4984 = vmatmul.f32.gmra.mxu3 %v18133_v18  ;;  %v2700_v41 = vpop.xlane.xlu2 %2699  ;;  %v4866_v19 = vadd.f32 %v4865_v22, %v4672_v8  ;;  %v4677_v22 = vadd.f32 %v4676_v7, %v4498_v14 }
 0x3cf   : > { %2773 = vst.msk [vmem:[%s14676_s8 + $0x58] sm:$0xff] %vm2761_vm7, %v2700_v41  ;;  %v18136_v41 = vld [vmem:[#allocation131_spill] sm:$0xff] }
 0x3d0   : > { %4765 = vmatmul.f32.gmra.mxu2 %v18134_v49 }
 0x3d2   : > { %5336 = vmatmul.f32.gmra.mxu1 %v14072_v23  ;;  %5171 = vmatmul.f32.gmra.mxu0 %v18131_v25 }
 0x3d4   : > { %v14802_v1 = vpop.f32.mrf.mxu1  ;;  %v4681_v8 = vpop.f32.mrf.mxu2 }
 0x3d5   : > { %v2703_v18 = vpop.xlane.xlu0 %2702  ;;  %v4871_v60 = vpop.f32.mrf.mxu3  ;;  %v4682_v7 = vadd.f32 %v4681_v8, %v4502_v31 }
 0x3d6   : > { %4990 = vmatmul.f32.gmra.mxu3 %v18135_v28  ;;  %2774 = vst.msk [vmem:[%s14676_s8 + $0x60] sm:$0xff] %vm2761_vm7, %v2703_v18  ;;  %v4872_v12 = vadd.f32 %v4871_v60, %v4677_v22  ;;  %v18140_v28 = vld [vmem:[#allocation157_spill] sm:$0xff] }
 0x3d8   : > { %4770 = vmatmul.f32.gmra.mxu2 %v18136_v41  ;;  %v18139_v41 = vld [vmem:[#allocation106_spill] sm:$0xff] }
 0x3da   : > { %5340 = vmatmul.f32.gmra.mxu1 %v14331_v42  ;;  %5175 = vmatmul.f32.gmra.mxu0 %v14072_v23  ;;  %v4506_v23 = vadd.f32 %v14490_v46, %v14556_v3 }
 0x3dc   : > { %v4686_v14 = vpop.f32.mrf.mxu2 }
 0x3dd   : > { %v4877_v22 = vpop.f32.mrf.mxu3  ;;  %v4687_v31 = vadd.f32 %v4686_v14, %v4506_v23 }
 0x3de   : > { %v2706_v49 = vpop.xlane.xlu1 %2705  ;;  %v5281_v25 = vpop.f32.mrf.mxu1  ;;  %4996 = vmatmul.f32.gmra.mxu3 %v18137_v43  ;;  %v4878_v60 = vadd.f32 %v4877_v22, %v4682_v7 }
 0x3df   : > { %2775 = vst.msk [vmem:[%s14676_s8 + $0x68] sm:$0xff] %vm2761_vm7, %v2706_v49  ;;  %v14815_v18 = vpop.f32.mrf.mxu0 }
 0x3e0   : > { %4775 = vmatmul.f32.gmra.mxu2 %v18138_v33  ;;  %v18142_v33 = vld [vmem:[#allocation75_spill] sm:$0xff] }
 0x3e2   : > { %5344 = vmatmul.f32.gmra.mxu1 %v18139_v41  ;;  %5179 = vmatmul.f32.gmra.mxu0 %v14331_v42  ;;  %v18145_v42 = vld [vmem:[#allocation156_spill] sm:$0xff] }
 0x3e4   : > { %v4691_v22 = vpop.f32.mrf.mxu2 }
 0x3e6   : > { %5002 = vmatmul.f32.gmra.mxu3 %v18140_v28  ;;  %v4883_v28 = vpop.f32.mrf.mxu3 }
 0x3e7   : > { %v5285_v43 = vpop.f32.mrf.mxu1  ;;  %v5120_v49 = vpop.f32.mrf.mxu0  ;;  %v4884_v46 = vadd.f32 %v4883_v28, %v4687_v31 }
 0x3e8   : > { %v2709_v15 = vpop.xlane.xlu2 %2708  ;;  %v5121_v20 = vadd.f32 %v5120_v49, %v4866_v19  ;;  %4780 = vmatmul.f32.gmra.mxu2 %v18141_v24  ;;  %v18144_v19 = vld [vmem:[#allocation161_spill] sm:$0xff] }
 0x3e9   : > { %2776 = vst.msk [vmem:[%s14676_s8 + $0x70] sm:$0xff] %vm2761_vm7, %v2709_v15  ;;  %v2712_v8 = vpop.xlane.xlu0 %2711  ;;  %v4510_v15 = vadd.f32 %v14558_v52, %v14621_v54  ;;  %v4514_v54 = vadd.f32 %v14623_v34, %v14653_v58  ;;  %v4518_v34 = vadd.f32 %v14655_v4, %v14680_v44  ;;  %v18152_v58 = vld [vmem:[#allocation171_spill] sm:$0xff]  ;;  %v4522_v44 = vadd.f32 %v14682_v27, %v14699_v5  ;;  %v18160_v27 = vld [vmem:[#allocation186_spill] sm:$0xff] }
 0x3ea   : > { %5348 = vmatmul.f32.gmra.mxu1 %v18142_v33  ;;  %5183 = vmatmul.f32.gmra.mxu0 %v18139_v41  ;;  %v14830_v7 = vadd.f32 %v5281_v25, %v5121_v20  ;;  %2777 = vst.msk [vmem:[%s14676_s8 + $0x78] sm:$0xff] %vm2761_vm7, %v2712_v8  ;;  %v18146_v41 = vld [vmem:[#allocation9_spill] sm:$0xff]  ;;  %v4526_v5 = vadd.f32 %v14701_v51, %v14717_v37  ;;  %v18164_v37 = vld [vmem:[#allocation195_spill] sm:$0xff]  ;;  %v18165_v51 = vld [vmem:[#allocation154_spill] sm:$0xff] }
 0x3eb   : > { %v4692_v25 = vadd.f32 %v4691_v22, %v4510_v15 }
 0x3ec   : > { %18143 = vst [vmem:[#allocation166_spill] sm:$0xff] %v14830_v7  ;;  %v4696_v28 = vpop.f32.mrf.mxu2  ;;  %v18148_v7 = vld [vmem:[#allocation172_spill] sm:$0xff] }
 0x3ee   : > { %5008 = vmatmul.f32.gmra.mxu3 %v18144_v19  ;;  %v4889_v20 = vpop.f32.mrf.mxu3  ;;  %v18157_v19 = vld [vmem:[#allocation136_spill] sm:$0xff] }
 0x3ef   : > { %v5289_v3 = vpop.f32.mrf.mxu1  ;;  %v5124_v49 = vpop.f32.mrf.mxu0  ;;  %v4890_v8 = vadd.f32 %v4889_v20, %v4692_v25  ;;  %v18151_v20 = vld [vmem:[#allocation179_spill] sm:$0xff] }
 0x3f0   : > { %v5125_v24 = vadd.f32 %v5124_v49, %v4872_v12  ;;  %4785 = vmatmul.f32.gmra.mxu2 %v18145_v42  ;;  %v18149_v12 = vld [vmem:[#allocation41_spill] sm:$0xff]  ;;  %v18150_v49 = vld [vmem:[#allocation122_spill] sm:$0xff] }
 0x3f1   : > { %v2715_v23 = vpop.xlane.xlu0 %2714 }
 0x3f2   : > { %5352 = vmatmul.f32.gmra.mxu1 %v18146_v41  ;;  %5187 = vmatmul.f32.gmra.mxu0 %v18142_v33  ;;  %v14840_v14 = vadd.f32 %v5285_v43, %v5125_v24  ;;  %2778 = vst.msk [vmem:[%s14676_s8 + $0x80] sm:$0xff] %vm2761_vm7, %v2715_v23  ;;  %v4697_v43 = vadd.f32 %v4696_v28, %v4514_v54 }
 0x3f4   : > { %18147 = vst [vmem:[#allocation169_spill] sm:$0xff] %v14840_v14  ;;  %v4701_v24 = vpop.f32.mrf.mxu2 }
 0x3f5   : > { %v4702_v28 = vadd.f32 %v4701_v24, %v4518_v34 }
 0x3f6   : > { %5014 = vmatmul.f32.gmra.mxu3 %v18148_v7  ;;  %v4895_v22 = vpop.f32.mrf.mxu3 }
 0x3f7   : > { %v5293_v31 = vpop.f32.mrf.mxu1  ;;  %v5128_v52 = vpop.f32.mrf.mxu0  ;;  %v4896_v15 = vadd.f32 %v4895_v22, %v4697_v43 }
 0x3f8   : > { %4790 = vmatmul.f32.gmra.mxu2 %v18149_v12  ;;  %v5129_v23 = vadd.f32 %v5128_v52, %v4878_v60  ;;  %v18153_v12 = vld [vmem:[#allocation129_spill] sm:$0xff] }
 0x3f9   : > { %v2724_v42 = vpop.xlane.xlu0 %2723 }
 0x3fa   : > { %5356 = vmatmul.f32.gmra.mxu1 %v18150_v49  ;;  %5191 = vmatmul.f32.gmra.mxu0 %v18146_v41  ;;  %2781 = vst.msk [vmem:[%s14676_s8 + $0x98] sm:$0xff] %vm2761_vm7, %v2724_v42  ;;  %v14858_v42 = vadd.f32 %v5289_v3, %v5129_v23 }
 0x3fc   : > { %18154 = vst [vmem:[#allocation70_spill] sm:$0xff] %v14858_v42  ;;  %v4706_v60 = vpop.f32.mrf.mxu2  ;;  %v18161_v42 = vld [vmem:[#allocation146_spill] sm:$0xff] }
 0x3fd   : > { %v4707_v3 = vadd.f32 %v4706_v60, %v4522_v44 }
 0x3fe   : > { %5020 = vmatmul.f32.gmra.mxu3 %v18151_v20  ;;  %v4901_v52 = vpop.f32.mrf.mxu3  ;;  %v18155_v20 = vld [vmem:[#allocation188_spill] sm:$0xff] }
 0x3ff   : > { %v5297_v25 = vpop.f32.mrf.mxu1  ;;  %v5132_v14 = vpop.f32.mrf.mxu0  ;;  %v4902_v54 = vadd.f32 %v4901_v52, %v4702_v28  ;;  %v18159_v28 = vld [vmem:[#allocation196_spill] sm:$0xff] }
 0x400   : > { %4795 = vmatmul.f32.gmra.mxu2 %v18152_v58  ;;  %v5133_v43 = vadd.f32 %v5132_v14, %v4884_v46  ;;  %v18156_v58 = vld [vmem:[#allocation177_spill] sm:$0xff] }
 0x401   : > { %v2727_v7 = vpop.xlane.xlu0 %2726 }
 0x402   : > { %5360 = vmatmul.f32.gmra.mxu1 %v18153_v12  ;;  %5195 = vmatmul.f32.gmra.mxu0 %v18150_v49  ;;  %2782 = vst.msk [vmem:[%s14676_s8 + $0xa0] sm:$0xff] %vm2761_vm7, %v2727_v7  ;;  %v14868_v24 = vadd.f32 %v5293_v31, %v5133_v43 }
 0x404   : > { %18158 = vst [vmem:[#allocation39_spill] sm:$0xff] %v14868_v24  ;;  %v4711_v7 = vpop.f32.mrf.mxu2  ;;  %v4530_v24 = vadd.f32 %v14722_v53, %v14736_v9  ;;  %v4534_v9 = vadd.f32 %v14738_v38, %v14746_v16  ;;  %v18168_v53 = vld [vmem:[#allocation108_spill] sm:$0xff]  ;;  %v4538_v38 = vadd.f32 %v14748_v17, %v14758_v61  ;;  %v18172_v16 = vld [vmem:[#allocation51_spill] sm:$0xff] }
 0x405   : > { %v4712_v60 = vadd.f32 %v4711_v7, %v4526_v5  ;;  %v18174_v61 = vld [vmem:[#allocation151_spill] sm:$0xff] }
 0x406   : > { %5026 = vmatmul.f32.gmra.mxu3 %v18155_v20  ;;  %v4907_v23 = vpop.f32.mrf.mxu3 }
 0x407   : > { %v5301_v22 = vpop.f32.mrf.mxu1  ;;  %v5136_v4 = vpop.f32.mrf.mxu0  ;;  %v4908_v34 = vadd.f32 %v4907_v23, %v4707_v3 }
 0x408   : > { %4800 = vmatmul.f32.gmra.mxu2 %v18156_v58  ;;  %v5137_v46 = vadd.f32 %v5136_v4, %v4890_v8  ;;  %v18163_v4 = vld [vmem:[#allocation113_spill] sm:$0xff] }
 0x40a   : > { %5364 = vmatmul.f32.gmra.mxu1 %v18157_v19  ;;  %5199 = vmatmul.f32.gmra.mxu0 %v18153_v12  ;;  %v14876_v31 = vadd.f32 %v5297_v25, %v5137_v46 }
 0x40c   : > { %18162 = vst [vmem:[#allocation38_spill] sm:$0xff] %v14876_v31  ;;  %v4716_v43 = vpop.f32.mrf.mxu2 }
 0x40d   : > { %v4717_v7 = vadd.f32 %v4716_v43, %v4530_v24 }
 0x40e   : > { %5032 = vmatmul.f32.gmra.mxu3 %v18159_v28  ;;  %v4913_v44 = vpop.f32.mrf.mxu3 }
 0x40f   : > { %v5305_v14 = vpop.f32.mrf.mxu1  ;;  %v5140_v52 = vpop.f32.mrf.mxu0  ;;  %v4914_v3 = vadd.f32 %v4913_v44, %v4712_v60  ;;  %v18166_v44 = vld [vmem:[#allocation23_spill] sm:$0xff] }
 0x410   : > { %4805 = vmatmul.f32.gmra.mxu2 %v18160_v27  ;;  %v5141_v27 = vadd.f32 %v5140_v52, %v4896_v15 }
 0x412   : > { %5368 = vmatmul.f32.gmra.mxu1 %v18161_v42  ;;  %5203 = vmatmul.f32.gmra.mxu0 %v18157_v19  ;;  %v14887_v31 = vadd.f32 %v5301_v22, %v5141_v27  ;;  %v18170_v22 = vld [vmem:[#allocation142_spill] sm:$0xff] }
 0x414   : > { %v4721_v25 = vpop.f32.mrf.mxu2  ;;  %18167 = vst [vmem:[#allocation73_spill] sm:$0xff] %v14887_v31 }
 0x415   : > { %v4722_v24 = vadd.f32 %v4721_v25, %v4534_v9 }
 0x416   : > { %5038 = vmatmul.f32.gmra.mxu3 %v18163_v4  ;;  %v4919_v46 = vpop.f32.mrf.mxu3 }
 0x417   : > { %v5309_v8 = vpop.f32.mrf.mxu1  ;;  %v5144_v23 = vpop.f32.mrf.mxu0  ;;  %v14884_v5 = vadd.f32 %v4919_v46, %v4717_v7 }
 0x418   : > { %4810 = vmatmul.f32.gmra.mxu2 %v18164_v37  ;;  %v18169_v37 = vld [vmem:[#allocation160_spill] sm:$0xff]  ;;  %v5145_v15 = vadd.f32 %v5144_v23, %v4902_v54 }
 0x419   : > { %v18173_v54 = vld [vmem:[#allocation168_spill] sm:$0xff] }
 0x41a   : > { %5372 = vmatmul.f32.gmra.mxu1 %v18165_v51  ;;  %5207 = vmatmul.f32.gmra.mxu0 %v18161_v42  ;;  %v14899_v27 = vadd.f32 %v5305_v14, %v5145_v15  ;;  %v4542_v15 = vadd.f32 %v14763_v2, %v14771_v21  ;;  %v4546_v21 = vadd.f32 %v14778_v36, %v14786_v11  ;;  %v18177_v2 = vld [vmem:[#allocation120_spill] sm:$0xff] }
 0x41b   : > { %v4550_v36 = vadd.f32 %v14788_v45, %v14800_v57  ;;  %v18180_v11 = vld [vmem:[#allocation124_spill] sm:$0xff]  ;;  %v18182_v57 = vld [vmem:[#allocation130_spill] sm:$0xff] }
 0x41c   : > { %v4726_v52 = vpop.f32.mrf.mxu2  ;;  %18171 = vst [vmem:[#allocation101_spill] sm:$0xff] %v14899_v27  ;;  %v18175_v27 = vld [vmem:[#allocation175_spill] sm:$0xff] }
 0x41d   : > { %v4727_v23 = vadd.f32 %v4726_v52, %v4538_v38 }
 0x41e   : > { %5044 = vmatmul.f32.gmra.mxu3 %v18166_v44  ;;  %v4925_v43 = vpop.f32.mrf.mxu3 }
 0x41f   : > { %v5313_v60 = vpop.f32.mrf.mxu1  ;;  %v5148_v4 = vpop.f32.mrf.mxu0  ;;  %v14894_v7 = vadd.f32 %v4925_v43, %v4722_v24 }
 0x420   : > { %4815 = vmatmul.f32.gmra.mxu2 %v18168_v53  ;;  %v5149_v17 = vadd.f32 %v5148_v4, %v4908_v34  ;;  %v18178_v4 = vld [vmem:[#allocation184_spill] sm:$0xff] }
 0x422   : > { %5376 = vmatmul.f32.gmra.mxu1 %v18169_v37  ;;  %5211 = vmatmul.f32.gmra.mxu0 %v18165_v51 }
 0x424   : > { %v4731_v25 = vpop.f32.mrf.mxu2 }
 0x425   : > { %v4732_v52 = vadd.f32 %v4731_v25, %v4542_v15 }
 0x426   : > { %5050 = vmatmul.f32.gmra.mxu3 %v18170_v22  ;;  %v4931_v9 = vpop.f32.mrf.mxu3 }
 0x427   : > { %v14896_v46 = vpop.f32.mrf.mxu1  ;;  %v5152_v31 = vpop.f32.mrf.mxu0  ;;  %v14906_v24 = vadd.f32 %v4931_v9, %v4727_v23  ;;  %v14918_v9 = vadd.f32 %v5309_v8, %v5149_v17 }
 0x428   : > { %4820 = vmatmul.f32.gmra.mxu2 %v18172_v16  ;;  %v5153_v34 = vadd.f32 %v5152_v31, %v4914_v3  ;;  %v18181_v31 = vld [vmem:[#allocation48_spill] sm:$0xff]  ;;  %v4554_v3 = vadd.f32 %v14802_v1, %v14815_v18 }
 0x429   : > { %18176 = vst [vmem:[#allocation176_spill] sm:$0xff] %v14918_v9 }
 0x42a   : > { %5380 = vmatmul.f32.gmra.mxu1 %v18173_v54  ;;  %5215 = vmatmul.f32.gmra.mxu0 %v18169_v37  ;;  %v14930_v17 = vadd.f32 %v5313_v60, %v5153_v34 }
 0x42c   : > { %v4736_v38 = vpop.f32.mrf.mxu2  ;;  %18179 = vst [vmem:[#allocation85_spill] sm:$0xff] %v14930_v17 }
 0x42d   : > { %v4737_v25 = vadd.f32 %v4736_v38, %v4546_v21 }
 0x42e   : > { %5794 = vmatmul.f32.vlgmr.msra.gmra.mxu3 %v18031_v48  ;;  %v4937_v16 = vpop.f32.mrf.mxu3 }
 0x42f   : > { %v14908_v43 = vpop.f32.mrf.mxu1  ;;  %v5156_v14 = vpop.f32.mrf.mxu0  ;;  %v14916_v23 = vadd.f32 %v4937_v16, %v4732_v52 }
 0x430   : > { %4825 = vmatmul.f32.gmra.mxu2 %v18174_v61  ;;  %v5157_v1 = vadd.f32 %v5156_v14, %v14884_v5  ;;  %v18191_v61 = vld [vmem:[#allocation81_spill] sm:$0xff] }
 0x432   : > { %5384 = vmatmul.f32.gmra.mxu1 %v18175_v27  ;;  %5219 = vmatmul.f32.gmra.mxu0 %v18173_v54 }
 0x434   : > { %v4741_v16 = vpop.f32.mrf.mxu2 }
 0x435   : > { %v4742_v38 = vadd.f32 %v4741_v16, %v4550_v36 }
 0x436   : > { %5798 = vmatmul.f32.gmra.mxu3 %v18048_v35  ;;  %v4943_v15 = vpop.f32.mrf.mxu3 }
 0x437   : > { %v14920_v22 = vpop.f32.mrf.mxu1  ;;  %v5160_v53 = vpop.f32.mrf.mxu0  ;;  %v14928_v8 = vadd.f32 %v4943_v15, %v4737_v25  ;;  %v18183_v15 = vld [vmem:[#allocation55_spill] sm:$0xff] }
 0x438   : > { %5445 = vmatmul.f32.vlgmr.msra.gmra.mxu2 %v18177_v2 }
 0x43a   : > { %5388 = vmatmul.f32.gmra.mxu1 %v18178_v4  ;;  %5223 = vmatmul.f32.gmra.mxu0 %v18175_v27 }
 0x43c   : > { %v4746_v60 = vpop.f32.mrf.mxu2 }
 0x43d   : > { %v4747_v2 = vadd.f32 %v4746_v60, %v4554_v3  ;;  %v14958_v60 = vadd.f32 %v14896_v46, %v5157_v1  ;;  %v18187_v1 = vld [vmem:[#allocation147_spill] sm:$0xff] }
 0x43e   : > { %5802 = vmatmul.f32.gmra.mxu3 %v18067_v29  ;;  %v4949_v21 = vpop.f32.mrf.mxu3 }
 0x43f   : > { %v14932_v52 = vpop.f32.mrf.mxu1  ;;  %v5164_v9 = vpop.f32.mrf.mxu0  ;;  %v14942_v34 = vadd.f32 %v4949_v21, %v4742_v38  ;;  %18184 = vst [vmem:[#allocation45_spill] sm:$0xff] %v14958_v60  ;;  %v18185_v21 = vld [vmem:[#allocation139_spill] sm:$0xff] }
 0x440   : > { %5453 = vmatmul.f32.gmra.mxu2 %v18180_v11 }
 0x442   : > { %5392 = vmatmul.f32.gmra.mxu1 %v18181_v31  ;;  %5227 = vmatmul.f32.gmra.mxu0 %v18178_v4 }
 0x444   : > { %v4751_v18 = vpop.f32.mrf.mxu2 }
 0x445   : > { %v4752_v36 = vadd.f32 %v4751_v18, %v14342_v63  ;;  %v5161_v18 = vadd.f32 %v5160_v53, %v14894_v7  ;;  %v5165_v53 = vadd.f32 %v5164_v9, %v14906_v24 }
 0x446   : > { %5806 = vmatmul.f32.gmra.mxu3 %v18084_v6  ;;  %v4955_v16 = vpop.f32.mrf.mxu3 }
 0x447   : > { %v14944_v25 = vpop.f32.mrf.mxu1  ;;  %v5168_v45 = vpop.f32.mrf.mxu0  ;;  %v14952_v11 = vadd.f32 %v4955_v16, %v4747_v2  ;;  %v14974_v60 = vadd.f32 %v14908_v43, %v5161_v18  ;;  %v14985_v43 = vadd.f32 %v14920_v22, %v5165_v53 }
 0x448   : > { %5461 = vmatmul.f32.gmra.mxu2 %v18182_v57  ;;  %v18186_v57 = vld [vmem:[#allocation59_spill] sm:$0xff]  ;;  %v5169_v24 = vadd.f32 %v5168_v45, %v14916_v23 }
 0x449   : > { %18189 = vst [vmem:[#allocation5_spill] sm:$0xff] %v14974_v60 }
 0x44a   : > { %5396 = vmatmul.f32.gmra.mxu1 %v18183_v15  ;;  %5231 = vmatmul.f32.gmra.mxu0 %v18181_v31  ;;  %18192 = vst [vmem:[#allocation6_spill] sm:$0xff] %v14985_v43  ;;  %v14994_v22 = vadd.f32 %v14932_v52, %v5169_v24 }
 0x44c   : > { %v4756_v5 = vpop.f32.mrf.mxu2  ;;  %18194 = vst [vmem:[#allocation79_spill] sm:$0xff] %v14994_v22 }
 0x44d   : > { %v4757_v63 = vadd.f32 %v4756_v5, %v14430_v50 }
 0x44e   : > { %5810 = vmatmul.f32.gmra.mxu3 %v18095_v39  ;;  %v4961_v14 = vpop.f32.mrf.mxu3 }
 0x44f   : > { %v14954_v3 = vpop.f32.mrf.mxu1  ;;  %v5172_v38 = vpop.f32.mrf.mxu0  ;;  %v14964_v2 = vadd.f32 %v4961_v14, %v4752_v36 }
 0x450   : > { %5469 = vmatmul.f32.gmra.mxu2 %v18185_v21  ;;  %v18188_v21 = vld [vmem:[#allocation27_spill] sm:$0xff]  ;;  %v5173_v23 = vadd.f32 %v5172_v38, %v14928_v8 }
 0x452   : > { %5400 = vmatmul.f32.gmra.mxu1 %v18186_v57  ;;  %5235 = vmatmul.f32.gmra.mxu0 %v18183_v15  ;;  %v15005_v52 = vadd.f32 %v14944_v25, %v5173_v23  ;;  %v18202_v25 = vld [vmem:[#allocation126_spill] sm:$0xff] }
 0x454   : > { %v4761_v17 = vpop.f32.mrf.mxu2  ;;  %18198 = vst [vmem:[#allocation185_spill] sm:$0xff] %v15005_v52 }
 0x455   : > { %v4762_v36 = vadd.f32 %v4761_v17, %v14470_v47 }
 0x456   : > { %5814 = vmatmul.f32.gmra.mxu3 %v18102_v55  ;;  %v4967_v50 = vpop.f32.mrf.mxu3 }
 0x457   : > { %v14967_v16 = vpop.f32.mrf.mxu1  ;;  %v5176_v46 = vpop.f32.mrf.mxu0  ;;  %v4968_v5 = vadd.f32 %v4967_v50, %v4757_v63  ;;  %v18193_v50 = vld [vmem:[#allocation40_spill] sm:$0xff] }
 0x458   : > { %5477 = vmatmul.f32.gmra.mxu2 %v18187_v1  ;;  %v18190_v1 = vld [vmem:[#allocation155_spill] sm:$0xff]  ;;  %v5177_v24 = vadd.f32 %v5176_v46, %v14942_v34 }
 0x45a   : > { %5404 = vmatmul.f32.gmra.mxu1 %v18188_v21  ;;  %5239 = vmatmul.f32.gmra.mxu0 %v18186_v57  ;;  %v15016_v23 = vadd.f32 %v14954_v3, %v5177_v24  ;;  %v18209_v3 = vld [vmem:[#allocation134_spill] sm:$0xff] }
 0x45c   : > { %v4766_v18 = vpop.f32.mrf.mxu2  ;;  %18203 = vst [vmem:[#allocation46_spill] sm:$0xff] %v15016_v23  ;;  %v18304_v23 = vld [vmem:[#allocation41_spill] sm:$0xff] }
 0x45d   : > { %v4767_v47 = vadd.f32 %v4766_v18, %v14507_v40  ;;  %v18195_v18 = vld [vmem:[#allocation173_spill] sm:$0xff] }
 0x45e   : > { %5818 = vmatmul.f32.gmra.mxu3 %v18108_v13  ;;  %v4973_v60 = vpop.f32.mrf.mxu3 }
 0x45f   : > { %v14978_v7 = vpop.f32.mrf.mxu1  ;;  %v5180_v14 = vpop.f32.mrf.mxu0  ;;  %v4974_v17 = vadd.f32 %v4973_v60, %v4762_v36 }
 0x460   : > { %5485 = vmatmul.f32.gmra.mxu2 %v18190_v1 }
 0x462   : > { %6166 = vmatmul.f32.vlgmr.msra.gmra.mxu1 %v18191_v61  ;;  %5243 = vmatmul.f32.gmra.mxu0 %v18188_v21 }
 0x464   : > { %v4771_v61 = vpop.f32.mrf.mxu2 }
 0x465   : > { %v4772_v40 = vadd.f32 %v4771_v61, %v14554_v32 }
 0x466   : > { %5822 = vmatmul.f32.gmra.mxu3 %v18112_v62  ;;  %v4979_v53 = vpop.f32.mrf.mxu3 }
 0x467   : > { %v5349_v9 = vpop.f32.mrf.mxu1  ;;  %v5184_v63 = vpop.f32.mrf.mxu0  ;;  %v4980_v60 = vadd.f32 %v4979_v53, %v4767_v47 }
 0x468   : > { %5493 = vmatmul.f32.gmra.mxu2 %v18193_v50 }
 0x46a   : > { %6172 = vmatmul.f32.gmra.mxu1 %v17957_v0  ;;  %5972 = vmatmul.f32.vlgmr.msra.gmra.mxu0 %v17956_v10  ;;  %v18197_v0 = vld [vmem:[#allocation8_spill] sm:$0xff] }
 0x46c   : > { %v4776_v32 = vpop.f32.mrf.mxu2 }
 0x46d   : > { %v4777_v8 = vadd.f32 %v4776_v32, %v14619_v30 }
 0x46e   : > { %5826 = vmatmul.f32.gmra.mxu3 %v18115_v56  ;;  %v4985_v47 = vpop.f32.mrf.mxu3 }
 0x46f   : > { %v5353_v45 = vpop.f32.mrf.mxu1  ;;  %v5188_v36 = vpop.f32.mrf.mxu0  ;;  %v4986_v38 = vadd.f32 %v4985_v47, %v4772_v40  ;;  %v18206_v47 = vld [vmem:[#allocation187_spill] sm:$0xff] }
 0x470   : > { %v5189_v1 = vadd.f32 %v5188_v36, %v4968_v5  ;;  %5501 = vmatmul.f32.gmra.mxu2 %v18195_v18  ;;  %v18204_v36 = vld [vmem:[#allocation144_spill] sm:$0xff] }
 0x472   : > { %6178 = vmatmul.f32.gmra.mxu1 %v17964_v26  ;;  %v15001_v10 = vadd.f32 %v5349_v9, %v5189_v1  ;;  %5977 = vmatmul.f32.gmra.mxu0 %v18197_v0  ;;  %v18199_v26 = vld [vmem:[#allocation178_spill] sm:$0xff]  ;;  %v18200_v9 = vld [vmem:[#allocation135_spill] sm:$0xff]  ;;  %v5181_v1 = vadd.f32 %v5180_v14, %v14952_v11 }
 0x474   : > { %18196 = vst [vmem:[#allocation78_spill] sm:$0xff] %v15001_v10  ;;  %v4781_v30 = vpop.f32.mrf.mxu2  ;;  %v15027_v24 = vadd.f32 %v14967_v16, %v5181_v1  ;;  %v18216_v16 = vld [vmem:[#allocation143_spill] sm:$0xff]  ;;  %v18290_v10 = vld [vmem:[#allocation190_spill] sm:$0xff] }
 0x475   : > { %v4782_v34 = vadd.f32 %v4781_v30, %v18204_v36  ;;  %v18213_v36 = vld [vmem:[#allocation197_spill] sm:$0xff] }
 0x476   : > { %5830 = vmatmul.f32.gmra.mxu3 %v18117_v59  ;;  %v4991_v40 = vpop.f32.mrf.mxu3  ;;  %18210 = vst [vmem:[#allocation193_spill] sm:$0xff] %v15027_v24 }
 0x477   : > { %v5357_v50 = vpop.f32.mrf.mxu1  ;;  %v5192_v5 = vpop.f32.mrf.mxu0  ;;  %v4992_v46 = vadd.f32 %v4991_v40, %v4777_v8 }
 0x478   : > { %v5193_v61 = vadd.f32 %v5192_v5, %v4974_v17  ;;  %5509 = vmatmul.f32.gmra.mxu2 %v18199_v26  ;;  %v18205_v17 = vld [vmem:[#allocation191_spill] sm:$0xff] }
 0x479   : > { %v18211_v26 = vld [vmem:[#allocation31_spill] sm:$0xff] }
 0x47a   : > { %6184 = vmatmul.f32.gmra.mxu1 %v18200_v9  ;;  %v15012_v53 = vadd.f32 %v5353_v45, %v5193_v61  ;;  %5982 = vmatmul.f32.gmra.mxu0 %v18202_v25  ;;  %v18207_v45 = vld [vmem:[#allocation145_spill] sm:$0xff]  ;;  %v5185_v9 = vadd.f32 %v5184_v63, %v14964_v2 }
 0x47c   : > { %18201 = vst [vmem:[#allocation88_spill] sm:$0xff] %v15012_v53  ;;  %v4786_v61 = vpop.f32.mrf.mxu2  ;;  %v15038_v1 = vadd.f32 %v14978_v7, %v5185_v9  ;;  %v18244_v53 = vld [vmem:[#allocation63_spill] sm:$0xff] }
 0x47d   : > { %v4787_v11 = vadd.f32 %v4786_v61, %v18211_v26  ;;  %v18221_v26 = vld [vmem:[#allocation164_spill] sm:$0xff] }
 0x47e   : > { %5834 = vmatmul.f32.gmra.mxu3 %v18205_v17  ;;  %v4997_v8 = vpop.f32.mrf.mxu3  ;;  %18217 = vst [vmem:[#allocation105_spill] sm:$0xff] %v15038_v1 }
 0x47f   : > { %v5361_v18 = vpop.f32.mrf.mxu1  ;;  %v5196_v0 = vpop.f32.mrf.mxu0  ;;  %v4998_v14 = vadd.f32 %v4997_v8, %v4782_v34  ;;  %v18220_v8 = vld [vmem:[#allocation57_spill] sm:$0xff] }
 0x480   : > { %v5197_v32 = vadd.f32 %v5196_v0, %v4980_v60  ;;  %5517 = vmatmul.f32.gmra.mxu2 %v18206_v47  ;;  %v18212_v60 = vld [vmem:[#allocation200_spill] sm:$0xff]  ;;  %v18218_v47 = vld [vmem:[#allocation37_spill] sm:$0xff] }
 0x482   : > { %6190 = vmatmul.f32.gmra.mxu1 %v18207_v45  ;;  %v15023_v5 = vadd.f32 %v5357_v50, %v5197_v32  ;;  %5987 = vmatmul.f32.gmra.mxu0 %v18209_v3  ;;  %v18214_v50 = vld [vmem:[#allocation153_spill] sm:$0xff]  ;;  %v18219_v3 = vld [vmem:[#allocation24_spill] sm:$0xff] }
 0x484   : > { %18208 = vst [vmem:[#allocation80_spill] sm:$0xff] %v15023_v5  ;;  %v4791_v32 = vpop.f32.mrf.mxu2  ;;  %v18238_v5 = vld [vmem:[#allocation110_spill] sm:$0xff] }
 0x485   : > { %v4792_v2 = vadd.f32 %v4791_v32, %v18218_v47  ;;  %v18226_v47 = vld [vmem:[#allocation25_spill] sm:$0xff] }
 0x486   : > { %5838 = vmatmul.f32.gmra.mxu3 %v18212_v60  ;;  %v5003_v34 = vpop.f32.mrf.mxu3 }
 0x487   : > { %v5365_v25 = vpop.f32.mrf.mxu1  ;;  %v5200_v30 = vpop.f32.mrf.mxu0  ;;  %v5004_v63 = vadd.f32 %v5003_v34, %v4787_v11  ;;  %v18225_v11 = vld [vmem:[#allocation21_spill] sm:$0xff] }
 0x488   : > { %v5201_v40 = vadd.f32 %v5200_v30, %v4986_v38  ;;  %5525 = vmatmul.f32.gmra.mxu2 %v18213_v36  ;;  %v18223_v30 = vld [vmem:[#allocation152_spill] sm:$0xff] }
 0x48a   : > { %6196 = vmatmul.f32.gmra.mxu1 %v18214_v50  ;;  %v15034_v0 = vadd.f32 %v5361_v18, %v5201_v40  ;;  %5992 = vmatmul.f32.gmra.mxu0 %v18216_v16  ;;  %v18224_v40 = vld [vmem:[#allocation189_spill] sm:$0xff] }
 0x48c   : > { %18215 = vst [vmem:[#allocation132_spill] sm:$0xff] %v15034_v0  ;;  %v4796_v7 = vpop.f32.mrf.mxu2  ;;  %v18232_v0 = vld [vmem:[#allocation52_spill] sm:$0xff] }
 0x48d   : > { %v4797_v36 = vadd.f32 %v4796_v7, %v18224_v40 }
 0x48e   : > { %5842 = vmatmul.f32.gmra.mxu3 %v18219_v3  ;;  %v5009_v9 = vpop.f32.mrf.mxu3 }
 0x48f   : > { %v5369_v45 = vpop.f32.mrf.mxu1  ;;  %v5204_v38 = vpop.f32.mrf.mxu0  ;;  %v5010_v50 = vadd.f32 %v5009_v9, %v4792_v2  ;;  %v18231_v2 = vld [vmem:[#allocation97_spill] sm:$0xff] }
 0x490   : > { %v5205_v61 = vadd.f32 %v5204_v38, %v4992_v46  ;;  %5533 = vmatmul.f32.gmra.mxu2 %v18220_v8  ;;  %v18227_v46 = vld [vmem:[#allocation170_spill] sm:$0xff] }
 0x492   : > { %6202 = vmatmul.f32.gmra.mxu1 %v18221_v26  ;;  %v15044_v18 = vadd.f32 %v5365_v25, %v5205_v61  ;;  %5997 = vmatmul.f32.gmra.mxu0 %v18223_v30  ;;  %v18229_v25 = vld [vmem:[#allocation163_spill] sm:$0xff]  ;;  %v18230_v26 = vld [vmem:[#allocation72_spill] sm:$0xff] }
 0x494   : > { %18222 = vst [vmem:[#allocation90_spill] sm:$0xff] %v15044_v18  ;;  %v4801_v61 = vpop.f32.mrf.mxu2 }
 0x495   : > { %v4802_v30 = vadd.f32 %v4801_v61, %v18230_v26 }
 0x496   : > { %5846 = vmatmul.f32.gmra.mxu3 %v18225_v11  ;;  %v5015_v8 = vpop.f32.mrf.mxu3 }
 0x497   : > { %v5373_v16 = vpop.f32.mrf.mxu1  ;;  %v5208_v32 = vpop.f32.mrf.mxu0  ;;  %v5016_v18 = vadd.f32 %v5015_v8, %v4797_v36  ;;  %v18237_v36 = vld [vmem:[#allocation20_spill] sm:$0xff] }
 0x498   : > { %v5209_v34 = vadd.f32 %v5208_v32, %v4998_v14  ;;  %5541 = vmatmul.f32.gmra.mxu2 %v18226_v47  ;;  %v18233_v14 = vld [vmem:[#allocation43_spill] sm:$0xff] }
 0x49a   : > { %6208 = vmatmul.f32.gmra.mxu1 %v18227_v46  ;;  %v15051_v38 = vadd.f32 %v5369_v45, %v5209_v34  ;;  %6002 = vmatmul.f32.gmra.mxu0 %v18229_v25  ;;  %v18235_v45 = vld [vmem:[#allocation42_spill] sm:$0xff]  ;;  %v18236_v46 = vld [vmem:[#allocation192_spill] sm:$0xff] }
 0x49c   : > { %18228 = vst [vmem:[#allocation91_spill] sm:$0xff] %v15051_v38  ;;  %v4806_v34 = vpop.f32.mrf.mxu2 }
 0x49d   : > { %v4807_v25 = vadd.f32 %v4806_v34, %v18236_v46 }
 0x49e   : > { %5850 = vmatmul.f32.gmra.mxu3 %v18231_v2  ;;  %v5021_v47 = vpop.f32.mrf.mxu3 }
 0x49f   : > { %v5377_v7 = vpop.f32.mrf.mxu1  ;;  %v5212_v9 = vpop.f32.mrf.mxu0  ;;  %v5022_v38 = vadd.f32 %v5021_v47, %v4802_v30  ;;  %v18243_v30 = vld [vmem:[#allocation106_spill] sm:$0xff] }
 0x4a0   : > { %v5213_v40 = vadd.f32 %v5212_v9, %v5004_v63  ;;  %5549 = vmatmul.f32.gmra.mxu2 %v18232_v0  ;;  %v18239_v63 = vld [vmem:[#allocation47_spill] sm:$0xff] }
 0x4a2   : > { %6214 = vmatmul.f32.gmra.mxu1 %v18233_v14  ;;  %v15058_v32 = vadd.f32 %v5373_v16, %v5213_v40  ;;  %6007 = vmatmul.f32.gmra.mxu0 %v18235_v45  ;;  %v18241_v16 = vld [vmem:[#allocation16_spill] sm:$0xff] }
 0x4a3   : > { %v18242_v14 = vld [vmem:[#allocation32_spill] sm:$0xff] }
 0x4a4   : > { %18234 = vst [vmem:[#allocation94_spill] sm:$0xff] %v15058_v32  ;;  %v4811_v9 = vpop.f32.mrf.mxu2 }
 0x4a5   : > { %v4812_v45 = vadd.f32 %v4811_v9, %v18242_v14  ;;  %v18249_v14 = vld [vmem:[#allocation112_spill] sm:$0xff] }
 0x4a6   : > { %5854 = vmatmul.f32.gmra.mxu3 %v18237_v36  ;;  %v5027_v40 = vpop.f32.mrf.mxu3 }
 0x4a7   : > { %v5381_v61 = vpop.f32.mrf.mxu1  ;;  %v5216_v8 = vpop.f32.mrf.mxu0  ;;  %v5028_v32 = vadd.f32 %v5027_v40, %v4807_v25 }
 0x4a8   : > { %v5217_v26 = vadd.f32 %v5216_v8, %v5010_v50  ;;  %5557 = vmatmul.f32.gmra.mxu2 %v18238_v5  ;;  %v18245_v50 = vld [vmem:[#allocation194_spill] sm:$0xff] }
 0x4aa   : > { %6220 = vmatmul.f32.gmra.mxu1 %v18239_v63  ;;  %v15065_v0 = vadd.f32 %v5377_v7, %v5217_v26  ;;  %6012 = vmatmul.f32.gmra.mxu0 %v18241_v16  ;;  %v18247_v7 = vld [vmem:[#allocation183_spill] sm:$0xff]  ;;  %v18248_v63 = vld [vmem:[#allocation162_spill] sm:$0xff] }
 0x4ac   : > { %18240 = vst [vmem:[#allocation99_spill] sm:$0xff] %v15065_v0  ;;  %v4816_v8 = vpop.f32.mrf.mxu2 }
 0x4ad   : > { %v4817_v16 = vadd.f32 %v4816_v8, %v18248_v63  ;;  %v18254_v63 = vld [vmem:[#allocation69_spill] sm:$0xff] }
 0x4ae   : > { %5858 = vmatmul.f32.gmra.mxu3 %v18243_v30  ;;  %v5033_v26 = vpop.f32.mrf.mxu3 }
 0x4af   : > { %v5385_v34 = vpop.f32.mrf.mxu1  ;;  %v5220_v47 = vpop.f32.mrf.mxu0  ;;  %v5034_v0 = vadd.f32 %v5033_v26, %v4812_v45 }
 0x4b0   : > { %v5221_v46 = vadd.f32 %v5220_v47, %v5016_v18  ;;  %5565 = vmatmul.f32.gmra.mxu2 %v18244_v53  ;;  %v18250_v18 = vld [vmem:[#allocation19_spill] sm:$0xff] }
 0x4b2   : > { %6226 = vmatmul.f32.gmra.mxu1 %v18245_v50  ;;  %v15072_v5 = vadd.f32 %v5381_v61, %v5221_v46  ;;  %6017 = vmatmul.f32.gmra.mxu0 %v18247_v7  ;;  %v18252_v61 = vld [vmem:[#allocation17_spill] sm:$0xff]  ;;  %v18253_v50 = vld [vmem:[#allocation199_spill] sm:$0xff] }
 0x4b4   : > { %18246 = vst [vmem:[#allocation10_spill] sm:$0xff] %v15072_v5  ;;  %v4821_v47 = vpop.f32.mrf.mxu2 }
 0x4b5   : > { %v4822_v7 = vadd.f32 %v4821_v47, %v18253_v50  ;;  %v18259_v50 = vld [vmem:[#allocation82_spill] sm:$0xff] }
 0x4b6   : > { %5862 = vmatmul.f32.gmra.mxu3 %v18142_v33  ;;  %v5039_v46 = vpop.f32.mrf.mxu3 }
 0x4b7   : > { %v5389_v9 = vpop.f32.mrf.mxu1  ;;  %v5224_v25 = vpop.f32.mrf.mxu0  ;;  %v5040_v5 = vadd.f32 %v5039_v46, %v4817_v16 }
 0x4b8   : > { %v5225_v40 = vadd.f32 %v5224_v25, %v5022_v38  ;;  %5573 = vmatmul.f32.gmra.mxu2 %v18249_v14  ;;  %v18255_v38 = vld [vmem:[#allocation65_spill] sm:$0xff] }
 0x4ba   : > { %6232 = vmatmul.f32.gmra.mxu1 %v18250_v18  ;;  %v15079_v53 = vadd.f32 %v5385_v34, %v5225_v40  ;;  %6022 = vmatmul.f32.gmra.mxu0 %v18252_v61  ;;  %v18257_v34 = vld [vmem:[#allocation22_spill] sm:$0xff]  ;;  %v18258_v18 = vld [vmem:[#allocation71_spill] sm:$0xff] }
 0x4bc   : > { %18251 = vst [vmem:[#allocation93_spill] sm:$0xff] %v15079_v53  ;;  %v4826_v40 = vpop.f32.mrf.mxu2 }
 0x4bd   : > { %v4827_v61 = vadd.f32 %v4826_v40, %v18258_v18  ;;  %v18264_v18 = vld [vmem:[#allocation28_spill] sm:$0xff] }
 0x4be   : > { %5866 = vmatmul.f32.gmra.mxu3 %v18146_v41  ;;  %v5045_v14 = vpop.f32.mrf.mxu3 }
 0x4bf   : > { %v5393_v8 = vpop.f32.mrf.mxu1  ;;  %v5228_v45 = vpop.f32.mrf.mxu0  ;;  %v5046_v53 = vadd.f32 %v5045_v14, %v4822_v7  ;;  %v18263_v14 = vld [vmem:[#allocation83_spill] sm:$0xff] }
 0x4c0   : > { %v5229_v26 = vadd.f32 %v5228_v45, %v5028_v32  ;;  %5581 = vmatmul.f32.gmra.mxu2 %v18254_v63  ;;  %v18260_v32 = vld [vmem:[#allocation36_spill] sm:$0xff] }
 0x4c2   : > { %6238 = vmatmul.f32.gmra.mxu1 %v18255_v38  ;;  %v15086_v25 = vadd.f32 %v5389_v9, %v5229_v26  ;;  %6027 = vmatmul.f32.gmra.mxu0 %v18257_v34  ;;  %v18262_v9 = vld [vmem:[#allocation58_spill] sm:$0xff] }
 0x4c4   : > { %18256 = vst [vmem:[#allocation60_spill] sm:$0xff] %v15086_v25  ;;  %v5446_v63 = vpop.f32.mrf.mxu2 }
 0x4c6   : > { %5870 = vmatmul.f32.gmra.mxu3 %v18150_v49  ;;  %v5051_v26 = vpop.f32.mrf.mxu3 }
 0x4c7   : > { %v5397_v47 = vpop.f32.mrf.mxu1  ;;  %v5232_v16 = vpop.f32.mrf.mxu0  ;;  %v5052_v38 = vadd.f32 %v5051_v26, %v4827_v61  ;;  %v18268_v26 = vld [vmem:[#allocation54_spill] sm:$0xff] }
 0x4c8   : > { %v5233_v46 = vadd.f32 %v5232_v16, %v5034_v0  ;;  %5589 = vmatmul.f32.gmra.mxu2 %v18259_v50  ;;  %v18266_v16 = vld [vmem:[#allocation141_spill] sm:$0xff] }
 0x4ca   : > { %6244 = vmatmul.f32.gmra.mxu1 %v18260_v32  ;;  %v15093_v45 = vadd.f32 %v5393_v8, %v5233_v46  ;;  %6032 = vmatmul.f32.gmra.mxu0 %v18262_v9  ;;  %v18267_v9 = vld [vmem:[#allocation133_spill] sm:$0xff] }
 0x4cc   : > { %18261 = vst [vmem:[#allocation158_spill] sm:$0xff] %v15093_v45  ;;  %v5454_v8 = vpop.f32.mrf.mxu2  ;;  %v18282_v45 = vld [vmem:[#allocation125_spill] sm:$0xff] }
 0x4ce   : > { %5874 = vmatmul.f32.gmra.mxu3 %v18153_v12  ;;  %v5795_v46 = vpop.f32.mrf.mxu3 }
 0x4cf   : > { %v5236_v34 = vpop.f32.mrf.mxu0  ;;  %v5401_v40 = vpop.f32.mrf.mxu1  ;;  %v5796_v50 = vadd.f32 %v5795_v46, %v5446_v63  ;;  %v18271_v46 = vld [vmem:[#allocation89_spill] sm:$0xff] }
 0x4d0   : > { %v5237_v7 = vadd.f32 %v5236_v34, %v5040_v5  ;;  %5597 = vmatmul.f32.gmra.mxu2 %v18263_v14  ;;  %v18270_v14 = vld [vmem:[#allocation26_spill] sm:$0xff] }
 0x4d2   : > { %6250 = vmatmul.f32.gmra.mxu1 %v18264_v18  ;;  %v15099_v0 = vadd.f32 %v5397_v47, %v5237_v7  ;;  %6037 = vmatmul.f32.gmra.mxu0 %v18266_v16 }
 0x4d4   : > { %18265 = vst [vmem:[#allocation30_spill] sm:$0xff] %v15099_v0  ;;  %v5462_v47 = vpop.f32.mrf.mxu2  ;;  %v18272_v0 = vld [vmem:[#allocation109_spill] sm:$0xff] }
 0x4d6   : > { %5878 = vmatmul.f32.gmra.mxu3 %v18157_v19  ;;  %v5799_v7 = vpop.f32.mrf.mxu3 }
 0x4d7   : > { %v5240_v32 = vpop.f32.mrf.mxu0  ;;  %v5405_v34 = vpop.f32.mrf.mxu1  ;;  %v5800_v18 = vadd.f32 %v5799_v7, %v5454_v8  ;;  %v18275_v7 = vld [vmem:[#allocation150_spill] sm:$0xff] }
 0x4d8   : > { %v5241_v61 = vadd.f32 %v5240_v32, %v5046_v53  ;;  %5605 = vmatmul.f32.gmra.mxu2 %v18267_v9  ;;  %v18274_v32 = vld [vmem:[#allocation137_spill] sm:$0xff] }
 0x4da   : > { %6256 = vmatmul.f32.gmra.mxu1 %v18268_v26  ;;  %v15105_v5 = vadd.f32 %v5401_v40, %v5241_v61  ;;  %6042 = vmatmul.f32.gmra.mxu0 %v18270_v14 }
 0x4dc   : > { %18269 = vst [vmem:[#allocation174_spill] sm:$0xff] %v15105_v5  ;;  %v5470_v40 = vpop.f32.mrf.mxu2  ;;  %v18276_v5 = vld [vmem:[#allocation117_spill] sm:$0xff] }
 0x4de   : > { %5882 = vmatmul.f32.gmra.mxu3 %v18161_v42  ;;  %v5803_v61 = vpop.f32.mrf.mxu3 }
 0x4df   : > { %v5244_v16 = vpop.f32.mrf.mxu0  ;;  %v5804_v9 = vadd.f32 %v5803_v61, %v5462_v47  ;;  %v6167_v26 = vpop.f32.mrf.mxu1  ;;  %v18278_v61 = vld [vmem:[#allocation159_spill] sm:$0xff] }
 0x4e0   : > { %v5245_v63 = vadd.f32 %v5244_v16, %v5052_v38  ;;  %5613 = vmatmul.f32.gmra.mxu2 %v18271_v46  ;;  %v18277_v38 = vld [vmem:[#allocation107_spill] sm:$0xff] }
 0x4e2   : > { %6262 = vmatmul.f32.gmra.mxu1 %v18272_v0  ;;  %v15111_v53 = vadd.f32 %v5405_v34, %v5245_v63  ;;  %6047 = vmatmul.f32.gmra.mxu0 %v18274_v32 }
 0x4e4   : > { %18273 = vst [vmem:[#allocation181_spill] sm:$0xff] %v15111_v53  ;;  %v5478_v0 = vpop.f32.mrf.mxu2  ;;  %v18279_v53 = vld [vmem:[#allocation84_spill] sm:$0xff] }
 0x4e6   : > { %5886 = vmatmul.f32.gmra.mxu3 %v18165_v51  ;;  %v5807_v34 = vpop.f32.mrf.mxu3 }
 0x4e7   : > { %v5973_v14 = vpop.f32.mrf.mxu0  ;;  %v5808_v63 = vadd.f32 %v5807_v34, %v5470_v40  ;;  %v6173_v46 = vpop.f32.mrf.mxu1 }
 0x4e8   : > { %v5974_v8 = vadd.f32 %v5973_v14, %v5796_v50  ;;  %5621 = vmatmul.f32.gmra.mxu2 %v18275_v7  ;;  %v18280_v50 = vld [vmem:[#allocation64_spill] sm:$0xff] }
 0x4ea   : > { %6268 = vmatmul.f32.gmra.mxu1 %v18276_v5  ;;  %6052 = vmatmul.f32.gmra.mxu0 %v18277_v38  ;;  %v15118_v16 = vadd.f32 %v6167_v26, %v5974_v8  ;;  %v18281_v38 = vld [vmem:[#allocation165_spill] sm:$0xff] }
 0x4ec   : > { %v5486_v5 = vpop.f32.mrf.mxu2 }
 0x4ee   : > { %5890 = vmatmul.f32.gmra.mxu3 %v18169_v37  ;;  %v5811_v7 = vpop.f32.mrf.mxu3 }
 0x4ef   : > { %v5978_v47 = vpop.f32.mrf.mxu0  ;;  %v5812_v26 = vadd.f32 %v5811_v7, %v5478_v0  ;;  %v6179_v34 = vpop.f32.mrf.mxu1  ;;  %v18284_v0 = vld [vmem:[#allocation29_spill] sm:$0xff]  ;;  %v18285_v7 = vld [vmem:[#allocation95_spill] sm:$0xff] }
 0x4f0   : > { %v5979_v32 = vadd.f32 %v5978_v47, %v5800_v18  ;;  %5629 = vmatmul.f32.gmra.mxu2 %v18278_v61  ;;  %v18283_v18 = vld [vmem:[#allocation119_spill] sm:$0xff] }
 0x4f2   : > { %6274 = vmatmul.f32.gmra.mxu1 %v18279_v53  ;;  %6057 = vmatmul.f32.gmra.mxu0 %v18280_v50  ;;  %v15124_v14 = vadd.f32 %v6173_v46, %v5979_v32 }
 0x4f4   : > { %v5494_v53 = vpop.f32.mrf.mxu2 }
 0x4f6   : > { %5894 = vmatmul.f32.gmra.mxu3 %v18173_v54  ;;  %v5815_v61 = vpop.f32.mrf.mxu3 }
 0x4f7   : > { %v5983_v8 = vpop.f32.mrf.mxu0  ;;  %v5816_v46 = vadd.f32 %v5815_v61, %v5486_v5  ;;  %v18287_v5 = vld [vmem:[#allocation180_spill] sm:$0xff]  ;;  %v18289_v61 = vld [vmem:[#allocation131_spill] sm:$0xff] }
 0x4f8   : > { %v5984_v40 = vadd.f32 %v5983_v8, %v5804_v9  ;;  %5637 = vmatmul.f32.gmra.mxu2 %v18281_v38  ;;  %v18286_v9 = vld [vmem:[#allocation123_spill] sm:$0xff] }
 0x4fa   : > { %6280 = vmatmul.f32.gmra.mxu1 %v18282_v45  ;;  %6062 = vmatmul.f32.gmra.mxu0 %v18283_v18  ;;  %v15130_v47 = vadd.f32 %v6179_v34, %v5984_v40  ;;  %v6185_v45 = vpop.f32.mrf.mxu1  ;;  %v18288_v34 = vld [vmem:[#allocation140_spill] sm:$0xff] }
 0x4fc   : > { %v5502_v8 = vpop.f32.mrf.mxu2 }
 0x4fe   : > { %5898 = vmatmul.f32.gmra.mxu3 %v18175_v27  ;;  %v5819_v38 = vpop.f32.mrf.mxu3 }
 0x4ff   : > { %v5988_v32 = vpop.f32.mrf.mxu0  ;;  %v5820_v25 = vadd.f32 %v5819_v38, %v5494_v53  ;;  %v18291_v53 = vld [vmem:[#allocation149_spill] sm:$0xff]  ;;  %v18292_v38 = vld [vmem:[#allocation138_spill] sm:$0xff] }
 0x500   : > { %5645 = vmatmul.f32.gmra.mxu2 %v18284_v0  ;;  %v5989_v50 = vadd.f32 %v5988_v32, %v5808_v63 }
 0x502   : > { %6286 = vmatmul.f32.gmra.mxu1 %v18285_v7  ;;  %6067 = vmatmul.f32.gmra.mxu0 %v18286_v9  ;;  %v15136_v18 = vadd.f32 %v6185_v45, %v5989_v50  ;;  %v6191_v7 = vpop.f32.mrf.mxu1 }
 0x504   : > { %v5510_v63 = vpop.f32.mrf.mxu2 }
 0x506   : > { %5902 = vmatmul.f32.gmra.mxu3 %v18178_v4  ;;  %v5823_v32 = vpop.f32.mrf.mxu3 }
 0x507   : > { %v5993_v40 = vpop.f32.mrf.mxu0  ;;  %v5824_v0 = vadd.f32 %v5823_v32, %v5502_v8 }
 0x508   : > { %5653 = vmatmul.f32.gmra.mxu2 %v18287_v5  ;;  %v5994_v9 = vadd.f32 %v5993_v40, %v5812_v26  ;;  %v18294_v26 = vld [vmem:[#allocation198_spill] sm:$0xff]  ;;  %v18295_v40 = vld [vmem:[#allocation157_spill] sm:$0xff] }
 0x50a   : > { %6292 = vmatmul.f32.gmra.mxu1 %v18288_v34  ;;  %6072 = vmatmul.f32.gmra.mxu0 %v18289_v61  ;;  %v15146_v45 = vadd.f32 %v6191_v7, %v5994_v9  ;;  %v6197_v8 = vpop.f32.mrf.mxu1 }
 0x50c   : > { %v5518_v5 = vpop.f32.mrf.mxu2 }
 0x50e   : > { %5906 = vmatmul.f32.gmra.mxu3 %v18181_v31  ;;  %v5827_v34 = vpop.f32.mrf.mxu3 }
 0x50f   : > { %v5998_v50 = vpop.f32.mrf.mxu0  ;;  %v15148_v1 = vadd.f32 %v5827_v34, %v5510_v63  ;;  %v18298_v63 = vld [vmem:[#allocation49_spill] sm:$0xff] }
 0x510   : > { %5661 = vmatmul.f32.gmra.mxu2 %v18290_v10  ;;  %v5999_v61 = vadd.f32 %v5998_v50, %v5816_v46  ;;  %v18296_v10 = vld [vmem:[#allocation148_spill] sm:$0xff]  ;;  %v18299_v46 = vld [vmem:[#allocation161_spill] sm:$0xff] }
 0x511   : > { %18293 = vst [vmem:[#allocation75_spill] sm:$0xff] %v15148_v1 }
 0x512   : > { %6298 = vmatmul.f32.gmra.mxu1 %v18291_v53  ;;  %6077 = vmatmul.f32.gmra.mxu0 %v18292_v38  ;;  %v15154_v32 = vadd.f32 %v6197_v8, %v5999_v61  ;;  %v6203_v50 = vpop.f32.mrf.mxu1  ;;  %v18302_v8 = vld [vmem:[#allocation111_spill] sm:$0xff] }
 0x514   : > { %v5526_v53 = vpop.f32.mrf.mxu2 }
 0x516   : > { %5910 = vmatmul.f32.gmra.mxu3 %v18183_v15  ;;  %v5831_v38 = vpop.f32.mrf.mxu3  ;;  %v8779_v15 = vld [vmem:[%s8989_s22 + $0xc0] sm:$0xff] }
 0x517   : > { %v15156_v7 = vadd.f32 %v5831_v38, %v5518_v5  ;;  %v6003_v9 = vpop.f32.mrf.mxu0  ;;  %v18303_v38 = vld [vmem:[#allocation172_spill] sm:$0xff] }
 0x518   : > { %5669 = vmatmul.f32.gmra.mxu2 %v18294_v26  ;;  %v6004_v34 = vadd.f32 %v6003_v9, %v5820_v25  ;;  %v18300_v26 = vld [vmem:[#allocation156_spill] sm:$0xff] }
 0x519   : > { %18297 = vst [vmem:[#allocation9_spill] sm:$0xff] %v15156_v7 }
 0x51a   : > { %6304 = vmatmul.f32.gmra.mxu1 %v18295_v40  ;;  %6082 = vmatmul.f32.gmra.mxu0 %v18296_v10  ;;  %v15165_v61 = vadd.f32 %v6203_v50, %v6004_v34  ;;  %v18307_v50 = vld [vmem:[#allocation179_spill] sm:$0xff] }
 0x51b   : > { %v18308_v34 = vld [vmem:[#allocation171_spill] sm:$0xff] }
 0x51c   : > { %v5534_v40 = vpop.f32.mrf.mxu2 }
 0x51e   : > { %5914 = vmatmul.f32.gmra.mxu3 %v18186_v57  ;;  %v5835_v24 = vpop.f32.mrf.mxu3  ;;  %v8778_v57 = vld [vmem:[%s8989_s22 + $0x40] sm:$0xff] }
 0x51f   : > { %v15162_v10 = vadd.f32 %v5835_v24, %v5526_v53  ;;  %v6008_v5 = vpop.f32.mrf.mxu0  ;;  %v18306_v53 = vld [vmem:[#allocation62_spill] sm:$0xff] }
 0x520   : > { %5677 = vmatmul.f32.gmra.mxu2 %v18298_v63  ;;  %v6009_v63 = vadd.f32 %v6008_v5, %v5824_v0 }
 0x521   : > { %18301 = vst [vmem:[#allocation122_spill] sm:$0xff] %v15162_v10 }
 0x522   : > { %6310 = vmatmul.f32.gmra.mxu1 %v18299_v46  ;;  %6087 = vmatmul.f32.gmra.mxu0 %v18300_v26  ;;  %v6209_v26 = vpop.f32.mrf.mxu1 }
 0x523   : > { %v15173_v24 = vadd.f32 %v6209_v26, %v6009_v63  ;;  %v18311_v63 = vld [vmem:[#allocation186_spill] sm:$0xff] }
 0x524   : > { %v5542_v46 = vpop.f32.mrf.mxu2 }
 0x526   : > { %5918 = vmatmul.f32.gmra.mxu3 %v18188_v21  ;;  %v5839_v25 = vpop.f32.mrf.mxu3 }
 0x527   : > { %v15170_v9 = vadd.f32 %v5839_v25, %v5534_v40 }
 0x528   : > { %5685 = vmatmul.f32.gmra.mxu2 %v18302_v8 }
 0x529   : > { %18305 = vst [vmem:[#allocation129_spill] sm:$0xff] %v15170_v9 }
 0x52a   : > { %6316 = vmatmul.f32.gmra.mxu1 %v18303_v38  ;;  %6092 = vmatmul.f32.gmra.mxu0 %v18304_v23 }
 0x52c   : > { %v5550_v8 = vpop.f32.mrf.mxu2 }
 0x52e   : > { %6582 = vmatmul.f32.vlgmr.msrb.gmra.mxu3 %v18031_v48  ;;  %v5843_v38 = vpop.f32.mrf.mxu3 }
 0x52f   : > { %v15178_v0 = vadd.f32 %v5843_v38, %v5542_v46  ;;  %v18319_v38 = vld [vmem:[#allocation51_spill] sm:$0xff] }
 0x530   : > { %5693 = vmatmul.f32.gmra.mxu2 %v18306_v53 }
 0x531   : > { %18309 = vst [vmem:[#allocation188_spill] sm:$0xff] %v15178_v0 }
 0x532   : > { %6322 = vmatmul.f32.gmra.mxu1 %v18307_v50  ;;  %6097 = vmatmul.f32.gmra.mxu0 %v18308_v34 }
 0x534   : > { %v5558_v23 = vpop.f32.mrf.mxu2 }
 0x536   : > { %6586 = vmatmul.f32.gmra.mxu3 %v18048_v35  ;;  %v5847_v40 = vpop.f32.mrf.mxu3 }
 0x537   : > { %v15184_v5 = vadd.f32 %v5847_v40, %v5550_v8 }
 0x538   : > { %6421 = vmatmul.f32.vlgmr.msrb.gmra.mxu2 %v18031_v48  ;;  %v18313_v48 = vld [vmem:[#allocation113_spill] sm:$0xff] }
 0x539   : > { %18310 = vst [vmem:[#allocation177_spill] sm:$0xff] %v15184_v5 }
 0x53a   : > { %6328 = vmatmul.f32.gmra.mxu1 %v18155_v20  ;;  %6102 = vmatmul.f32.gmra.mxu0 %v18156_v58  ;;  %v18314_v20 = vld [vmem:[#allocation195_spill] sm:$0xff] }
 0x53c   : > { %v5566_v46 = vpop.f32.mrf.mxu2 }
 0x53e   : > { %6590 = vmatmul.f32.gmra.mxu3 %v18067_v29  ;;  %v5851_v25 = vpop.f32.mrf.mxu3 }
 0x53f   : > { %v15190_v26 = vadd.f32 %v5851_v25, %v5558_v23 }
 0x540   : > { %6425 = vmatmul.f32.gmra.mxu2 %v18048_v35  ;;  %v18316_v35 = vld [vmem:[#allocation108_spill] sm:$0xff] }
 0x541   : > { %18312 = vst [vmem:[#allocation136_spill] sm:$0xff] %v15190_v26 }
 0x542   : > { %6334 = vmatmul.f32.gmra.mxu1 %v18159_v28  ;;  %6107 = vmatmul.f32.gmra.mxu0 %v18311_v63 }
 0x544   : > { %v5574_v58 = vpop.f32.mrf.mxu2 }
 0x546   : > { %6594 = vmatmul.f32.gmra.mxu3 %v18084_v6  ;;  %v5855_v53 = vpop.f32.mrf.mxu3 }
 0x547   : > { %v15196_v50 = vadd.f32 %v5855_v53, %v5566_v46 }
 0x548   : > { %6429 = vmatmul.f32.gmra.mxu2 %v18067_v29  ;;  %v18318_v29 = vld [vmem:[#allocation142_spill] sm:$0xff] }
 0x549   : > { %18315 = vst [vmem:[#allocation196_spill] sm:$0xff] %v15196_v50 }
 0x54a   : > { %6340 = vmatmul.f32.gmra.mxu1 %v18313_v48  ;;  %6112 = vmatmul.f32.gmra.mxu0 %v18314_v20 }
 0x54c   : > { %v5582_v28 = vpop.f32.mrf.mxu2 }
 0x54e   : > { %6598 = vmatmul.f32.gmra.mxu3 %v18095_v39  ;;  %v5859_v34 = vpop.f32.mrf.mxu3 }
 0x54f   : > { %v15202_v8 = vadd.f32 %v5859_v34, %v5574_v58  ;;  %v8769_v34 = vld [vmem:[%s8989_s22 + $0x68] sm:$0xff] }
 0x550   : > { %6433 = vmatmul.f32.gmra.mxu2 %v18084_v6  ;;  %v18321_v6 = vld [vmem:[#allocation151_spill] sm:$0xff] }
 0x551   : > { %18317 = vst [vmem:[#allocation146_spill] sm:$0xff] %v15202_v8 }
 0x552   : > { %6346 = vmatmul.f32.gmra.mxu1 %v18166_v44  ;;  %6117 = vmatmul.f32.gmra.mxu0 %v18316_v35 }
 0x554   : > { %v5590_v23 = vpop.f32.mrf.mxu2 }
 0x556   : > { %6602 = vmatmul.f32.gmra.mxu3 %v18102_v55  ;;  %v5863_v40 = vpop.f32.mrf.mxu3 }
 0x557   : > { %v15208_v63 = vadd.f32 %v5863_v40, %v5582_v28 }
 0x558   : > { %6437 = vmatmul.f32.gmra.mxu2 %v18095_v39 }
 0x559   : > { %18320 = vst [vmem:[#allocation154_spill] sm:$0xff] %v15208_v63 }
 0x55a   : > { %6352 = vmatmul.f32.gmra.mxu1 %v18318_v29  ;;  %6122 = vmatmul.f32.gmra.mxu0 %v18319_v38  ;;  %v8770_v29 = vld [vmem:[%s8989_s22 + $0x60] sm:$0xff] }
 0x55b   : > { %v7164_v38 = vpack.c.bf16 %v8769_v34, %v8770_v29 }
 0x55c   : > { %v5598_v44 = vpop.f32.mrf.mxu2 }
 0x55d   : > { %7175 = vmatpush.bf16.msrb.mxu0 %v7164_v38 }
 0x55e   : > { %6606 = vmatmul.f32.gmra.mxu3 %v18108_v13  ;;  %v5867_v46 = vpop.f32.mrf.mxu3 }
 0x55f   : > { %v15213_v25 = vadd.f32 %v5867_v46, %v5590_v23  ;;  %v8772_v23 = vld [vmem:[%s8989_s22 + $0xe0] sm:$0xff] }
 0x560   : > { %6441 = vmatmul.f32.gmra.mxu2 %v18102_v55 }
 0x561   : > { %18322 = vst [vmem:[#allocation23_spill] sm:$0xff] %v15213_v25 }
 0x562   : > { %6127 = vmatmul.f32.gmra.mxu0 %v18321_v6 }
 0x564   : > { %v5606_v39 = vpop.f32.mrf.mxu2 }
 0x566   : > { %6610 = vmatmul.f32.gmra.mxu3 %v18112_v62  ;;  %v5871_v48 = vpop.f32.mrf.mxu3 }
 0x567   : > { %v15217_v20 = vadd.f32 %v5871_v48, %v5598_v44 }
 0x568   : > { %6445 = vmatmul.f32.gmra.mxu2 %v18108_v13 }
 0x569   : > { %18323 = vst [vmem:[#allocation160_spill] sm:$0xff] %v15217_v20 }
 0x56c   : > { %v5614_v55 = vpop.f32.mrf.mxu2 }
 0x56e   : > { %6614 = vmatmul.f32.gmra.mxu3 %v18115_v56  ;;  %v5875_v58 = vpop.f32.mrf.mxu3 }
 0x56f   : > { %v15221_v53 = vadd.f32 %v5875_v58, %v5606_v39  ;;  %v18329_v58 = vld [vmem:[#allocation77_spill] sm:$0xff] }
 0x570   : > { %6449 = vmatmul.f32.gmra.mxu2 %v18112_v62  ;;  %v8771_v62 = vld [vmem:[%s8989_s22 + $0xe8] sm:$0xff]  ;;  %vm1928_vm5 = vcmp.eq.f32.partialorder %v18329_v58, inf  ;;  %vm1930_vm9 = vcmp.eq.f32.partialorder %v18329_v58, 0.0 }
 0x571   : > { %18324 = vst [vmem:[#allocation168_spill] sm:$0xff] %v15221_v53  ;;  %v7172_v40 = vpack.c.bf16 %v8771_v62, %v8772_v23  ;;  %v18331_v62 = vld [vmem:[#allocation35_spill] sm:$0xff]  ;;  %v8775_v53 = vld [vmem:[%s8989_s22 + $0xd8] sm:$0xff] }
 0x572   : > { %vm1964_vm3 = vcmp.eq.f32.partialorder %v18331_v62, inf  ;;  %vm1966_vm13 = vcmp.eq.f32.partialorder %v18331_v62, 0.0 }
 0x573   : > { %7264 = vmatpush.bf16.msrb.mxu1 %v7172_v40 }
 0x574   : > { %v5622_v13 = vpop.f32.mrf.mxu2 }
 0x576   : > { %6618 = vmatmul.f32.gmra.mxu3 %v18117_v59  ;;  %v5879_v35 = vpop.f32.mrf.mxu3 }
 0x577   : > { %v15225_v28 = vadd.f32 %v5879_v35, %v5614_v55 }
 0x578   : > { %6453 = vmatmul.f32.gmra.mxu2 %v18115_v56  ;;  %v18327_v56 = vld [vmem:[#allocation61_spill] sm:$0xff] }
 0x579   : > { %18325 = vst [vmem:[#allocation175_spill] sm:$0xff] %v15225_v28  ;;  %8522 = vrsqrt.f32 %v18327_v56  ;;  %vm1916_vm6 = vcmp.eq.f32.partialorder %v18327_v56, inf  ;;  %vm1918_vm8 = vcmp.eq.f32.partialorder %v18327_v56, 0.0 }
 0x57a   : > { %8524 = vrsqrt.f32 %v18329_v58 }
 0x57b   : > { %8526 = vrsqrt.f32 %v18331_v62 }
 0x57c   : > { %v5630_v6 = vpop.f32.mrf.mxu2 }
 0x57e   : > { %6622 = vmatmul.f32.gmra.mxu3 %v18205_v17  ;;  %v5883_v44 = vpop.f32.mrf.mxu3 }
 0x57f   : > { %v15233_v46 = vadd.f32 %v5883_v44, %v5622_v13  ;;  %v8523_v55 = vpop.eup %8522 }
 0x580   : > { %6457 = vmatmul.f32.gmra.mxu2 %v18117_v59  ;;  %v1910_v13 = vmul.f32 %v8523_v55, %v18327_v56 }
 0x581   : > { %18326 = vst [vmem:[#allocation120_spill] sm:$0xff] %v15233_v46  ;;  %v8774_v46 = vld [vmem:[%s8989_s22 + $0x50] sm:$0xff] }
 0x582   : > { %v1911_v38 = vmul.f32 %v8523_v55, %v1910_v13 }
 0x584   : > { %v5638_v39 = vpop.f32.mrf.mxu2  ;;  %v1912_v40 = vmul.f32 0.5, %v1911_v38  ;;  %v8773_v38 = vld [vmem:[%s8989_s22 + $0x58] sm:$0xff] }
 0x585   : > { %v7163_v28 = vpack.c.bf16 %v8773_v38, %v8774_v46 }
 0x586   : > { %6626 = vmatmul.f32.gmra.mxu3 %v18212_v60  ;;  %v5887_v59 = vpop.f32.mrf.mxu3  ;;  %v1913_v13 = vsub.f32 1.5, %v1912_v40 }
 0x587   : > { %v15238_v48 = vadd.f32 %v5887_v59, %v5630_v6  ;;  %7176 = vmatpush.bf16.msrb.mxu0 %v7163_v28 }
 0x588   : > { %6461 = vmatmul.f32.gmra.mxu2 %v18205_v17  ;;  %v8525_v17 = vpop.eup %8524  ;;  %v1914_v40 = vmul.f32 %v8523_v55, %v1913_v13  ;;  %v18337_v55 = vld [vmem:[#allocation56_spill] sm:$0xff]  ;;  %v18338_v13 = vld [vmem:[#allocation66_spill] sm:$0xff] }
 0x589   : > { %18328 = vst [vmem:[#allocation184_spill] sm:$0xff] %v15238_v48  ;;  %v1922_v23 = vmul.f32 %v8525_v17, %v18329_v58  ;;  %v18334_v48 = vld [vmem:[#allocation121_spill] sm:$0xff]  ;;  %vm2012_vm2 = vcmp.eq.f32.partialorder %v18337_v55, inf  ;;  %vm2036_vm4 = vcmp.eq.f32.partialorder %v18338_v13, inf }
 0x58a   : > { %v1915_v52 = vmul.f32 %v1914_v40, %v18327_v56  ;;  %vm2000_vm12 = vcmp.eq.f32.partialorder %v18334_v48, inf  ;;  %vm2002_vm15 = vcmp.eq.f32.partialorder %v18334_v48, 0.0 }
 0x58b   : > { %v1923_v59 = vmul.f32 %v8525_v17, %v1922_v23 }
 0x58c   : > { %v5646_v35 = vpop.f32.mrf.mxu2 }
 0x58d   : > { %v1924_v23 = vmul.f32 0.5, %v1923_v59  ;;  %v1917_v59 = vsel %vm1916_vm6, %v18327_v56, %v1915_v52 }
 0x58e   : > { %6630 = vmatmul.f32.gmra.mxu3 %v18219_v3  ;;  %v5891_v34 = vpop.f32.mrf.mxu3 }
 0x58f   : > { %v15244_v29 = vadd.f32 %v5891_v34, %v5638_v39  ;;  %v18333_v34 = vld [vmem:[#allocation76_spill] sm:$0xff] }
 0x590   : > { %6465 = vmatmul.f32.gmra.mxu2 %v18212_v60  ;;  %v8527_v60 = vpop.eup %8526  ;;  %8528 = vrsqrt.f32 %v18333_v34  ;;  %vm1976_vm11 = vcmp.eq.f32.partialorder %v18333_v34, inf  ;;  %vm1978_vm10 = vcmp.eq.f32.partialorder %v18333_v34, 0.0 }
 0x591   : > { %18330 = vst [vmem:[#allocation124_spill] sm:$0xff] %v15244_v29  ;;  %v1958_v29 = vmul.f32 %v8527_v60, %v18331_v62  ;;  %8530 = vrsqrt.f32 %v18334_v48 }
 0x594   : > { %v5654_v6 = vpop.f32.mrf.mxu2 }
 0x596   : > { %6634 = vmatmul.f32.gmra.mxu3 %v18225_v11  ;;  %v5895_v44 = vpop.f32.mrf.mxu3  ;;  %v15262_v20 = vpop.eup %8528 }
 0x597   : > { %v15250_v39 = vadd.f32 %v5895_v44, %v5646_v35  ;;  %v8776_v35 = vld [vmem:[%s8989_s22 + $0xd0] sm:$0xff]  ;;  %v15264_v8 = vpop.eup %8530  ;;  %v1970_v28 = vmul.f32 %v15262_v20, %v18333_v34 }
 0x598   : > { %6469 = vmatmul.f32.gmra.mxu2 %v18219_v3  ;;  %v18335_v3 = vld [vmem:[#allocation67_spill] sm:$0xff]  ;;  %v7171_v44 = vpack.c.bf16 %v8775_v53, %v8776_v35 }
 0x599   : > { %18332 = vst [vmem:[#allocation130_spill] sm:$0xff] %v15250_v39  ;;  %8532 = vrsqrt.f32 %v18335_v3  ;;  %v1959_v39 = vmul.f32 %v8527_v60, %v1958_v29  ;;  %v1994_v29 = vmul.f32 %v15264_v8, %v18334_v48  ;;  %v1971_v35 = vmul.f32 %v15262_v20, %v1970_v28 }
 0x59a   : > { %7265 = vmatpush.bf16.msrb.mxu1 %v7171_v44  ;;  %8534 = vrsqrt.f32 %v18337_v55  ;;  %vm1988_vm14 = vcmp.eq.f32.partialorder %v18335_v3, inf  ;;  %vm1990_vm1 = vcmp.eq.f32.partialorder %v18335_v3, 0.0 }
 0x59b   : > { %v1960_v53 = vmul.f32 0.5, %v1959_v39  ;;  %8536 = vrsqrt.f32 %v18338_v13  ;;  %v1995_v44 = vmul.f32 %v15264_v8, %v1994_v29 }
 0x59c   : > { %v5662_v25 = vpop.f32.mrf.mxu2 }
 0x59d   : > { %v1961_v38 = vsub.f32 1.5, %v1960_v53  ;;  %v18340_v53 = vld [vmem:[#allocation127_spill] sm:$0xff]  ;;  %v1996_v29 = vmul.f32 0.5, %v1995_v44 }
 0x59e   : > { %6638 = vmatmul.f32.gmra.mxu3 %v18231_v2  ;;  %v5899_v63 = vpop.f32.mrf.mxu3  ;;  %8538 = vrsqrt.f32 %v18340_v53  ;;  %vm2024_vm6 = vcmp.eq.f32.partialorder %v18340_v53, inf }
 0x59f   : > { %v15266_v50 = vadd.f32 %v5899_v63, %v5654_v6  ;;  %v15269_v46 = vpop.eup %8532  ;;  %v1919_v63 = vand.u32 2147483648, %v18327_v56  ;;  %v1962_v56 = vmul.f32 %v8527_v60, %v1961_v38  ;;  %v1997_v44 = vsub.f32 1.5, %v1996_v29 }
 0x5a0   : > { %6473 = vmatmul.f32.gmra.mxu2 %v18225_v11  ;;  %v1925_v11 = vsub.f32 1.5, %v1924_v23  ;;  %v1982_v39 = vmul.f32 %v15269_v46, %v18335_v3  ;;  %v1967_v29 = vand.u32 2147483648, %v18331_v62 }
 0x5a1   : > { %18336 = vst [vmem:[#allocation139_spill] sm:$0xff] %v15266_v50  ;;  %v15287_v50 = vpop.eup %8534  ;;  %v1998_v43 = vmul.f32 %v15264_v8, %v1997_v44  ;;  %v1979_v8 = vand.u32 2147483648, %v18333_v34 }
 0x5a2   : > { %v1926_v6 = vmul.f32 %v8525_v17, %v1925_v11  ;;  %v1983_v52 = vmul.f32 %v15269_v46, %v1982_v39  ;;  %v1972_v11 = vmul.f32 0.5, %v1971_v35  ;;  %v15296_v28 = vpop.eup %8536  ;;  %v18341_v35 = vld [vmem:[#allocation167_spill] sm:$0xff] }
 0x5a3   : > { %v2030_v38 = vmul.f32 %v15296_v28, %v18338_v13  ;;  %8540 = vrsqrt.f32 %v18341_v35 }
 0x5a4   : > { %v5670_v23 = vpop.f32.mrf.mxu2  ;;  %v1927_v17 = vmul.f32 %v1926_v6, %v18329_v58  ;;  %v1984_v60 = vmul.f32 0.5, %v1983_v52  ;;  %v1973_v39 = vsub.f32 1.5, %v1972_v11 }
 0x5a5   : > { %v2031_v5 = vmul.f32 %v15296_v28, %v2030_v38 }
 0x5a6   : > { %6642 = vmatmul.f32.gmra.mxu3 %v18237_v36  ;;  %v5903_v40 = vpop.f32.mrf.mxu3  ;;  %v1929_v6 = vsel %vm1928_vm5, %v18329_v58, %v1927_v17  ;;  %v15313_v17 = vpop.eup %8538  ;;  %v1985_v11 = vsub.f32 1.5, %v1984_v60  ;;  %v18344_v60 = vld [vmem:[#allocation68_spill] sm:$0xff] }
 0x5a7   : > { %v15289_v26 = vadd.f32 %v5903_v40, %v5662_v25  ;;  %v2006_v25 = vmul.f32 %v15287_v50, %v18337_v55  ;;  %v2032_v44 = vmul.f32 0.5, %v2031_v5 }
 0x5a8   : > { %6477 = vmatmul.f32.gmra.mxu2 %v18231_v2  ;;  %v1920_v2 = vsel %vm1918_vm8, %v1919_v63, %v1917_v59  ;;  %v1931_v63 = vand.u32 2147483648, %v18329_v58  ;;  %v1963_v59 = vmul.f32 %v1962_v56, %v18331_v62  ;;  %v18342_v58 = vld [vmem:[#allocation33_spill] sm:$0xff] }
 0x5a9   : > { %18339 = vst [vmem:[#allocation147_spill] sm:$0xff] %v15289_v26  ;;  %v15300_v40 = vadd.f32 2.220446e-16, %v1920_v2  ;;  %v2007_v2 = vmul.f32 %v15287_v50, %v2006_v25  ;;  %v1974_v25 = vmul.f32 %v15262_v20, %v1973_v39 }
 0x5aa   : > { %v1932_v56 = vsel %vm1930_vm9, %v1931_v63, %v1929_v6  ;;  %v1965_v22 = vsel %vm1964_vm3, %v18331_v62, %v1963_v59  ;;  %v15329_v6 = vpop.eup %8540  ;;  %v1986_v59 = vmul.f32 %v15269_v46, %v1985_v11  ;;  %v18345_v11 = vld [vmem:[#allocation182_spill] sm:$0xff]  ;;  %vm2014_vm3 = vcmp.eq.f32.partialorder %v18337_v55, 0.0 }
 0x5ab   : > { %8542 = vrcp.f32 %v15300_v40  ;;  %v2008_v0 = vmul.f32 0.5, %v2007_v2  ;;  %v15327_v63 = vadd.f32 2.220446e-16, %v1932_v56  ;;  %v1975_v38 = vmul.f32 %v1974_v25, %v18333_v34 }
 0x5ac   : > { %v5678_v26 = vpop.f32.mrf.mxu2  ;;  %8544 = vrsqrt.f32 %v18342_v58  ;;  %v1999_v2 = vmul.f32 %v1998_v43, %v18334_v48  ;;  %v2042_v46 = vmul.f32 %v15329_v6, %v18341_v35  ;;  %v1987_v43 = vmul.f32 %v1986_v59, %v18335_v3 }
 0x5ad   : > { %8546 = vrsqrt.f32 %v18344_v60  ;;  %v1991_v59 = vand.u32 2147483648, %v18335_v3  ;;  %vm2381_vm8 = vweird.f32 %v15300_v40 }
 0x5ae   : > { %6646 = vmatmul.f32.gmra.mxu3 %v18243_v30  ;;  %8548 = vrcp.f32 %v15327_v63  ;;  %v2043_v9 = vmul.f32 %v15329_v6, %v2042_v46  ;;  %v2039_v46 = vand.u32 2147483648, %v18338_v13 }
 0x5af   : > { %8550 = vrsqrt.f32 %v18345_v11 }
 0x5b0   : > { %6481 = vmatmul.f32.gmra.mxu2 %v18237_v36  ;;  %v5907_v36 = vpop.f32.mrf.mxu3 }
 0x5b1   : > { %v15316_v52 = vadd.f32 %v5907_v36, %v5670_v23  ;;  %v2018_v23 = vmul.f32 %v15313_v17, %v18340_v53  ;;  %v15334_v20 = vpop.eup %8542  ;;  %v2009_v36 = vsub.f32 1.5, %v2008_v0 }
 0x5b2   : > { %v15340_v39 = vpop.eup %8544  ;;  %v2377_v5 = vmul.f32 %v15334_v20, %v15300_v40  ;;  %vm2382_vm5 = vweird.f32 %v15334_v20 }
 0x5b3   : > { %18343 = vst [vmem:[#allocation155_spill] sm:$0xff] %v15316_v52  ;;  %v2019_v56 = vmul.f32 %v15313_v17, %v2018_v23  ;;  %v2054_v0 = vmul.f32 %v15340_v39, %v18342_v58  ;;  %v2001_v23 = vsel %vm2000_vm12, %v18334_v48, %v1999_v2  ;;  %v1989_v2 = vsel %vm1988_vm14, %v18335_v3, %v1987_v43  ;;  %vm15434_vm9 = vmor %vm2381_vm8, %vm2382_vm5 }
 0x5b4   : > { %v5686_v52 = vpop.f32.mrf.mxu2  ;;  %v2378_v31 = vsub.f32 1.0, %v2377_v5  ;;  %vm2038_vm12 = vcmp.eq.f32.partialorder %v18338_v13, 0.0  ;;  %vm2048_vm14 = vcmp.eq.f32.partialorder %v18341_v35, inf }
 0x5b6   : > { %6650 = vmatmul.f32.gmra.mxu3 %v18142_v33 }
 0x5b8   : > { %6485 = vmatmul.f32.gmra.mxu2 %v18243_v30  ;;  %v1968_v30 = vsel %vm1966_vm13, %v1967_v29, %v1965_v22  ;;  %v5911_v21 = vpop.f32.mrf.mxu3  ;;  %v2003_v22 = vand.u32 2147483648, %v18334_v48  ;;  %v15362_v29 = vpop.eup %8546  ;;  %v1992_v48 = vsel %vm1990_vm1, %v1991_v59, %v1989_v2  ;;  %vm2060_vm1 = vcmp.eq.f32.partialorder %v18342_v58, inf }
 0x5b9   : > { %v15352_v25 = vadd.f32 %v5911_v21, %v5678_v26  ;;  %v15360_v62 = vadd.f32 2.220446e-16, %v1968_v30  ;;  %v1977_v21 = vsel %vm1976_vm11, %v18333_v34, %v1975_v38  ;;  %v2033_v26 = vsub.f32 1.5, %v2032_v44  ;;  %v8777_v38 = vld [vmem:[%s8989_s22 + $0x48] sm:$0xff]  ;;  %v15381_v1 = vpop.eup %8548 }
 0x5ba   : > { %v2010_v30 = vmul.f32 %v15287_v50, %v2009_v36  ;;  %v7162_v10 = vpack.c.bf16 %v8777_v38, %v8778_v57  ;;  %v8780_v44 = vld [vmem:[%s8989_s22 + $0xc8] sm:$0xff]  ;;  %v2066_v50 = vmul.f32 %v15362_v29, %v18344_v60  ;;  %v2055_v36 = vmul.f32 %v15340_v39, %v2054_v0 }
 0x5bb   : > { %18346 = vst [vmem:[#allocation81_spill] sm:$0xff] %v15352_v25  ;;  %v2020_v25 = vmul.f32 0.5, %v2019_v56  ;;  %v7170_v7 = vpack.c.bf16 %v8780_v44, %v8779_v15  ;;  %8552 = vrcp.f32 %v15360_v62  ;;  %v2034_v57 = vmul.f32 %v15296_v28, %v2033_v26 }
 0x5bc   : > { %7177 = vmatpush.bf16.msrb.mxu0 %v7162_v10  ;;  %v2011_v56 = vmul.f32 %v2010_v30, %v18337_v55  ;;  %v5694_v43 = vpop.f32.mrf.mxu2  ;;  %v1980_v38 = vsel %vm1978_vm10, %v1979_v8, %v1977_v21  ;;  %v2044_v44 = vmul.f32 0.5, %v2043_v9  ;;  %v2379_v28 = vmul.f32 %v15334_v20, %v2378_v31 }
 0x5bd   : > { %7266 = vmatpush.bf16.msrb.mxu1 %v7170_v7  ;;  %v2021_v5 = vsub.f32 1.5, %v2020_v25  ;;  %v2392_v7 = vmul.f32 %v15381_v1, %v15327_v63  ;;  %v2067_v10 = vmul.f32 %v15362_v29, %v2066_v50  ;;  %v2056_v26 = vmul.f32 0.5, %v2055_v36 }
 0x5be   : > { %6654 = vmatmul.f32.gmra.mxu3 %v18146_v41  ;;  %v2004_v34 = vsel %vm2002_vm15, %v2003_v22, %v2001_v23  ;;  %v2035_v8 = vmul.f32 %v2034_v57, %v18338_v13  ;;  %v15415_v31 = vadd.f32 2.220446e-16, %v1980_v38  ;;  %v2385_v21 = vand.u32 2147483647, %v15300_v40 }
 0x5bf   : > { %v2387_v30 = vand.u32 2147483648, %v15300_v40  ;;  %v2027_v22 = vand.u32 2147483648, %v18340_v53  ;;  %v2380_v23 = vadd.f32 %v15334_v20, %v2379_v28  ;;  %v2393_v50 = vsub.f32 1.0, %v2392_v7 }
 0x5c0   : > { %6489 = vmatmul.f32.gmra.mxu2 %v18142_v33  ;;  %v15390_v33 = vpop.eup %8550  ;;  %v5915_v0 = vpop.f32.mrf.mxu3  ;;  %v15427_v36 = vadd.f32 2.220446e-16, %v2004_v34  ;;  %v2045_v57 = vsub.f32 1.5, %v2044_v44  ;;  %v2057_v38 = vsub.f32 1.5, %v2056_v26  ;;  %8554 = vrcp.f32 %v15415_v31 }
 0x5c1   : > { %v15401_v15 = vadd.f32 %v5915_v0, %v5686_v52  ;;  %v2078_v25 = vmul.f32 %v15390_v33, %v18345_v11  ;;  %v15417_v9 = vpop.eup %8552  ;;  %v2022_v52 = vmul.f32 %v15313_v17, %v2021_v5  ;;  %v2068_v0 = vmul.f32 0.5, %v2067_v10 }
 0x5c2   : > { %v2437_v59 = vmul.f32 %v15417_v9, %v15360_v62  ;;  %v15445_v2 = vadd.f32 2.220446e-16, %v1992_v48  ;;  %v15450_v40 = vsel %vm2036_vm4, %v18338_v13, %v2035_v8  ;;  %vm15453_vm13 = vcmp.eq.f32.partialorder %v2385_v21, 8.507059e+37 }
 0x5c3   : > { %v2079_v17 = vmul.f32 %v15390_v33, %v2078_v25  ;;  %v2023_v5 = vmul.f32 %v2022_v52, %v18340_v53  ;;  %v2388_v7 = vor.u32 1.1754944e-38, %v2387_v30  ;;  %v2384_v26 = vsel %vm15434_vm9, %v15334_v20, %v2380_v23 }
 0x5c4   : > { %v6422_v28 = vpop.f32.mrf.mxu2  ;;  %v2394_v25 = vmul.f32 %v15381_v1, %v2393_v50  ;;  %8556 = vrcp.f32 %v15427_v36  ;;  %v2046_v34 = vmul.f32 %v15329_v6, %v2045_v57  ;;  %v2069_v8 = vsub.f32 1.5, %v2068_v0 }
 0x5c5   : > { %v2058_v52 = vmul.f32 %v15340_v39, %v2057_v38  ;;  %v2080_v21 = vmul.f32 0.5, %v2079_v17  ;;  %vm2396_vm11 = vweird.f32 %v15327_v63  ;;  %vm2397_vm10 = vweird.f32 %v15381_v1 }
 0x5c6   : > { %6658 = vmatmul.f32.gmra.mxu3 %v18150_v49  ;;  %8558 = vrcp.f32 %v15445_v2  ;;  %v15473_v20 = vsel %vm2024_vm6, %v18340_v53, %v2023_v5  ;;  %v2389_v6 = vsel %vm15453_vm13, %v2388_v7, %v2384_v26  ;;  %v2400_v39 = vand.u32 2147483647, %v15327_v63  ;;  %v15479_v48 = vpop.eup %8554 }
 0x5c7   : > { %v2402_v30 = vand.u32 2147483648, %v15327_v63  ;;  %vm2026_vm15 = vcmp.eq.f32.partialorder %v18340_v53, 0.0  ;;  %v2051_v23 = vand.u32 2147483648, %v18341_v35  ;;  %v2395_v57 = vadd.f32 %v15381_v1, %v2394_v25  ;;  %v18364_v53 = vld [vmem:[#allocation169_spill] sm:$0xff] }
 0x5c8   : > { %6493 = vmatmul.f32.gmra.mxu2 %v18146_v41  ;;  %v2013_v41 = vsel %vm2012_vm2, %v18337_v55, %v2011_v56  ;;  %v5919_v44 = vpop.f32.mrf.mxu3  ;;  %v2047_v0 = vmul.f32 %v2046_v34, %v18341_v35  ;;  %v2070_v38 = vmul.f32 %v15362_v29, %v2069_v8  ;;  %v2059_v17 = vmul.f32 %v2058_v52, %v18342_v58  ;;  %vm15496_vm2 = vmor %vm2396_vm11, %vm2397_vm10 }
 0x5c9   : > { %v15457_v10 = vadd.f32 %v5919_v44, %v5694_v43  ;;  %v2438_v43 = vsub.f32 1.0, %v2437_v59  ;;  %v6423_v5 = vadd.f32 %v6422_v28, %v15118_v16  ;;  %v18353_v44 = vld [vmem:[#allocation87_spill] sm:$0xff]  ;;  %vm15505_vm4 = vcmp.eq.f32.partialorder %v2400_v39, 8.507059e+37 }
 0x5ca   : > { %v15500_v59 = vpop.eup %8556  ;;  %v2390_v56 = vmul.f32 %v2389_v6, %v18353_v44  ;;  %v2403_v63 = vor.u32 1.1754944e-38, %v2402_v30  ;;  %vm2441_vm6 = vweird.f32 %v15360_v62  ;;  %v2452_v34 = vmul.f32 %v15479_v48, %v15415_v31 }
 0x5cb   : > { %v2439_v29 = vmul.f32 %v15417_v9, %v2438_v43  ;;  %v2399_v16 = vsel %vm15496_vm2, %v15381_v1, %v2395_v57  ;;  %vm2442_vm8 = vweird.f32 %v15417_v9  ;;  %v2445_v28 = vand.u32 2147483647, %v15360_v62  ;;  %v18357_v57 = vld [vmem:[#allocation166_spill] sm:$0xff] }
 0x5cc   : > { %v6426_v7 = vpop.f32.mrf.mxu2  ;;  %v15512_v8 = vpop.eup %8558  ;;  %v2447_v43 = vand.u32 2147483648, %v15360_v62  ;;  %v2482_v6 = vmul.f32 %v15500_v59, %v15427_v36  ;;  %v18356_v39 = vand.u32 2147483648, %v18337_v55  ;;  %v15532_v1 = vsel %vm2048_vm14, %v18341_v35, %v2047_v0  ;;  %vm15546_vm5 = vmor %vm2441_vm6, %vm2442_vm8 }
 0x5cd   : > { %v15540_v50 = vmul.f32 %v2070_v38, %v18344_v60  ;;  %v2404_v55 = vsel %vm15505_vm4, %v2403_v63, %v2399_v16  ;;  %v2453_v0 = vsub.f32 1.0, %v2452_v34  ;;  %vm15561_vm9 = vcmp.eq.f32.partialorder %v2445_v28, 8.507059e+37  ;;  %v18363_v16 = vld [vmem:[#allocation86_spill] sm:$0xff] }
 0x5ce   : > { %6662 = vmatmul.f32.gmra.mxu3 %v18153_v12  ;;  %v2016_v30 = vsel %vm2014_vm3, %v18356_v39, %v2013_v41  ;;  %vm2062_vm3 = vcmp.eq.f32.partialorder %v18342_v58, 0.0  ;;  %v2448_v63 = vor.u32 1.1754944e-38, %v2447_v43  ;;  %v2460_v34 = vand.u32 2147483647, %v15415_v31  ;;  %v8784_v41 = vld [vmem:[%s8989_s22 + $0xb0] sm:$0xff] }
 0x5cf   : > { %v15565_v25 = vadd.f32 2.220446e-16, %v2016_v30  ;;  %vm2050_vm13 = vcmp.eq.f32.partialorder %v18341_v35, 0.0  ;;  %v2405_v28 = vmul.f32 %v2404_v55, %v18363_v16  ;;  %v8783_v55 = vld [vmem:[%s8989_s22 + $0xb8] sm:$0xff]  ;;  %vm2456_vm11 = vweird.f32 %v15415_v31 }
 0x5d0   : > { %6497 = vmatmul.f32.gmra.mxu2 %v18150_v49  ;;  %v2081_v49 = vsub.f32 1.5, %v2080_v21  ;;  %v6583_v26 = vpop.f32.mrf.mxu3  ;;  %v2063_v21 = vand.u32 2147483648, %v18342_v58  ;;  %vm2486_vm10 = vweird.f32 %v15427_v36  ;;  %vm2487_vm14 = vweird.f32 %v15500_v59 }
 0x5d1   : > { %v15514_v52 = vadd.f32 %v6583_v26, %v6423_v5  ;;  %v18358_v5 = vld [vmem:[#allocation7_spill] sm:$0xff]  ;;  %v2440_v26 = vadd.f32 %v15417_v9, %v2439_v29  ;;  %v15555_v29 = vsel %vm2060_vm1, %v18342_v58, %v2059_v17  ;;  %v2462_v17 = vand.u32 2147483648, %v15415_v31  ;;  %vm15640_vm8 = vmor %vm2486_vm10, %vm2487_vm14 }
 0x5d2   : > { %v2618_v44 = vsub.f32 %v18358_v5, %v2390_v56  ;;  %v2467_v56 = vmul.f32 %v15512_v8, %v15445_v2  ;;  %v15558_v38 = vmul.f32 %v15390_v33, %v2081_v49  ;;  %v2483_v33 = vsub.f32 1.0, %v2482_v6 }
 0x5d3   : > { %v6710_v3 = vmax.f32 %v18357_v57, %v15514_v52  ;;  %v2444_v43 = vsel %vm15546_vm5, %v15417_v9, %v2440_v26  ;;  %v2040_v6 = vsel %vm2038_vm12, %v2039_v46, %v15450_v40  ;;  %v8781_v9 = vld [vmem:[%s8989_s22 + $0x38] sm:$0xff]  ;;  %8560 = vrcp.f32 %v15565_v25 }
 0x5d4   : > { %v2650_v49 = vand.u32 2147483647, %v2618_v44  ;;  %v6430_v39 = vpop.f32.mrf.mxu2  ;;  %v2468_v5 = vsub.f32 1.0, %v2467_v56  ;;  %v8782_v44 = vld [vmem:[%s8989_s22 + $0x30] sm:$0xff]  ;;  %v2484_v13 = vmul.f32 %v15500_v59, %v2483_v33  ;;  %v2492_v46 = vand.u32 2147483648, %v15427_v36  ;;  %v18365_v56 = vld [vmem:[#allocation96_spill] sm:$0xff] }
 0x5d5   : > { %6711 = vmax.xlane.f32.xlu1 %v6710_v3  ;;  %v2454_v3 = vmul.f32 %v15479_v48, %v2453_v0  ;;  %v7161_v26 = vpack.c.bf16 %v8781_v9, %v8782_v44  ;;  %v7169_v0 = vpack.c.bf16 %v8783_v55, %v8784_v41  ;;  %vm2072_vm12 = vcmp.eq.f32.partialorder %v18344_v60, inf }
 0x5d6   : > { %6666 = vmatmul.f32.gmra.mxu3 %v18157_v19  ;;  %v2716_v40 = vsel %vm517_vm0, %v2650_v49, 0.0  ;;  %v2449_v33 = vsel %vm15561_vm9, %v2448_v63, %v2444_v43  ;;  %vm15613_vm1 = vcmp.eq.f32.partialorder %v2460_v34, 8.507059e+37  ;;  %vm2074_vm2 = vcmp.eq.f32.partialorder %v18344_v60, 0.0 }
 0x5d7   : > { %7178 = vmatpush.bf16.msrb.mxu0 %v7161_v26  ;;  %7267 = vmatpush.bf16.msrb.mxu1 %v7169_v0  ;;  %v2455_v49 = vadd.f32 %v15479_v48, %v2454_v3  ;;  %v2485_v63 = vadd.f32 %v15500_v59, %v2484_v13  ;;  %v2490_v34 = vand.u32 2147483647, %v15427_v36  ;;  %vm2471_vm6 = vweird.f32 %v15445_v2  ;;  %v18370_v3 = vld [vmem:[#allocation98_spill] sm:$0xff] }
 0x5d8   : > { %6501 = vmatmul.f32.gmra.mxu2 %v18153_v12  ;;  %v6427_v12 = vadd.f32 %v6426_v7, %v15124_v14  ;;  %v6587_v30 = vpop.f32.mrf.mxu3  ;;  %v2028_v14 = vsel %vm2026_vm15, %v2027_v22, %v15473_v20  ;;  %vm2457_vm15 = vweird.f32 %v15479_v48  ;;  %v15603_v20 = vadd.f32 2.220446e-16, %v2040_v6 }
 0x5d9   : > { %v15610_v16 = vadd.f32 2.220446e-16, %v2028_v14  ;;  %v2463_v6 = vor.u32 1.1754944e-38, %v2462_v17  ;;  %vm15624_vm4 = vmor %vm2456_vm11, %vm2457_vm15  ;;  %v2475_v17 = vand.u32 2147483647, %v15445_v2  ;;  %v15632_v43 = vpop.eup %8560  ;;  %vm2472_vm5 = vweird.f32 %v15512_v8 }
 0x5da   : > { %v15587_v7 = vadd.f32 %v6587_v30, %v6427_v12  ;;  %v2619_v12 = vsub.f32 %v18365_v56, %v2405_v28  ;;  %v2469_v28 = vmul.f32 %v15512_v8, %v2468_v5  ;;  %v2450_v5 = vmul.f32 %v2449_v33, %v18370_v3  ;;  %vm15668_vm11 = vmor %vm2471_vm6, %vm2472_vm5 }
 0x5db   : > { %8562 = vrcp.f32 %v15603_v20  ;;  %v2493_v26 = vor.u32 1.1754944e-38, %v2492_v46  ;;  %v2459_v36 = vsel %vm15624_vm4, %v15479_v48, %v2455_v49  ;;  %v2064_v41 = vsel %vm2062_vm3, %v2063_v21, %v15555_v29  ;;  %v18378_v29 = vld [vmem:[#allocation12_spill] sm:$0xff] }
 0x5dc   : > { %v6713_v22 = vmax.f32 %v18364_v53, %v15587_v7  ;;  %v6434_v14 = vpop.f32.mrf.mxu2  ;;  %v2651_v44 = vand.u32 2147483647, %v2619_v12  ;;  %8564 = vrcp.f32 %v15610_v16  ;;  %v2470_v55 = vadd.f32 %v15512_v8, %v2469_v28 }
 0x5dd   : > { %2717 = vadd.xlane.f32.xlu1 %v2716_v40  ;;  %v2489_v0 = vsel %vm15640_vm8, %v15500_v59, %v2485_v63  ;;  %vm15662_vm9 = vcmp.eq.f32.partialorder %v2490_v34, 8.507059e+37  ;;  %v2497_v46 = vmul.f32 %v15632_v43, %v15565_v25  ;;  %v2052_v58 = vsel %vm2050_vm13, %v2051_v23, %v15532_v1  ;;  %v18379_v34 = vld [vmem:[#allocation100_spill] sm:$0xff] }
 0x5de   : > { %6670 = vmatmul.f32.gmra.mxu3 %v18161_v42  ;;  %6714 = vmax.xlane.f32.xlu2 %v6713_v22  ;;  %v2083_v59 = vmul.f32 %v15558_v38, %v18345_v11  ;;  %vm2084_vm3 = vcmp.eq.f32.partialorder %v18345_v11, inf  ;;  %v2622_v22 = vsub.f32 %v18378_v29, %v2450_v5  ;;  %v2719_v40 = vsel %vm517_vm0, %v2651_v44, 0.0  ;;  %v18380_v5 = vld [vmem:[#allocation102_spill] sm:$0xff]  ;;  %v15744_v29 = vpop.f32.mrf.mxu1 }
 0x5df   : > { %v2464_v56 = vsel %vm15613_vm1, %v2463_v6, %v2459_v36  ;;  %v15689_v35 = vadd.f32 2.220446e-16, %v2064_v41  ;;  %v2494_v1 = vsel %vm15662_vm9, %v2493_v26, %v2489_v0  ;;  %v2474_v38 = vsel %vm15668_vm11, %v15512_v8, %v2470_v55  ;;  %v15732_v41 = vpop.f32.mrf.mxu0  ;;  %v18382_v0 = vld [vmem:[#allocation39_spill] sm:$0xff] }
 0x5e0   : > { %6505 = vmatmul.f32.gmra.mxu2 %v18157_v19  ;;  %v6431_v19 = vadd.f32 %v6430_v39, %v15130_v47  ;;  %v6591_v9 = vpop.f32.mrf.mxu3  ;;  %v2477_v47 = vand.u32 2147483648, %v15445_v2  ;;  %v18377_v2 = vld [vmem:[#allocation70_spill] sm:$0xff]  ;;  %vm2476_vm13 = vcmp.eq.f32.partialorder %v2475_v17, 8.507059e+37  ;;  %v15698_v33 = vadd.f32 2.220446e-16, %v2052_v58 }
 0x5e1   : > { %v15691_v23 = vpop.eup %8562  ;;  %v2073_v30 = vsel %vm2072_vm12, %v18344_v60, %v15540_v50  ;;  %vm2086_vm10 = vcmp.eq.f32.partialorder %v18345_v11, 0.0  ;;  %v2087_v6 = vand.u32 2147483648, %v18345_v11  ;;  %v2498_v28 = vsub.f32 1.0, %v2497_v46  ;;  %v18383_v46 = vld [vmem:[#allocation11_spill] sm:$0xff] }
 0x5e2   : > { %v15648_v39 = vadd.f32 %v6591_v9, %v6431_v19  ;;  %v2478_v12 = vor.u32 1.1754944e-38, %v2477_v47  ;;  %v15700_v49 = vpop.eup %8564  ;;  %v2085_v8 = vsel %vm2084_vm3, %v18345_v11, %v2083_v59  ;;  %v6435_v62 = vadd.f32 %v6434_v14, %v15136_v18 }
 0x5e3   : > { %v2654_v63 = vand.u32 2147483647, %v2622_v22  ;;  %v2465_v17 = vmul.f32 %v2464_v56, %v18379_v34  ;;  %v2495_v50 = vmul.f32 %v2494_v1, %v18380_v5  ;;  %v2527_v9 = vmul.f32 %v15691_v23, %v15603_v20  ;;  %v18385_v22 = vld [vmem:[#allocation15_spill] sm:$0xff]  ;;  %v18390_v5 = vld [vmem:[#allocation13_spill] sm:$0xff] }
 0x5e4   : > { %v6716_v21 = vmax.f32 %v18377_v2, %v15648_v39  ;;  %v6438_v19 = vpop.f32.mrf.mxu2  ;;  %v2479_v31 = vsel %vm2476_vm13, %v2478_v12, %v2474_v38  ;;  %8566 = vrcp.f32 %v15689_v35  ;;  %v2512_v44 = vmul.f32 %v15700_v49, %v15610_v16 }
 0x5e5   : > { %8568 = vrcp.f32 %v15698_v33  ;;  %v18381_v18 = vand.u32 2147483648, %v18344_v60  ;;  %v2499_v26 = vmul.f32 %v15632_v43, %v2498_v28  ;;  %v2505_v47 = vand.u32 2147483647, %v15565_v25  ;;  %v18384_v60 = vld [vmem:[#allocation103_spill] sm:$0xff] }
 0x5e6   : > { %6674 = vmatmul.f32.gmra.mxu3 %v18165_v51  ;;  %2720 = vadd.xlane.f32.xlu2 %v2719_v40  ;;  %v2507_v36 = vand.u32 2147483648, %v15565_v25  ;;  %v2088_v55 = vsel %vm2086_vm10, %v2087_v6, %v2085_v8  ;;  %v2728_v48 = vsel %vm517_vm0, %v2654_v63, 0.0  ;;  %v2623_v58 = vsub.f32 %v18383_v46, %v2465_v17 }
 0x5e7   : > { %6717 = vmax.xlane.f32.xlu1 %v6716_v21  ;;  %v2076_v14 = vsel %vm2074_vm2, %v18381_v18, %v2073_v30  ;;  %vm2501_vm12 = vweird.f32 %v15565_v25  ;;  %v2480_v59 = vmul.f32 %v2479_v31, %v18384_v60  ;;  %vm2502_vm15 = vweird.f32 %v15632_v43 }
 0x5e8   : > { %6509 = vmatmul.f32.gmra.mxu2 %v18161_v42  ;;  %v6595_v3 = vpop.f32.mrf.mxu3  ;;  %v2528_v21 = vsub.f32 1.0, %v2527_v9  ;;  %v15742_v11 = vadd.f32 2.220446e-16, %v2076_v14  ;;  %v2625_v40 = vsub.f32 %v18385_v22, %v2495_v50  ;;  %v2513_v56 = vsub.f32 1.0, %v2512_v44  ;;  %vm15764_vm1 = vmor %vm2501_vm12, %vm2502_vm15  ;;  %v18391_v14 = vld [vmem:[#allocation38_spill] sm:$0xff] }
 0x5e9   : > { %v15718_v42 = vadd.f32 %v6595_v3, %v6435_v62  ;;  %v15747_v12 = vadd.f32 2.220446e-16, %v2088_v55  ;;  %v2500_v38 = vadd.f32 %v15632_v43, %v2499_v26  ;;  %vm15753_vm14 = vcmp.eq.f32.partialorder %v2505_v47, 8.507059e+37 }
 0x5ea   : > { %v15749_v1 = vpop.eup %8566  ;;  %v2508_v6 = vor.u32 1.1754944e-38, %v2507_v36  ;;  %v6439_v8 = vadd.f32 %v6438_v19, %v15146_v45  ;;  %vm2531_vm2 = vweird.f32 %v15603_v20  ;;  %v2537_v63 = vand.u32 2147483648, %v15603_v20 }
 0x5eb   : > { %v6719_v13 = vmax.f32 %v18382_v0, %v15718_v42  ;;  %v15757_v28 = vpop.eup %8568  ;;  %v2655_v3 = vand.u32 2147483647, %v2623_v58  ;;  %v2624_v50 = vsub.f32 %v18390_v5, %v2480_v59  ;;  %v2529_v45 = vmul.f32 %v15691_v23, %v2528_v21 }
 0x5ec   : > { %v6442_v34 = vpop.f32.mrf.mxu2  ;;  %8570 = vrcp.f32 %v15742_v11  ;;  %v2657_v19 = vand.u32 2147483647, %v2625_v40  ;;  %v2514_v31 = vmul.f32 %v15700_v49, %v2513_v56  ;;  %v2504_v9 = vsel %vm15764_vm1, %v15632_v43, %v2500_v38  ;;  %v15825_v38 = vpop.f32.mrf.mxu1 }
 0x5ed   : > { %8572 = vrcp.f32 %v15747_v12  ;;  %vm2532_vm4 = vweird.f32 %v15691_v23  ;;  %v2557_v44 = vmul.f32 %v15749_v1, %v15689_v35  ;;  %v2542_v18 = vmul.f32 %v15757_v28, %v15698_v33 }
 0x5ee   : > { %6678 = vmatmul.f32.gmra.mxu3 %v18169_v37  ;;  %6720 = vmax.xlane.f32.xlu2 %v6719_v13  ;;  %vm2516_vm6 = vweird.f32 %v15610_v16  ;;  %vm2517_vm8 = vweird.f32 %v15700_v49  ;;  %v2520_v47 = vand.u32 2147483647, %v15610_v16  ;;  %v2731_v36 = vsel %vm517_vm0, %v2655_v3, 0.0  ;;  %vm15803_vm5 = vmor %vm2531_vm2, %vm2532_vm4 }
 0x5ef   : > { %2729 = vadd.xlane.f32.xlu1 %v2728_v48  ;;  %v2656_v43 = vand.u32 2147483647, %v2624_v50  ;;  %v2530_v55 = vadd.f32 %v15691_v23, %v2529_v45  ;;  %v2522_v13 = vand.u32 2147483648, %v15610_v16  ;;  %v15795_v48 = vpop.f32.mrf.mxu0  ;;  %v2509_v46 = vsel %vm15753_vm14, %v2508_v6, %v2504_v9  ;;  %vm15819_vm11 = vmor %vm2516_vm6, %vm2517_vm8  ;;  %v8786_v45 = vld [vmem:[%s8989_s22 + $0x20] sm:$0xff] }
 0x5f0   : > { %6513 = vmatmul.f32.gmra.mxu2 %v18165_v51  ;;  %v2535_v51 = vand.u32 2147483647, %v15603_v20  ;;  %v6599_v17 = vpop.f32.mrf.mxu3  ;;  %v2515_v60 = vadd.f32 %v15700_v49, %v2514_v31  ;;  %v2558_v22 = vsub.f32 1.0, %v2557_v44  ;;  %v2543_v40 = vsub.f32 1.0, %v2542_v18  ;;  %v8787_v31 = vld [vmem:[%s8989_s22 + $0xa8] sm:$0xff]  ;;  %v8788_v9 = vld [vmem:[%s8989_s22 + $0xa0] sm:$0xff] }
 0x5f1   : > { %v15774_v25 = vadd.f32 %v6599_v17, %v6439_v8  ;;  %v2737_v30 = vsel %vm517_vm0, %v2657_v19, 0.0  ;;  %v2538_v6 = vor.u32 1.1754944e-38, %v2537_v63  ;;  %vm15829_vm3 = vcmp.eq.f32.partialorder %v2520_v47, 8.507059e+37  ;;  %v18400_v17 = vld [vmem:[#allocation104_spill] sm:$0xff] }
 0x5f2   : > { %v15808_v59 = vpop.eup %8570  ;;  %vm15811_vm9 = vcmp.eq.f32.partialorder %v2535_v51, 8.507059e+37  ;;  %v2734_v51 = vsel %vm517_vm0, %v2656_v43, 0.0  ;;  %v2510_v3 = vmul.f32 %v2509_v46, %v18400_v17  ;;  %v2534_v5 = vsel %vm15803_vm5, %v15691_v23, %v2530_v55  ;;  %v18402_v55 = vld [vmem:[#allocation14_spill] sm:$0xff] }
 0x5f3   : > { %v6722_v26 = vmax.f32 %v18391_v14, %v15774_v25  ;;  %v15823_v56 = vpop.eup %8572  ;;  %v2523_v50 = vor.u32 1.1754944e-38, %v2522_v13  ;;  %v2519_v63 = vsel %vm15819_vm11, %v15700_v49, %v2515_v60  ;;  %v7168_v44 = vpack.c.bf16 %v8787_v31, %v8788_v9 }
 0x5f4   : > { %v6446_v8 = vpop.f32.mrf.mxu2  ;;  %v2559_v18 = vmul.f32 %v15749_v1, %v2558_v22  ;;  %v2572_v23 = vmul.f32 %v15808_v59, %v15742_v11  ;;  %v2587_v47 = vmul.f32 %v15823_v56, %v15747_v12  ;;  %vm2561_vm13 = vweird.f32 %v15689_v35 }
 0x5f5   : > { %6723 = vmax.xlane.f32.xlu0 %v6722_v26  ;;  %v2544_v26 = vmul.f32 %v15757_v28, %v2543_v40  ;;  %vm2562_vm10 = vweird.f32 %v15749_v1  ;;  %v2565_v49 = vand.u32 2147483647, %v15689_v35  ;;  %7268 = vmatpush.bf16.msrb.mxu1 %v7168_v44  ;;  %v2626_v13 = vsub.f32 %v18402_v55, %v2510_v3 }
 0x5f6   : > { %6682 = vmatmul.f32.gmra.mxu3 %v18173_v54  ;;  %2732 = vadd.xlane.f32.xlu2 %v2731_v36  ;;  %v18401_v36 = vld [vmem:[#allocation73_spill] sm:$0xff]  ;;  %v2539_v46 = vsel %vm15811_vm9, %v2538_v6, %v2534_v5  ;;  %vm2546_vm12 = vweird.f32 %v15698_v33  ;;  %vm2547_vm15 = vweird.f32 %v15757_v28  ;;  %v2524_v58 = vsel %vm15829_vm3, %v2523_v50, %v2519_v63  ;;  %vm15875_vm14 = vmor %vm2561_vm13, %vm2562_vm10  ;;  %v18408_v50 = vld [vmem:[#allocation115_spill] sm:$0xff] }
 0x5f7   : > { %v2567_v60 = vand.u32 2147483648, %v15689_v35  ;;  %v2550_v20 = vand.u32 2147483647, %v15698_v33  ;;  %v2552_v22 = vand.u32 2147483648, %v15698_v33  ;;  %v2560_v21 = vadd.f32 %v15749_v1, %v2559_v18  ;;  %v15880_v16 = vpop.f32.mrf.mxu0  ;;  %vm15888_vm1 = vmor %vm2546_vm12, %vm2547_vm15  ;;  %v18421_v35 = vld [vmem:[#allocation116_spill] sm:$0xff] }
 0x5f8   : > { %6517 = vmatmul.f32.gmra.mxu2 %v18169_v37  ;;  %v6443_v37 = vadd.f32 %v6442_v34, %v15154_v32  ;;  %v6603_v62 = vpop.f32.mrf.mxu3  ;;  %v8785_v34 = vld [vmem:[%s8989_s22 + $0x28] sm:$0xff]  ;;  %v2588_v6 = vsub.f32 1.0, %v2587_v47  ;;  %v2658_v5 = vand.u32 2147483647, %v2626_v13  ;;  %v2525_v63 = vmul.f32 %v2524_v58, %v18408_v50 }
 0x5f9   : > { %v7160_v19 = vpack.c.bf16 %v8785_v34, %v8786_v45  ;;  %vm15893_vm2 = vcmp.eq.f32.partialorder %v2565_v49, 8.507059e+37  ;;  %v2568_v45 = vor.u32 1.1754944e-38, %v2567_v60  ;;  %vm15901_vm4 = vcmp.eq.f32.partialorder %v2550_v20, 8.507059e+37  ;;  %v18414_v47 = vld [vmem:[#allocation18_spill] sm:$0xff] }
 0x5fa   : > { %v15838_v32 = vadd.f32 %v6603_v62, %v6443_v37  ;;  %v2545_v37 = vadd.f32 %v15757_v28, %v2544_v26  ;;  %v6447_v62 = vadd.f32 %v6446_v8, %v15165_v61  ;;  %v15897_v61 = vpop.f32.mrf.mxu1  ;;  %v2564_v31 = vsel %vm15875_vm14, %v15749_v1, %v2560_v21  ;;  %v18413_v26 = vld [vmem:[#allocation101_spill] sm:$0xff]  ;;  %v18415_v1 = vld [vmem:[#allocation44_spill] sm:$0xff]  ;;  %v18428_v20 = vld [vmem:[#allocation74_spill] sm:$0xff] }
 0x5fb   : > { %7179 = vmatpush.bf16.msrb.mxu0 %v7160_v19  ;;  %v2553_v19 = vor.u32 1.1754944e-38, %v2552_v22  ;;  %v2589_v18 = vmul.f32 %v15823_v56, %v2588_v6  ;;  %vm2576_vm6 = vweird.f32 %v15742_v11  ;;  %vm2577_vm8 = vweird.f32 %v15808_v59 }
 0x5fc   : > { %v6725_v43 = vmax.f32 %v18401_v36, %v15838_v32  ;;  %v6450_v17 = vpop.f32.mrf.mxu2  ;;  %v2549_v9 = vsel %vm15888_vm1, %v15757_v28, %v2545_v37  ;;  %v2740_v49 = vsel %vm517_vm0, %v2658_v5, 0.0  ;;  %v2627_v55 = vsub.f32 %v18415_v1, %v2525_v63  ;;  %vm15933_vm11 = vmor %vm2576_vm6, %vm2577_vm8  ;;  %v18422_v5 = vld [vmem:[#allocation75_spill] sm:$0xff] }
 0x5fd   : > { %2738 = vadd.xlane.f32.xlu0 %v2737_v30  ;;  %v2573_v30 = vsub.f32 1.0, %v2572_v23  ;;  %vm2591_vm5 = vweird.f32 %v15747_v12  ;;  %vm2592_vm9 = vweird.f32 %v15823_v56  ;;  %v2569_v28 = vsel %vm15893_vm2, %v2568_v45, %v2564_v31 }
 0x5fe   : > { %6686 = vmatmul.f32.gmra.mxu3 %v18175_v27  ;;  %6726 = vmax.xlane.f32.xlu1 %v6725_v43  ;;  %v2554_v13 = vsel %vm15901_vm4, %v2553_v19, %v2549_v9  ;;  %v2597_v58 = vand.u32 2147483648, %v15747_v12  ;;  %v2580_v22 = vand.u32 2147483647, %v15742_v11  ;;  %v2590_v21 = vadd.f32 %v15823_v56, %v2589_v18  ;;  %vm15945_vm3 = vmor %vm2591_vm5, %vm2592_vm9  ;;  %v18424_v9 = vld [vmem:[#allocation50_spill] sm:$0xff]  ;;  %v18425_v18 = vld [vmem:[#allocation128_spill] sm:$0xff] }
 0x5ff   : > { %2735 = vadd.xlane.f32.xlu2 %v2734_v51  ;;  %v18405_v51 = vld [vmem:[#allocation114_spill] sm:$0xff]  ;;  %v2574_v44 = vmul.f32 %v15808_v59, %v2573_v30  ;;  %v2595_v40 = vand.u32 2147483647, %v15747_v12  ;;  %v6451_v37 = vadd.f32 %v6450_v17, %v15173_v24  ;;  %v6014_v50 = vadd.f32 %v15732_v41, %v18422_v5  ;;  %v15953_v24 = vpop.f32.mrf.mxu0  ;;  %v18423_v41 = vld [vmem:[#allocation176_spill] sm:$0xff] }
 0x600   : > { %6521 = vmatmul.f32.gmra.mxu2 %v18173_v54  ;;  %v2540_v54 = vmul.f32 %v2539_v46, %v18405_v51  ;;  %v6607_v3 = vpop.f32.mrf.mxu3  ;;  %v2582_v46 = vand.u32 2147483648, %v15742_v11  ;;  %v2659_v51 = vand.u32 2147483647, %v2627_v55  ;;  %v2598_v63 = vor.u32 1.1754944e-38, %v2597_v58  ;;  %v18427_v58 = vld [vmem:[#allocation92_spill] sm:$0xff] }
 0x601   : > { %v15899_v8 = vadd.f32 %v6607_v3, %v6447_v62  ;;  %v2575_v60 = vadd.f32 %v15808_v59, %v2574_v44  ;;  %v2555_v3 = vmul.f32 %v2554_v13, %v18421_v35  ;;  %vm2581_vm13 = vcmp.eq.f32.partialorder %v2580_v22, 8.507059e+37  ;;  %v18433_v35 = vld [vmem:[#allocation55_spill] sm:$0xff] }
 0x602   : > { %v2628_v43 = vsub.f32 %v18414_v47, %v2540_v54  ;;  %v18420_v54 = vld [vmem:[#allocation118_spill] sm:$0xff]  ;;  %v2583_v12 = vor.u32 1.1754944e-38, %v2582_v46  ;;  %v2594_v45 = vsel %vm15945_vm3, %v15823_v56, %v2590_v21  ;;  %vm2596_vm10 = vcmp.eq.f32.partialorder %v2595_v40, 8.507059e+37  ;;  %v15963_v33 = vpop.f32.mrf.mxu1  ;;  %v18426_v47 = vld [vmem:[#allocation48_spill] sm:$0xff]  ;;  %v18429_v21 = vld [vmem:[#allocation9_spill] sm:$0xff] }
 0x603   : > { %v6728_v23 = vmax.f32 %v18413_v26, %v15899_v8  ;;  %v2570_v11 = vmul.f32 %v2569_v28, %v18420_v54  ;;  %v2579_v34 = vsel %vm15933_vm11, %v15808_v59, %v2575_v60  ;;  %v2743_v31 = vsel %vm517_vm0, %v2659_v51, 0.0  ;;  %v18432_v54 = vld [vmem:[#allocation53_spill] sm:$0xff] }
 0x604   : > { %v6454_v30 = vpop.f32.mrf.mxu2  ;;  %v2660_v62 = vand.u32 2147483647, %v2628_v43  ;;  %v6216_v59 = vadd.f32 %v15744_v29, %v6014_v50  ;;  %v2584_v56 = vsel %vm2581_vm13, %v2583_v12, %v2579_v34  ;;  %v6019_v29 = vadd.f32 %v15795_v48, %v18429_v21  ;;  %v18438_v21 = vld [vmem:[#allocation5_spill] sm:$0xff] }
 0x605   : > { %v2630_v44 = vsub.f32 %v18424_v9, %v2570_v11  ;;  %v2585_v60 = vmul.f32 %v2584_v56, %v18427_v58  ;;  %v8789_v9 = vld [vmem:[%s8989_s22 + $0x18] sm:$0xff]  ;;  %vm7846_vm12 = vcmask 15368  }
 0x606   : > { %6690 = vmatmul.f32.gmra.mxu3 %v18178_v4  ;;  %2741 = vadd.xlane.f32.xlu1 %v2740_v49  ;;  %v2746_v43 = vsel %vm517_vm0, %v2660_v62, 0.0  ;;  %v2599_v49 = vsel %vm2596_vm10, %v2598_v63, %v2594_v45  ;;  %v6455_v1 = vadd.f32 %v6454_v30, %v6216_v59  ;;  %v18431_v62 = vld [vmem:[#allocation34_spill] sm:$0xff]  ;;  %v6222_v48 = vadd.f32 %v15825_v38, %v6019_v29  ;;  %v8791_v38 = vld [vmem:[%s8989_s22 + $0x90] sm:$0xff] }
 0x607   : > { %6729 = vmax.xlane.f32.xlu2 %v6728_v23  ;;  %v2629_v23 = vsub.f32 %v18425_v18, %v2555_v3  ;;  %v2662_v13 = vand.u32 2147483647, %v2630_v44  ;;  %v2600_v22 = vmul.f32 %v2599_v49, %v18428_v20  ;;  %v2631_v51 = vsub.f32 %v18431_v62, %v2585_v60  ;;  %v18434_v45 = vld [vmem:[#allocation122_spill] sm:$0xff]  ;;  %v8790_v44 = vld [vmem:[%s8989_s22 + $0x10] sm:$0xff]  ;;  %v18437_v60 = vld [vmem:[#allocation129_spill] sm:$0xff] }
 0x608   : > { %6525 = vmatmul.f32.gmra.mxu2 %v18175_v27  ;;  %v6611_v6 = vpop.f32.mrf.mxu3  ;;  %v18430_v27 = vld [vmem:[#allocation85_spill] sm:$0xff]  ;;  %v7159_v18 = vpack.c.bf16 %v8789_v9, %v8790_v44  ;;  %v18436_v49 = vld [vmem:[#allocation59_spill] sm:$0xff]  ;;  %v6029_v20 = vadd.f32 %v15953_v24, %v18437_v60  ;;  %v8795_v60 = vld [vmem:[%s8989_s22 + $0x88] sm:$0xff] }
 0x609   : > { %v15955_v17 = vadd.f32 %v6611_v6, %v6451_v37  ;;  %v2661_v46 = vand.u32 2147483647, %v2629_v23  ;;  %v6033_v37 = vpop.f32.mrf.mxu0  ;;  %v2632_v11 = vsub.f32 %v18432_v54, %v2600_v22  ;;  %v2663_v63 = vand.u32 2147483647, %v2631_v51  ;;  %v8792_v23 = vld [vmem:[%s8989_s22 + $0x98] sm:$0xff]  ;;  %v18443_v44 = vld [vmem:[#allocation79_spill] sm:$0xff] }
 0x60a   : > { %v6239_v3 = vpop.f32.mrf.mxu1  ;;  %v7167_v59 = vpack.c.bf16 %v8792_v23, %v8791_v38  ;;  %7180 = vmatpush.bf16.msrb.mxu0 %v7159_v18  ;;  %v18440_v54 = vld [vmem:[#allocation188_spill] sm:$0xff] }
 0x60b   : > { %v6731_v19 = vmax.f32 %v18423_v41, %v15955_v17  ;;  %v2749_v30 = vsel %vm517_vm0, %v2661_v46, 0.0  ;;  %v2664_v34 = vand.u32 2147483647, %v2632_v11  ;;  %v6034_v11 = vadd.f32 %v6033_v37, %v18440_v54 }
 0x60c   : > { %v6458_v55 = vpop.f32.mrf.mxu2  ;;  %7269 = vmatpush.bf16.msrb.mxu1 %v7167_v59 }
 0x60d   : > { %6732 = vmax.xlane.f32.xlu0 %v6731_v19  ;;  %v6459_v5 = vadd.f32 %v6458_v55, %v6222_v48  ;;  %v6024_v19 = vadd.f32 %v15880_v16, %v18434_v45  ;;  %v2758_v55 = vsel %vm517_vm0, %v2664_v34, 0.0  ;;  %v18441_v48 = vld [vmem:[#allocation6_spill] sm:$0xff]  ;;  %v18442_v34 = vld [vmem:[#allocation177_spill] sm:$0xff] }
 0x60e   : > { %6694 = vmatmul.f32.gmra.mxu3 %v18426_v47  ;;  %2744 = vadd.xlane.f32.xlu1 %v2743_v31 }
 0x60f   : > { %2747 = vadd.xlane.f32.xlu2 %v2746_v43  ;;  %v18435_v43 = vld [vmem:[#allocation45_spill] sm:$0xff]  ;;  %v6228_v16 = vadd.f32 %v15897_v61, %v6024_v19  ;;  %v18439_v61 = vld [vmem:[#allocation27_spill] sm:$0xff] }
 0x610   : > { %6529 = vmatmul.f32.gmra.mxu2 %v18178_v4  ;;  %v6615_v28 = vpop.f32.mrf.mxu3  ;;  %v2752_v4 = vsel %vm517_vm0, %v2662_v13, 0.0 }
 0x611   : > { %v15978_v40 = vadd.f32 %v6615_v28, %v6455_v1  ;;  %v6038_v1 = vpop.f32.mrf.mxu0 }
 0x612   : > { %v6245_v28 = vpop.f32.mrf.mxu1  ;;  %v6039_v45 = vadd.f32 %v6038_v1, %v18442_v34  ;;  %v18445_v1 = vld [vmem:[#allocation185_spill] sm:$0xff] }
 0x613   : > { %v6734_v6 = vmax.f32 %v18430_v27, %v15978_v40 }
 0x614   : > { %v6462_v50 = vpop.f32.mrf.mxu2 }
 0x615   : > { %2750 = vadd.xlane.f32.xlu0 %v2749_v30  ;;  %v6463_v13 = vadd.f32 %v6462_v50, %v6228_v16  ;;  %v6240_v50 = vadd.f32 %v6239_v3, %v6034_v11  ;;  %v6246_v3 = vadd.f32 %v6245_v28, %v6039_v45  ;;  %v18447_v11 = vld [vmem:[#allocation46_spill] sm:$0xff] }
 0x616   : > { %6698 = vmatmul.f32.gmra.mxu3 %v18433_v35  ;;  %2753 = vadd.xlane.f32.xlu1 %v2752_v4  ;;  %v18448_v45 = vld [vmem:[#allocation146_spill] sm:$0xff] }
 0x617   : > { %6735 = vmax.xlane.f32.xlu2 %v6734_v6  ;;  %v6234_v6 = vadd.f32 %v15963_v33, %v6029_v20  ;;  %v8796_v20 = vld [vmem:[%s8989_s22 + $0x80] sm:$0xff] }
 0x618   : > { %6533 = vmatmul.f32.gmra.mxu2 %v18426_v47  ;;  %v6619_v12 = vpop.f32.mrf.mxu3  ;;  %v2755_v47 = vsel %vm517_vm0, %v2663_v63, 0.0 }
 0x619   : > { %v15991_v31 = vadd.f32 %v6619_v12, %v6459_v5  ;;  %v6043_v4 = vpop.f32.mrf.mxu0 }
 0x61b   : > { %v6737_v56 = vmax.f32 %v18435_v43, %v15991_v31 }
 0x61c   : > { %v6466_v46 = vpop.f32.mrf.mxu2 }
 0x61d   : > { %6738 = vmax.xlane.f32.xlu0 %v6737_v56  ;;  %v6467_v30 = vadd.f32 %v6466_v46, %v6234_v6  ;;  %v18444_v56 = vld [vmem:[#allocation136_spill] sm:$0xff]  ;;  %v8794_v46 = vld [vmem:[%s8989_s22] sm:$0xff] }
 0x61e   : > { %6702 = vmatmul.f32.gmra.mxu3 %v18436_v49  ;;  %2756 = vadd.xlane.f32.xlu1 %v2755_v47  ;;  %v6044_v47 = vadd.f32 %v6043_v4, %v18444_v56 }
 0x61f   : > { %2759 = vadd.xlane.f32.xlu2 %v2758_v55 }
 0x620   : > { %6537 = vmatmul.f32.gmra.mxu2 %v18433_v35  ;;  %v6623_v58 = vpop.f32.mrf.mxu3  ;;  %v6251_v35 = vpop.f32.mrf.mxu1 }
 0x621   : > { %v16006_v22 = vadd.f32 %v6623_v58, %v6463_v13  ;;  %v6048_v19 = vpop.f32.mrf.mxu0  ;;  %v8793_v13 = vld [vmem:[%s8989_s22 + $0x8] sm:$0xff]  ;;  %v6252_v28 = vadd.f32 %v6251_v35, %v6044_v47  ;;  %s8811_s22 = sshra.s32 %s7906_s30, 4  ;;  %s8812_s22 = int_to_ptr.hbm [resolvable:$true] %s8811_s22 }
 0x622   : > { %v7158_v58 = vpack.c.bf16 %v8793_v13, %v8794_v46  ;;  %s8813_s10 = scalar_lea.hbm %s8812_s22, 256  ;;  %p8818_p1 = scmp.lt.s32.totalorder %s8812_s22, %s16886_s6 }
 0x623   : > { %v6740_v29 = vmax.f32 %v18438_v21, %v16006_v22  ;;  %p8814_p12 = scmp.ne.s32.totalorder %s8812_s22, %s8813_s10  ;;  %p8819_p2 = scmp.lt.s32.totalorder %s8817_s15, %s8813_s10 }
 0x624   : > { %v6470_v62 = vpop.f32.mrf.mxu2  ;;  %7181 = vmatpush.bf16.msrb.mxu0 %v7158_v58 }
 0x625   : > { %6741 = vmax.xlane.f32.xlu0 %v6740_v29  ;;  %v6471_v33 = vadd.f32 %v6470_v62, %v6240_v50  ;;  %v7166_v29 = vpack.c.bf16 %v8795_v60, %v8796_v20  ;;  %v18446_v62 = vld [vmem:[#allocation196_spill] sm:$0xff]  ;;  %v18450_v60 = vld [vmem:[#allocation154_spill] sm:$0xff]  ;;  %p8815_p13 = pnand %p8814_p12, %p8959_p4  ;;  %p8820_p3 = por %p8819_p2, %p8818_p1 }
 0x626   : > { %6706 = vmatmul.f32.gmra.mxu3 %v18439_v61 }
 0x627   : > { %7270 = vmatpush.bf16.msrb.mxu1 %v7166_v29  ;;  %p8816_p0 = pneg %p8815_p13 }
 0x628   : > { %6541 = vmatmul.f32.gmra.mxu2 %v18436_v49  ;;  %v6627_v51 = vpop.f32.mrf.mxu3  ;;  %v6257_v9 = vpop.f32.mrf.mxu1 }
 0x629   : > { %v16014_v24 = vadd.f32 %v6627_v51, %v6467_v30  ;;  %v6053_v16 = vpop.f32.mrf.mxu0  ;;  %v6049_v51 = vadd.f32 %v6048_v19, %v18446_v62  ;;  %p8821_p5 = pnand %p8820_p3, %p8816_p0 }
 0x62b   : > { %v6743_v5 = vmax.f32 %v18441_v48, %v16014_v24 }
 0x62c   : > { %v6474_v12 = vpop.f32.mrf.mxu2 }
 0x62d   : > { %6744 = vmax.xlane.f32.xlu1 %v6743_v5  ;;  %v6475_v38 = vadd.f32 %v6474_v12, %v6246_v3 }
 0x630   : > { %6545 = vmatmul.f32.gmra.mxu2 %v18439_v61  ;;  %v6631_v63 = vpop.f32.mrf.mxu3  ;;  %v6263_v61 = vpop.f32.mrf.mxu1 }
 0x631   : > { %v16020_v37 = vadd.f32 %v6631_v63, %v6471_v33  ;;  %v6058_v50 = vpop.f32.mrf.mxu0  ;;  %v6258_v33 = vadd.f32 %v6257_v9, %v6049_v51 }
 0x632   : > { %v6059_v20 = vadd.f32 %v6058_v50, %v18450_v60 }
 0x633   : > { %v6746_v18 = vmax.f32 %v18443_v44, %v16020_v37 }
 0x634   : > { %v6478_v23 = vpop.f32.mrf.mxu2 }
 0x635   : > { %6747 = vmax.xlane.f32.xlu2 %v6746_v18  ;;  %v6479_v6 = vadd.f32 %v6478_v23, %v6252_v28  ;;  %v6054_v18 = vadd.f32 %v6053_v16, %v18448_v45  ;;  %v8088_v16 = vld [vmem:[%s16885_s5 + $0x1] ss:$2 sm:$0x3] }
 0x636   : > { %v16060_v51 = vperm.slane %v8088_v16, 1 }
 0x637   : > { %v6264_v9 = vadd.f32 %v6263_v61, %v6054_v18 }
 0x638   : > { %v6635_v59 = vpop.f32.mrf.mxu3  ;;  %v6269_v12 = vpop.f32.mrf.mxu1 }
 0x639   : > { %v16025_v49 = vadd.f32 %v6635_v59, %v6475_v38  ;;  %v18449_v59 = vld [vmem:[#allocation193_spill] sm:$0xff]  ;;  %v6063_v13 = vpop.f32.mrf.mxu0 }
 0x63b   : > { %v6749_v55 = vmax.f32 %v18445_v1, %v16025_v49 }
 0x63c   : > { %v6482_v30 = vpop.f32.mrf.mxu2 }
 0x63d   : > { %6750 = vmax.xlane.f32.xlu0 %v6749_v55  ;;  %v6483_v63 = vadd.f32 %v6482_v30, %v6258_v33 }
 0x640   : > { %v6639_v4 = vpop.f32.mrf.mxu3  ;;  %v6275_v30 = vpop.f32.mrf.mxu1 }
 0x641   : > { %v16034_v54 = vadd.f32 %v6639_v4, %v6479_v6  ;;  %v16054_v6 = vperm.slane %v8088_v16, 0 }
 0x643   : > { %v6752_v5 = vmax.f32 %v18447_v11, %v16034_v54 }
 0x644   : > { %v6486_v34 = vpop.f32.mrf.mxu2 }
 0x645   : > { %6753 = vmax.xlane.f32.xlu1 %v6752_v5  ;;  %v6487_v46 = vadd.f32 %v6486_v34, %v6264_v9  ;;  %v18451_v5 = vld [vmem:[#allocation105_spill] sm:$0xff] }
 0x648   : > { %v6643_v35 = vpop.f32.mrf.mxu3  ;;  %v6712_v38 = vpop.xlane.xlu1 %6711 }
 0x649   : > { %v16039_v3 = vadd.f32 %v6643_v35, %v6483_v63  ;;  %v6806_v23 = vsub.f32 %v18357_v57, %v6712_v38  ;;  %v6807_v19 = vsub.f32 %v15514_v52, %v6712_v38  ;;  %v7416_v52 = vld [vmem:[%s16885_s5] ss:$2 sm:$0x3]  ;;  %v6270_v38 = vadd.f32 %v6269_v12, %v6059_v20 }
 0x64a   : > { %v16064_v63 = vperm.slane %v7416_v52, 0  ;;  %v16066_v50 = vperm.slane %v7416_v52, 1 }
 0x64b   : > { %v6755_v56 = vmax.f32 %v18449_v59, %v16039_v3  ;;  %v6870_v47 = vmul.f32 1.442695, %v6806_v23  ;;  %v6872_v55 = vmul.f32 1.442695, %v6807_v19 }
 0x64c   : > { %v6490_v58 = vpop.f32.mrf.mxu2 }
 0x64d   : > { %6756 = vmax.xlane.f32.xlu2 %v6755_v56  ;;  %8574 = vpow2.f32 %v6870_v47  ;;  %v6491_v19 = vadd.f32 %v6490_v58, %v6270_v38  ;;  %v18452_v58 = vld [vmem:[#allocation23_spill] sm:$0xff] }
 0x64e   : > { %8576 = vpow2.f32 %v6872_v55  ;;  %v6064_v20 = vadd.f32 %v6063_v13, %v18452_v58 }
 0x650   : > { %v6647_v57 = vpop.f32.mrf.mxu3  ;;  %v2718_v61 = vpop.xlane.xlu1 %2717 }
 0x651   : > { %v16052_v29 = vadd.f32 %v6647_v57, %v6487_v46  ;;  %v6715_v28 = vpop.xlane.xlu2 %6714  ;;  %2779 = vst.msk [vmem:[%s14676_s8 + $0x88] sm:$0xff] %vm2761_vm7, %v2718_v61  ;;  %v6068_v61 = vpop.f32.mrf.mxu0 }
 0x652   : > { %v6808_v4 = vsub.f32 %v18364_v53, %v6715_v28  ;;  %v6809_v62 = vsub.f32 %v15587_v7, %v6715_v28 }
 0x653   : > { %v6758_v33 = vmax.f32 %v18451_v5, %v16052_v29  ;;  %v8575_v34 = vpop.eup %8574 }
 0x654   : > { %v6874_v35 = vmul.f32 1.442695, %v6808_v4  ;;  %v6876_v45 = vmul.f32 1.442695, %v6809_v62  ;;  %v8577_v18 = vpop.eup %8576  ;;  %v7654_v23 = vmul.f32 %v8575_v34, %v16054_v6  ;;  %v7424_v56 = vmul.f32 %v8575_v34, %v16064_v63  ;;  %v6494_v55 = vpop.f32.mrf.mxu2 }
 0x655   : > { %6759 = vmax.xlane.f32.xlu0 %v6758_v33  ;;  %v6998_v53 = vadd.f32 %v8577_v18, %v8575_v34  ;;  %v7655_v7 = vmul.f32 %v8577_v18, %v16060_v51  ;;  %v7425_v47 = vmul.f32 %v8577_v18, %v16066_v50  ;;  %v6281_v62 = vpop.f32.mrf.mxu1  ;;  %v18453_v33 = vld [vmem:[#allocation78_spill] sm:$0xff] }
 0x656   : > { %8578 = vpow2.f32 %v6874_v35 }
 0x657   : > { %8580 = vpow2.f32 %v6876_v45  ;;  %6999 = vadd.xlane.f32.xlu1 %v6998_v53  ;;  %v7718_v16 = vadd.f32 %v7655_v7, %v7654_v23  ;;  %v7488_v28 = vadd.f32 %v7425_v47, %v7424_v56 }
 0x658   : > { %v6651_v9 = vpop.f32.mrf.mxu3 }
 0x659   : > { %v16072_v46 = vadd.f32 %v6651_v9, %v6491_v19  ;;  %v2721_v57 = vpop.xlane.xlu2 %2720  ;;  %7719 = vadd.xlane.f32.xlu2 %v7718_v16 }
 0x65a   : > { %v6718_v12 = vpop.xlane.xlu1 %6717  ;;  %2780 = vst.msk [vmem:[%s14676_s8 + $0x90] sm:$0xff] %vm2761_vm7, %v2721_v57 }
 0x65b   : > { %v6810_v52 = vsub.f32 %v18377_v2, %v6718_v12  ;;  %v6811_v60 = vsub.f32 %v15648_v39, %v6718_v12  ;;  %v6761_v35 = vmax.f32 %v18453_v33, %v16072_v46  ;;  %v6276_v39 = vadd.f32 %v6275_v30, %v6064_v20 }
 0x65c   : > { %v8579_v4 = vpop.eup %8578  ;;  %v6498_v19 = vpop.f32.mrf.mxu2 }
 0x65d   : > { %v6878_v45 = vmul.f32 1.442695, %v6810_v52  ;;  %v8581_v38 = vpop.eup %8580  ;;  %v6880_v23 = vmul.f32 1.442695, %v6811_v60  ;;  %7489 = vadd.xlane.f32.xlu0 %v7488_v28  ;;  %v7126_v53 = vpack.c.bf16 %v8579_v4, %v8575_v34  ;;  %v7656_v7 = vmul.f32 %v8579_v4, %v16054_v6 }
 0x65e   : > { %v7127_v2 = vpack.c.bf16 %v8581_v38, %v8577_v18  ;;  %v7657_v13 = vmul.f32 %v8581_v38, %v16060_v51  ;;  %v7001_v47 = vadd.f32 %v8581_v38, %v8579_v4  ;;  %v6495_v9 = vadd.f32 %v6494_v55, %v6276_v39  ;;  %v6073_v55 = vpop.f32.mrf.mxu0 }
 0x65f   : > { %7182 = vmatmul.bf16.vlgmr.msrb.gmra.mxu0 %v7126_v53  ;;  %8582 = vpow2.f32 %v6878_v45  ;;  %6762 = vmax.xlane.f32.xlu1 %v6761_v35  ;;  %v7426_v34 = vmul.f32 %v8579_v4, %v16064_v63  ;;  %v7427_v57 = vmul.f32 %v8581_v38, %v16066_v50  ;;  %v6287_v35 = vpop.f32.mrf.mxu1 }
 0x660   : > { %7271 = vmatmul.bf16.vlgmr.msrb.gmra.mxu1 %v7127_v2  ;;  %v6655_v56 = vpop.f32.mrf.mxu3  ;;  %8584 = vpow2.f32 %v6880_v23  ;;  %v7721_v52 = vadd.f32 %v7657_v13, %v7656_v7  ;;  %v18454_v23 = vld [vmem:[#allocation160_spill] sm:$0xff] }
 0x661   : > { %v6721_v12 = vpop.xlane.xlu2 %6720  ;;  %7002 = vadd.xlane.f32.xlu2 %v7001_v47  ;;  %v16089_v60 = vadd.f32 %v6655_v56, %v6495_v9  ;;  %v7491_v4 = vadd.f32 %v7427_v57, %v7426_v34  ;;  %v6069_v53 = vadd.f32 %v6068_v61, %v18454_v23 }
 0x662   : > { %v2730_v16 = vpop.xlane.xlu1 %2729  ;;  %v6812_v30 = vsub.f32 %v18382_v0, %v6721_v12  ;;  %v6813_v18 = vsub.f32 %v15718_v42, %v6721_v12  ;;  %v18455_v42 = vld [vmem:[#allocation88_spill] sm:$0xff] }
 0x663   : > { %2783 = vst.msk [vmem:[%s14676_s8 + $0xa8] sm:$0xff] %vm2761_vm7, %v2730_v16  ;;  %v6764_v0 = vmax.f32 %v18455_v42, %v16089_v60  ;;  %v6282_v47 = vadd.f32 %v6281_v62, %v6069_v53 }
 0x664   : > { %v6882_v58 = vmul.f32 1.442695, %v6812_v30  ;;  %v6884_v20 = vmul.f32 1.442695, %v6813_v18  ;;  %v6502_v7 = vpop.f32.mrf.mxu2 }
 0x665   : > { %7722 = vadd.xlane.f32.xlu0 %v7721_v52  ;;  %v8583_v28 = vpop.eup %8582  ;;  %v6499_v18 = vadd.f32 %v6498_v19, %v6282_v47 }
 0x666   : > { %8586 = vpow2.f32 %v6882_v58  ;;  %v8585_v45 = vpop.eup %8584  ;;  %v7658_v13 = vmul.f32 %v8583_v28, %v16054_v6  ;;  %v7428_v12 = vmul.f32 %v8583_v28, %v16064_v63 }
 0x667   : > { %8588 = vpow2.f32 %v6884_v20  ;;  %7492 = vadd.xlane.f32.xlu1 %v7491_v4  ;;  %v7659_v56 = vmul.f32 %v8585_v45, %v16060_v51  ;;  %v7004_v9 = vadd.f32 %v8585_v45, %v8583_v28  ;;  %v7429_v34 = vmul.f32 %v8585_v45, %v16066_v50  ;;  %v6078_v4 = vpop.f32.mrf.mxu0  ;;  %v6293_v62 = vpop.f32.mrf.mxu1 }
 0x668   : > { %v6659_v38 = vpop.f32.mrf.mxu3  ;;  %v6724_v2 = vpop.xlane.xlu0 %6723 }
 0x669   : > { %v2733_v39 = vpop.xlane.xlu2 %2732  ;;  %6765 = vmax.xlane.f32.xlu2 %v6764_v0  ;;  %v6814_v61 = vsub.f32 %v18391_v14, %v6724_v2  ;;  %v6815_v57 = vsub.f32 %v15774_v25, %v6724_v2  ;;  %v7724_v58 = vadd.f32 %v7659_v56, %v7658_v13  ;;  %v16102_v23 = vadd.f32 %v6659_v38, %v6499_v18  ;;  %v18456_v25 = vld [vmem:[#allocation168_spill] sm:$0xff] }
 0x66a   : > { %2784 = vst.msk [vmem:[%s14676_s8 + $0xb0] sm:$0xff] %vm2761_vm7, %v2733_v39  ;;  %v7494_v0 = vadd.f32 %v7429_v34, %v7428_v12  ;;  %v6074_v2 = vadd.f32 %v6073_v55, %v18456_v25  ;;  %v18457_v13 = vld [vmem:[#allocation80_spill] sm:$0xff]  ;;  %v18458_v25 = vld [vmem:[#allocation175_spill] sm:$0xff] }
 0x66b   : > { %v6886_v14 = vmul.f32 1.442695, %v6814_v61  ;;  %v6888_v39 = vmul.f32 1.442695, %v6815_v57  ;;  %v6767_v56 = vmax.f32 %v18457_v13, %v16102_v23 }
 0x66c   : > { %v8587_v16 = vpop.eup %8586  ;;  %v6506_v61 = vpop.f32.mrf.mxu2 }
 0x66d   : > { %v8589_v30 = vpop.eup %8588  ;;  %7005 = vadd.xlane.f32.xlu0 %v7004_v9  ;;  %v7128_v52 = vpack.c.bf16 %v8587_v16, %v8583_v28  ;;  %v7660_v9 = vmul.f32 %v8587_v16, %v16054_v6  ;;  %8590 = vpow2.f32 %v6886_v14  ;;  %v7430_v18 = vmul.f32 %v8587_v16, %v16064_v63 }
 0x66e   : > { %v7129_v20 = vpack.c.bf16 %v8589_v30, %v8585_v45  ;;  %v7661_v55 = vmul.f32 %v8589_v30, %v16060_v51  ;;  %8592 = vpow2.f32 %v6888_v39  ;;  %v7431_v57 = vmul.f32 %v8589_v30, %v16066_v50 }
 0x66f   : > { %7187 = vmatmul.bf16.gmra.mxu0 %v7128_v52  ;;  %7725 = vadd.xlane.f32.xlu1 %v7724_v58  ;;  %v6083_v14 = vpop.f32.mrf.mxu0 }
 0x670   : > { %7276 = vmatmul.bf16.gmra.mxu1 %v7129_v20  ;;  %v6663_v53 = vpop.f32.mrf.mxu3  ;;  %v2739_v47 = vpop.xlane.xlu0 %2738  ;;  %v7727_v20 = vadd.f32 %v7661_v55, %v7660_v9 }
 0x671   : > { %v6727_v19 = vpop.xlane.xlu1 %6726  ;;  %2786 = vst.msk [vmem:[%s14676_s8 + $0xc0] sm:$0xff] %vm2761_vm7, %v2739_v47  ;;  %7495 = vadd.xlane.f32.xlu2 %v7494_v0 }
 0x672   : > { %v6816_v28 = vsub.f32 %v18401_v36, %v6727_v19  ;;  %v6817_v45 = vsub.f32 %v15838_v32, %v6727_v19  ;;  %v2736_v38 = vpop.xlane.xlu2 %2735  ;;  %v6288_v32 = vadd.f32 %v6287_v35, %v6074_v2  ;;  %v7007_v36 = vadd.f32 %v8589_v30, %v8587_v16 }
 0x673   : > { %2785 = vst.msk [vmem:[%s14676_s8 + $0xb8] sm:$0xff] %vm2761_vm7, %v2736_v38  ;;  %v8591_v19 = vpop.eup %8590  ;;  %v6079_v2 = vadd.f32 %v6078_v4, %v18458_v25  ;;  %v7497_v16 = vadd.f32 %v7431_v57, %v7430_v18 }
 0x674   : > { %v6890_v12 = vmul.f32 1.442695, %v6816_v28  ;;  %v6892_v34 = vmul.f32 1.442695, %v6817_v45  ;;  %v6503_v52 = vadd.f32 %v6502_v7, %v6288_v32  ;;  %v8593_v39 = vpop.eup %8592  ;;  %v6299_v28 = vpop.f32.mrf.mxu1  ;;  %v7662_v4 = vmul.f32 %v8591_v19, %v16054_v6 }
 0x675   : > { %6768 = vmax.xlane.f32.xlu0 %v6767_v56  ;;  %v6294_v55 = vadd.f32 %v6293_v62, %v6079_v2  ;;  %v7663_v32 = vmul.f32 %v8593_v39, %v16060_v51  ;;  %v7433_v2 = vmul.f32 %v8593_v39, %v16066_v50 }
 0x676   : > { %8594 = vpow2.f32 %v6890_v12  ;;  %v16117_v47 = vadd.f32 %v6663_v53, %v6503_v52  ;;  %v18459_v53 = vld [vmem:[#allocation132_spill] sm:$0xff]  ;;  %v6510_v12 = vpop.f32.mrf.mxu2 }
 0x677   : > { %8596 = vpow2.f32 %v6892_v34  ;;  %7008 = vadd.xlane.f32.xlu1 %v7007_v36  ;;  %v6507_v18 = vadd.f32 %v6506_v61, %v6294_v55 }
 0x678   : > { %v6667_v58 = vpop.f32.mrf.mxu3  ;;  %v6770_v9 = vmax.f32 %v18459_v53, %v16117_v47 }
 0x679   : > { %v2742_v0 = vpop.xlane.xlu1 %2741  ;;  %7728 = vadd.xlane.f32.xlu2 %v7727_v20  ;;  %v16136_v61 = vadd.f32 %v6667_v58, %v6507_v18 }
 0x67a   : > { %2787 = vst.msk [vmem:[%s14676_s8 + $0xc8] sm:$0xff] %vm2761_vm7, %v2742_v0  ;;  %v6730_v35 = vpop.xlane.xlu2 %6729  ;;  %v7432_v0 = vmul.f32 %v8591_v19, %v16064_v63 }
 0x67b   : > { %v6818_v7 = vsub.f32 %v18413_v26, %v6730_v35  ;;  %v6819_v38 = vsub.f32 %v15899_v8, %v6730_v35  ;;  %v7010_v8 = vadd.f32 %v8593_v39, %v8591_v19 }
 0x67c   : > { %v8595_v45 = vpop.eup %8594 }
 0x67d   : > { %v8597_v30 = vpop.eup %8596  ;;  %7498 = vadd.xlane.f32.xlu0 %v7497_v16  ;;  %v7130_v56 = vpack.c.bf16 %v8595_v45, %v8591_v19  ;;  %v6894_v36 = vmul.f32 1.442695, %v6818_v7  ;;  %v6896_v57 = vmul.f32 1.442695, %v6819_v38  ;;  %v6088_v16 = vpop.f32.mrf.mxu0  ;;  %v7730_v7 = vadd.f32 %v7663_v32, %v7662_v4 }
 0x67e   : > { %v7131_v34 = vpack.c.bf16 %v8597_v30, %v8593_v39  ;;  %v18461_v39 = vld [vmem:[#allocation90_spill] sm:$0xff]  ;;  %v6514_v55 = vpop.f32.mrf.mxu2  ;;  %v7665_v18 = vmul.f32 %v8597_v30, %v16060_v51 }
 0x67f   : > { %7192 = vmatmul.bf16.gmra.mxu0 %v7130_v56  ;;  %6771 = vmax.xlane.f32.xlu1 %v6770_v9  ;;  %8598 = vpow2.f32 %v6894_v36  ;;  %v6305_v56 = vpop.f32.mrf.mxu1 }
 0x680   : > { %7281 = vmatmul.bf16.gmra.mxu1 %v7131_v34  ;;  %v6671_v26 = vpop.f32.mrf.mxu3  ;;  %v6733_v52 = vpop.xlane.xlu0 %6732  ;;  %8600 = vpow2.f32 %v6896_v57  ;;  %v6773_v34 = vmax.f32 %v18461_v39, %v16136_v61 }
 0x681   : > { %v2745_v20 = vpop.xlane.xlu1 %2744  ;;  %v6820_v62 = vsub.f32 %v18423_v41, %v6733_v52  ;;  %v6821_v35 = vsub.f32 %v15955_v17, %v6733_v52  ;;  %7011 = vadd.xlane.f32.xlu2 %v7010_v8  ;;  %v7500_v17 = vadd.f32 %v7433_v2, %v7432_v0  ;;  %v18460_v41 = vld [vmem:[#allocation120_spill] sm:$0xff]  ;;  %v7664_v8 = vmul.f32 %v8595_v45, %v16054_v6 }
 0x682   : > { %2788 = vst.msk [vmem:[%s14676_s8 + $0xd0] sm:$0xff] %vm2761_vm7, %v2745_v20  ;;  %v2748_v25 = vpop.xlane.xlu2 %2747  ;;  %v6084_v9 = vadd.f32 %v6083_v14, %v18460_v41  ;;  %v7013_v20 = vadd.f32 %v8597_v30, %v8595_v45 }
 0x683   : > { %2789 = vst.msk [vmem:[%s14676_s8 + $0xd8] sm:$0xff] %vm2761_vm7, %v2748_v25  ;;  %v6898_v38 = vmul.f32 1.442695, %v6820_v62  ;;  %v6900_v19 = vmul.f32 1.442695, %v6821_v35  ;;  %v7434_v35 = vmul.f32 %v8595_v45, %v16064_v63  ;;  %v7435_v25 = vmul.f32 %v8597_v30, %v16066_v50 }
 0x684   : > { %v6300_v14 = vadd.f32 %v6299_v28, %v6084_v9 }
 0x685   : > { %7731 = vadd.xlane.f32.xlu0 %v7730_v7  ;;  %8602 = vpow2.f32 %v6898_v38  ;;  %v8599_v32 = vpop.eup %8598  ;;  %v6093_v7 = vpop.f32.mrf.mxu0  ;;  %v7503_v45 = vadd.f32 %v7435_v25, %v7434_v35 }
 0x686   : > { %8604 = vpow2.f32 %v6900_v19  ;;  %v8601_v57 = vpop.eup %8600  ;;  %v6511_v38 = vadd.f32 %v6510_v12, %v6300_v14 }
 0x687   : > { %7501 = vadd.xlane.f32.xlu1 %v7500_v17  ;;  %v7733_v17 = vadd.f32 %v7665_v18, %v7664_v8  ;;  %v6311_v9 = vpop.f32.mrf.mxu1  ;;  %v18463_v18 = vld [vmem:[#allocation91_spill] sm:$0xff] }
 0x688   : > { %v2751_v4 = vpop.xlane.xlu0 %2750  ;;  %v6675_v52 = vpop.f32.mrf.mxu3 }
 0x689   : > { %v2754_v58 = vpop.xlane.xlu1 %2753  ;;  %6774 = vmax.xlane.f32.xlu2 %v6773_v34  ;;  %2790 = vst.msk [vmem:[%s14676_s8 + $0xe0] sm:$0xff] %vm2761_vm7, %v2751_v4  ;;  %v16157_v34 = vadd.f32 %v6671_v26, %v6511_v38 }
 0x68a   : > { %2791 = vst.msk [vmem:[%s14676_s8 + $0xe8] sm:$0xff] %vm2761_vm7, %v2754_v58  ;;  %v6736_v36 = vpop.xlane.xlu2 %6735 }
 0x68b   : > { %v16147_v0 = vpop.eup %8602  ;;  %v6822_v62 = vsub.f32 %v18430_v27, %v6736_v36  ;;  %v6823_v19 = vsub.f32 %v15978_v40, %v6736_v36  ;;  %v18462_v40 = vld [vmem:[#allocation184_spill] sm:$0xff]  ;;  %v6776_v14 = vmax.f32 %v18463_v18, %v16157_v34 }
 0x68c   : > { %v16152_v2 = vpop.eup %8604  ;;  %v7132_v28 = vpack.c.bf16 %v16147_v0, %v8599_v32  ;;  %v6089_v4 = vadd.f32 %v6088_v16, %v18462_v40  ;;  %v7667_v16 = vmul.f32 %v8601_v57, %v16060_v51 }
 0x68d   : > { %7014 = vadd.xlane.f32.xlu0 %v7013_v20  ;;  %v7133_v41 = vpack.c.bf16 %v16152_v2, %v8601_v57  ;;  %v6902_v27 = vmul.f32 1.442695, %v6822_v62  ;;  %v6904_v30 = vmul.f32 1.442695, %v6823_v19  ;;  %v6518_v20 = vpop.f32.mrf.mxu2  ;;  %v7666_v62 = vmul.f32 %v8599_v32, %v16054_v6  ;;  %v6098_v19 = vpop.f32.mrf.mxu0 }
 0x68f   : > { %7197 = vmatmul.bf16.gmra.mxu0 %v7132_v28  ;;  %7734 = vadd.xlane.f32.xlu1 %v7733_v17  ;;  %8606 = vpow2.f32 %v6902_v27  ;;  %v7436_v28 = vmul.f32 %v8599_v32, %v16064_v63  ;;  %v7437_v17 = vmul.f32 %v8601_v57, %v16066_v50  ;;  %v6317_v27 = vpop.f32.mrf.mxu1 }
 0x690   : > { %7286 = vmatmul.bf16.gmra.mxu1 %v7133_v41  ;;  %v6739_v58 = vpop.xlane.xlu0 %6738  ;;  %8608 = vpow2.f32 %v6904_v30  ;;  %v6679_v38 = vpop.f32.mrf.mxu3 }
 0x691   : > { %v2757_v12 = vpop.xlane.xlu1 %2756  ;;  %v6824_v36 = vsub.f32 %v18435_v43, %v6739_v58  ;;  %v6825_v8 = vsub.f32 %v15991_v31, %v6739_v58  ;;  %7504 = vadd.xlane.f32.xlu2 %v7503_v45  ;;  %v6306_v43 = vadd.f32 %v6305_v56, %v6089_v4  ;;  %v7016_v31 = vadd.f32 %v8601_v57, %v8599_v32  ;;  %v18464_v56 = vld [vmem:[#allocation124_spill] sm:$0xff] }
 0x692   : > { %2792 = vst.msk [vmem:[%s14676_s8 + $0xf0] sm:$0xff] %vm2761_vm7, %v2757_v12  ;;  %v2760_v26 = vpop.xlane.xlu2 %2759  ;;  %v7736_v45 = vadd.f32 %v7667_v16, %v7666_v62  ;;  %v6094_v4 = vadd.f32 %v6093_v7, %v18464_v56  ;;  %v7669_v16 = vmul.f32 %v16152_v2, %v16060_v51  ;;  %v7439_v56 = vmul.f32 %v16152_v2, %v16066_v50 }
 0x693   : > { %2793 = vst.msk [vmem:[%s14676_s8 + $0xf8] sm:$0xff] %vm2761_vm7, %v2760_v26  ;;  %v6906_v35 = vmul.f32 1.442695, %v6824_v36  ;;  %v6908_v25 = vmul.f32 1.442695, %v6825_v8  ;;  %v6515_v41 = vadd.f32 %v6514_v55, %v6306_v43  ;;  %v7506_v36 = vadd.f32 %v7437_v17, %v7436_v28 }
 0x694   : > { %v7019_v43 = vadd.f32 %v16152_v2, %v16147_v0  ;;  %vm7616_vm7 = vcmask 7168  }
 0x695   : > { %6777 = vmax.xlane.f32.xlu0 %v6776_v14  ;;  %8610 = vpow2.f32 %v6906_v35  ;;  %v16172_v58 = vpop.eup %8606  ;;  %v16174_v40 = vadd.f32 %v6675_v52, %v6515_v41  ;;  %v6522_v55 = vpop.f32.mrf.mxu2  ;;  %v18465_v14 = vld [vmem:[#allocation94_spill] sm:$0xff]  ;;  %v6312_v35 = vadd.f32 %v6311_v9, %v6094_v4 }
 0x696   : > { %8612 = vpow2.f32 %v6908_v25  ;;  %v16176_v30 = vpop.eup %8608 }
 0x697   : > { %7017 = vadd.xlane.f32.xlu1 %v7016_v31  ;;  %v6779_v62 = vmax.f32 %v18465_v14, %v16174_v40  ;;  %v6103_v31 = vpop.f32.mrf.mxu0  ;;  %v6519_v28 = vadd.f32 %v6518_v20, %v6312_v35  ;;  %v6323_v4 = vpop.f32.mrf.mxu1 }
 0x698   : > { %v6742_v12 = vpop.xlane.xlu0 %6741  ;;  %v6683_v25 = vpop.f32.mrf.mxu3 }
 0x699   : > { %7737 = vadd.xlane.f32.xlu2 %v7736_v45  ;;  %v6826_v32 = vsub.f32 %v18438_v21, %v6742_v12  ;;  %v6827_v26 = vsub.f32 %v16006_v22, %v6742_v12  ;;  %v7668_v21 = vmul.f32 %v16147_v0, %v16054_v6  ;;  %v7438_v12 = vmul.f32 %v16147_v0, %v16064_v63  ;;  %v18467_v0 = vld [vmem:[#allocation99_spill] sm:$0xff] }
 0x69b   : > { %v16179_v8 = vpop.eup %8610  ;;  %v6910_v22 = vmul.f32 1.442695, %v6826_v32  ;;  %v6912_v17 = vmul.f32 1.442695, %v6827_v26  ;;  %v16203_v32 = vadd.f32 %v6679_v38, %v6519_v28  ;;  %v18466_v26 = vld [vmem:[#allocation130_spill] sm:$0xff]  ;;  %v18468_v38 = vld [vmem:[#allocation139_spill] sm:$0xff] }
 0x69c   : > { %v16182_v57 = vpop.eup %8612  ;;  %v7134_v52 = vpack.c.bf16 %v16179_v8, %v16172_v58 }
 0x69d   : > { %7507 = vadd.xlane.f32.xlu0 %v7506_v36  ;;  %v7135_v7 = vpack.c.bf16 %v16182_v57, %v16176_v30  ;;  %v7739_v36 = vadd.f32 %v7669_v16, %v7668_v21  ;;  %8614 = vpow2.f32 %v6910_v22  ;;  %v6104_v16 = vadd.f32 %v6103_v31, %v18468_v38 }
 0x69e   : > { %8616 = vpow2.f32 %v6912_v17 }
 0x69f   : > { %7202 = vmatmul.bf16.gmra.mxu0 %v7134_v52  ;;  %6780 = vmax.xlane.f32.xlu1 %v6779_v62  ;;  %v6526_v62 = vpop.f32.mrf.mxu2  ;;  %v6329_v31 = vpop.f32.mrf.mxu1 }
 0x6a0   : > { %7291 = vmatmul.bf16.gmra.mxu1 %v7135_v7  ;;  %v6745_v41 = vpop.xlane.xlu1 %6744  ;;  %v6782_v7 = vmax.f32 %v18467_v0, %v16203_v32  ;;  %v6687_v2 = vpop.f32.mrf.mxu3 }
 0x6a1   : > { %v6828_v9 = vsub.f32 %v18441_v48, %v6745_v41  ;;  %v6829_v45 = vsub.f32 %v16014_v24, %v6745_v41  ;;  %7020 = vadd.xlane.f32.xlu2 %v7019_v43  ;;  %v7509_v48 = vadd.f32 %v7439_v56, %v7438_v12  ;;  %v6099_v24 = vadd.f32 %v6098_v19, %v18466_v26  ;;  %v6108_v43 = vpop.f32.mrf.mxu0 }
 0x6a2   : > { %v7022_v19 = vadd.f32 %v16176_v30, %v16172_v58 }
 0x6a3   : > { %v6914_v52 = vmul.f32 1.442695, %v6828_v9  ;;  %v6916_v20 = vmul.f32 1.442695, %v6829_v45  ;;  %v16208_v21 = vpop.eup %8614  ;;  %v6318_v28 = vadd.f32 %v6317_v27, %v6099_v24  ;;  %v7440_v9 = vmul.f32 %v16172_v58, %v16064_v63 }
 0x6a4   : > { %v16211_v22 = vpop.eup %8616  ;;  %v7441_v45 = vmul.f32 %v16176_v30, %v16066_v50 }
 0x6a5   : > { %7740 = vadd.xlane.f32.xlu0 %v7739_v36  ;;  %8618 = vpow2.f32 %v6914_v52  ;;  %v6523_v56 = vadd.f32 %v6522_v55, %v6318_v28  ;;  %v6324_v52 = vadd.f32 %v6323_v4, %v6104_v16  ;;  %v18470_v28 = vld [vmem:[#allocation10_spill] sm:$0xff] }
 0x6a6   : > { %8620 = vpow2.f32 %v6916_v20  ;;  %v7512_v55 = vadd.f32 %v7441_v45, %v7440_v9 }
 0x6a7   : > { %7510 = vadd.xlane.f32.xlu1 %v7509_v48  ;;  %v16231_v48 = vadd.f32 %v6683_v25, %v6523_v56  ;;  %v6527_v26 = vadd.f32 %v6526_v62, %v6324_v52  ;;  %v18471_v56 = vld [vmem:[#allocation147_spill] sm:$0xff] }
 0x6a8   : > { %v6748_v35 = vpop.xlane.xlu2 %6747  ;;  %v6109_v62 = vadd.f32 %v6108_v43, %v18471_v56  ;;  %v7028_v43 = vadd.f32 %v16211_v22, %v16208_v21 }
 0x6a9   : > { %6783 = vmax.xlane.f32.xlu2 %v6782_v7  ;;  %v6830_v41 = vsub.f32 %v18443_v44, %v6748_v35  ;;  %v6831_v36 = vsub.f32 %v16020_v37, %v6748_v35  ;;  %v7025_v44 = vadd.f32 %v16182_v57, %v16179_v8  ;;  %v6530_v37 = vpop.f32.mrf.mxu2  ;;  %v16233_v38 = vadd.f32 %v6687_v2, %v6527_v26  ;;  %v6113_v9 = vpop.f32.mrf.mxu0  ;;  %v18472_v2 = vld [vmem:[#allocation93_spill] sm:$0xff] }
 0x6aa   : > { %v6785_v25 = vmax.f32 %v18470_v28, %v16231_v48  ;;  %v6330_v52 = vadd.f32 %v6329_v31, %v6109_v62 }
 0x6ab   : > { %v16215_v17 = vpop.eup %8618  ;;  %v6918_v24 = vmul.f32 1.442695, %v6830_v41  ;;  %v6920_v7 = vmul.f32 1.442695, %v6831_v36  ;;  %18469 = vst [vmem:[#allocation40_spill] sm:$0xff] %v16233_v38  ;;  %v6788_v45 = vmax.f32 %v18472_v2, %v16233_v38  ;;  %v7443_v36 = vmul.f32 %v16182_v57, %v16066_v50 }
 0x6ac   : > { %v16222_v12 = vpop.eup %8620  ;;  %v7136_v27 = vpack.c.bf16 %v16215_v17, %v16208_v21  ;;  %v6531_v26 = vadd.f32 %v6530_v37, %v6330_v52 }
 0x6ad   : > { %7023 = vadd.xlane.f32.xlu0 %v7022_v19  ;;  %v7137_v20 = vpack.c.bf16 %v16222_v12, %v16211_v22  ;;  %v6691_v19 = vpop.f32.mrf.mxu3  ;;  %8622 = vpow2.f32 %v6918_v24  ;;  %v7444_v24 = vmul.f32 %v16208_v21, %v16064_v63 }
 0x6ae   : > { %8624 = vpow2.f32 %v6920_v7 }
 0x6af   : > { %7207 = vmatmul.bf16.gmra.mxu0 %v7136_v27  ;;  %7026 = vadd.xlane.f32.xlu1 %v7025_v44 }
 0x6b0   : > { %7296 = vmatmul.bf16.gmra.mxu1 %v7137_v20  ;;  %v6751_v35 = vpop.xlane.xlu0 %6750 }
 0x6b1   : > { %v6832_v4 = vsub.f32 %v18445_v1, %v6751_v35  ;;  %v6833_v16 = vsub.f32 %v16025_v49, %v6751_v35  ;;  %7513 = vadd.xlane.f32.xlu2 %v7512_v55  ;;  %v6335_v1 = vpop.f32.mrf.mxu1  ;;  %v7442_v49 = vmul.f32 %v16179_v8, %v16064_v63  ;;  %v7445_v55 = vmul.f32 %v16211_v22, %v16066_v50  ;;  %v6534_v35 = vpop.f32.mrf.mxu2 }
 0x6b2   : > { %v6118_v52 = vpop.f32.mrf.mxu0 }
 0x6b3   : > { %v6922_v41 = vmul.f32 1.442695, %v6832_v4  ;;  %v6924_v27 = vmul.f32 1.442695, %v6833_v16  ;;  %v16248_v20 = vpop.eup %8622  ;;  %v7515_v4 = vadd.f32 %v7443_v36, %v7442_v49  ;;  %v16258_v16 = vadd.f32 %v6691_v19, %v6531_v26  ;;  %v18473_v49 = vld [vmem:[#allocation155_spill] sm:$0xff]  ;;  %v18474_v19 = vld [vmem:[#allocation60_spill] sm:$0xff] }
 0x6b4   : > { %v16254_v7 = vpop.eup %8624  ;;  %v6114_v36 = vadd.f32 %v6113_v9, %v18473_v49  ;;  %v7031_v9 = vadd.f32 %v16222_v12, %v16215_v17 }
 0x6b5   : > { %6786 = vmax.xlane.f32.xlu0 %v6785_v25  ;;  %8626 = vpow2.f32 %v6922_v41  ;;  %v6695_v37 = vpop.f32.mrf.mxu3 }
 0x6b6   : > { %8628 = vpow2.f32 %v6924_v27  ;;  %v7518_v27 = vadd.f32 %v7445_v55, %v7444_v24  ;;  %v6336_v2 = vadd.f32 %v6335_v1, %v6114_v36 }
 0x6b7   : > { %6789 = vmax.xlane.f32.xlu1 %v6788_v45 }
 0x6b8   : > { %v6754_v44 = vpop.xlane.xlu1 %6753 }
 0x6b9   : > { %7029 = vadd.xlane.f32.xlu2 %v7028_v43  ;;  %v6834_v25 = vsub.f32 %v18447_v11, %v6754_v44  ;;  %v6835_v62 = vsub.f32 %v16034_v54, %v6754_v44  ;;  %v6791_v11 = vmax.f32 %v18474_v19, %v16258_v16  ;;  %v6341_v26 = vpop.f32.mrf.mxu1  ;;  %v6538_v49 = vpop.f32.mrf.mxu2 }
 0x6bb   : > { %v16256_v31 = vpop.eup %8626  ;;  %v6926_v43 = vmul.f32 1.442695, %v6834_v25  ;;  %v6928_v54 = vmul.f32 1.442695, %v6835_v62  ;;  %v7447_v62 = vmul.f32 %v16222_v12, %v16066_v50 }
 0x6bc   : > { %v16261_v56 = vpop.eup %8628  ;;  %v7138_v41 = vpack.c.bf16 %v16256_v31, %v16248_v20 }
 0x6bd   : > { %7516 = vadd.xlane.f32.xlu0 %v7515_v4  ;;  %v7139_v45 = vpack.c.bf16 %v16261_v56, %v16254_v7  ;;  %v18475_v4 = vld [vmem:[#allocation81_spill] sm:$0xff]  ;;  %8630 = vpow2.f32 %v6926_v43  ;;  %v6699_v36 = vpop.f32.mrf.mxu3 }
 0x6be   : > { %v6119_v38 = vadd.f32 %v6118_v52, %v18475_v4  ;;  %8632 = vpow2.f32 %v6928_v54  ;;  %v6123_v4 = vpop.f32.mrf.mxu0 }
 0x6bf   : > { %7212 = vmatmul.bf16.gmra.mxu0 %v7138_v41  ;;  %7519 = vadd.xlane.f32.xlu1 %v7518_v27  ;;  %v7446_v41 = vmul.f32 %v16215_v17, %v16064_v63 }
 0x6c0   : > { %7301 = vmatmul.bf16.gmra.mxu1 %v7139_v45  ;;  %v6757_v44 = vpop.xlane.xlu2 %6756  ;;  %v6535_v45 = vadd.f32 %v6534_v35, %v6336_v2 }
 0x6c1   : > { %6792 = vmax.xlane.f32.xlu2 %v6791_v11  ;;  %v6836_v24 = vsub.f32 %v18449_v59, %v6757_v44  ;;  %v6837_v55 = vsub.f32 %v16039_v3, %v6757_v44  ;;  %v6342_v59 = vadd.f32 %v6341_v26, %v6119_v38  ;;  %v7034_v3 = vadd.f32 %v16254_v7, %v16248_v20  ;;  %v6347_v38 = vpop.f32.mrf.mxu1  ;;  %v18477_v26 = vld [vmem:[#allocation158_spill] sm:$0xff] }
 0x6c2   : > { %v16282_v1 = vadd.f32 %v6695_v37, %v6535_v45  ;;  %v7521_v43 = vadd.f32 %v7447_v62, %v7446_v41  ;;  %v18478_v45 = vld [vmem:[#allocation30_spill] sm:$0xff] }
 0x6c3   : > { %v6930_v25 = vmul.f32 1.442695, %v6836_v24  ;;  %v6932_v27 = vmul.f32 1.442695, %v6837_v55  ;;  %v6539_v52 = vadd.f32 %v6538_v49, %v6342_v59  ;;  %v16284_v44 = vpop.eup %8630  ;;  %v7672_v55 = vmul.f32 %v16179_v8, %v16054_v6 }
 0x6c4   : > { %v16288_v35 = vpop.eup %8632  ;;  %v6794_v54 = vmax.f32 %v18477_v26, %v16282_v1  ;;  %v7448_v8 = vmul.f32 %v16248_v20, %v16064_v63 }
 0x6c5   : > { %7032 = vadd.xlane.f32.xlu0 %v7031_v9  ;;  %8634 = vpow2.f32 %v6930_v25  ;;  %v16286_v2 = vadd.f32 %v6699_v36, %v6539_v52  ;;  %v7673_v9 = vmul.f32 %v16182_v57, %v16060_v51  ;;  %v7675_v36 = vmul.f32 %v16211_v22, %v16060_v51  ;;  %v6542_v52 = vpop.f32.mrf.mxu2 }
 0x6c6   : > { %8636 = vpow2.f32 %v6932_v27  ;;  %v7671_v22 = vmul.f32 %v16176_v30, %v16060_v51 }
 0x6c7   : > { %7035 = vadd.xlane.f32.xlu1 %v7034_v3  ;;  %18476 = vst [vmem:[#allocation173_spill] sm:$0xff] %v16286_v2  ;;  %v6797_v49 = vmax.f32 %v18478_v45, %v16286_v2  ;;  %v7674_v3 = vmul.f32 %v16208_v21, %v16054_v6  ;;  %v7670_v21 = vmul.f32 %v16172_v58, %v16054_v6 }
 0x6c8   : > { %v6760_v11 = vpop.xlane.xlu0 %6759 }
 0x6c9   : > { %7522 = vadd.xlane.f32.xlu2 %v7521_v43  ;;  %v6838_v25 = vsub.f32 %v18451_v5, %v6760_v11  ;;  %v6839_v57 = vsub.f32 %v16052_v29, %v6760_v11  ;;  %v7449_v5 = vmul.f32 %v16254_v7, %v16066_v50  ;;  %v16316_v2 = vadd.f32 %v7675_v36, %v7674_v3  ;;  %v6703_v29 = vpop.f32.mrf.mxu3 }
 0x6ca   : > { %v7000_v37 = vpop.xlane.xlu1 %6999 }
 0x6cb   : > { %v16292_v24 = vpop.eup %8634  ;;  %8638 = vrcp.f32 %v7000_v37  ;;  %v6934_v37 = vmul.f32 1.442695, %v6838_v25  ;;  %v6936_v11 = vmul.f32 1.442695, %v6839_v57 }
 0x6cc   : > { %v16298_v41 = vpop.eup %8636  ;;  %v7720_v27 = vpop.xlane.xlu2 %7719  ;;  %v7140_v62 = vpack.c.bf16 %v16292_v24, %v16284_v44 }
 0x6cd   : > { %6795 = vmax.xlane.f32.xlu0 %v6794_v54  ;;  %v7141_v59 = vpack.c.bf16 %v16298_v41, %v16288_v35  ;;  %v7745_v54 = vadd.f32 %v7673_v9, %v7672_v55  ;;  %8640 = vpow2.f32 %v6934_v37 }
 0x6cf   : > { %7217 = vmatmul.bf16.gmra.mxu0 %v7140_v62  ;;  %6798 = vmax.xlane.f32.xlu1 %v6797_v49  ;;  %v7524_v62 = vadd.f32 %v7449_v5, %v7448_v8  ;;  %v6124_v49 = vadd.f32 %v6123_v4, %v15401_v15  ;;  %v7742_v8 = vadd.f32 %v7671_v22, %v7670_v21  ;;  %v6546_v5 = vpop.f32.mrf.mxu2 }
 0x6d0   : > { %7306 = vmatmul.bf16.gmra.mxu1 %v7141_v59  ;;  %v7490_v43 = vpop.xlane.xlu0 %7489  ;;  %v6128_v59 = vpop.f32.mrf.mxu0  ;;  %v7040_v22 = vadd.f32 %v16288_v35, %v16284_v44 }
 0x6d1   : > { %v16318_v45 = vpop.eup %8638  ;;  %7746 = vadd.xlane.f32.xlu2 %v7745_v54  ;;  %v6353_v54 = vpop.f32.mrf.mxu1  ;;  %v6129_v15 = vadd.f32 %v6128_v59, %v15457_v10  ;;  %v6348_v4 = vadd.f32 %v6347_v38, %v6124_v49  ;;  %v7451_v10 = vmul.f32 %v16261_v56, %v16066_v50 }
 0x6d2   : > { %v7814_v55 = vmul.f32 %v16318_v45, %v7720_v27  ;;  %v7584_v9 = vmul.f32 %v16318_v45, %v7490_v43  ;;  %v6763_v25 = vpop.xlane.xlu1 %6762  ;;  %v7450_v43 = vmul.f32 %v16256_v31, %v16064_v63 }
 0x6d3   : > { %v6840_v3 = vsub.f32 %v18453_v33, %v6763_v25  ;;  %v6841_v36 = vsub.f32 %v16072_v46, %v6763_v25  ;;  %v7037_v33 = vadd.f32 %v16261_v56, %v16256_v31  ;;  %v6543_v57 = vadd.f32 %v6542_v52, %v6348_v4  ;;  %v16341_v37 = vpop.eup %8640  ;;  %v6707_v52 = vpop.f32.mrf.mxu3 }
 0x6d4   : > { %7617 = vst.msk [vmem:[%s14676_s8] sm:$0xff] %vm7616_vm7, %v7584_v9  ;;  %v7003_v58 = vpop.xlane.xlu2 %7002  ;;  %v6354_v38 = vadd.f32 %v6353_v54, %v6129_v15  ;;  %v18479_v15 = vld [vmem:[#allocation174_spill] sm:$0xff] }
 0x6d5   : > { %7525 = vadd.xlane.f32.xlu0 %v7524_v62  ;;  %7847 = vst.msk [vmem:[%s14676_s8] sm:$0xff] %vm7846_vm12, %v7814_v55  ;;  %v6938_v30 = vmul.f32 1.442695, %v6840_v3  ;;  %v6940_v27 = vmul.f32 1.442695, %v6841_v36  ;;  %8642 = vrcp.f32 %v7003_v58  ;;  %v16345_v55 = vadd.f32 %v6703_v29, %v6543_v57 }
 0x6d6   : > { %8644 = vpow2.f32 %v6936_v11  ;;  %v6547_v62 = vadd.f32 %v6546_v5, %v6354_v38 }
 0x6d7   : > { %8646 = vpow2.f32 %v6938_v30  ;;  %7743 = vadd.xlane.f32.xlu1 %v7742_v8  ;;  %v7527_v30 = vadd.f32 %v7451_v10, %v7450_v43  ;;  %v6800_v4 = vmax.f32 %v18479_v15, %v16345_v55  ;;  %v7676_v43 = vmul.f32 %v16215_v17, %v16054_v6  ;;  %v18480_v10 = vld [vmem:[#allocation181_spill] sm:$0xff] }
 0x6d8   : > { %v7723_v46 = vpop.xlane.xlu0 %7722  ;;  %8648 = vpow2.f32 %v6940_v27  ;;  %v16355_v27 = vadd.f32 %v6707_v52, %v6547_v62 }
 0x6d9   : > { %7038 = vadd.xlane.f32.xlu2 %v7037_v33 }
 0x6da   : > { %v7493_v21 = vpop.xlane.xlu1 %7492  ;;  %v6803_v38 = vmax.f32 %v18480_v10, %v16355_v27 }
 0x6db   : > { %v8643_v11 = vpop.eup %8642 }
 0x6dc   : > { %v7183_v9 = vpop.f32.mrf.mxu0  ;;  %v16349_v25 = vpop.eup %8644  ;;  %v7815_v49 = vmul.f32 %v8643_v11, %v7723_v46  ;;  %v7585_v59 = vmul.f32 %v8643_v11, %v7493_v21 }
 0x6dd   : > { %v7272_v3 = vpop.f32.mrf.mxu1  ;;  %v6766_v36 = vpop.xlane.xlu2 %6765  ;;  %7041 = vadd.xlane.f32.xlu0 %v7040_v22 }
 0x6de   : > { %v16351_v54 = vpop.eup %8646  ;;  %v7273_v58 = vadd.f32 %v7272_v3, %v7183_v9  ;;  %7618 = vst.msk [vmem:[%s14676_s8 + $0x8] sm:$0xff] %vm7616_vm7, %v7585_v59  ;;  %v6842_v5 = vsub.f32 %v18455_v42, %v6766_v36  ;;  %v6843_v21 = vsub.f32 %v16089_v60, %v6766_v36  ;;  %v7452_v9 = vmul.f32 %v16284_v44, %v16064_v63 }
 0x6df   : > { %v16353_v29 = vpop.eup %8648  ;;  %v7142_v8 = vpack.c.bf16 %v16351_v54, %v16341_v37  ;;  %7848 = vst.msk [vmem:[%s14676_s8 + $0x8] sm:$0xff] %vm7846_vm12, %v7815_v49  ;;  %7528 = vadd.xlane.f32.xlu1 %v7527_v30  ;;  %v7453_v42 = vmul.f32 %v16288_v35, %v16066_v50 }
 0x6e0   : > { %v7352_v46 = vmul.f32 %v16318_v45, %v7273_v58  ;;  %v7143_v33 = vpack.c.bf16 %v16353_v29, %v16349_v25  ;;  %v7006_v57 = vpop.xlane.xlu0 %7005  ;;  %v7677_v45 = vmul.f32 %v16222_v12, %v16060_v51  ;;  %v6942_v17 = vmul.f32 1.442695, %v6842_v5 }
 0x6e1   : > { %7222 = vmatmul.bf16.gmra.mxu0 %v7142_v8  ;;  %8650 = vrcp.f32 %v7006_v57  ;;  %6801 = vmax.xlane.f32.xlu2 %v6800_v4  ;;  %v6944_v58 = vmul.f32 1.442695, %v6843_v21  ;;  %v7530_v4 = vadd.f32 %v7453_v42, %v7452_v9  ;;  %v7682_v57 = vmul.f32 %v16284_v44, %v16054_v6 }
 0x6e2   : > { %7384 = vst.msk [vmem:[%s16368_s20] sm:$0xff] %vm517_vm0, %v7352_v46  ;;  %7311 = vmatmul.bf16.gmra.mxu1 %v7143_v33  ;;  %v7726_v22 = vpop.xlane.xlu1 %7725  ;;  %v7751_v12 = vadd.f32 %v7677_v45, %v7676_v43  ;;  %8652 = vpow2.f32 %v6942_v17  ;;  %v7683_v5 = vmul.f32 %v16288_v35, %v16060_v51  ;;  %v7681_v9 = vmul.f32 %v16261_v56, %v16060_v51 }
 0x6e3   : > { %8654 = vpow2.f32 %v6944_v58 }
 0x6e4   : > { %v7185_v52 = vpop.f32.mrf.mxu0 }
 0x6e5   : > { %v7274_v62 = vpop.f32.mrf.mxu1  ;;  %v7496_v49 = vpop.xlane.xlu2 %7495  ;;  %6804 = vmax.xlane.f32.xlu0 %v6803_v38  ;;  %v7679_v38 = vmul.f32 %v16254_v7, %v16060_v51 }
 0x6e6   : > { %v7275_v59 = vadd.f32 %v7274_v62, %v7185_v52  ;;  %v7680_v52 = vmul.f32 %v16256_v31, %v16054_v6 }
 0x6e7   : > { %v8651_v3 = vpop.eup %8650  ;;  %7752 = vadd.xlane.f32.xlu1 %v7751_v12 }
 0x6e8   : > { %v7816_v30 = vmul.f32 %v8651_v3, %v7726_v22  ;;  %v7353_v60 = vmul.f32 %v8643_v11, %v7275_v59  ;;  %v7586_v36 = vmul.f32 %v8651_v3, %v7496_v49  ;;  %v6769_v8 = vpop.xlane.xlu0 %6768  ;;  %v7760_v22 = vadd.f32 %v7683_v5, %v7682_v57  ;;  %v16405_v42 = vpop.eup %8652 }
 0x6e9   : > { %v6844_v46 = vsub.f32 %v18457_v13, %v6769_v8  ;;  %v6845_v33 = vsub.f32 %v16102_v23, %v6769_v8  ;;  %7531 = vadd.xlane.f32.xlu2 %v7530_v4  ;;  %v7678_v13 = vmul.f32 %v16248_v20, %v16054_v6  ;;  %v16407_v49 = vpop.eup %8654  ;;  %v7757_v56 = vadd.f32 %v7681_v9, %v7680_v52 }
 0x6ea   : > { %7385 = vst.msk [vmem:[%s16368_s20 + $0x8] sm:$0xff] %vm517_vm0, %v7353_v60  ;;  %v7009_v45 = vpop.xlane.xlu1 %7008  ;;  %v7684_v60 = vmul.f32 %v16292_v24, %v16054_v6  ;;  %v7043_v57 = vadd.f32 %v16298_v41, %v16292_v24 }
 0x6eb   : > { %7619 = vst.msk [vmem:[%s14676_s8 + $0x10] sm:$0xff] %vm7616_vm7, %v7586_v36  ;;  %v6946_v11 = vmul.f32 1.442695, %v6844_v46  ;;  %v6948_v43 = vmul.f32 1.442695, %v6845_v33  ;;  %8656 = vrcp.f32 %v7009_v45  ;;  %v7754_v62 = vadd.f32 %v7679_v38, %v7678_v13 }
 0x6ec   : > { %7849 = vst.msk [vmem:[%s14676_s8 + $0x10] sm:$0xff] %vm7846_vm12, %v7816_v30  ;;  %v7188_v23 = vpop.f32.mrf.mxu0  ;;  %v7685_v36 = vmul.f32 %v16298_v41, %v16060_v51 }
 0x6ed   : > { %8658 = vpow2.f32 %v6946_v11  ;;  %v7277_v44 = vpop.f32.mrf.mxu1  ;;  %v7729_v35 = vpop.xlane.xlu2 %7728  ;;  %7749 = vadd.xlane.f32.xlu0 %v16316_v2  ;;  %v7454_v11 = vmul.f32 %v16292_v24, %v16064_v63 }
 0x6ee   : > { %8660 = vpow2.f32 %v6948_v43  ;;  %v7278_v21 = vadd.f32 %v7277_v44, %v7188_v23  ;;  %v7455_v43 = vmul.f32 %v16298_v41, %v16066_v50  ;;  %v7763_v38 = vadd.f32 %v7685_v36, %v7684_v60 }
 0x6ef   : > { %7761 = vadd.xlane.f32.xlu1 %v7760_v22  ;;  %v7456_v44 = vmul.f32 %v16341_v37, %v16064_v63  ;;  %v7688_v36 = vmul.f32 %v16351_v54, %v16054_v6 }
 0x6f0   : > { %v7354_v20 = vmul.f32 %v8651_v3, %v7278_v21  ;;  %v7499_v7 = vpop.xlane.xlu0 %7498  ;;  %v7533_v21 = vadd.f32 %v7455_v43, %v7454_v11 }
 0x6f1   : > { %v8657_v17 = vpop.eup %8656  ;;  %7755 = vadd.xlane.f32.xlu2 %v7754_v62 }
 0x6f2   : > { %7386 = vst.msk [vmem:[%s16368_s20 + $0x10] sm:$0xff] %vm517_vm0, %v7354_v20  ;;  %v7817_v31 = vmul.f32 %v8657_v17, %v7729_v35  ;;  %v7587_v59 = vmul.f32 %v8657_v17, %v7499_v7  ;;  %v6772_v12 = vpop.xlane.xlu1 %6771 }
 0x6f3   : > { %v16411_v2 = vpop.eup %8658  ;;  %v6846_v5 = vsub.f32 %v18459_v53, %v6772_v12  ;;  %v6847_v45 = vsub.f32 %v16117_v47, %v6772_v12  ;;  %v7457_v53 = vmul.f32 %v16349_v25, %v16066_v50  ;;  %v7046_v12 = vadd.f32 %v16349_v25, %v16341_v37 }
 0x6f4   : > { %v16413_v58 = vpop.eup %8660  ;;  %v7190_v3 = vpop.f32.mrf.mxu0  ;;  %v7144_v30 = vpack.c.bf16 %v16411_v2, %v16405_v42  ;;  %7620 = vst.msk [vmem:[%s14676_s8 + $0x18] sm:$0xff] %vm7616_vm7, %v7587_v59 }
 0x6f5   : > { %v7279_v8 = vpop.f32.mrf.mxu1  ;;  %v7012_v4 = vpop.xlane.xlu2 %7011  ;;  %7758 = vadd.xlane.f32.xlu0 %v7757_v56  ;;  %v7145_v46 = vpack.c.bf16 %v16413_v58, %v16407_v49  ;;  %7850 = vst.msk [vmem:[%s14676_s8 + $0x18] sm:$0xff] %vm7846_vm12, %v7817_v31  ;;  %v6950_v35 = vmul.f32 1.442695, %v6846_v5  ;;  %v6952_v22 = vmul.f32 1.442695, %v6847_v45  ;;  %v7536_v59 = vadd.f32 %v7457_v53, %v7456_v44 }
 0x6f6   : > { %v7280_v33 = vadd.f32 %v7279_v8, %v7190_v3  ;;  %8662 = vrcp.f32 %v7012_v4  ;;  %7227 = vmatmul.bf16.gmra.mxu0 %v7144_v30  ;;  %v7686_v56 = vmul.f32 %v16341_v37, %v16054_v6  ;;  %v7687_v3 = vmul.f32 %v16349_v25, %v16060_v51 }
 0x6f7   : > { %7316 = vmatmul.bf16.gmra.mxu1 %v7145_v46  ;;  %7044 = vadd.xlane.f32.xlu1 %v7043_v57  ;;  %8664 = vpow2.f32 %v6950_v35  ;;  %v7689_v37 = vmul.f32 %v16353_v29, %v16060_v51  ;;  %v7458_v46 = vmul.f32 %v16351_v54, %v16064_v63 }
 0x6f8   : > { %v7355_v23 = vmul.f32 %v8657_v17, %v7280_v33  ;;  %v7732_v13 = vpop.xlane.xlu0 %7731  ;;  %8666 = vpow2.f32 %v6952_v22  ;;  %v7766_v8 = vadd.f32 %v7687_v3, %v7686_v56  ;;  %v7459_v33 = vmul.f32 %v16353_v29, %v16066_v50 }
 0x6f9   : > { %7764 = vadd.xlane.f32.xlu2 %v7763_v38 }
 0x6fa   : > { %7387 = vst.msk [vmem:[%s16368_s20 + $0x18] sm:$0xff] %vm517_vm0, %v7355_v23  ;;  %v7502_v24 = vpop.xlane.xlu1 %7501  ;;  %v7769_v23 = vadd.f32 %v7689_v37, %v7688_v36  ;;  %v7462_v36 = vmul.f32 %v16411_v2, %v16064_v63 }
 0x6fc   : > { %v8663_v41 = vpop.eup %8662  ;;  %v7193_v47 = vpop.f32.mrf.mxu0 }
 0x6fd   : > { %v7818_v52 = vmul.f32 %v8663_v41, %v7732_v13  ;;  %v7588_v9 = vmul.f32 %v8663_v41, %v7502_v24  ;;  %v7282_v20 = vpop.f32.mrf.mxu1  ;;  %v6775_v7 = vpop.xlane.xlu2 %6774  ;;  %7534 = vadd.xlane.f32.xlu0 %v7533_v21  ;;  %v7539_v21 = vadd.f32 %v7459_v33, %v7458_v46 }
 0x6fe   : > { %v7283_v62 = vadd.f32 %v7282_v20, %v7193_v47  ;;  %v6848_v17 = vsub.f32 %v18461_v39, %v6775_v7  ;;  %v6849_v31 = vsub.f32 %v16136_v61, %v6775_v7  ;;  %v16463_v57 = vpop.eup %8664  ;;  %v7690_v7 = vmul.f32 %v16405_v42, %v16054_v6 }
 0x6ff   : > { %7621 = vst.msk [vmem:[%s14676_s8 + $0x20] sm:$0xff] %vm7616_vm7, %v7588_v9  ;;  %7537 = vadd.xlane.f32.xlu1 %v7536_v59  ;;  %v16465_v43 = vpop.eup %8666  ;;  %v7049_v9 = vadd.f32 %v16353_v29, %v16351_v54  ;;  %v7460_v54 = vmul.f32 %v16405_v42, %v16064_v63  ;;  %v7461_v29 = vmul.f32 %v16407_v49, %v16066_v50 }
 0x700   : > { %7851 = vst.msk [vmem:[%s14676_s8 + $0x20] sm:$0xff] %vm7846_vm12, %v7818_v52  ;;  %v7356_v39 = vmul.f32 %v8663_v41, %v7283_v62  ;;  %v6954_v30 = vmul.f32 1.442695, %v6848_v17  ;;  %v6956_v60 = vmul.f32 1.442695, %v6849_v31  ;;  %v7015_v61 = vpop.xlane.xlu0 %7014  ;;  %v7691_v62 = vmul.f32 %v16407_v49, %v16060_v51 }
 0x701   : > { %8668 = vrcp.f32 %v7015_v61  ;;  %7047 = vadd.xlane.f32.xlu2 %v7046_v12  ;;  %v7052_v12 = vadd.f32 %v16407_v49, %v16405_v42  ;;  %v7542_v61 = vadd.f32 %v7461_v29, %v7460_v54  ;;  %v7463_v42 = vmul.f32 %v16413_v58, %v16066_v50 }
 0x702   : > { %7388 = vst.msk [vmem:[%s16368_s20 + $0x20] sm:$0xff] %vm517_vm0, %v7356_v39  ;;  %8670 = vpow2.f32 %v6954_v30  ;;  %v7735_v25 = vpop.xlane.xlu1 %7734  ;;  %v7772_v39 = vadd.f32 %v7691_v62, %v7690_v7 }
 0x703   : > { %8672 = vpow2.f32 %v6956_v60 }
 0x704   : > { %v7195_v4 = vpop.f32.mrf.mxu0 }
 0x705   : > { %v7284_v5 = vpop.f32.mrf.mxu1  ;;  %v7505_v11 = vpop.xlane.xlu2 %7504  ;;  %7767 = vadd.xlane.f32.xlu0 %v7766_v8 }
 0x706   : > { %v7285_v45 = vadd.f32 %v7284_v5, %v7195_v4 }
 0x707   : > { %v8669_v13 = vpop.eup %8668  ;;  %7770 = vadd.xlane.f32.xlu1 %v7769_v23 }
 0x708   : > { %v16467_v38 = vpop.eup %8670  ;;  %v7819_v44 = vmul.f32 %v8669_v13, %v7735_v25  ;;  %v7357_v53 = vmul.f32 %v8669_v13, %v7285_v45  ;;  %v7589_v35 = vmul.f32 %v8669_v13, %v7505_v11  ;;  %v6778_v24 = vpop.xlane.xlu0 %6777  ;;  %v7545_v13 = vadd.f32 %v7463_v42, %v7462_v36 }
 0x709   : > { %v16469_v41 = vpop.eup %8672  ;;  %v7146_v22 = vpack.c.bf16 %v16467_v38, %v16463_v57  ;;  %7540 = vadd.xlane.f32.xlu2 %v7539_v21  ;;  %v6850_v17 = vsub.f32 %v18463_v18, %v6778_v24  ;;  %v6851_v56 = vsub.f32 %v16157_v34, %v6778_v24  ;;  %v7695_v24 = vmul.f32 %v16465_v43, %v16060_v51 }
 0x70a   : > { %7389 = vst.msk [vmem:[%s16368_s20 + $0x28] sm:$0xff] %vm517_vm0, %v7357_v53  ;;  %v7147_v47 = vpack.c.bf16 %v16469_v41, %v16465_v43  ;;  %v7018_v52 = vpop.xlane.xlu1 %7017  ;;  %v7055_v53 = vadd.f32 %v16413_v58, %v16411_v2  ;;  %v7058_v36 = vadd.f32 %v16465_v43, %v16463_v57 }
 0x70b   : > { %7622 = vst.msk [vmem:[%s14676_s8 + $0x28] sm:$0xff] %vm7616_vm7, %v7589_v35  ;;  %7232 = vmatmul.bf16.gmra.mxu0 %v7146_v22  ;;  %8674 = vrcp.f32 %v7018_v52  ;;  %v6958_v30 = vmul.f32 1.442695, %v6850_v17  ;;  %v6960_v37 = vmul.f32 1.442695, %v6851_v56  ;;  %v7694_v35 = vmul.f32 %v16463_v57, %v16054_v6 }
 0x70c   : > { %7852 = vst.msk [vmem:[%s14676_s8 + $0x28] sm:$0xff] %vm7846_vm12, %v7819_v44  ;;  %7321 = vmatmul.bf16.gmra.mxu1 %v7147_v47  ;;  %v7198_v20 = vpop.f32.mrf.mxu0 }
 0x70d   : > { %v7287_v31 = vpop.f32.mrf.mxu1  ;;  %v7738_v59 = vpop.xlane.xlu2 %7737  ;;  %7050 = vadd.xlane.f32.xlu0 %v7049_v9  ;;  %8676 = vpow2.f32 %v6958_v30  ;;  %v7778_v29 = vadd.f32 %v7695_v24, %v7694_v35 }
 0x70e   : > { %v7288_v18 = vadd.f32 %v7287_v31, %v7198_v20 }
 0x70f   : > { %7053 = vadd.xlane.f32.xlu1 %v7052_v12 }
 0x710   : > { %v7508_v3 = vpop.xlane.xlu0 %7507 }
 0x711   : > { %v8675_v60 = vpop.eup %8674  ;;  %7773 = vadd.xlane.f32.xlu2 %v7772_v39 }
 0x712   : > { %v7358_v49 = vmul.f32 %v8675_v60, %v7288_v18  ;;  %v7820_v25 = vmul.f32 %v8675_v60, %v7738_v59  ;;  %v7590_v34 = vmul.f32 %v8675_v60, %v7508_v3  ;;  %v6781_v8 = vpop.xlane.xlu1 %6780 }
 0x713   : > { %v6852_v4 = vsub.f32 %v18465_v14, %v6781_v8  ;;  %v6853_v46 = vsub.f32 %v16174_v40, %v6781_v8  ;;  %v7692_v14 = vmul.f32 %v16411_v2, %v16054_v6  ;;  %v7693_v40 = vmul.f32 %v16413_v58, %v16060_v51  ;;  %v16517_v21 = vpop.eup %8676 }
 0x714   : > { %v7200_v33 = vpop.f32.mrf.mxu0  ;;  %7390 = vst.msk [vmem:[%s16368_s20 + $0x30] sm:$0xff] %vm517_vm0, %v7358_v49  ;;  %v7464_v2 = vmul.f32 %v16463_v57, %v16064_v63  ;;  %v7465_v58 = vmul.f32 %v16465_v43, %v16066_v50  ;;  %v7696_v49 = vmul.f32 %v16467_v38, %v16054_v6  ;;  %v7466_v57 = vmul.f32 %v16467_v38, %v16064_v63 }
 0x715   : > { %v7289_v5 = vpop.f32.mrf.mxu1  ;;  %v7021_v11 = vpop.xlane.xlu2 %7020  ;;  %7543 = vadd.xlane.f32.xlu0 %v7542_v61  ;;  %7623 = vst.msk [vmem:[%s14676_s8 + $0x30] sm:$0xff] %vm7616_vm7, %v7590_v34  ;;  %v6962_v45 = vmul.f32 1.442695, %v6852_v4  ;;  %v6964_v23 = vmul.f32 1.442695, %v6853_v46  ;;  %v7775_v52 = vadd.f32 %v7693_v40, %v7692_v14 }
 0x716   : > { %8678 = vrcp.f32 %v7021_v11  ;;  %7853 = vst.msk [vmem:[%s14676_s8 + $0x30] sm:$0xff] %vm7846_vm12, %v7820_v25  ;;  %v7290_v22 = vadd.f32 %v7289_v5, %v7200_v33  ;;  %v7548_v18 = vadd.f32 %v7465_v58, %v7464_v2  ;;  %v7697_v25 = vmul.f32 %v16469_v41, %v16060_v51 }
 0x717   : > { %8680 = vpow2.f32 %v6960_v37  ;;  %7546 = vadd.xlane.f32.xlu1 %v7545_v13 }
 0x718   : > { %8682 = vpow2.f32 %v6962_v45  ;;  %v7741_v44 = vpop.xlane.xlu0 %7740 }
 0x719   : > { %8684 = vpow2.f32 %v6964_v23  ;;  %7056 = vadd.xlane.f32.xlu2 %v7055_v53  ;;  %v7781_v23 = vadd.f32 %v7697_v25, %v7696_v49 }
 0x71a   : > { %v7511_v47 = vpop.xlane.xlu1 %7510 }
 0x71c   : > { %v8679_v9 = vpop.eup %8678  ;;  %v7203_v20 = vpop.f32.mrf.mxu0 }
 0x71d   : > { %v16523_v7 = vpop.eup %8680  ;;  %v7359_v62 = vmul.f32 %v8679_v9, %v7290_v22  ;;  %v7821_v17 = vmul.f32 %v8679_v9, %v7741_v44  ;;  %v7591_v31 = vmul.f32 %v8679_v9, %v7511_v47  ;;  %v7292_v59 = vpop.f32.mrf.mxu1  ;;  %7776 = vadd.xlane.f32.xlu0 %v7775_v52  ;;  %v7468_v44 = vmul.f32 %v16517_v21, %v16064_v63 }
 0x71e   : > { %v6784_v12 = vpop.xlane.xlu2 %6783  ;;  %v16525_v54 = vpop.eup %8682  ;;  %v7293_v4 = vadd.f32 %v7292_v59, %v7203_v20  ;;  %v7469_v53 = vmul.f32 %v16523_v7, %v16066_v50  ;;  %v7698_v20 = vmul.f32 %v16517_v21, %v16054_v6  ;;  %v7699_v2 = vmul.f32 %v16523_v7, %v16060_v51 }
 0x71f   : > { %v16527_v56 = vpop.eup %8684  ;;  %7391 = vst.msk [vmem:[%s16368_s20 + $0x38] sm:$0xff] %vm517_vm0, %v7359_v62  ;;  %v7148_v3 = vpack.c.bf16 %v16525_v54, %v16517_v21  ;;  %7779 = vadd.xlane.f32.xlu1 %v7778_v29  ;;  %v6854_v60 = vsub.f32 %v18467_v0, %v6784_v12  ;;  %v6855_v42 = vsub.f32 %v16203_v32, %v6784_v12 }
 0x720   : > { %7624 = vst.msk [vmem:[%s14676_s8 + $0x38] sm:$0xff] %vm7616_vm7, %v7591_v31  ;;  %v7149_v39 = vpack.c.bf16 %v16527_v56, %v16523_v7  ;;  %v7024_v30 = vpop.xlane.xlu0 %7023  ;;  %v7061_v0 = vadd.f32 %v16469_v41, %v16467_v38  ;;  %v7467_v32 = vmul.f32 %v16469_v41, %v16066_v50  ;;  %v7554_v9 = vadd.f32 %v7469_v53, %v7468_v44 }
 0x721   : > { %7854 = vst.msk [vmem:[%s14676_s8 + $0x38] sm:$0xff] %vm7846_vm12, %v7821_v17  ;;  %7237 = vmatmul.bf16.gmra.mxu0 %v7148_v3  ;;  %8686 = vrcp.f32 %v7024_v30  ;;  %7549 = vadd.xlane.f32.xlu2 %v7548_v18  ;;  %v6966_v46 = vmul.f32 1.442695, %v6854_v60  ;;  %v6968_v33 = vmul.f32 1.442695, %v6855_v42  ;;  %v7064_v62 = vadd.f32 %v16523_v7, %v16517_v21 }
 0x722   : > { %7326 = vmatmul.bf16.gmra.mxu1 %v7149_v39  ;;  %v7027_v61 = vpop.xlane.xlu1 %7026  ;;  %v7551_v41 = vadd.f32 %v7467_v32, %v7466_v57  ;;  %v7700_v59 = vmul.f32 %v16525_v54, %v16054_v6  ;;  %v7701_v12 = vmul.f32 %v16527_v56, %v16060_v51  ;;  %v7784_v30 = vadd.f32 %v7699_v2, %v7698_v20 }
 0x723   : > { %8688 = vrcp.f32 %v7027_v61  ;;  %v7470_v61 = vmul.f32 %v16525_v54, %v16064_v63 }
 0x724   : > { %v7205_v37 = vpop.f32.mrf.mxu0  ;;  %8690 = vpow2.f32 %v6966_v46 }
 0x725   : > { %v7294_v34 = vpop.f32.mrf.mxu1  ;;  %7059 = vadd.xlane.f32.xlu0 %v7058_v36  ;;  %8692 = vpow2.f32 %v6968_v33  ;;  %v7471_v36 = vmul.f32 %v16527_v56, %v16066_v50 }
 0x726   : > { %v7514_v8 = vpop.xlane.xlu2 %7513  ;;  %v7295_v13 = vadd.f32 %v7294_v34, %v7205_v37  ;;  %v18481_v37 = vld [vmem:[#allocation93_spill] sm:$0xff] }
 0x727   : > { %v16553_v43 = vpop.eup %8686  ;;  %7062 = vadd.xlane.f32.xlu1 %v7061_v0  ;;  %v18482_v0 = vld [vmem:[#allocation40_spill] sm:$0xff] }
 0x728   : > { %v7360_v5 = vmul.f32 %v16553_v43, %v7293_v4  ;;  %v7592_v11 = vmul.f32 %v16553_v43, %v7514_v8  ;;  %v6787_v45 = vpop.xlane.xlu0 %6786  ;;  %v7787_v8 = vadd.f32 %v7701_v12, %v7700_v59 }
 0x729   : > { %v6856_v14 = vsub.f32 %v18470_v28, %v6787_v45  ;;  %v6857_v38 = vsub.f32 %v16231_v48, %v6787_v45  ;;  %v16559_v40 = vpop.eup %8688  ;;  %7782 = vadd.xlane.f32.xlu2 %v7781_v23  ;;  %v7557_v23 = vadd.f32 %v7471_v36, %v7470_v61  ;;  %v18484_v36 = vld [vmem:[#allocation173_spill] sm:$0xff] }
 0x72a   : > { %7392 = vst.msk [vmem:[%s16368_s20 + $0x40] sm:$0xff] %vm517_vm0, %v7360_v5  ;;  %v7361_v35 = vmul.f32 %v16559_v40, %v7295_v13  ;;  %v6790_v48 = vpop.xlane.xlu1 %6789  ;;  %v8691_v17 = vpop.eup %8690 }
 0x72b   : > { %7625 = vst.msk [vmem:[%s14676_s8 + $0x40] sm:$0xff] %vm7616_vm7, %v7592_v11  ;;  %v6970_v28 = vmul.f32 1.442695, %v6856_v14  ;;  %v6972_v24 = vmul.f32 1.442695, %v6857_v38  ;;  %v8693_v29 = vpop.eup %8692  ;;  %v6858_v49 = vsub.f32 %v18481_v37, %v6790_v48  ;;  %v6859_v57 = vsub.f32 %v18482_v0, %v6790_v48 }
 0x72c   : > { %v7208_v22 = vpop.f32.mrf.mxu0  ;;  %7393 = vst.msk [vmem:[%s16368_s20 + $0x48] sm:$0xff] %vm517_vm0, %v7361_v35  ;;  %v7703_v44 = vmul.f32 %v8693_v29, %v16060_v51  ;;  %v7070_v48 = vadd.f32 %v8693_v29, %v8691_v17 }
 0x72d   : > { %8694 = vpow2.f32 %v6970_v28  ;;  %v7297_v47 = vpop.f32.mrf.mxu1  ;;  %7552 = vadd.xlane.f32.xlu0 %v7551_v41  ;;  %v6974_v13 = vmul.f32 1.442695, %v6858_v49  ;;  %v6976_v38 = vmul.f32 1.442695, %v6859_v57  ;;  %v7702_v41 = vmul.f32 %v8691_v17, %v16054_v6 }
 0x72e   : > { %v7030_v52 = vpop.xlane.xlu2 %7029  ;;  %8696 = vpow2.f32 %v6972_v24  ;;  %v7298_v21 = vadd.f32 %v7297_v47, %v7208_v22  ;;  %v7472_v47 = vmul.f32 %v8691_v17, %v16064_v63 }
 0x72f   : > { %8698 = vrcp.f32 %v7030_v52  ;;  %7555 = vadd.xlane.f32.xlu1 %v7554_v9  ;;  %v7790_v2 = vadd.f32 %v7703_v44, %v7702_v41 }
 0x730   : > { %v7517_v58 = vpop.xlane.xlu0 %7516 }
 0x731   : > { %v7593_v31 = vmul.f32 %v16559_v40, %v7517_v58  ;;  %7065 = vadd.xlane.f32.xlu2 %v7064_v62 }
 0x732   : > { %v7520_v39 = vpop.xlane.xlu1 %7519 }
 0x733   : > { %v16583_v3 = vpop.eup %8694  ;;  %7626 = vst.msk [vmem:[%s14676_s8 + $0x48] sm:$0xff] %vm7616_vm7, %v7593_v31 }
 0x734   : > { %v16587_v18 = vpop.eup %8696  ;;  %v7210_v7 = vpop.f32.mrf.mxu0  ;;  %v7150_v60 = vpack.c.bf16 %v16583_v3, %v8691_v17  ;;  %v7474_v12 = vmul.f32 %v16583_v3, %v16064_v63 }
 0x735   : > { %v16594_v42 = vpop.eup %8698  ;;  %v7299_v25 = vpop.f32.mrf.mxu1  ;;  %7785 = vadd.xlane.f32.xlu0 %v7784_v30  ;;  %v7151_v4 = vpack.c.bf16 %v16587_v18, %v8693_v29 }
 0x736   : > { %v6793_v34 = vpop.xlane.xlu2 %6792  ;;  %v7362_v32 = vmul.f32 %v16594_v42, %v7298_v21  ;;  %v7594_v46 = vmul.f32 %v16594_v42, %v7520_v39  ;;  %7242 = vmatmul.bf16.gmra.mxu0 %v7150_v60  ;;  %v7300_v35 = vadd.f32 %v7299_v25, %v7210_v7  ;;  %v18483_v60 = vld [vmem:[#allocation30_spill] sm:$0xff] }
 0x737   : > { %v6860_v33 = vsub.f32 %v18474_v19, %v6793_v34  ;;  %v6861_v5 = vsub.f32 %v16258_v16, %v6793_v34  ;;  %7331 = vmatmul.bf16.gmra.mxu1 %v7151_v4  ;;  %7788 = vadd.xlane.f32.xlu1 %v7787_v8  ;;  %v7067_v16 = vadd.f32 %v16527_v56, %v16525_v54 }
 0x738   : > { %7394 = vst.msk [vmem:[%s16368_s20 + $0x50] sm:$0xff] %vm517_vm0, %v7362_v32  ;;  %v7033_v45 = vpop.xlane.xlu0 %7032  ;;  %v7473_v54 = vmul.f32 %v8693_v29, %v16066_v50  ;;  %v7475_v29 = vmul.f32 %v16587_v18, %v16066_v50  ;;  %v7704_v32 = vmul.f32 %v16583_v3, %v16054_v6 }
 0x739   : > { %v6978_v11 = vmul.f32 1.442695, %v6860_v33  ;;  %7627 = vst.msk [vmem:[%s14676_s8 + $0x50] sm:$0xff] %vm7616_vm7, %v7594_v46  ;;  %v6980_v14 = vmul.f32 1.442695, %v6861_v5  ;;  %8700 = vrcp.f32 %v7033_v45  ;;  %7558 = vadd.xlane.f32.xlu2 %v7557_v23  ;;  %v7705_v46 = vmul.f32 %v16587_v18, %v16060_v51 }
 0x73a   : > { %v7036_v19 = vpop.xlane.xlu1 %7035  ;;  %v7560_v21 = vadd.f32 %v7473_v54, %v7472_v47  ;;  %v7563_v4 = vadd.f32 %v7475_v29, %v7474_v12  ;;  %v7073_v45 = vadd.f32 %v16587_v18, %v16583_v3 }
 0x73b   : > { %8702 = vpow2.f32 %v6978_v11 }
 0x73c   : > { %8704 = vpow2.f32 %v6980_v14  ;;  %v7213_v28 = vpop.f32.mrf.mxu0 }
 0x73d   : > { %8706 = vrcp.f32 %v7036_v19  ;;  %7068 = vadd.xlane.f32.xlu0 %v7067_v16  ;;  %v7302_v24 = vpop.f32.mrf.mxu1  ;;  %v7793_v19 = vadd.f32 %v7705_v46, %v7704_v32 }
 0x73e   : > { %8708 = vpow2.f32 %v6974_v13  ;;  %v7523_v53 = vpop.xlane.xlu2 %7522  ;;  %v7303_v62 = vadd.f32 %v7302_v24, %v7213_v28 }
 0x73f   : > { %8710 = vpow2.f32 %v6976_v38  ;;  %v16611_v22 = vpop.eup %8700  ;;  %7071 = vadd.xlane.f32.xlu1 %v7070_v48 }
 0x740   : > { %v7363_v52 = vmul.f32 %v16611_v22, %v7300_v35  ;;  %v7595_v9 = vmul.f32 %v16611_v22, %v7523_v53  ;;  %v6796_v20 = vpop.xlane.xlu0 %6795 }
 0x741   : > { %v16615_v56 = vpop.eup %8702  ;;  %v6862_v31 = vsub.f32 %v18477_v26, %v6796_v20  ;;  %v6863_v17 = vsub.f32 %v16282_v1, %v6796_v20  ;;  %7791 = vadd.xlane.f32.xlu2 %v7790_v2 }
 0x742   : > { %v16619_v58 = vpop.eup %8704  ;;  %7395 = vst.msk [vmem:[%s16368_s20 + $0x58] sm:$0xff] %vm517_vm0, %v7363_v52  ;;  %v6799_v26 = vpop.xlane.xlu1 %6798 }
 0x743   : > { %v16622_v59 = vpop.eup %8706  ;;  %7628 = vst.msk [vmem:[%s14676_s8 + $0x58] sm:$0xff] %vm7616_vm7, %v7595_v9  ;;  %v6864_v61 = vsub.f32 %v18483_v60, %v6799_v26  ;;  %v6865_v37 = vsub.f32 %v18484_v36, %v6799_v26  ;;  %v6982_v49 = vmul.f32 1.442695, %v6862_v31  ;;  %v6984_v8 = vmul.f32 1.442695, %v6863_v17 }
 0x744   : > { %v8709_v39 = vpop.eup %8708  ;;  %v7364_v30 = vmul.f32 %v16622_v59, %v7303_v62  ;;  %v7215_v5 = vpop.f32.mrf.mxu0  ;;  %v7708_v31 = vmul.f32 %v16615_v56, %v16054_v6  ;;  %v7709_v17 = vmul.f32 %v16619_v58, %v16060_v51  ;;  %v7079_v60 = vadd.f32 %v16619_v58, %v16615_v56 }
 0x745   : > { %v8711_v7 = vpop.eup %8710  ;;  %v7152_v1 = vpack.c.bf16 %v16615_v56, %v8709_v39  ;;  %7561 = vadd.xlane.f32.xlu0 %v7560_v21  ;;  %v6986_v0 = vmul.f32 1.442695, %v6864_v61  ;;  %v6988_v33 = vmul.f32 1.442695, %v6865_v37  ;;  %8712 = vpow2.f32 %v6982_v49  ;;  %v7304_v23 = vpop.f32.mrf.mxu1 }
 0x746   : > { %7396 = vst.msk [vmem:[%s16368_s20 + $0x60] sm:$0xff] %vm517_vm0, %v7364_v30  ;;  %v7747_v25 = vpop.xlane.xlu2 %7746  ;;  %v7153_v34 = vpack.c.bf16 %v16619_v58, %v8711_v7  ;;  %8714 = vpow2.f32 %v6984_v8  ;;  %v7706_v13 = vmul.f32 %v8709_v39, %v16054_v6  ;;  %v7707_v14 = vmul.f32 %v8711_v7, %v16060_v51 }
 0x747   : > { %7247 = vmatmul.bf16.gmra.mxu0 %v7152_v1  ;;  %v7823_v57 = vmul.f32 %v16559_v40, %v7747_v25  ;;  %7564 = vadd.xlane.f32.xlu1 %v7563_v4  ;;  %8716 = vpow2.f32 %v6986_v0  ;;  %v7476_v18 = vmul.f32 %v8709_v39, %v16064_v63  ;;  %v7477_v16 = vmul.f32 %v8711_v7, %v16066_v50 }
 0x748   : > { %7336 = vmatmul.bf16.gmra.mxu1 %v7153_v34  ;;  %v7526_v11 = vpop.xlane.xlu0 %7525  ;;  %8718 = vpow2.f32 %v6988_v33  ;;  %v7796_v44 = vadd.f32 %v7707_v14, %v7706_v13  ;;  %v7305_v54 = vadd.f32 %v7304_v23, %v7215_v5  ;;  %v7076_v20 = vadd.f32 %v8711_v7, %v8709_v39 }
 0x749   : > { %7856 = vst.msk [vmem:[%s14676_s8 + $0x48] sm:$0xff] %vm7846_vm12, %v7823_v57  ;;  %v7596_v40 = vmul.f32 %v16622_v59, %v7526_v11  ;;  %7074 = vadd.xlane.f32.xlu2 %v7073_v45  ;;  %v7566_v24 = vadd.f32 %v7477_v16, %v7476_v18  ;;  %v7478_v36 = vmul.f32 %v16615_v56, %v16064_v63 }
 0x74a   : > { %v7744_v38 = vpop.xlane.xlu1 %7743  ;;  %v7479_v37 = vmul.f32 %v16619_v58, %v16066_v50  ;;  %v7799_v25 = vadd.f32 %v7709_v17, %v7708_v31 }
 0x74b   : > { %7629 = vst.msk [vmem:[%s14676_s8 + $0x60] sm:$0xff] %vm7616_vm7, %v7596_v40  ;;  %v7822_v3 = vmul.f32 %v16553_v43, %v7744_v38  ;;  %v16659_v53 = vpop.eup %8712 }
 0x74c   : > { %v16661_v35 = vpop.eup %8714  ;;  %v7218_v47 = vpop.f32.mrf.mxu0  ;;  %v7480_v56 = vmul.f32 %v16659_v53, %v16064_v63  ;;  %v7569_v32 = vadd.f32 %v7479_v37, %v7478_v36  ;;  %v7710_v5 = vmul.f32 %v16659_v53, %v16054_v6 }
 0x74d   : > { %7794 = vadd.xlane.f32.xlu0 %v7793_v19  ;;  %7855 = vst.msk [vmem:[%s14676_s8 + $0x40] sm:$0xff] %vm7846_vm12, %v7822_v3  ;;  %v16663_v48 = vpop.eup %8716  ;;  %v7307_v52 = vpop.f32.mrf.mxu1  ;;  %v7481_v58 = vmul.f32 %v16661_v35, %v16066_v50  ;;  %v7711_v11 = vmul.f32 %v16661_v35, %v16060_v51 }
 0x74e   : > { %v7039_v41 = vpop.xlane.xlu2 %7038  ;;  %v16665_v43 = vpop.eup %8718  ;;  %v7154_v62 = vpack.c.bf16 %v16663_v48, %v16659_v53  ;;  %v7308_v26 = vadd.f32 %v7307_v52, %v7218_v47 }
 0x74f   : > { %8720 = vrcp.f32 %v7039_v41  ;;  %7797 = vadd.xlane.f32.xlu1 %v7796_v44  ;;  %v7155_v39 = vpack.c.bf16 %v16665_v43, %v16661_v35  ;;  %v7572_v33 = vadd.f32 %v7481_v58, %v7480_v56  ;;  %v7802_v18 = vadd.f32 %v7711_v11, %v7710_v5 }
 0x750   : > { %v7042_v28 = vpop.xlane.xlu0 %7041  ;;  %v7713_v36 = vmul.f32 %v16665_v43, %v16060_v51 }
 0x751   : > { %8722 = vrcp.f32 %v7042_v28  ;;  %7567 = vadd.xlane.f32.xlu2 %v7566_v24 }
 0x752   : > { %v7529_v9 = vpop.xlane.xlu1 %7528 }
 0x754   : > { %v7220_v40 = vpop.f32.mrf.mxu0 }
 0x755   : > { %v16667_v2 = vpop.eup %8720  ;;  %7077 = vadd.xlane.f32.xlu0 %v7076_v20  ;;  %v7309_v38 = vpop.f32.mrf.mxu1 }
 0x756   : > { %v7365_v12 = vmul.f32 %v16667_v2, %v7305_v54  ;;  %v7597_v29 = vmul.f32 %v16667_v2, %v7529_v9  ;;  %v6802_v30 = vpop.xlane.xlu2 %6801 }
 0x757   : > { %v6866_v21 = vsub.f32 %v18479_v15, %v6802_v30  ;;  %v6867_v7 = vsub.f32 %v16345_v55, %v6802_v30  ;;  %7252 = vmatmul.bf16.gmra.mxu0 %v7154_v62  ;;  %v8723_v61 = vpop.eup %8722  ;;  %7080 = vadd.xlane.f32.xlu1 %v7079_v60 }
 0x758   : > { %7397 = vst.msk [vmem:[%s16368_s20 + $0x68] sm:$0xff] %vm517_vm0, %v7365_v12  ;;  %7341 = vmatmul.bf16.gmra.mxu1 %v7155_v39  ;;  %v7366_v1 = vmul.f32 %v8723_v61, %v7308_v26  ;;  %v6805_v49 = vpop.xlane.xlu0 %6804 }
 0x759   : > { %7630 = vst.msk [vmem:[%s14676_s8 + $0x68] sm:$0xff] %vm7616_vm7, %v7597_v29  ;;  %v6990_v15 = vmul.f32 1.442695, %v6866_v21  ;;  %v6992_v55 = vmul.f32 1.442695, %v6867_v7  ;;  %v6868_v34 = vsub.f32 %v18480_v10, %v6805_v49  ;;  %v6869_v8 = vsub.f32 %v16355_v27, %v6805_v49  ;;  %7800 = vadd.xlane.f32.xlu2 %v7799_v25 }
 0x75a   : > { %7398 = vst.msk [vmem:[%s16368_s20 + $0x70] sm:$0xff] %vm517_vm0, %v7366_v1  ;;  %v7753_v57 = vpop.xlane.xlu1 %7752  ;;  %v7310_v7 = vadd.f32 %v7309_v38, %v7220_v40 }
 0x75b   : > { %8724 = vpow2.f32 %v6990_v15  ;;  %v6994_v4 = vmul.f32 1.442695, %v6868_v34  ;;  %v6996_v0 = vmul.f32 1.442695, %v6869_v8  ;;  %v7825_v10 = vmul.f32 %v16611_v22, %v7753_v57 }
 0x75c   : > { %8726 = vpow2.f32 %v6992_v55  ;;  %v7082_v22 = vadd.f32 %v16661_v35, %v16659_v53  ;;  %v7482_v53 = vmul.f32 %v16663_v48, %v16064_v63  ;;  %v7483_v35 = vmul.f32 %v16665_v43, %v16066_v50 }
 0x75d   : > { %8728 = vpow2.f32 %v6994_v4  ;;  %7570 = vadd.xlane.f32.xlu0 %v7569_v32  ;;  %7858 = vst.msk [vmem:[%s14676_s8 + $0x58] sm:$0xff] %vm7846_vm12, %v7825_v10 }
 0x75e   : > { %v7532_v27 = vpop.xlane.xlu2 %7531  ;;  %8730 = vpow2.f32 %v6996_v0  ;;  %v7575_v52 = vadd.f32 %v7483_v35, %v7482_v53  ;;  %v7223_v31 = vpop.f32.mrf.mxu0 }
 0x75f   : > { %v7598_v46 = vmul.f32 %v8723_v61, %v7532_v27  ;;  %7573 = vadd.xlane.f32.xlu1 %v7572_v33  ;;  %v7312_v12 = vpop.f32.mrf.mxu1 }
 0x760   : > { %v7750_v45 = vpop.xlane.xlu0 %7749  ;;  %v7313_v0 = vadd.f32 %v7312_v12, %v7223_v31 }
 0x761   : > { %7631 = vst.msk [vmem:[%s14676_s8 + $0x70] sm:$0xff] %vm7616_vm7, %v7598_v46  ;;  %v8725_v23 = vpop.eup %8724  ;;  %v7824_v13 = vmul.f32 %v16594_v42, %v7750_v45  ;;  %7083 = vadd.xlane.f32.xlu2 %v7082_v22 }
 0x762   : > { %v8727_v14 = vpop.eup %8726  ;;  %v7762_v3 = vpop.xlane.xlu1 %7761  ;;  %v7484_v39 = vmul.f32 %v8725_v23, %v16064_v63  ;;  %v7714_v55 = vmul.f32 %v8725_v23, %v16054_v6 }
 0x763   : > { %v8729_v19 = vpop.eup %8728  ;;  %7857 = vst.msk [vmem:[%s14676_s8 + $0x50] sm:$0xff] %vm7846_vm12, %v7824_v13  ;;  %v7828_v41 = vmul.f32 %v8723_v61, %v7762_v3  ;;  %v7088_v47 = vadd.f32 %v8727_v14, %v8725_v23  ;;  %v7712_v61 = vmul.f32 %v16663_v48, %v16054_v6  ;;  %v7715_v49 = vmul.f32 %v8727_v14, %v16060_v51 }
 0x764   : > { %v8731_v16 = vpop.eup %8730  ;;  %v7156_v44 = vpack.c.bf16 %v8729_v19, %v8725_v23  ;;  %v7486_v20 = vmul.f32 %v8729_v19, %v16064_v63 }
 0x765   : > { %7803 = vadd.xlane.f32.xlu0 %v7802_v18  ;;  %v7157_v28 = vpack.c.bf16 %v8731_v16, %v8727_v14  ;;  %7861 = vst.msk [vmem:[%s14676_s8 + $0x70] sm:$0xff] %vm7846_vm12, %v7828_v41  ;;  %v7487_v62 = vmul.f32 %v8731_v16, %v16066_v50  ;;  %v7091_v21 = vadd.f32 %v8731_v16, %v8729_v19 }
 0x766   : > { %v7756_v42 = vpop.xlane.xlu2 %7755  ;;  %v7225_v25 = vpop.f32.mrf.mxu0  ;;  %v7717_v56 = vmul.f32 %v8731_v16, %v16060_v51  ;;  %v7808_v4 = vadd.f32 %v7715_v49, %v7714_v55 }
 0x767   : > { %v7826_v24 = vmul.f32 %v16622_v59, %v7756_v42  ;;  %7257 = vmatmul.bf16.gmra.mxu0 %v7156_v44  ;;  %7089 = vadd.xlane.f32.xlu1 %v7088_v47  ;;  %v7085_v59 = vadd.f32 %v16665_v43, %v16663_v48  ;;  %v7581_v30 = vadd.f32 %v7487_v62, %v7486_v20  ;;  %v7314_v8 = vpop.f32.mrf.mxu1 }
 0x768   : > { %7346 = vmatmul.bf16.gmra.mxu1 %v7157_v28  ;;  %v7759_v54 = vpop.xlane.xlu0 %7758  ;;  %v7805_v48 = vadd.f32 %v7713_v36, %v7712_v61  ;;  %v7716_v43 = vmul.f32 %v8729_v19, %v16054_v6  ;;  %v7315_v23 = vadd.f32 %v7314_v8, %v7225_v25 }
 0x769   : > { %7859 = vst.msk [vmem:[%s14676_s8 + $0x60] sm:$0xff] %vm7846_vm12, %v7826_v24  ;;  %v7827_v9 = vmul.f32 %v16667_v2, %v7759_v54  ;;  %7576 = vadd.xlane.f32.xlu2 %v7575_v52  ;;  %v7485_v2 = vmul.f32 %v8727_v14, %v16066_v50 }
 0x76a   : > { %v7045_v17 = vpop.xlane.xlu1 %7044  ;;  %v7811_v32 = vadd.f32 %v7717_v56, %v7716_v43 }
 0x76b   : > { %7860 = vst.msk [vmem:[%s14676_s8 + $0x68] sm:$0xff] %vm7846_vm12, %v7827_v9  ;;  %8732 = vrcp.f32 %v7045_v17  ;;  %v7578_v50 = vadd.f32 %v7485_v2, %v7484_v39 }
 0x76d   : > { %7086 = vadd.xlane.f32.xlu0 %v7085_v59 }
 0x76e   : > { %v7765_v29 = vpop.xlane.xlu2 %7764 }
 0x76f   : > { %7582 = vadd.xlane.f32.xlu1 %v7581_v30 }
 0x770   : > { %v7535_v26 = vpop.xlane.xlu0 %7534 }
 0x771   : > { %v8733_v60 = vpop.eup %8732  ;;  %7092 = vadd.xlane.f32.xlu2 %v7091_v21 }
 0x772   : > { %v7367_v37 = vmul.f32 %v8733_v60, %v7310_v7  ;;  %v7829_v1 = vmul.f32 %v8733_v60, %v7765_v29  ;;  %v7599_v63 = vmul.f32 %v8733_v60, %v7535_v26  ;;  %v7538_v15 = vpop.xlane.xlu1 %7537 }
 0x773   : > { %v7228_v27 = vpop.f32.mrf.mxu0 }
 0x774   : > { %7399 = vst.msk [vmem:[%s16368_s20 + $0x78] sm:$0xff] %vm517_vm0, %v7367_v37  ;;  %v7317_v6 = vpop.f32.mrf.mxu1 }
 0x775   : > { %7579 = vadd.xlane.f32.xlu0 %v7578_v50  ;;  %7632 = vst.msk [vmem:[%s14676_s8 + $0x78] sm:$0xff] %vm7616_vm7, %v7599_v63  ;;  %v7318_v16 = vadd.f32 %v7317_v6, %v7228_v27 }
 0x776   : > { %v7048_v34 = vpop.xlane.xlu2 %7047  ;;  %7862 = vst.msk [vmem:[%s14676_s8 + $0x78] sm:$0xff] %vm7846_vm12, %v7829_v1 }
 0x777   : > { %8734 = vrcp.f32 %v7048_v34  ;;  %7806 = vadd.xlane.f32.xlu1 %v7805_v48 }
 0x778   : > { %v7768_v58 = vpop.xlane.xlu0 %7767 }
 0x779   : > { %7809 = vadd.xlane.f32.xlu2 %v7808_v4 }
 0x77a   : > { %v7771_v57 = vpop.xlane.xlu1 %7770 }
 0x77b   : > { %v7230_v13 = vpop.f32.mrf.mxu0 }
 0x77c   : > { %v7319_v14 = vpop.f32.mrf.mxu1 }
 0x77d   : > { %v8735_v10 = vpop.eup %8734  ;;  %7812 = vadd.xlane.f32.xlu0 %v7811_v32  ;;  %v7320_v52 = vadd.f32 %v7319_v14, %v7230_v13 }
 0x77e   : > { %v7368_v46 = vmul.f32 %v8735_v10, %v7313_v0  ;;  %v7600_v33 = vmul.f32 %v8735_v10, %v7538_v15  ;;  %v7830_v5 = vmul.f32 %v8735_v10, %v7768_v58  ;;  %v7541_v11 = vpop.xlane.xlu2 %7540 }
 0x780   : > { %7400 = vst.msk [vmem:[%s16368_s20 + $0x80] sm:$0xff] %vm517_vm0, %v7368_v46  ;;  %v7051_v51 = vpop.xlane.xlu0 %7050 }
 0x781   : > { %7633 = vst.msk [vmem:[%s14676_s8 + $0x80] sm:$0xff] %vm7616_vm7, %v7600_v33  ;;  %8736 = vrcp.f32 %v7051_v51 }
 0x782   : > { %7863 = vst.msk [vmem:[%s14676_s8 + $0x80] sm:$0xff] %vm7846_vm12, %v7830_v5  ;;  %v7054_v45 = vpop.xlane.xlu1 %7053 }
 0x783   : > { %8738 = vrcp.f32 %v7054_v45 }
 0x786   : > { %v7774_v22 = vpop.xlane.xlu2 %7773 }
 0x787   : > { %v8737_v40 = vpop.eup %8736 }
 0x788   : > { %v7369_v38 = vmul.f32 %v8737_v40, %v7315_v23  ;;  %v7601_v19 = vmul.f32 %v8737_v40, %v7541_v11  ;;  %v7831_v3 = vmul.f32 %v8737_v40, %v7771_v57  ;;  %v7544_v18 = vpop.xlane.xlu0 %7543  ;;  %v7233_v24 = vpop.f32.mrf.mxu0 }
 0x789   : > { %v8739_v41 = vpop.eup %8738  ;;  %v7322_v47 = vpop.f32.mrf.mxu1 }
 0x78a   : > { %7401 = vst.msk [vmem:[%s16368_s20 + $0x88] sm:$0xff] %vm517_vm0, %v7369_v38  ;;  %v7370_v44 = vmul.f32 %v8739_v41, %v7318_v16  ;;  %v7832_v53 = vmul.f32 %v8739_v41, %v7774_v22  ;;  %v7602_v35 = vmul.f32 %v8739_v41, %v7544_v18  ;;  %v7547_v42 = vpop.xlane.xlu1 %7546  ;;  %v7323_v26 = vadd.f32 %v7322_v47, %v7233_v24 }
 0x78b   : > { %7634 = vst.msk [vmem:[%s14676_s8 + $0x88] sm:$0xff] %vm7616_vm7, %v7601_v19 }
 0x78c   : > { %7864 = vst.msk [vmem:[%s14676_s8 + $0x88] sm:$0xff] %vm7846_vm12, %v7831_v3 }
 0x78d   : > { %7402 = vst.msk [vmem:[%s16368_s20 + $0x90] sm:$0xff] %vm517_vm0, %v7370_v44 }
 0x78e   : > { %v7057_v28 = vpop.xlane.xlu2 %7056  ;;  %7635 = vst.msk [vmem:[%s14676_s8 + $0x90] sm:$0xff] %vm7616_vm7, %v7602_v35 }
 0x78f   : > { %8740 = vrcp.f32 %v7057_v28  ;;  %7865 = vst.msk [vmem:[%s14676_s8 + $0x90] sm:$0xff] %vm7846_vm12, %v7832_v53 }
 0x790   : > { %v7777_v54 = vpop.xlane.xlu0 %7776  ;;  %v7235_v29 = vpop.f32.mrf.mxu0 }
 0x791   : > { %v7324_v30 = vpop.f32.mrf.mxu1 }
 0x792   : > { %v7780_v9 = vpop.xlane.xlu1 %7779  ;;  %v7325_v37 = vadd.f32 %v7324_v30, %v7235_v29 }
 0x795   : > { %v8741_v20 = vpop.eup %8740 }
 0x796   : > { %v7371_v62 = vmul.f32 %v8741_v20, %v7320_v52  ;;  %v7603_v31 = vmul.f32 %v8741_v20, %v7547_v42  ;;  %v7833_v17 = vmul.f32 %v8741_v20, %v7777_v54  ;;  %v7550_v59 = vpop.xlane.xlu2 %7549 }
 0x798   : > { %7403 = vst.msk [vmem:[%s16368_s20 + $0x98] sm:$0xff] %vm517_vm0, %v7371_v62  ;;  %v7060_v12 = vpop.xlane.xlu0 %7059 }
 0x799   : > { %7636 = vst.msk [vmem:[%s14676_s8 + $0x98] sm:$0xff] %vm7616_vm7, %v7603_v31  ;;  %8742 = vrcp.f32 %v7060_v12 }
 0x79a   : > { %7866 = vst.msk [vmem:[%s14676_s8 + $0x98] sm:$0xff] %vm7846_vm12, %v7833_v17  ;;  %v7063_v39 = vpop.xlane.xlu1 %7062 }
 0x79b   : > { %8744 = vrcp.f32 %v7063_v39 }
 0x79e   : > { %v7783_v2 = vpop.xlane.xlu2 %7782  ;;  %v7238_v1 = vpop.f32.mrf.mxu0 }
 0x79f   : > { %v8743_v21 = vpop.eup %8742  ;;  %v7327_v15 = vpop.f32.mrf.mxu1 }
 0x7a0   : > { %v7372_v7 = vmul.f32 %v8743_v21, %v7323_v26  ;;  %v7604_v60 = vmul.f32 %v8743_v21, %v7550_v59  ;;  %v7834_v61 = vmul.f32 %v8743_v21, %v7780_v9  ;;  %v7553_v36 = vpop.xlane.xlu0 %7552  ;;  %v7328_v48 = vadd.f32 %v7327_v15, %v7238_v1 }
 0x7a1   : > { %v8745_v63 = vpop.eup %8744 }
 0x7a2   : > { %7404 = vst.msk [vmem:[%s16368_s20 + $0xa0] sm:$0xff] %vm517_vm0, %v7372_v7  ;;  %v7373_v50 = vmul.f32 %v8745_v63, %v7325_v37  ;;  %v7835_v55 = vmul.f32 %v8745_v63, %v7783_v2  ;;  %v7605_v49 = vmul.f32 %v8745_v63, %v7553_v36  ;;  %v7556_v25 = vpop.xlane.xlu1 %7555 }
 0x7a3   : > { %7637 = vst.msk [vmem:[%s14676_s8 + $0xa0] sm:$0xff] %vm7616_vm7, %v7604_v60 }
 0x7a4   : > { %7867 = vst.msk [vmem:[%s14676_s8 + $0xa0] sm:$0xff] %vm7846_vm12, %v7834_v61 }
 0x7a5   : > { %7405 = vst.msk [vmem:[%s16368_s20 + $0xa8] sm:$0xff] %vm517_vm0, %v7373_v50 }
 0x7a6   : > { %v7066_v34 = vpop.xlane.xlu2 %7065  ;;  %7638 = vst.msk [vmem:[%s14676_s8 + $0xa8] sm:$0xff] %vm7616_vm7, %v7605_v49  ;;  %v7240_v43 = vpop.f32.mrf.mxu0 }
 0x7a7   : > { %8746 = vrcp.f32 %v7066_v34  ;;  %7868 = vst.msk [vmem:[%s14676_s8 + $0xa8] sm:$0xff] %vm7846_vm12, %v7835_v55  ;;  %v7329_v4 = vpop.f32.mrf.mxu1 }
 0x7a8   : > { %v7786_v8 = vpop.xlane.xlu0 %7785  ;;  %v7330_v6 = vadd.f32 %v7329_v4, %v7240_v43 }
 0x7aa   : > { %v7789_v56 = vpop.xlane.xlu1 %7788 }
 0x7ad   : > { %v8747_v58 = vpop.eup %8746 }
 0x7ae   : > { %v7374_v0 = vmul.f32 %v8747_v58, %v7328_v48  ;;  %v7606_v57 = vmul.f32 %v8747_v58, %v7556_v25  ;;  %v7836_v32 = vmul.f32 %v8747_v58, %v7786_v8  ;;  %v7559_v10 = vpop.xlane.xlu2 %7558 }
 0x7b0   : > { %7406 = vst.msk [vmem:[%s16368_s20 + $0xb0] sm:$0xff] %vm517_vm0, %v7374_v0  ;;  %v7069_v27 = vpop.xlane.xlu0 %7068 }
 0x7b1   : > { %7639 = vst.msk [vmem:[%s14676_s8 + $0xb0] sm:$0xff] %vm7616_vm7, %v7606_v57  ;;  %8748 = vrcp.f32 %v7069_v27 }
 0x7b2   : > { %7869 = vst.msk [vmem:[%s14676_s8 + $0xb0] sm:$0xff] %vm7846_vm12, %v7836_v32  ;;  %v7072_v46 = vpop.xlane.xlu1 %7071 }
 0x7b3   : > { %v7243_v33 = vpop.f32.mrf.mxu0  ;;  %8750 = vrcp.f32 %v7072_v46 }
 0x7b4   : > { %v7332_v5 = vpop.f32.mrf.mxu1 }
 0x7b5   : > { %v7333_v13 = vadd.f32 %v7332_v5, %v7243_v33 }
 0x7b6   : > { %v7792_v11 = vpop.xlane.xlu2 %7791 }
 0x7b7   : > { %v8749_v51 = vpop.eup %8748 }
 0x7b8   : > { %v7375_v45 = vmul.f32 %v8749_v51, %v7330_v6  ;;  %v7607_v22 = vmul.f32 %v8749_v51, %v7559_v10  ;;  %v7837_v23 = vmul.f32 %v8749_v51, %v7789_v56  ;;  %v7562_v40 = vpop.xlane.xlu0 %7561 }
 0x7b9   : > { %v8751_v14 = vpop.eup %8750 }
 0x7ba   : > { %7407 = vst.msk [vmem:[%s16368_s20 + $0xb8] sm:$0xff] %vm517_vm0, %v7375_v45  ;;  %v7376_v38 = vmul.f32 %v8751_v14, %v7333_v13  ;;  %v7838_v19 = vmul.f32 %v8751_v14, %v7792_v11  ;;  %v7608_v3 = vmul.f32 %v8751_v14, %v7562_v40  ;;  %v7565_v18 = vpop.xlane.xlu1 %7564 }
 0x7bb   : > { %7640 = vst.msk [vmem:[%s14676_s8 + $0xb8] sm:$0xff] %vm7616_vm7, %v7607_v22  ;;  %v7245_v16 = vpop.f32.mrf.mxu0 }
 0x7bc   : > { %7870 = vst.msk [vmem:[%s14676_s8 + $0xb8] sm:$0xff] %vm7846_vm12, %v7837_v23  ;;  %v7334_v41 = vpop.f32.mrf.mxu1 }
 0x7bd   : > { %7408 = vst.msk [vmem:[%s16368_s20 + $0xc0] sm:$0xff] %vm517_vm0, %v7376_v38  ;;  %v7335_v35 = vadd.f32 %v7334_v41, %v7245_v16 }
 0x7be   : > { %v7075_v44 = vpop.xlane.xlu2 %7074  ;;  %7641 = vst.msk [vmem:[%s14676_s8 + $0xc0] sm:$0xff] %vm7616_vm7, %v7608_v3 }
 0x7bf   : > { %8752 = vrcp.f32 %v7075_v44  ;;  %7871 = vst.msk [vmem:[%s14676_s8 + $0xc0] sm:$0xff] %vm7846_vm12, %v7838_v19 }
 0x7c0   : > { %v7795_v53 = vpop.xlane.xlu0 %7794 }
 0x7c2   : > { %v7798_v42 = vpop.xlane.xlu1 %7797 }
 0x7c4   : > { %v7248_v28 = vpop.f32.mrf.mxu0 }
 0x7c5   : > { %v8753_v24 = vpop.eup %8752  ;;  %v7337_v47 = vpop.f32.mrf.mxu1 }
 0x7c6   : > { %v7377_v54 = vmul.f32 %v8753_v24, %v7335_v35  ;;  %v7609_v52 = vmul.f32 %v8753_v24, %v7565_v18  ;;  %v7839_v9 = vmul.f32 %v8753_v24, %v7795_v53  ;;  %v7568_v20 = vpop.xlane.xlu2 %7567  ;;  %v7338_v29 = vadd.f32 %v7337_v47, %v7248_v28 }
 0x7c8   : > { %7409 = vst.msk [vmem:[%s16368_s20 + $0xc8] sm:$0xff] %vm517_vm0, %v7377_v54  ;;  %v7078_v62 = vpop.xlane.xlu0 %7077 }
 0x7c9   : > { %7642 = vst.msk [vmem:[%s14676_s8 + $0xc8] sm:$0xff] %vm7616_vm7, %v7609_v52  ;;  %8754 = vrcp.f32 %v7078_v62 }
 0x7ca   : > { %7872 = vst.msk [vmem:[%s14676_s8 + $0xc8] sm:$0xff] %vm7846_vm12, %v7839_v9  ;;  %v7081_v31 = vpop.xlane.xlu1 %7080 }
 0x7cb   : > { %8756 = vrcp.f32 %v7081_v31 }
 0x7cc   : > { %v7250_v17 = vpop.f32.mrf.mxu0 }
 0x7cd   : > { %v7339_v59 = vpop.f32.mrf.mxu1 }
 0x7ce   : > { %v7801_v12 = vpop.xlane.xlu2 %7800  ;;  %v7340_v7 = vadd.f32 %v7339_v59, %v7250_v17 }
 0x7cf   : > { %v8755_v30 = vpop.eup %8754 }
 0x7d0   : > { %v7378_v39 = vmul.f32 %v8755_v30, %v7338_v29  ;;  %v7610_v2 = vmul.f32 %v8755_v30, %v7568_v20  ;;  %v7840_v26 = vmul.f32 %v8755_v30, %v7798_v42  ;;  %v7571_v21 = vpop.xlane.xlu0 %7570 }
 0x7d1   : > { %v8757_v60 = vpop.eup %8756 }
 0x7d2   : > { %7410 = vst.msk [vmem:[%s16368_s20 + $0xd0] sm:$0xff] %vm517_vm0, %v7378_v39  ;;  %v7379_v61 = vmul.f32 %v8757_v60, %v7340_v7  ;;  %v7841_v36 = vmul.f32 %v8757_v60, %v7801_v12  ;;  %v7611_v37 = vmul.f32 %v8757_v60, %v7571_v21  ;;  %v7574_v1 = vpop.xlane.xlu1 %7573 }
 0x7d3   : > { %7643 = vst.msk [vmem:[%s14676_s8 + $0xd0] sm:$0xff] %vm7616_vm7, %v7610_v2 }
 0x7d4   : > { %v7253_v63 = vpop.f32.mrf.mxu0  ;;  %7873 = vst.msk [vmem:[%s14676_s8 + $0xd0] sm:$0xff] %vm7846_vm12, %v7840_v26 }
 0x7d5   : > { %v7342_v15 = vpop.f32.mrf.mxu1  ;;  %7411 = vst.msk [vmem:[%s16368_s20 + $0xd8] sm:$0xff] %vm517_vm0, %v7379_v61 }
 0x7d6   : > { %v7084_v50 = vpop.xlane.xlu2 %7083  ;;  %7644 = vst.msk [vmem:[%s14676_s8 + $0xd8] sm:$0xff] %vm7616_vm7, %v7611_v37  ;;  %v7343_v49 = vadd.f32 %v7342_v15, %v7253_v63 }
 0x7d7   : > { %8758 = vrcp.f32 %v7084_v50  ;;  %7874 = vst.msk [vmem:[%s14676_s8 + $0xd8] sm:$0xff] %vm7846_vm12, %v7841_v36 }
 0x7d8   : > { %v7804_v55 = vpop.xlane.xlu0 %7803 }
 0x7da   : > { %v7090_v25 = vpop.xlane.xlu1 %7089 }
 0x7db   : > { %8760 = vrcp.f32 %v7090_v25 }
 0x7dc   : > { %v7255_v34 = vpop.f32.mrf.mxu0 }
 0x7dd   : > { %v8759_v8 = vpop.eup %8758  ;;  %v7344_v48 = vpop.f32.mrf.mxu1 }
 0x7de   : > { %v7380_v43 = vmul.f32 %v8759_v8, %v7343_v49  ;;  %v7612_v56 = vmul.f32 %v8759_v8, %v7574_v1  ;;  %v7842_v58 = vmul.f32 %v8759_v8, %v7804_v55  ;;  %v7577_v4 = vpop.xlane.xlu2 %7576  ;;  %v7345_v5 = vadd.f32 %v7344_v48, %v7255_v34 }
 0x7e0   : > { %7412 = vst.msk [vmem:[%s16368_s20 + $0xe0] sm:$0xff] %vm517_vm0, %v7380_v43  ;;  %v7087_v0 = vpop.xlane.xlu0 %7086 }
 0x7e1   : > { %7645 = vst.msk [vmem:[%s14676_s8 + $0xe0] sm:$0xff] %vm7616_vm7, %v7612_v56  ;;  %8762 = vrcp.f32 %v7087_v0  ;;  %v8761_v33 = vpop.eup %8760 }
 0x7e2   : > { %7875 = vst.msk [vmem:[%s14676_s8 + $0xe0] sm:$0xff] %vm7846_vm12, %v7842_v58  ;;  %v7583_v57 = vpop.xlane.xlu1 %7582 }
 0x7e4   : > { %v7258_v32 = vpop.f32.mrf.mxu0 }
 0x7e5   : > { %v7347_v10 = vpop.f32.mrf.mxu1 }
 0x7e6   : > { %v7348_v27 = vadd.f32 %v7347_v10, %v7258_v32  ;;  %v7093_v46 = vpop.xlane.xlu2 %7092 }
 0x7e7   : > { %8764 = vrcp.f32 %v7093_v46  ;;  %v8763_v11 = vpop.eup %8762 }
 0x7e8   : > { %v7382_v6 = vmul.f32 %v8761_v33, %v7348_v27  ;;  %v7381_v51 = vmul.f32 %v8763_v11, %v7345_v5  ;;  %v7613_v45 = vmul.f32 %v8763_v11, %v7577_v4  ;;  %v7580_v22 = vpop.xlane.xlu0 %7579 }
 0x7e9   : > { %v7614_v23 = vmul.f32 %v8761_v33, %v7580_v22 }
 0x7ea   : > { %7414 = vst.msk [vmem:[%s16368_s20 + $0xf0] sm:$0xff] %vm517_vm0, %v7382_v6  ;;  %v7807_v40 = vpop.xlane.xlu1 %7806 }
 0x7eb   : > { %7413 = vst.msk [vmem:[%s16368_s20 + $0xe8] sm:$0xff] %vm517_vm0, %v7381_v51  ;;  %v7843_v38 = vmul.f32 %v8763_v11, %v7807_v40 }
 0x7ec   : > { %7646 = vst.msk [vmem:[%s14676_s8 + $0xe8] sm:$0xff] %vm7616_vm7, %v7613_v45  ;;  %v7260_v13 = vpop.f32.mrf.mxu0 }
 0x7ed   : > { %v8765_v14 = vpop.eup %8764  ;;  %7647 = vst.msk [vmem:[%s14676_s8 + $0xf0] sm:$0xff] %vm7616_vm7, %v7614_v23  ;;  %v7349_v19 = vpop.f32.mrf.mxu1 }
 0x7ee   : > { %v7615_v3 = vmul.f32 %v8765_v14, %v7583_v57  ;;  %v7350_v18 = vadd.f32 %v7349_v19, %v7260_v13  ;;  %v7810_v16 = vpop.xlane.xlu2 %7809  ;;  %7876 = vst.msk [vmem:[%s14676_s8 + $0xe8] sm:$0xff] %vm7846_vm12, %v7843_v38 }
 0x7ef   : > { %v7844_v41 = vmul.f32 %v8761_v33, %v7810_v16 }
 0x7f0   : > { %7648 = vst.msk [vmem:[%s14676_s8 + $0xf8] sm:$0xff] %vm7616_vm7, %v7615_v3  ;;  %v7383_v44 = vmul.f32 %v8765_v14, %v7350_v18  ;;  %v7813_v53 = vpop.xlane.xlu0 %7812 }
 0x7f1   : > { %7877 = vst.msk [vmem:[%s14676_s8 + $0xf0] sm:$0xff] %vm7846_vm12, %v7844_v41  ;;  %v7845_v35 = vmul.f32 %v8765_v14, %v7813_v53 }
 0x7f2   : > { %7415 = vst.msk [vmem:[%s16368_s20 + $0xf8] sm:$0xff] %vm517_vm0, %v7383_v44 }
 0x7f3   : > { %8824 = shalt.err (!%p8821_p5)
}
 0x7f4   : > { %s8877_s17 = smov 128   ;;  %s8878_s20 = smov 8   ;;  %7878 = vst.msk [vmem:[%s14676_s8 + $0xf8] sm:$0xff] %vm7846_vm12, %v7845_v35 }
 0x7f5   : > { %8131 = dma.vmem_to_hbm [thread:$0]  (%p8959_p4), %s7904_s27, 4096, %s7906_s30, %s7880_s16, %s8877_s17, %s8877_s17, %s8878_s20  }
 0x7f6 PF: > { %p8137_p6 = scmp.ge.s32.totalorder %s8875_s29, 2  ;;  %s7924_s23 = sand.u32 1, %s8855_s24  }
 0x7f7   : > { %s7925_s22 = scalar_lea.sflag [#allocation3], %s7924_s23 }
 0x7f8   : > { %p8134_p7 = pnand %p8137_p6, %p8966_p8 }
 0x7fa   : > { %p8135_p9 = pneg %p8134_p7 }
 0x7fc   : > { %8850 = dma.done.wait (%p8135_p9), %s7925_s22, 4096  }
 0x7fd   : > { %8852 = vsyncadd (%p8135_p9), %s7925_s22, 4294963200  ;;  %s21_s29 = sadd.s32 1, %s8875_s29   ;;  %s18485_s24 = smov %s8859_s25 }
 0x7fe   : > { %p18_p10 = scmp.ge.s32.totalorder %s21_s29, 4   ;;  %s18486_s25 = smov %s8863_s26 }
 0x7ff   : > { %s18487_s26 = smov %s8972_s14  ;;  %s18488_s27 = smov %s8871_s28 }
 0x800   : > { %s18489_s28 = smov %s18491_s9  ;;  %20 = sbr.rel (!%p18_p10) target bundleno = 4 (0x4), region = 104 }
 0x805   :  { %7943 = vsyncpa [#allocation3], 1 }
 0x806   :  { %7945 = vsyncpa [#allocation3 + $0x1], 1 }

</bundles_post_ra>
